<compile_context>
chip_gen: v7x
topology: tpu7x:2x2x1
jax: 0.10.0
libtpu: 0.0.40
codegen_flags: <defaults>
</compile_context>

<pallas_src>
import functools

import numpy as np

import jax
import jax.numpy as jnp
from jax.experimental import pallas as pl
from jax.experimental.pallas import tpu as pltpu


# ------------------------------ Pallas kernel ------------------------------ #

def _up_block_kernel(x1w_ref, x2_ref, ah_ref, awt_ref, w1_ref, w2_ref,
                     s1_ref, b1_ref, s2_ref, b2_ref, o_ref,
                     xc, y1p, *, pad_t, pad_l):
    # Per grid step (= one batch element):
    #   x1w_ref: (1, C1*H1, W1)      low-res decoder feature, (c,h)-fused rows
    #   x2_ref : (1, C2, H2, W2)     skip connection (NCHW), bf16
    #   ah_ref : (H2u, H1)           bilinear interp matrix along H
    #   awt_ref: (W1, W2u)           transposed interp matrix along W
    #   w1_ref : (Cmid, 9*(C2+C1))   conv1 im2col weights (tap-major K)
    #   w2_ref : (Cout, 9*Cmid)      conv2 im2col weights
    #   s*/b*  : (C, 1)              folded BN(+conv bias) scale / bias (f32)
    #   o_ref  : (1, Cout, H2*W2)    lane-dense output (flattened NCHW)
    #   xc     : (C2+C1, H2+2, W2+2) padded [x2 ; upsampled x1] scratch (f32)
    #   y1p    : (Cmid,  H2+2, W2+2) padded conv1-output scratch (f32)
    C2, H2, W2 = x2_ref.shape[1], x2_ref.shape[2], x2_ref.shape[3]
    Cin = xc.shape[0]
    C1 = Cin - C2
    W1 = x1w_ref.shape[2]
    H1 = x1w_ref.shape[1] // C1
    H2u, W2u = ah_ref.shape[0], awt_ref.shape[1]
    Cmid = w1_ref.shape[0]
    Cout = w2_ref.shape[0]
    Hp, Wp = H2 + 2, W2 + 2
    HW = H2 * W2
    f32 = jnp.float32

    # ---- zero ONLY the conv halo / F.pad margin strips (interiors below
    #      always fully overwrite; no full-buffer memsets per grid step) ----
    top, bot = 1 + pad_t, 1 + pad_t + H2u        # x1u rows land in [top, bot)
    lft, rgt = 1 + pad_l, 1 + pad_l + W2u
    xc[:, 0:top, :] = jnp.zeros((Cin, top, Wp), f32)
    xc[:, bot:Hp, :] = jnp.zeros((Cin, Hp - bot, Wp), f32)
    xc[:, :, 0:lft] = jnp.zeros((Cin, Hp, lft), f32)
    xc[:, :, rgt:Wp] = jnp.zeros((Cin, Hp, Wp - rgt), f32)
    y1p[:, 0:1, :] = jnp.zeros((Cmid, 1, Wp), f32)
    y1p[:, Hp - 1:Hp, :] = jnp.zeros((Cmid, 1, Wp), f32)
    y1p[:, :, 0:1] = jnp.zeros((Cmid, Hp, 1), f32)
    y1p[:, :, Wp - 1:Wp] = jnp.zeros((Cmid, Hp, 1), f32)

    # ---- skip connection into the first C2 channels of the concat buffer ----
    xc[0:C2, 1:1 + H2, 1:1 + W2] = x2_ref[0].astype(f32)

    # ---- separable bilinear 2x upsample (align_corners=True) of x1 ----
    # W-axis interp as ONE matmul over all (c, h) rows, then a tiny per-channel
    # H-axis matmul that writes straight into the concat buffer channels
    # [C2:C2+C1] (implements F.pad via the precomputed offsets).
    tw = jnp.dot(x1w_ref[0], awt_ref[...],
                 preferred_element_type=f32)            # (C1*H1, W2u)
    tw = tw.astype(jnp.bfloat16)
    for c in range(C1):
        rows = tw[c * H1:(c + 1) * H1, :]               # (H1, W2u)
        up_c = jnp.dot(ah_ref[...], rows,
                       preferred_element_type=f32)      # (H2u, W2u)
        xc[C2 + c, top:bot, lft:rgt] = up_c

    # ---- im2col helper: ONE (9*C, H*W) patch matrix per conv ----
    def im2col(buf, C):
        cols = []
        for dy in range(3):
            for dx in range(3):
                tap = buf[:, dy:dy + H2, dx:dx + W2]     # (C, H2, W2)
                cols.append(tap.reshape(C, HW))
        return jnp.concatenate(cols, axis=0)             # (9*C, H2*W2)

    # ---- conv1 (on cat([x2, x1u])) + BN + ReLU: single K=9*Cin matmul ----
    p1 = im2col(xc, Cin).astype(jnp.bfloat16)
    acc1 = jnp.dot(w1_ref[...], p1, preferred_element_type=f32)   # (Cmid, HW)
    y1 = jnp.maximum(acc1 * s1_ref[...] + b1_ref[...], 0.0)

    # Write conv1 result into its padded buffer row by row (H2 small stores;
    # avoids a lane-splitting (Cmid, H*W) -> (Cmid, H, W) reshape).
    for y in range(H2):
        y1p[:, 1 + y, 1:1 + W2] = y1[:, y * W2:(y + 1) * W2]

    # ---- conv2 + BN + ReLU: single K=9*Cmid matmul ----
    p2 = im2col(y1p, Cmid).astype(jnp.bfloat16)
    acc2 = jnp.dot(w2_ref[...], p2, preferred_element_type=f32)   # (Cout, HW)
    y2 = jnp.maximum(acc2 * s2_ref[...] + b2_ref[...], 0.0)

    # Lane-dense store: last dim H2*W2 (a multiple of 128 at these sizes).
    o_ref[0] = y2.astype(o_ref.dtype)


# -------------------------------- Wrappers --------------------------------- #

def _interp_matrix(out_size, in_size):
    """Row-stochastic 1-D bilinear interpolation matrix, align_corners=True."""
    if in_size == 1:
        return np.ones((out_size, 1), np.float32)
    src = np.arange(out_size) * (in_size - 1) / (out_size - 1)
    i0 = np.minimum(np.floor(src).astype(np.int64), in_size - 2)
    frac = (src - i0).astype(np.float32)
    A = np.zeros((out_size, in_size), np.float32)
    A[np.arange(out_size), i0] = 1.0 - frac
    A[np.arange(out_size), i0 + 1] = frac
    return A


def fold_bn(gamma, beta, mean, var, conv_bias, eps=1e-5):
    scale = gamma / jnp.sqrt(var + eps)
    bias = beta + (conv_bias - mean) * scale
    return scale, bias


def up_forward(x1_nchw, x2_nchw, params):
    """Equivalent of `up.forward` (inference-mode BatchNorm)."""
    N, C1, H1, W1 = x1_nchw.shape
    _, C2, H2, W2 = x2_nchw.shape
    H2u, W2u = 2 * H1, 2 * W1
    pad_t = (H2 - H2u) // 2
    pad_l = (W2 - W2u) // 2
    Cin = C1 + C2
    Cmid = params["w1"].shape[-1]
    Cout = params["w2"].shape[-1]
    HW = H2 * W2

    # Separable bilinear (align_corners=True) interpolation operators.
    ah = jnp.asarray(_interp_matrix(H2u, H1), jnp.bfloat16)        # (H2u, H1)
    awt = jnp.asarray(_interp_matrix(W2u, W1).T, jnp.bfloat16)     # (W1, W2u)

    # x1 rows fused as (c, h) so the W-axis interpolation is one matmul.
    x1w = x1_nchw.reshape(N, C1 * H1, W1).astype(jnp.bfloat16)
    x2 = x2_nchw.astype(jnp.bfloat16)

    # Conv weights as im2col matrices; K ordered tap-major / channel-minor,
    # with conv1's channel order matching cat([x2, x1], dim=1).
    w1m = jnp.transpose(params["w1"].reshape(9 * Cin, Cmid)).astype(jnp.bfloat16)
    w2m = jnp.transpose(params["w2"].reshape(9 * Cmid, Cout)).astype(jnp.bfloat16)

    s1, b1 = fold_bn(*params["bn1"], params["cb1"])
    s2, b2 = fold_bn(*params["bn2"], params["cb2"])

    kernel = functools.partial(_up_block_kernel, pad_t=pad_t, pad_l=pad_l)
    out = pl.pallas_call(
        kernel,
        out_shape=jax.ShapeDtypeStruct((N, Cout, HW), jnp.float32),
        grid=(N,),
        in_specs=[
            pl.BlockSpec((1, C1 * H1, W1), lambda n: (n, 0, 0)),
            pl.BlockSpec((1, C2, H2, W2), lambda n: (n, 0, 0, 0)),
            pl.BlockSpec((H2u, H1), lambda n: (0, 0)),
            pl.BlockSpec((W1, W2u), lambda n: (0, 0)),
            pl.BlockSpec((Cmid, 9 * Cin), lambda n: (0, 0)),
            pl.BlockSpec((Cout, 9 * Cmid), lambda n: (0, 0)),
            pl.BlockSpec((Cmid, 1), lambda n: (0, 0)),
            pl.BlockSpec((Cmid, 1), lambda n: (0, 0)),
            pl.BlockSpec((Cout, 1), lambda n: (0, 0)),
            pl.BlockSpec((Cout, 1), lambda n: (0, 0)),
        ],
        out_specs=pl.BlockSpec((1, Cout, HW), lambda n: (n, 0, 0)),
        scratch_shapes=[
            pltpu.VMEM((Cin, H2 + 2, W2 + 2), jnp.float32),   # padded concat
            pltpu.VMEM((Cmid, H2 + 2, W2 + 2), jnp.float32),  # padded conv1 out
        ],
        compiler_params=pltpu.CompilerParams(
            dimension_semantics=("parallel",)),
    )(x1w, x2, ah, awt, w1m, w2m,
      s1.reshape(Cmid, 1), b1.reshape(Cmid, 1),
      s2.reshape(Cout, 1), b2.reshape(Cout, 1))

    # Output is already NCHW (channel-major), just un-flatten the spatial axis.
    return out.reshape(N, Cout, H2, W2)


# ---------------------------- Reference (JAX) ------------------------------- #

def _ref_up(x1_nchw, x2_nchw, params):
    def upsample2(x):  # NCHW, bilinear, align_corners=True (gather + lerp)
        def lerp_axis(x, axis, in_size):
            out_size = 2 * in_size
            src = jnp.arange(out_size) * (in_size - 1) / (out_size - 1)
            i0 = jnp.clip(jnp.floor(src).astype(jnp.int32), 0, in_size - 2)
            frac = src - i0
            a = jnp.take(x, i0, axis=axis)
            b = jnp.take(x, i0 + 1, axis=axis)
            shape = [1] * x.ndim
            shape[axis] = out_size
            frac = frac.reshape(shape)
            return a * (1.0 - frac) + b * frac
        x = lerp_axis(x, 2, x.shape[2])
        x = lerp_axis(x, 3, x.shape[3])
        return x

    x1 = upsample2(x1_nchw)
    diffY = x2_nchw.shape[2] - x1.shape[2]
    diffX = x2_nchw.shape[3] - x1.shape[3]
    x1 = jnp.pad(x1, ((0, 0), (0, 0),
                      (diffY // 2, diffY - diffY // 2),
                      (diffX // 2, diffX - diffX // 2)))
    x = jnp.concatenate([x2_nchw, x1], axis=1)

    def conv_bn_relu(x, w9, cb, bn):
        Cin, Cc = w9.shape[1], w9.shape[2]
        w = jnp.transpose(w9.reshape(3, 3, Cin, Cc), (3, 2, 0, 1))   # OIHW
        y = jax.lax.conv_general_dilated(
            x, w, window_strides=(1, 1), padding=((1, 1), (1, 1)),
            dimension_numbers=("NCHW", "OIHW", "NCHW"))
        y = y + cb[None, :, None, None]
        gamma, beta, mean, var = bn
        s = gamma / jnp.sqrt(var + 1e-5)
        y = (y - mean[None, :, None, None]) * s[None, :, None, None] \
            + beta[None, :, None, None]
        return jnp.maximum(y, 0.0)

    x = conv_bn_relu(x, params["w1"], params["cb1"], params["bn1"])
    x = conv_bn_relu(x, params["w2"], params["cb2"], params["bn2"])
    return x


# --------------------------------- Main ------------------------------------ #

if __name__ == "__main__":
    key = jax.random.PRNGKey(0)
    N = 2
    C1, C2 = 4, 4                  # x1 (decoder) / x2 (skip) channels
    in_ch = C1 + C2
    out_ch = 8
    H1 = W1 = 8                    # low-res input -> upsampled to 16x16
    H2 = W2 = 16

    ks = jax.random.split(key, 14)
    x1 = jax.random.normal(ks[0], (N, C1, H1, W1), jnp.float32)
    x2 = jax.random.normal(ks[1], (N, C2, H2, W2), jnp.float32)

    # Conv weights stored as (9, Cin, Cout) == flattened (3,3,Cin,Cout);
    # conv1's first C2 input channels correspond to x2 (cat order [x2, x1]).
    w1 = 0.1 * jax.random.normal(ks[2], (9, in_ch, out_ch), jnp.float32)
    w2 = 0.1 * jax.random.normal(ks[3], (9, out_ch, out_ch), jnp.float32)
    cb1 = 0.1 * jax.random.normal(ks[4], (out_ch,), jnp.float32)   # conv biases
    cb2 = 0.1 * jax.random.normal(ks[5], (out_ch,), jnp.float32)

    # BatchNorm params (gamma, beta, running_mean, running_var)
    bn1 = (1.0 + 0.1 * jax.random.normal(ks[6], (out_ch,), jnp.float32),
           0.1 * jax.random.normal(ks[7], (out_ch,), jnp.float32),
           0.1 * jax.random.normal(ks[8], (out_ch,), jnp.float32),
           1.0 + 0.1 * jnp.abs(jax.random.normal(ks[9], (out_ch,), jnp.float32)))
    bn2 = (1.0 + 0.1 * jax.random.normal(ks[10], (out_ch,), jnp.float32),
           0.1 * jax.random.normal(ks[11], (out_ch,), jnp.float32),
           0.1 * jax.random.normal(ks[12], (out_ch,), jnp.float32),
           1.0 + 0.1 * jnp.abs(jax.random.normal(ks[13], (out_ch,), jnp.float32)))

    params = {"w1": w1, "w2": w2, "cb1": cb1, "cb2": cb2,
              "bn1": bn1, "bn2": bn2}

    out = jax.block_until_ready(up_forward(x1, x2, params))
    assert out.shape == (N, out_ch, H2, W2), out.shape

    ref = jax.block_until_ready(_ref_up(x1, x2, params))
    # Kernel uses bf16 MXU operands (f32 accumulation); reference is pure f32,
    # so allow a bf16-level tolerance.
    err = float(jnp.max(jnp.abs(out - ref)))
    assert err < 5e-2, err

    print("KERNEL_OK")
</pallas_src>

<mosaic_0001>
module attributes {stable_mosaic.version = 11 : i64} {
  func.func @_up_block_kernel(%arg0: i32, %arg1: memref<1x32x8xbf16, #tpu.memory_space<vmem>>, %arg2: memref<1x4x16x16xbf16, #tpu.memory_space<vmem>>, %arg3: memref<16x8xbf16, #tpu.memory_space<vmem>>, %arg4: memref<8x16xbf16, #tpu.memory_space<vmem>>, %arg5: memref<8x72xbf16, #tpu.memory_space<vmem>>, %arg6: memref<8x72xbf16, #tpu.memory_space<vmem>>, %arg7: memref<8x1xf32, #tpu.memory_space<vmem>>, %arg8: memref<8x1xf32, #tpu.memory_space<vmem>>, %arg9: memref<8x1xf32, #tpu.memory_space<vmem>>, %arg10: memref<8x1xf32, #tpu.memory_space<vmem>>, %arg11: memref<1x8x256xf32, #tpu.memory_space<vmem>>, %arg12: memref<8x18x18xf32, #tpu.memory_space<vmem>>, %arg13: memref<8x18x18xf32, #tpu.memory_space<vmem>>) attributes {dimension_semantics = [#tpu.dimension_semantics<parallel>], iteration_bounds = array<i64: 2>, scalar_prefetch = 0 : i64, scratch_operands = 2 : i64, tpu.core_type = #tpu.core_type<tc>, window_params = [{transform_indices = @transform_0, window_bounds = array<i64: 1, 32, 8>}, {transform_indices = @transform_1, window_bounds = array<i64: 1, 4, 16, 16>}, {pipeline_mode = #tpu.pipeline_mode<synchronous>, transform_indices = @transform_2, window_bounds = array<i64: 16, 8>}, {pipeline_mode = #tpu.pipeline_mode<synchronous>, transform_indices = @transform_3, window_bounds = array<i64: 8, 16>}, {pipeline_mode = #tpu.pipeline_mode<synchronous>, transform_indices = @transform_4, window_bounds = array<i64: 8, 72>}, {pipeline_mode = #tpu.pipeline_mode<synchronous>, transform_indices = @transform_5, window_bounds = array<i64: 8, 72>}, {pipeline_mode = #tpu.pipeline_mode<synchronous>, transform_indices = @transform_6, window_bounds = array<i64: 8, 1>}, {pipeline_mode = #tpu.pipeline_mode<synchronous>, transform_indices = @transform_7, window_bounds = array<i64: 8, 1>}, {pipeline_mode = #tpu.pipeline_mode<synchronous>, transform_indices = @transform_8, window_bounds = array<i64: 8, 1>}, {pipeline_mode = #tpu.pipeline_mode<synchronous>, transform_indices = @transform_9, window_bounds = array<i64: 8, 1>}, {transform_indices = @transform_10, window_bounds = array<i64: 1, 8, 256>}]} {
    %cst = arith.constant 0.000000e+00 : f32
    %0 = vector.broadcast %cst : f32 to vector<8x1x18xf32>
    %c0 = arith.constant 0 : index
    %c0_0 = arith.constant 0 : index
    %c0_1 = arith.constant 0 : index
    %1 = vector.load %arg12[%c0, %c0_0, %c0_1] : memref<8x18x18xf32, #tpu.memory_space<vmem>>, vector<8x1x18xf32>
    tpu.vector_store %arg12[%c0, %c0_0, %c0_1], %0 {strides = array<i32>} : memref<8x18x18xf32, #tpu.memory_space<vmem>>, vector<8x1x18xf32>,
    %cst_2 = arith.constant 0.000000e+00 : f32
    %2 = vector.broadcast %cst_2 : f32 to vector<8x1x18xf32>
    %c0_3 = arith.constant 0 : index
    %c17 = arith.constant 17 : index
    %c0_4 = arith.constant 0 : index
    %3 = vector.load %arg12[%c0_3, %c17, %c0_4] : memref<8x18x18xf32, #tpu.memory_space<vmem>>, vector<8x1x18xf32>
    tpu.vector_store %arg12[%c0_3, %c17, %c0_4], %2 {strides = array<i32>} : memref<8x18x18xf32, #tpu.memory_space<vmem>>, vector<8x1x18xf32>,
    %cst_5 = arith.constant 0.000000e+00 : f32
    %4 = vector.broadcast %cst_5 : f32 to vector<8x18x1xf32>
    %c0_6 = arith.constant 0 : index
    %c0_7 = arith.constant 0 : index
    %c0_8 = arith.constant 0 : index
    %5 = vector.load %arg12[%c0_6, %c0_7, %c0_8] : memref<8x18x18xf32, #tpu.memory_space<vmem>>, vector<8x18x1xf32>
    tpu.vector_store %arg12[%c0_6, %c0_7, %c0_8], %4 {strides = array<i32>} : memref<8x18x18xf32, #tpu.memory_space<vmem>>, vector<8x18x1xf32>,
    %cst_9 = arith.constant 0.000000e+00 : f32
    %6 = vector.broadcast %cst_9 : f32 to vector<8x18x1xf32>
    %c0_10 = arith.constant 0 : index
    %c0_11 = arith.constant 0 : index
    %c17_12 = arith.constant 17 : index
    %7 = vector.load %arg12[%c0_10, %c0_11, %c17_12] : memref<8x18x18xf32, #tpu.memory_space<vmem>>, vector<8x18x1xf32>
    tpu.vector_store %arg12[%c0_10, %c0_11, %c17_12], %6 {strides = array<i32>} : memref<8x18x18xf32, #tpu.memory_space<vmem>>, vector<8x18x1xf32>,
    %cst_13 = arith.constant 0.000000e+00 : f32
    %8 = vector.broadcast %cst_13 : f32 to vector<8x1x18xf32>
    %c0_14 = arith.constant 0 : index
    %c0_15 = arith.constant 0 : index
    %c0_16 = arith.constant 0 : index
    %9 = vector.load %arg13[%c0_14, %c0_15, %c0_16] : memref<8x18x18xf32, #tpu.memory_space<vmem>>, vector<8x1x18xf32>
    tpu.vector_store %arg13[%c0_14, %c0_15, %c0_16], %8 {strides = array<i32>} : memref<8x18x18xf32, #tpu.memory_space<vmem>>, vector<8x1x18xf32>,
    %cst_17 = arith.constant 0.000000e+00 : f32
    %10 = vector.broadcast %cst_17 : f32 to vector<8x1x18xf32>
    %c0_18 = arith.constant 0 : index
    %c17_19 = arith.constant 17 : index
    %c0_20 = arith.constant 0 : index
    %11 = vector.load %arg13[%c0_18, %c17_19, %c0_20] : memref<8x18x18xf32, #tpu.memory_space<vmem>>, vector<8x1x18xf32>
    tpu.vector_store %arg13[%c0_18, %c17_19, %c0_20], %10 {strides = array<i32>} : memref<8x18x18xf32, #tpu.memory_space<vmem>>, vector<8x1x18xf32>,
    %cst_21 = arith.constant 0.000000e+00 : f32
    %12 = vector.broadcast %cst_21 : f32 to vector<8x18x1xf32>
    %c0_22 = arith.constant 0 : index
    %c0_23 = arith.constant 0 : index
    %c0_24 = arith.constant 0 : index
    %13 = vector.load %arg13[%c0_22, %c0_23, %c0_24] : memref<8x18x18xf32, #tpu.memory_space<vmem>>, vector<8x18x1xf32>
    tpu.vector_store %arg13[%c0_22, %c0_23, %c0_24], %12 {strides = array<i32>} : memref<8x18x18xf32, #tpu.memory_space<vmem>>, vector<8x18x1xf32>,
    %cst_25 = arith.constant 0.000000e+00 : f32
    %14 = vector.broadcast %cst_25 : f32 to vector<8x18x1xf32>
    %c0_26 = arith.constant 0 : index
    %c0_27 = arith.constant 0 : index
    %c17_28 = arith.constant 17 : index
    %15 = vector.load %arg13[%c0_26, %c0_27, %c17_28] : memref<8x18x18xf32, #tpu.memory_space<vmem>>, vector<8x18x1xf32>
    tpu.vector_store %arg13[%c0_26, %c0_27, %c17_28], %14 {strides = array<i32>} : memref<8x18x18xf32, #tpu.memory_space<vmem>>, vector<8x18x1xf32>,
    %c0_29 = arith.constant 0 : index
    %c0_30 = arith.constant 0 : index
    %c0_31 = arith.constant 0 : index
    %c0_32 = arith.constant 0 : index
    %16 = vector.load %arg2[%c0_29, %c0_30, %c0_31, %c0_32] : memref<1x4x16x16xbf16, #tpu.memory_space<vmem>>, vector<1x4x16x16xbf16>
    %17 = vector.shape_cast %16 : vector<1x4x16x16xbf16> to vector<4x16x16xbf16>
    %18 = arith.extf %17 : vector<4x16x16xbf16> to vector<4x16x16xf32>
    %c0_33 = arith.constant 0 : index
    %c1 = arith.constant 1 : index
    %c1_34 = arith.constant 1 : index
    %19 = vector.load %arg12[%c0_33, %c1, %c1_34] : memref<8x18x18xf32, #tpu.memory_space<vmem>>, vector<4x16x16xf32>
    tpu.vector_store %arg12[%c0_33, %c1, %c1_34], %18 {strides = array<i32>} : memref<8x18x18xf32, #tpu.memory_space<vmem>>, vector<4x16x16xf32>,
    %c0_35 = arith.constant 0 : index
    %c0_36 = arith.constant 0 : index
    %c0_37 = arith.constant 0 : index
    %20 = vector.load %arg1[%c0_35, %c0_36, %c0_37] : memref<1x32x8xbf16, #tpu.memory_space<vmem>>, vector<1x32x8xbf16>
    %21 = vector.shape_cast %20 : vector<1x32x8xbf16> to vector<32x8xbf16>
    %c0_38 = arith.constant 0 : index
    %c0_39 = arith.constant 0 : index
    %22 = vector.load %arg4[%c0_38, %c0_39] : memref<8x16xbf16, #tpu.memory_space<vmem>>, vector<8x16xbf16>
    %cst_40 = arith.constant dense<0.000000e+00> : vector<32x16xf32>
    %23 = tpu.matmul %21, %22, %cst_40 {dimension_numbers = #tpu.dot_dimension_numbers<[1], [0], [0], [1], [0, 0, 1, 1], [], []>} : vector<32x8xbf16>, vector<8x16xbf16>, vector<32x16xf32> -> vector<32x16xf32>
    %24 = arith.truncf %23 : vector<32x16xf32> to vector<32x16xbf16>
    %25 = vector.extract_strided_slice %24 {offsets = [0, 0], sizes = [8, 16], strides = [1, 1]} : vector<32x16xbf16> to vector<8x16xbf16>
    %c0_41 = arith.constant 0 : index
    %c0_42 = arith.constant 0 : index
    %26 = vector.load %arg3[%c0_41, %c0_42] : memref<16x8xbf16, #tpu.memory_space<vmem>>, vector<16x8xbf16>
    %cst_43 = arith.constant dense<0.000000e+00> : vector<16x16xf32>
    %27 = tpu.matmul %26, %25, %cst_43 {dimension_numbers = #tpu.dot_dimension_numbers<[1], [0], [0], [1], [0, 0, 1, 1], [], []>} : vector<16x8xbf16>, vector<8x16xbf16>, vector<16x16xf32> -> vector<16x16xf32>
    %c4 = arith.constant 4 : index
    %c1_44 = arith.constant 1 : index
    %c1_45 = arith.constant 1 : index
    %28 = vector.load %arg12[%c4, %c1_44, %c1_45] : memref<8x18x18xf32, #tpu.memory_space<vmem>>, vector<1x16x16xf32>
    %29 = vector.shape_cast %28 : vector<1x16x16xf32> to vector<16x16xf32>
    %30 = vector.shape_cast %27 : vector<16x16xf32> to vector<1x16x16xf32>
    tpu.vector_store %arg12[%c4, %c1_44, %c1_45], %30 {strides = array<i32>} : memref<8x18x18xf32, #tpu.memory_space<vmem>>, vector<1x16x16xf32>,
    %31 = vector.extract_strided_slice %24 {offsets = [8, 0], sizes = [8, 16], strides = [1, 1]} : vector<32x16xbf16> to vector<8x16xbf16>
    %c0_46 = arith.constant 0 : index
    %c0_47 = arith.constant 0 : index
    %32 = vector.load %arg3[%c0_46, %c0_47] : memref<16x8xbf16, #tpu.memory_space<vmem>>, vector<16x8xbf16>
    %cst_48 = arith.constant dense<0.000000e+00> : vector<16x16xf32>
    %33 = tpu.matmul %32, %31, %cst_48 {dimension_numbers = #tpu.dot_dimension_numbers<[1], [0], [0], [1], [0, 0, 1, 1], [], []>} : vector<16x8xbf16>, vector<8x16xbf16>, vector<16x16xf32> -> vector<16x16xf32>
    %c5 = arith.constant 5 : index
    %c1_49 = arith.constant 1 : index
    %c1_50 = arith.constant 1 : index
    %34 = vector.load %arg12[%c5, %c1_49, %c1_50] : memref<8x18x18xf32, #tpu.memory_space<vmem>>, vector<1x16x16xf32>
    %35 = vector.shape_cast %34 : vector<1x16x16xf32> to vector<16x16xf32>
    %36 = vector.shape_cast %33 : vector<16x16xf32> to vector<1x16x16xf32>
    tpu.vector_store %arg12[%c5, %c1_49, %c1_50], %36 {strides = array<i32>} : memref<8x18x18xf32, #tpu.memory_space<vmem>>, vector<1x16x16xf32>,
    %37 = vector.extract_strided_slice %24 {offsets = [16, 0], sizes = [8, 16], strides = [1, 1]} : vector<32x16xbf16> to vector<8x16xbf16>
    %c0_51 = arith.constant 0 : index
    %c0_52 = arith.constant 0 : index
    %38 = vector.load %arg3[%c0_51, %c0_52] : memref<16x8xbf16, #tpu.memory_space<vmem>>, vector<16x8xbf16>
    %cst_53 = arith.constant dense<0.000000e+00> : vector<16x16xf32>
    %39 = tpu.matmul %38, %37, %cst_53 {dimension_numbers = #tpu.dot_dimension_numbers<[1], [0], [0], [1], [0, 0, 1, 1], [], []>} : vector<16x8xbf16>, vector<8x16xbf16>, vector<16x16xf32> -> vector<16x16xf32>
    %c6 = arith.constant 6 : index
    %c1_54 = arith.constant 1 : index
    %c1_55 = arith.constant 1 : index
    %40 = vector.load %arg12[%c6, %c1_54, %c1_55] : memref<8x18x18xf32, #tpu.memory_space<vmem>>, vector<1x16x16xf32>
    %41 = vector.shape_cast %40 : vector<1x16x16xf32> to vector<16x16xf32>
    %42 = vector.shape_cast %39 : vector<16x16xf32> to vector<1x16x16xf32>
    tpu.vector_store %arg12[%c6, %c1_54, %c1_55], %42 {strides = array<i32>} : memref<8x18x18xf32, #tpu.memory_space<vmem>>, vector<1x16x16xf32>,
    %43 = vector.extract_strided_slice %24 {offsets = [24, 0], sizes = [8, 16], strides = [1, 1]} : vector<32x16xbf16> to vector<8x16xbf16>
    %c0_56 = arith.constant 0 : index
    %c0_57 = arith.constant 0 : index
    %44 = vector.load %arg3[%c0_56, %c0_57] : memref<16x8xbf16, #tpu.memory_space<vmem>>, vector<16x8xbf16>
    %cst_58 = arith.constant dense<0.000000e+00> : vector<16x16xf32>
    %45 = tpu.matmul %44, %43, %cst_58 {dimension_numbers = #tpu.dot_dimension_numbers<[1], [0], [0], [1], [0, 0, 1, 1], [], []>} : vector<16x8xbf16>, vector<8x16xbf16>, vector<16x16xf32> -> vector<16x16xf32>
    %c7 = arith.constant 7 : index
    %c1_59 = arith.constant 1 : index
    %c1_60 = arith.constant 1 : index
    %46 = vector.load %arg12[%c7, %c1_59, %c1_60] : memref<8x18x18xf32, #tpu.memory_space<vmem>>, vector<1x16x16xf32>
    %47 = vector.shape_cast %46 : vector<1x16x16xf32> to vector<16x16xf32>
    %48 = vector.shape_cast %45 : vector<16x16xf32> to vector<1x16x16xf32>
    tpu.vector_store %arg12[%c7, %c1_59, %c1_60], %48 {strides = array<i32>} : memref<8x18x18xf32, #tpu.memory_space<vmem>>, vector<1x16x16xf32>,
    %c0_61 = arith.constant 0 : index
    %c0_62 = arith.constant 0 : index
    %c0_63 = arith.constant 0 : index
    %49 = vector.load %arg12[%c0_61, %c0_62, %c0_63] : memref<8x18x18xf32, #tpu.memory_space<vmem>>, vector<8x16x16xf32>
    %50 = vector.shape_cast %49 : vector<8x16x16xf32> to vector<8x256xf32>
    %c0_64 = arith.constant 0 : index
    %c0_65 = arith.constant 0 : index
    %c1_66 = arith.constant 1 : index
    %51 = vector.load %arg12[%c0_64, %c0_65, %c1_66] : memref<8x18x18xf32, #tpu.memory_space<vmem>>, vector<8x16x16xf32>
    %52 = vector.shape_cast %51 : vector<8x16x16xf32> to vector<8x256xf32>
    %c0_67 = arith.constant 0 : index
    %c0_68 = arith.constant 0 : index
    %c2 = arith.constant 2 : index
    %53 = vector.load %arg12[%c0_67, %c0_68, %c2] : memref<8x18x18xf32, #tpu.memory_space<vmem>>, vector<8x16x16xf32>
    %54 = vector.shape_cast %53 : vector<8x16x16xf32> to vector<8x256xf32>
    %c0_69 = arith.constant 0 : index
    %c1_70 = arith.constant 1 : index
    %c0_71 = arith.constant 0 : index
    %55 = vector.load %arg12[%c0_69, %c1_70, %c0_71] : memref<8x18x18xf32, #tpu.memory_space<vmem>>, vector<8x16x16xf32>
    %56 = vector.shape_cast %55 : vector<8x16x16xf32> to vector<8x256xf32>
    %c0_72 = arith.constant 0 : index
    %c1_73 = arith.constant 1 : index
    %c1_74 = arith.constant 1 : index
    %57 = vector.load %arg12[%c0_72, %c1_73, %c1_74] : memref<8x18x18xf32, #tpu.memory_space<vmem>>, vector<8x16x16xf32>
    %58 = vector.shape_cast %57 : vector<8x16x16xf32> to vector<8x256xf32>
    %c0_75 = arith.constant 0 : index
    %c1_76 = arith.constant 1 : index
    %c2_77 = arith.constant 2 : index
    %59 = vector.load %arg12[%c0_75, %c1_76, %c2_77] : memref<8x18x18xf32, #tpu.memory_space<vmem>>, vector<8x16x16xf32>
    %60 = vector.shape_cast %59 : vector<8x16x16xf32> to vector<8x256xf32>
    %c0_78 = arith.constant 0 : index
    %c2_79 = arith.constant 2 : index
    %c0_80 = arith.constant 0 : index
    %61 = vector.load %arg12[%c0_78, %c2_79, %c0_80] : memref<8x18x18xf32, #tpu.memory_space<vmem>>, vector<8x16x16xf32>
    %62 = vector.shape_cast %61 : vector<8x16x16xf32> to vector<8x256xf32>
    %c0_81 = arith.constant 0 : index
    %c2_82 = arith.constant 2 : index
    %c1_83 = arith.constant 1 : index
    %63 = vector.load %arg12[%c0_81, %c2_82, %c1_83] : memref<8x18x18xf32, #tpu.memory_space<vmem>>, vector<8x16x16xf32>
    %64 = vector.shape_cast %63 : vector<8x16x16xf32> to vector<8x256xf32>
    %c0_84 = arith.constant 0 : index
    %c2_85 = arith.constant 2 : index
    %c2_86 = arith.constant 2 : index
    %65 = vector.load %arg12[%c0_84, %c2_85, %c2_86] : memref<8x18x18xf32, #tpu.memory_space<vmem>>, vector<8x16x16xf32>
    %66 = vector.shape_cast %65 : vector<8x16x16xf32> to vector<8x256xf32>
    %67 = tpu.concatenate %50, %52, %54, %56, %58, %60, %62, %64, %66 in 0 : vector<8x256xf32>, vector<8x256xf32>, vector<8x256xf32>, vector<8x256xf32>, vector<8x256xf32>, vector<8x256xf32>, vector<8x256xf32>, vector<8x256xf32>, vector<8x256xf32> -> vector<72x256xf32>
    %68 = arith.truncf %67 : vector<72x256xf32> to vector<72x256xbf16>
    %c0_87 = arith.constant 0 : index
    %c0_88 = arith.constant 0 : index
    %69 = vector.load %arg5[%c0_87, %c0_88] : memref<8x72xbf16, #tpu.memory_space<vmem>>, vector<8x72xbf16>
    %cst_89 = arith.constant dense<0.000000e+00> : vector<8x256xf32>
    %70 = tpu.matmul %69, %68, %cst_89 {dimension_numbers = #tpu.dot_dimension_numbers<[1], [0], [0], [1], [0, 0, 1, 1], [], []>} : vector<8x72xbf16>, vector<72x256xbf16>, vector<8x256xf32> -> vector<8x256xf32>
    %c0_90 = arith.constant 0 : index
    %c0_91 = arith.constant 0 : index
    %71 = vector.load %arg7[%c0_90, %c0_91] : memref<8x1xf32, #tpu.memory_space<vmem>>, vector<8x1xf32>
    %72 = vector.broadcast %71 : vector<8x1xf32> to vector<8x256xf32>
    %73 = arith.mulf %70, %72 : vector<8x256xf32>
    %c0_92 = arith.constant 0 : index
    %c0_93 = arith.constant 0 : index
    %74 = vector.load %arg8[%c0_92, %c0_93] : memref<8x1xf32, #tpu.memory_space<vmem>>, vector<8x1xf32>
    %75 = vector.broadcast %74 : vector<8x1xf32> to vector<8x256xf32>
    %76 = arith.addf %73, %75 : vector<8x256xf32>
    %cst_94 = arith.constant 0.000000e+00 : f32
    %77 = vector.broadcast %cst_94 : f32 to vector<8x256xf32>
    %78 = arith.maximumf %76, %77 : vector<8x256xf32>
    %79 = vector.extract_strided_slice %78 {offsets = [0, 0], sizes = [8, 16], strides = [1, 1]} : vector<8x256xf32> to vector<8x16xf32>
    %c0_95 = arith.constant 0 : index
    %c1_96 = arith.constant 1 : index
    %c1_97 = arith.constant 1 : index
    %80 = vector.load %arg13[%c0_95, %c1_96, %c1_97] : memref<8x18x18xf32, #tpu.memory_space<vmem>>, vector<8x1x16xf32>
    %81 = vector.shape_cast %80 : vector<8x1x16xf32> to vector<8x16xf32>
    %82 = vector.shape_cast %79 : vector<8x16xf32> to vector<8x1x16xf32>
    tpu.vector_store %arg13[%c0_95, %c1_96, %c1_97], %82 {strides = array<i32>} : memref<8x18x18xf32, #tpu.memory_space<vmem>>, vector<8x1x16xf32>,
    %83 = vector.extract_strided_slice %78 {offsets = [0, 16], sizes = [8, 16], strides = [1, 1]} : vector<8x256xf32> to vector<8x16xf32>
    %c0_98 = arith.constant 0 : index
    %c2_99 = arith.constant 2 : index
    %c1_100 = arith.constant 1 : index
    %84 = vector.load %arg13[%c0_98, %c2_99, %c1_100] : memref<8x18x18xf32, #tpu.memory_space<vmem>>, vector<8x1x16xf32>
    %85 = vector.shape_cast %84 : vector<8x1x16xf32> to vector<8x16xf32>
    %86 = vector.shape_cast %83 : vector<8x16xf32> to vector<8x1x16xf32>
    tpu.vector_store %arg13[%c0_98, %c2_99, %c1_100], %86 {strides = array<i32>} : memref<8x18x18xf32, #tpu.memory_space<vmem>>, vector<8x1x16xf32>,
    %87 = vector.extract_strided_slice %78 {offsets = [0, 32], sizes = [8, 16], strides = [1, 1]} : vector<8x256xf32> to vector<8x16xf32>
    %c0_101 = arith.constant 0 : index
    %c3 = arith.constant 3 : index
    %c1_102 = arith.constant 1 : index
    %88 = vector.load %arg13[%c0_101, %c3, %c1_102] : memref<8x18x18xf32, #tpu.memory_space<vmem>>, vector<8x1x16xf32>
    %89 = vector.shape_cast %88 : vector<8x1x16xf32> to vector<8x16xf32>
    %90 = vector.shape_cast %87 : vector<8x16xf32> to vector<8x1x16xf32>
    tpu.vector_store %arg13[%c0_101, %c3, %c1_102], %90 {strides = array<i32>} : memref<8x18x18xf32, #tpu.memory_space<vmem>>, vector<8x1x16xf32>,
    %91 = vector.extract_strided_slice %78 {offsets = [0, 48], sizes = [8, 16], strides = [1, 1]} : vector<8x256xf32> to vector<8x16xf32>
    %c0_103 = arith.constant 0 : index
    %c4_104 = arith.constant 4 : index
    %c1_105 = arith.constant 1 : index
    %92 = vector.load %arg13[%c0_103, %c4_104, %c1_105] : memref<8x18x18xf32, #tpu.memory_space<vmem>>, vector<8x1x16xf32>
    %93 = vector.shape_cast %92 : vector<8x1x16xf32> to vector<8x16xf32>
    %94 = vector.shape_cast %91 : vector<8x16xf32> to vector<8x1x16xf32>
    tpu.vector_store %arg13[%c0_103, %c4_104, %c1_105], %94 {strides = array<i32>} : memref<8x18x18xf32, #tpu.memory_space<vmem>>, vector<8x1x16xf32>,
    %95 = vector.extract_strided_slice %78 {offsets = [0, 64], sizes = [8, 16], strides = [1, 1]} : vector<8x256xf32> to vector<8x16xf32>
    %c0_106 = arith.constant 0 : index
    %c5_107 = arith.constant 5 : index
    %c1_108 = arith.constant 1 : index
    %96 = vector.load %arg13[%c0_106, %c5_107, %c1_108] : memref<8x18x18xf32, #tpu.memory_space<vmem>>, vector<8x1x16xf32>
    %97 = vector.shape_cast %96 : vector<8x1x16xf32> to vector<8x16xf32>
    %98 = vector.shape_cast %95 : vector<8x16xf32> to vector<8x1x16xf32>
    tpu.vector_store %arg13[%c0_106, %c5_107, %c1_108], %98 {strides = array<i32>} : memref<8x18x18xf32, #tpu.memory_space<vmem>>, vector<8x1x16xf32>,
    %99 = vector.extract_strided_slice %78 {offsets = [0, 80], sizes = [8, 16], strides = [1, 1]} : vector<8x256xf32> to vector<8x16xf32>
    %c0_109 = arith.constant 0 : index
    %c6_110 = arith.constant 6 : index
    %c1_111 = arith.constant 1 : index
    %100 = vector.load %arg13[%c0_109, %c6_110, %c1_111] : memref<8x18x18xf32, #tpu.memory_space<vmem>>, vector<8x1x16xf32>
    %101 = vector.shape_cast %100 : vector<8x1x16xf32> to vector<8x16xf32>
    %102 = vector.shape_cast %99 : vector<8x16xf32> to vector<8x1x16xf32>
    tpu.vector_store %arg13[%c0_109, %c6_110, %c1_111], %102 {strides = array<i32>} : memref<8x18x18xf32, #tpu.memory_space<vmem>>, vector<8x1x16xf32>,
    %103 = vector.extract_strided_slice %78 {offsets = [0, 96], sizes = [8, 16], strides = [1, 1]} : vector<8x256xf32> to vector<8x16xf32>
    %c0_112 = arith.constant 0 : index
    %c7_113 = arith.constant 7 : index
    %c1_114 = arith.constant 1 : index
    %104 = vector.load %arg13[%c0_112, %c7_113, %c1_114] : memref<8x18x18xf32, #tpu.memory_space<vmem>>, vector<8x1x16xf32>
    %105 = vector.shape_cast %104 : vector<8x1x16xf32> to vector<8x16xf32>
    %106 = vector.shape_cast %103 : vector<8x16xf32> to vector<8x1x16xf32>
    tpu.vector_store %arg13[%c0_112, %c7_113, %c1_114], %106 {strides = array<i32>} : memref<8x18x18xf32, #tpu.memory_space<vmem>>, vector<8x1x16xf32>,
    %107 = vector.extract_strided_slice %78 {offsets = [0, 112], sizes = [8, 16], strides = [1, 1]} : vector<8x256xf32> to vector<8x16xf32>
    %c0_115 = arith.constant 0 : index
    %c8 = arith.constant 8 : index
    %c1_116 = arith.constant 1 : index
    %108 = vector.load %arg13[%c0_115, %c8, %c1_116] : memref<8x18x18xf32, #tpu.memory_space<vmem>>, vector<8x1x16xf32>
    %109 = vector.shape_cast %108 : vector<8x1x16xf32> to vector<8x16xf32>
    %110 = vector.shape_cast %107 : vector<8x16xf32> to vector<8x1x16xf32>
    tpu.vector_store %arg13[%c0_115, %c8, %c1_116], %110 {strides = array<i32>} : memref<8x18x18xf32, #tpu.memory_space<vmem>>, vector<8x1x16xf32>,
    %111 = vector.extract_strided_slice %78 {offsets = [0, 128], sizes = [8, 16], strides = [1, 1]} : vector<8x256xf32> to vector<8x16xf32>
    %c0_117 = arith.constant 0 : index
    %c9 = arith.constant 9 : index
    %c1_118 = arith.constant 1 : index
    %112 = vector.load %arg13[%c0_117, %c9, %c1_118] : memref<8x18x18xf32, #tpu.memory_space<vmem>>, vector<8x1x16xf32>
    %113 = vector.shape_cast %112 : vector<8x1x16xf32> to vector<8x16xf32>
    %114 = vector.shape_cast %111 : vector<8x16xf32> to vector<8x1x16xf32>
    tpu.vector_store %arg13[%c0_117, %c9, %c1_118], %114 {strides = array<i32>} : memref<8x18x18xf32, #tpu.memory_space<vmem>>, vector<8x1x16xf32>,
    %115 = vector.extract_strided_slice %78 {offsets = [0, 144], sizes = [8, 16], strides = [1, 1]} : vector<8x256xf32> to vector<8x16xf32>
    %c0_119 = arith.constant 0 : index
    %c10 = arith.constant 10 : index
    %c1_120 = arith.constant 1 : index
    %116 = vector.load %arg13[%c0_119, %c10, %c1_120] : memref<8x18x18xf32, #tpu.memory_space<vmem>>, vector<8x1x16xf32>
    %117 = vector.shape_cast %116 : vector<8x1x16xf32> to vector<8x16xf32>
    %118 = vector.shape_cast %115 : vector<8x16xf32> to vector<8x1x16xf32>
    tpu.vector_store %arg13[%c0_119, %c10, %c1_120], %118 {strides = array<i32>} : memref<8x18x18xf32, #tpu.memory_space<vmem>>, vector<8x1x16xf32>,
    %119 = vector.extract_strided_slice %78 {offsets = [0, 160], sizes = [8, 16], strides = [1, 1]} : vector<8x256xf32> to vector<8x16xf32>
    %c0_121 = arith.constant 0 : index
    %c11 = arith.constant 11 : index
    %c1_122 = arith.constant 1 : index
    %120 = vector.load %arg13[%c0_121, %c11, %c1_122] : memref<8x18x18xf32, #tpu.memory_space<vmem>>, vector<8x1x16xf32>
    %121 = vector.shape_cast %120 : vector<8x1x16xf32> to vector<8x16xf32>
    %122 = vector.shape_cast %119 : vector<8x16xf32> to vector<8x1x16xf32>
    tpu.vector_store %arg13[%c0_121, %c11, %c1_122], %122 {strides = array<i32>} : memref<8x18x18xf32, #tpu.memory_space<vmem>>, vector<8x1x16xf32>,
    %123 = vector.extract_strided_slice %78 {offsets = [0, 176], sizes = [8, 16], strides = [1, 1]} : vector<8x256xf32> to vector<8x16xf32>
    %c0_123 = arith.constant 0 : index
    %c12 = arith.constant 12 : index
    %c1_124 = arith.constant 1 : index
    %124 = vector.load %arg13[%c0_123, %c12, %c1_124] : memref<8x18x18xf32, #tpu.memory_space<vmem>>, vector<8x1x16xf32>
    %125 = vector.shape_cast %124 : vector<8x1x16xf32> to vector<8x16xf32>
    %126 = vector.shape_cast %123 : vector<8x16xf32> to vector<8x1x16xf32>
    tpu.vector_store %arg13[%c0_123, %c12, %c1_124], %126 {strides = array<i32>} : memref<8x18x18xf32, #tpu.memory_space<vmem>>, vector<8x1x16xf32>,
    %127 = vector.extract_strided_slice %78 {offsets = [0, 192], sizes = [8, 16], strides = [1, 1]} : vector<8x256xf32> to vector<8x16xf32>
    %c0_125 = arith.constant 0 : index
    %c13 = arith.constant 13 : index
    %c1_126 = arith.constant 1 : index
    %128 = vector.load %arg13[%c0_125, %c13, %c1_126] : memref<8x18x18xf32, #tpu.memory_space<vmem>>, vector<8x1x16xf32>
    %129 = vector.shape_cast %128 : vector<8x1x16xf32> to vector<8x16xf32>
    %130 = vector.shape_cast %127 : vector<8x16xf32> to vector<8x1x16xf32>
    tpu.vector_store %arg13[%c0_125, %c13, %c1_126], %130 {strides = array<i32>} : memref<8x18x18xf32, #tpu.memory_space<vmem>>, vector<8x1x16xf32>,
    %131 = vector.extract_strided_slice %78 {offsets = [0, 208], sizes = [8, 16], strides = [1, 1]} : vector<8x256xf32> to vector<8x16xf32>
    %c0_127 = arith.constant 0 : index
    %c14 = arith.constant 14 : index
    %c1_128 = arith.constant 1 : index
    %132 = vector.load %arg13[%c0_127, %c14, %c1_128] : memref<8x18x18xf32, #tpu.memory_space<vmem>>, vector<8x1x16xf32>
    %133 = vector.shape_cast %132 : vector<8x1x16xf32> to vector<8x16xf32>
    %134 = vector.shape_cast %131 : vector<8x16xf32> to vector<8x1x16xf32>
    tpu.vector_store %arg13[%c0_127, %c14, %c1_128], %134 {strides = array<i32>} : memref<8x18x18xf32, #tpu.memory_space<vmem>>, vector<8x1x16xf32>,
    %135 = vector.extract_strided_slice %78 {offsets = [0, 224], sizes = [8, 16], strides = [1, 1]} : vector<8x256xf32> to vector<8x16xf32>
    %c0_129 = arith.constant 0 : index
    %c15 = arith.constant 15 : index
    %c1_130 = arith.constant 1 : index
    %136 = vector.load %arg13[%c0_129, %c15, %c1_130] : memref<8x18x18xf32, #tpu.memory_space<vmem>>, vector<8x1x16xf32>
    %137 = vector.shape_cast %136 : vector<8x1x16xf32> to vector<8x16xf32>
    %138 = vector.shape_cast %135 : vector<8x16xf32> to vector<8x1x16xf32>
    tpu.vector_store %arg13[%c0_129, %c15, %c1_130], %138 {strides = array<i32>} : memref<8x18x18xf32, #tpu.memory_space<vmem>>, vector<8x1x16xf32>,
    %139 = vector.extract_strided_slice %78 {offsets = [0, 240], sizes = [8, 16], strides = [1, 1]} : vector<8x256xf32> to vector<8x16xf32>
    %c0_131 = arith.constant 0 : index
    %c16 = arith.constant 16 : index
    %c1_132 = arith.constant 1 : index
    %140 = vector.load %arg13[%c0_131, %c16, %c1_132] : memref<8x18x18xf32, #tpu.memory_space<vmem>>, vector<8x1x16xf32>
    %141 = vector.shape_cast %140 : vector<8x1x16xf32> to vector<8x16xf32>
    %142 = vector.shape_cast %139 : vector<8x16xf32> to vector<8x1x16xf32>
    tpu.vector_store %arg13[%c0_131, %c16, %c1_132], %142 {strides = array<i32>} : memref<8x18x18xf32, #tpu.memory_space<vmem>>, vector<8x1x16xf32>,
    %c0_133 = arith.constant 0 : index
    %c0_134 = arith.constant 0 : index
    %c0_135 = arith.constant 0 : index
    %143 = vector.load %arg13[%c0_133, %c0_134, %c0_135] : memref<8x18x18xf32, #tpu.memory_space<vmem>>, vector<8x16x16xf32>
    %144 = vector.shape_cast %143 : vector<8x16x16xf32> to vector<8x256xf32>
    %c0_136 = arith.constant 0 : index
    %c0_137 = arith.constant 0 : index
    %c1_138 = arith.constant 1 : index
    %145 = vector.load %arg13[%c0_136, %c0_137, %c1_138] : memref<8x18x18xf32, #tpu.memory_space<vmem>>, vector<8x16x16xf32>
    %146 = vector.shape_cast %145 : vector<8x16x16xf32> to vector<8x256xf32>
    %c0_139 = arith.constant 0 : index
    %c0_140 = arith.constant 0 : index
    %c2_141 = arith.constant 2 : index
    %147 = vector.load %arg13[%c0_139, %c0_140, %c2_141] : memref<8x18x18xf32, #tpu.memory_space<vmem>>, vector<8x16x16xf32>
    %148 = vector.shape_cast %147 : vector<8x16x16xf32> to vector<8x256xf32>
    %c0_142 = arith.constant 0 : index
    %c1_143 = arith.constant 1 : index
    %c0_144 = arith.constant 0 : index
    %149 = vector.load %arg13[%c0_142, %c1_143, %c0_144] : memref<8x18x18xf32, #tpu.memory_space<vmem>>, vector<8x16x16xf32>
    %150 = vector.shape_cast %149 : vector<8x16x16xf32> to vector<8x256xf32>
    %c0_145 = arith.constant 0 : index
    %c1_146 = arith.constant 1 : index
    %c1_147 = arith.constant 1 : index
    %151 = vector.load %arg13[%c0_145, %c1_146, %c1_147] : memref<8x18x18xf32, #tpu.memory_space<vmem>>, vector<8x16x16xf32>
    %152 = vector.shape_cast %151 : vector<8x16x16xf32> to vector<8x256xf32>
    %c0_148 = arith.constant 0 : index
    %c1_149 = arith.constant 1 : index
    %c2_150 = arith.constant 2 : index
    %153 = vector.load %arg13[%c0_148, %c1_149, %c2_150] : memref<8x18x18xf32, #tpu.memory_space<vmem>>, vector<8x16x16xf32>
    %154 = vector.shape_cast %153 : vector<8x16x16xf32> to vector<8x256xf32>
    %c0_151 = arith.constant 0 : index
    %c2_152 = arith.constant 2 : index
    %c0_153 = arith.constant 0 : index
    %155 = vector.load %arg13[%c0_151, %c2_152, %c0_153] : memref<8x18x18xf32, #tpu.memory_space<vmem>>, vector<8x16x16xf32>
    %156 = vector.shape_cast %155 : vector<8x16x16xf32> to vector<8x256xf32>
    %c0_154 = arith.constant 0 : index
    %c2_155 = arith.constant 2 : index
    %c1_156 = arith.constant 1 : index
    %157 = vector.load %arg13[%c0_154, %c2_155, %c1_156] : memref<8x18x18xf32, #tpu.memory_space<vmem>>, vector<8x16x16xf32>
    %158 = vector.shape_cast %157 : vector<8x16x16xf32> to vector<8x256xf32>
    %c0_157 = arith.constant 0 : index
    %c2_158 = arith.constant 2 : index
    %c2_159 = arith.constant 2 : index
    %159 = vector.load %arg13[%c0_157, %c2_158, %c2_159] : memref<8x18x18xf32, #tpu.memory_space<vmem>>, vector<8x16x16xf32>
    %160 = vector.shape_cast %159 : vector<8x16x16xf32> to vector<8x256xf32>
    %161 = tpu.concatenate %144, %146, %148, %150, %152, %154, %156, %158, %160 in 0 : vector<8x256xf32>, vector<8x256xf32>, vector<8x256xf32>, vector<8x256xf32>, vector<8x256xf32>, vector<8x256xf32>, vector<8x256xf32>, vector<8x256xf32>, vector<8x256xf32> -> vector<72x256xf32>
    %162 = arith.truncf %161 : vector<72x256xf32> to vector<72x256xbf16>
    %c0_160 = arith.constant 0 : index
    %c0_161 = arith.constant 0 : index
    %163 = vector.load %arg6[%c0_160, %c0_161] : memref<8x72xbf16, #tpu.memory_space<vmem>>, vector<8x72xbf16>
    %cst_162 = arith.constant dense<0.000000e+00> : vector<8x256xf32>
    %164 = tpu.matmul %163, %162, %cst_162 {dimension_numbers = #tpu.dot_dimension_numbers<[1], [0], [0], [1], [0, 0, 1, 1], [], []>} : vector<8x72xbf16>, vector<72x256xbf16>, vector<8x256xf32> -> vector<8x256xf32>
    %c0_163 = arith.constant 0 : index
    %c0_164 = arith.constant 0 : index
    %165 = vector.load %arg9[%c0_163, %c0_164] : memref<8x1xf32, #tpu.memory_space<vmem>>, vector<8x1xf32>
    %166 = vector.broadcast %165 : vector<8x1xf32> to vector<8x256xf32>
    %167 = arith.mulf %164, %166 : vector<8x256xf32>
    %c0_165 = arith.constant 0 : index
    %c0_166 = arith.constant 0 : index
    %168 = vector.load %arg10[%c0_165, %c0_166] : memref<8x1xf32, #tpu.memory_space<vmem>>, vector<8x1xf32>
    %169 = vector.broadcast %168 : vector<8x1xf32> to vector<8x256xf32>
    %170 = arith.addf %167, %169 : vector<8x256xf32>
    %cst_167 = arith.constant 0.000000e+00 : f32
    %171 = vector.broadcast %cst_167 : f32 to vector<8x256xf32>
    %172 = arith.maximumf %170, %171 : vector<8x256xf32>
    %c0_168 = arith.constant 0 : index
    %c0_169 = arith.constant 0 : index
    %c0_170 = arith.constant 0 : index
    %173 = vector.load %arg11[%c0_168, %c0_169, %c0_170] : memref<1x8x256xf32, #tpu.memory_space<vmem>>, vector<1x8x256xf32>
    %174 = vector.shape_cast %173 : vector<1x8x256xf32> to vector<8x256xf32>
    %175 = vector.shape_cast %172 : vector<8x256xf32> to vector<1x8x256xf32>
    tpu.vector_store %arg11[%c0_168, %c0_169, %c0_170], %175 {strides = array<i32>} : memref<1x8x256xf32, #tpu.memory_space<vmem>>, vector<1x8x256xf32>,
    return
  }
  func.func @transform_0(%arg0: i32) -> (i32, i32, i32) {
    %c0_i32 = arith.constant 0 : i32
    %c0_i32_0 = arith.constant 0 : i32
    %c0_i32_1 = arith.constant 0 : i32
    return %arg0, %c0_i32, %c0_i32_0 : i32, i32, i32
  }
  func.func @transform_1(%arg0: i32) -> (i32, i32, i32, i32) {
    %c0_i32 = arith.constant 0 : i32
    %c0_i32_0 = arith.constant 0 : i32
    %c0_i32_1 = arith.constant 0 : i32
    %c0_i32_2 = arith.constant 0 : i32
    return %arg0, %c0_i32, %c0_i32_0, %c0_i32_1 : i32, i32, i32, i32
  }
  func.func @transform_2(%arg0: i32) -> (i32, i32) {
    %c0_i32 = arith.constant 0 : i32
    %c0_i32_0 = arith.constant 0 : i32
    %c0_i32_1 = arith.constant 0 : i32
    return %c0_i32, %c0_i32_0 : i32, i32
  }
  func.func @transform_3(%arg0: i32) -> (i32, i32) {
    %c0_i32 = arith.constant 0 : i32
    %c0_i32_0 = arith.constant 0 : i32
    %c0_i32_1 = arith.constant 0 : i32
    return %c0_i32, %c0_i32_0 : i32, i32
  }
  func.func @transform_4(%arg0: i32) -> (i32, i32) {
    %c0_i32 = arith.constant 0 : i32
    %c0_i32_0 = arith.constant 0 : i32
    %c0_i32_1 = arith.constant 0 : i32
    return %c0_i32, %c0_i32_0 : i32, i32
  }
  func.func @transform_5(%arg0: i32) -> (i32, i32) {
    %c0_i32 = arith.constant 0 : i32
    %c0_i32_0 = arith.constant 0 : i32
    %c0_i32_1 = arith.constant 0 : i32
    return %c0_i32, %c0_i32_0 : i32, i32
  }
  func.func @transform_6(%arg0: i32) -> (i32, i32) {
    %c0_i32 = arith.constant 0 : i32
    %c0_i32_0 = arith.constant 0 : i32
    %c0_i32_1 = arith.constant 0 : i32
    return %c0_i32, %c0_i32_0 : i32, i32
  }
  func.func @transform_7(%arg0: i32) -> (i32, i32) {
    %c0_i32 = arith.constant 0 : i32
    %c0_i32_0 = arith.constant 0 : i32
    %c0_i32_1 = arith.constant 0 : i32
    return %c0_i32, %c0_i32_0 : i32, i32
  }
  func.func @transform_8(%arg0: i32) -> (i32, i32) {
    %c0_i32 = arith.constant 0 : i32
    %c0_i32_0 = arith.constant 0 : i32
    %c0_i32_1 = arith.constant 0 : i32
    return %c0_i32, %c0_i32_0 : i32, i32
  }
  func.func @transform_9(%arg0: i32) -> (i32, i32) {
    %c0_i32 = arith.constant 0 : i32
    %c0_i32_0 = arith.constant 0 : i32
    %c0_i32_1 = arith.constant 0 : i32
    return %c0_i32, %c0_i32_0 : i32, i32
  }
  func.func @transform_10(%arg0: i32) -> (i32, i32, i32) {
    %c0_i32 = arith.constant 0 : i32
    %c0_i32_0 = arith.constant 0 : i32
    %c0_i32_1 = arith.constant 0 : i32
    return %arg0, %c0_i32, %c0_i32_0 : i32, i32, i32
  }
}

</mosaic_0001>

<bundles_post_ra>
// kernel: tpu_custom_call.1
= control target key start
LH: loop header
LB: loop body
LE: loop exit
PB: predicated region body
PF: predicated region fallthrough
CT: control target
= control target key end

     0   :  { %15 = vsyncpa [#allocation5], 0  ;;  %s15334_s0 = inlined_call_operand.vmem [shape: bf16[2,32,8], index: 0, kind: input, shape index: {}]   ;;  %s15335_s1 = inlined_call_operand.vmem [shape: bf16[2,4,16,16], index: 1, kind: input, shape index: {}]   ;;  %s15336_s2 = inlined_call_operand.vmem [shape: bf16[16,8], index: 2, kind: input, shape index: {}]   ;;  %s15337_s3 = inlined_call_operand.vmem [shape: bf16[8,16], index: 3, kind: input, shape index: {}]   ;;  %s15338_s4 = inlined_call_operand.vmem [shape: bf16[8,72], index: 4, kind: input, shape index: {}]   ;;  %s15339_s5 = inlined_call_operand.vmem [shape: bf16[8,72], index: 5, kind: input, shape index: {}]   ;;  %s15340_s6 = inlined_call_operand.vmem [shape: f32[8,1], index: 6, kind: input, shape index: {}]   ;;  %s15341_s7 = inlined_call_operand.vmem [shape: f32[8,1], index: 7, kind: input, shape index: {}]   ;;  %s15342_s8 = inlined_call_operand.vmem [shape: f32[8,1], index: 8, kind: input, shape index: {}]   ;;  %s15343_s9 = inlined_call_operand.vmem [shape: f32[8,1], index: 9, kind: input, shape index: {}]   ;;  %s15344_s10 = inlined_call_operand.hbm [shape: f32[2,8,256], index: 10, kind: output, shape index: {}]  }
   0x1   :  { %17 = vsyncpa [#allocation5 + $0x1], 0  ;;  %s9768_s13 = smov 0   ;;  %s9770_s14 = smov 0  }
   0x2   :  { %s9772_s15 = smov 0   ;;  %s9774_s16 = smov 0  }
   0x3 LB: > { %s9789_s17 = sadd.s32 4294967295, %s9687_s16   ;;  %s8765_s18 = sadd.s32 4294967294, %s9687_s16   ;;  %s9687_s16 = sphi %s9774_s16, %s16459_s16   ;;  %s9683_s15 = sphi %s9772_s15, %s16458_s15   ;;  %s9679_s14 = sphi %s9770_s14, %s16457_s14   ;;  %s9675_s13 = sphi %s9768_s13, %s16456_s13  }
   0x4   : > { %s9793_s19 = sadd.s32 1, %s9687_s16   ;;  %s250_s20 = sadd.s32 1, %s9683_s15 }
   0x5   : > { %s247_s21 = ssub.s32 %s9687_s16, %s9793_s19  ;;  %p260_p0 = scmp.ne.s32.totalorder %s9683_s15, %s9679_s14 }
   0x6   : > { %p248_p1 = scmp.eq.s32.totalorder %s247_s21, 0  ;;  %p261_p2 = scmp.eq.s32.totalorder %s9789_s17, 1 }
   0x7   : > { %p266_p3 = scmp.ne.s32.totalorder %s9679_s14, %s9675_s13  ;;  %p267_p4 = scmp.eq.s32.totalorder %s8765_s18, 1 }
   0x8   : > { %s9804_s22 = scalar_select %p248_p1, %s9683_s15, %s250_s20  }
   0x9   : > { %p9806_p5 = por %p261_p2, %p260_p0  ;;  %p9810_p6 = por %p267_p4, %p266_p3 }
   0xa   : > { %p8768_p7 = scmp.ge.s32.totalorder %s9687_s16, 1  ;;  %p325_p8 = scmp.lt.s32.totalorder %s9687_s16, 3 }
   0xc   : > { %p326_p9 = pnand %p8768_p7, %p325_p8 }
   0xe   : > { %329 = sbr.rel (%p326_p9) target bundleno = 2277 (0x8e5), region = 60 }
  0x15   : > { %v573_v0 = vld [vmem:[%s15337_s3] sm:$0xf]  ;;  %vm591_vm0 = vcmask 1043456   ;;  %p368_p10 = scmp.lt.s32.totalorder %s9789_s17, 1  ;;  %v9689_v2 = vmov 0   ;;  %vm584_vm1 = vcmask 64512   ;;  %v931_v36 = vlaneseq }
  0x16   : > { %8858 = vmatprep.subr.msk.bf16.mxu0 %vm591_vm0, %v573_v0  ;;  %v593_v1 = vsel %vm591_vm0, %v573_v0, 0  ;;  %8921 = vset.pattern.permute.xlu1 %v9689_v2  ;;  %v4441_v3 = vld [vmem:[%s15340_s6] sm:$0xff]  ;;  %s9690_s27 = smov 1   ;;  %v9691_v22 = vmov 0.0   ;;  %vm9692_vm2 = vmmov 0   ;;  %vm379_vm3 = vcmask 139264  }
  0x17   : > { %8829 = vmatpush3.bf16.msra.mxu0 %v593_v1  ;;  %s369_s29 = scalar_select %p368_p10, %s9789_s17, 1  ;;  %4444 = vperm.xlu1 %8921, %v4441_v3   ;;  %v4449_v23 = vld [vmem:[%s15341_s7] sm:$0xff]  ;;  %vm396_vm4 = vcmask 7168   ;;  %vm399_vm5 = vcmask 1024   ;;  %vm422_vm6 = vcmask 146568   ;;  %vm425_vm7 = vcmask 140424  }
  0x18   : > { %8932 = vset.pattern.permute.xlu0 %v9689_v2  ;;  %8834 = vmatprep.subr.bf16.mxu1 %v9691_v22  ;;  %380 = vst.msk [vmem:[#allocation2] sm:$0x1] %vm379_vm3, %v9691_v22  ;;  %388 = vst.msk [vmem:[#allocation2 + $0x11] sm:$0x1] %vm379_vm3, %v9691_v22  ;;  %vm560_vm8 = vcmask 138248   ;;  %v10121_v43 = vshrl.u32 %v931_v36, 7 }
  0x19   : > { %s8795_s30 = sshll.u32 %s369_s29, 4  ;;  %s8796_s11 = sshll.u32 %s369_s29, 5  ;;  %8840 = vmatprep.subr.bf16.mxu0 %v9691_v22  ;;  %8836 = vmatprep.mubr.msk.bf16.mxu1 %vm9692_vm2, %v9691_v22  ;;  %398 = vst.msk [vmem:[#allocation2 + $0x8] sm:$0xff] %vm396_vm4, %v9691_v22  ;;  %402 = vst.msk [vmem:[#allocation2 + $0x20] sm:$0xff] %vm396_vm4, %v9691_v22  ;;  %v9693_v34 = vmov 1983009808  }
  0x1a   : > { %s372_s20 = scalar_lea.vmem %s15334_s0, %s8795_s30  ;;  %s377_s26 = scalar_lea.vmem %s15335_s1, %s8796_s11  ;;  %381 = vst.msk [vmem:[#allocation2 + $0x18] sm:$0x1] %vm379_vm3, %v9691_v22  ;;  %382 = vst.msk [vmem:[#allocation2 + $0x30] sm:$0x1] %vm379_vm3, %v9691_v22  ;;  %v929_v35 = vunpack.c.l.s4 %v9693_v34  ;;  %vm1254_vm9 = vcmask 130048   ;;  %vm1256_vm10 = vcmask 261120  }
  0x1b   : > { %v9573_v4 = vld [vmem:[%s372_s20] sm:$0xff]   ;;  %v9574_v5 = vld [vmem:[%s372_s20 + $0x8] sm:$0xff]   ;;  %v8815_v8 = vld [vmem:[%s377_s26 + $0x10] sm:$0xff]   ;;  %383 = vst.msk [vmem:[#allocation2 + $0x48] sm:$0x1] %vm379_vm3, %v9691_v22  ;;  %s9694_s30 = smov 127  }
  0x1c   : > { %8830 = vmatprep.mubr.msk.bf16.mxu0 %vm584_vm1, %v9573_v4  ;;  %v8799_v6 = vld [vmem:[%s377_s26] sm:$0xff]   ;;  %v8814_v7 = vld [vmem:[%s377_s26 + $0x8] sm:$0xff]   ;;  %v8816_v13 = vld [vmem:[%s377_s26 + $0x18] sm:$0xff]   ;;  %v8808_v14 = vunpack.c.l.bf16 %v8815_v8  ;;  %v8809_v15 = vunpack.c.h.bf16 %v8815_v8  ;;  %384 = vst.msk [vmem:[#allocation2 + $0x60] sm:$0x1] %vm379_vm3, %v9691_v22  ;;  %v930_v42 = vunpack.c.0.s8 %v929_v35  ;;  %s9695_s11 = smov 126  }
  0x1d   : > { %8831 = vmatmul.mubr.msk.bf16.vlgmr.msra.gmra.mrb[0].mxu0 %vm584_vm1, %v9574_v5  ;;  %v8800_v9 = vunpack.c.l.bf16 %v8799_v6  ;;  %v8801_v10 = vunpack.c.h.bf16 %v8799_v6  ;;  %v8804_v11 = vunpack.c.l.bf16 %v8814_v7  ;;  %v8805_v12 = vunpack.c.h.bf16 %v8814_v7  ;;  %385 = vst.msk [vmem:[#allocation2 + $0x78] sm:$0x1] %vm379_vm3, %v9691_v22  ;;  %386 = vst.msk [vmem:[#allocation2 + $0x90] sm:$0x1] %vm379_vm3, %v9691_v22  ;;  %s15532_s12 = smov 32   ;;  %s9698_s18 = smov 16  }
  0x1e   : > { %v8812_v16 = vunpack.c.l.bf16 %v8816_v13  ;;  %v8813_v17 = vunpack.c.h.bf16 %v8816_v13  ;;  %v8933_v19 = vpack.i.bf16 %v8809_v15, %v8808_v14  ;;  %8842 = vmatprep.mubr.msk.bf16.mxu0 %vm9692_vm2, %v9691_v22  ;;  %387 = vst.msk [vmem:[#allocation2 + $0xa8] sm:$0x1] %vm379_vm3, %v9691_v22  ;;  %389 = vst.msk [vmem:[#allocation2 + $0x29] sm:$0x1] %vm379_vm3, %v9691_v22  ;;  %v10134_v46 = vsub.s32 %v930_v42, %v10121_v43  ;;  %s15528_s20 = smov 64   ;;  %s15536_s21 = smov 48  }
  0x1f   : > { %v8922_v18 = vpack.i.bf16 %v8801_v10, %v8800_v9  ;;  %v8927_v20 = vpack.i.bf16 %v8805_v12, %v8804_v11  ;;  %390 = vst.msk [vmem:[#allocation2 + $0x41] sm:$0x1] %vm379_vm3, %v9691_v22  ;;  %391 = vst.msk [vmem:[#allocation2 + $0x59] sm:$0x1] %vm379_vm3, %v9691_v22  ;;  %s15526_s25 = smov 96   ;;  %s15534_s26 = smov 80  }
  0x20   : > { %8934 = vrot.lane.b32.xlu1 %v8933_v19, %s9690_s27  ;;  %v8938_v21 = vpack.i.bf16 %v8813_v17, %v8812_v16  ;;  %392 = vst.msk [vmem:[#allocation2 + $0x71] sm:$0x1] %vm379_vm3, %v9691_v22  ;;  %393 = vst.msk [vmem:[#allocation2 + $0x89] sm:$0x1] %vm379_vm3, %v9691_v22  ;;  %s15530_s28 = smov 112   ;;  %vm1258_vm11 = vcmask 392192  }
  0x21   : > { %8923 = vrot.lane.b32.xlu0 %v8922_v18, %s9690_s27  ;;  %394 = vst.msk [vmem:[#allocation2 + $0xa1] sm:$0x1] %vm379_vm3, %v9691_v22  ;;  %395 = vst.msk [vmem:[#allocation2 + $0xb9] sm:$0x1] %vm379_vm3, %v9691_v22  ;;  %vm1260_vm12 = vcmask 523264   ;;  %vm1262_vm13 = vcmask 654336  }
  0x22   : > { %405 = vst.msk [vmem:[#allocation2 + $0x38] sm:$0xff] %vm396_vm4, %v9691_v22  ;;  %408 = vst.msk [vmem:[#allocation2 + $0x50] sm:$0xff] %vm396_vm4, %v9691_v22  ;;  %vm1264_vm14 = vcmask 785408   ;;  %vm1266_vm15 = vcmask 916480   ;;  %s9706_s29 = smov 97  }
  0x23   : > { %411 = vst.msk [vmem:[#allocation2 + $0x68] sm:$0xff] %vm396_vm4, %v9691_v22  ;;  %414 = vst.msk [vmem:[#allocation2 + $0x80] sm:$0xff] %vm396_vm4, %v9691_v22 }
  0x24   : > { %8939 = vrot.lane.b32.xlu1 %v8938_v21, %s9690_s27  ;;  %417 = vst.msk [vmem:[#allocation2 + $0x98] sm:$0xff] %vm396_vm4, %v9691_v22  ;;  %420 = vst.msk [vmem:[#allocation2 + $0xb0] sm:$0xff] %vm396_vm4, %v9691_v22 }
  0x25   : > { %8928 = vrot.lane.b32.xlu0 %v8927_v20, %s9690_s27  ;;  %448 = vst.msk [vmem:[#allocation3] sm:$0x1] %vm379_vm3, %v9691_v22  ;;  %449 = vst.msk [vmem:[#allocation3 + $0x18] sm:$0x1] %vm379_vm3, %v9691_v22 }
  0x26   : > { %450 = vst.msk [vmem:[#allocation3 + $0x30] sm:$0x1] %vm379_vm3, %v9691_v22  ;;  %451 = vst.msk [vmem:[#allocation3 + $0x48] sm:$0x1] %vm379_vm3, %v9691_v22 }
  0x27   : > { %452 = vst.msk [vmem:[#allocation3 + $0x60] sm:$0x1] %vm379_vm3, %v9691_v22  ;;  %453 = vst.msk [vmem:[#allocation3 + $0x78] sm:$0x1] %vm379_vm3, %v9691_v22 }
  0x28   : > { %454 = vst.msk [vmem:[#allocation3 + $0x90] sm:$0x1] %vm379_vm3, %v9691_v22  ;;  %455 = vst.msk [vmem:[#allocation3 + $0xa8] sm:$0x1] %vm379_vm3, %v9691_v22 }
  0x29   : > { %4452 = vperm.xlu0 %8932, %v4449_v23   ;;  %456 = vst.msk [vmem:[#allocation3 + $0x11] sm:$0x1] %vm379_vm3, %v9691_v22  ;;  %457 = vst.msk [vmem:[#allocation3 + $0x29] sm:$0x1] %vm379_vm3, %v9691_v22 }
  0x2a   : > { %458 = vst.msk [vmem:[#allocation3 + $0x41] sm:$0x1] %vm379_vm3, %v9691_v22  ;;  %459 = vst.msk [vmem:[#allocation3 + $0x59] sm:$0x1] %vm379_vm3, %v9691_v22 }
  0x2b   : > { %460 = vst.msk [vmem:[#allocation3 + $0x71] sm:$0x1] %vm379_vm3, %v9691_v22  ;;  %461 = vst.msk [vmem:[#allocation3 + $0x89] sm:$0x1] %vm379_vm3, %v9691_v22 }
  0x2c   : > { %462 = vst.msk [vmem:[#allocation3 + $0xa1] sm:$0x1] %vm379_vm3, %v9691_v22  ;;  %463 = vst.msk [vmem:[#allocation3 + $0xb9] sm:$0x1] %vm379_vm3, %v9691_v22 }
  0x2d   : > { %465 = vst.msk [vmem:[#allocation3 + $0x8] sm:$0xff] %vm396_vm4, %v9691_v22  ;;  %468 = vst.msk [vmem:[#allocation3 + $0x20] sm:$0xff] %vm396_vm4, %v9691_v22 }
  0x2e   : > { %471 = vst.msk [vmem:[#allocation3 + $0x38] sm:$0xff] %vm396_vm4, %v9691_v22  ;;  %474 = vst.msk [vmem:[#allocation3 + $0x50] sm:$0xff] %vm396_vm4, %v9691_v22 }
  0x2f   : > { %477 = vst.msk [vmem:[#allocation3 + $0x68] sm:$0xff] %vm396_vm4, %v9691_v22  ;;  %480 = vst.msk [vmem:[#allocation3 + $0x80] sm:$0xff] %vm396_vm4, %v9691_v22 }
  0x30   : > { %483 = vst.msk [vmem:[#allocation3 + $0x98] sm:$0xff] %vm396_vm4, %v9691_v22  ;;  %486 = vst.msk [vmem:[#allocation3 + $0xb0] sm:$0xff] %vm396_vm4, %v9691_v22 }
  0x31   : > { %397 = vst.msk [vmem:[#allocation2] sm:$0xff] %vm396_vm4, %v9691_v22  ;;  %401 = vst.msk [vmem:[#allocation2 + $0x18] sm:$0xff] %vm396_vm4, %v9691_v22 }
  0x32   : > { %400 = vst.msk [vmem:[#allocation2 + $0x10] sm:$0x3] %vm399_vm5, %v9691_v22  ;;  %403 = vst.msk [vmem:[#allocation2 + $0x28] sm:$0x3] %vm399_vm5, %v9691_v22 }
  0x33   : > { %424 = vst.msk [vmem:[#allocation2 + $0x8] sm:$0xff] %vm422_vm6, %v9691_v22  ;;  %428 = vst.msk [vmem:[#allocation2 + $0x20] sm:$0xff] %vm422_vm6, %v9691_v22 }
  0x34   : > { %404 = vst.msk [vmem:[#allocation2 + $0x30] sm:$0xff] %vm396_vm4, %v9691_v22  ;;  %407 = vst.msk [vmem:[#allocation2 + $0x48] sm:$0xff] %vm396_vm4, %v9691_v22 }
  0x35   : > { %406 = vst.msk [vmem:[#allocation2 + $0x40] sm:$0x3] %vm399_vm5, %v9691_v22  ;;  %409 = vst.msk [vmem:[#allocation2 + $0x58] sm:$0x3] %vm399_vm5, %v9691_v22 }
  0x36   : > { %410 = vst.msk [vmem:[#allocation2 + $0x60] sm:$0xff] %vm396_vm4, %v9691_v22  ;;  %413 = vst.msk [vmem:[#allocation2 + $0x78] sm:$0xff] %vm396_vm4, %v9691_v22 }
  0x37   : > { %412 = vst.msk [vmem:[#allocation2 + $0x70] sm:$0x3] %vm399_vm5, %v9691_v22  ;;  %415 = vst.msk [vmem:[#allocation2 + $0x88] sm:$0x3] %vm399_vm5, %v9691_v22 }
  0x38   : > { %416 = vst.msk [vmem:[#allocation2 + $0x90] sm:$0xff] %vm396_vm4, %v9691_v22  ;;  %419 = vst.msk [vmem:[#allocation2 + $0xa8] sm:$0xff] %vm396_vm4, %v9691_v22 }
  0x39   : > { %418 = vst.msk [vmem:[#allocation2 + $0xa0] sm:$0x3] %vm399_vm5, %v9691_v22  ;;  %421 = vst.msk [vmem:[#allocation2 + $0xb8] sm:$0x3] %vm399_vm5, %v9691_v22 }
  0x3a   : > { %431 = vst.msk [vmem:[#allocation2 + $0x38] sm:$0xff] %vm422_vm6, %v9691_v22  ;;  %434 = vst.msk [vmem:[#allocation2 + $0x50] sm:$0xff] %vm422_vm6, %v9691_v22 }
  0x3b   : > { %437 = vst.msk [vmem:[#allocation2 + $0x68] sm:$0xff] %vm422_vm6, %v9691_v22  ;;  %440 = vst.msk [vmem:[#allocation2 + $0x80] sm:$0xff] %vm422_vm6, %v9691_v22 }
  0x3c   : > { %443 = vst.msk [vmem:[#allocation2 + $0x98] sm:$0xff] %vm422_vm6, %v9691_v22  ;;  %446 = vst.msk [vmem:[#allocation2 + $0xb0] sm:$0xff] %vm422_vm6, %v9691_v22 }
  0x3d   : > { %464 = vst.msk [vmem:[#allocation3] sm:$0xff] %vm396_vm4, %v9691_v22  ;;  %467 = vst.msk [vmem:[#allocation3 + $0x18] sm:$0xff] %vm396_vm4, %v9691_v22 }
  0x3e   : > { %466 = vst.msk [vmem:[#allocation3 + $0x10] sm:$0x3] %vm399_vm5, %v9691_v22  ;;  %469 = vst.msk [vmem:[#allocation3 + $0x28] sm:$0x3] %vm399_vm5, %v9691_v22 }
  0x3f   : > { %470 = vst.msk [vmem:[#allocation3 + $0x30] sm:$0xff] %vm396_vm4, %v9691_v22  ;;  %473 = vst.msk [vmem:[#allocation3 + $0x48] sm:$0xff] %vm396_vm4, %v9691_v22 }
  0x40   : > { %472 = vst.msk [vmem:[#allocation3 + $0x40] sm:$0x3] %vm399_vm5, %v9691_v22  ;;  %475 = vst.msk [vmem:[#allocation3 + $0x58] sm:$0x3] %vm399_vm5, %v9691_v22 }
  0x41   : > { %476 = vst.msk [vmem:[#allocation3 + $0x60] sm:$0xff] %vm396_vm4, %v9691_v22  ;;  %479 = vst.msk [vmem:[#allocation3 + $0x78] sm:$0xff] %vm396_vm4, %v9691_v22 }
  0x42   : > { %478 = vst.msk [vmem:[#allocation3 + $0x70] sm:$0x3] %vm399_vm5, %v9691_v22  ;;  %481 = vst.msk [vmem:[#allocation3 + $0x88] sm:$0x3] %vm399_vm5, %v9691_v22 }
  0x43   : > { %482 = vst.msk [vmem:[#allocation3 + $0x90] sm:$0xff] %vm396_vm4, %v9691_v22  ;;  %485 = vst.msk [vmem:[#allocation3 + $0xa8] sm:$0xff] %vm396_vm4, %v9691_v22 }
  0x44   : > { %484 = vst.msk [vmem:[#allocation3 + $0xa0] sm:$0x3] %vm399_vm5, %v9691_v22  ;;  %487 = vst.msk [vmem:[#allocation3 + $0xb8] sm:$0x3] %vm399_vm5, %v9691_v22 }
  0x45   : > { %489 = vst.msk [vmem:[#allocation3 + $0x8] sm:$0xff] %vm422_vm6, %v9691_v22  ;;  %492 = vst.msk [vmem:[#allocation3 + $0x20] sm:$0xff] %vm422_vm6, %v9691_v22 }
  0x46   : > { %495 = vst.msk [vmem:[#allocation3 + $0x38] sm:$0xff] %vm422_vm6, %v9691_v22  ;;  %498 = vst.msk [vmem:[#allocation3 + $0x50] sm:$0xff] %vm422_vm6, %v9691_v22 }
  0x47   : > { %501 = vst.msk [vmem:[#allocation3 + $0x68] sm:$0xff] %vm422_vm6, %v9691_v22  ;;  %504 = vst.msk [vmem:[#allocation3 + $0x80] sm:$0xff] %vm422_vm6, %v9691_v22 }
  0x48   : > { %507 = vst.msk [vmem:[#allocation3 + $0x98] sm:$0xff] %vm422_vm6, %v9691_v22  ;;  %510 = vst.msk [vmem:[#allocation3 + $0xb0] sm:$0xff] %vm422_vm6, %v9691_v22 }
  0x49   : > { %423 = vst.msk [vmem:[#allocation2] sm:$0xff] %vm422_vm6, %v9691_v22  ;;  %427 = vst.msk [vmem:[#allocation2 + $0x18] sm:$0xff] %vm422_vm6, %v9691_v22 }
  0x4a   : > { %426 = vst.msk [vmem:[#allocation2 + $0x10] sm:$0x3] %vm425_vm7, %v9691_v22  ;;  %429 = vst.msk [vmem:[#allocation2 + $0x28] sm:$0x3] %vm425_vm7, %v9691_v22 }
  0x4b   : > { %430 = vst.msk [vmem:[#allocation2 + $0x30] sm:$0xff] %vm422_vm6, %v9691_v22  ;;  %433 = vst.msk [vmem:[#allocation2 + $0x48] sm:$0xff] %vm422_vm6, %v9691_v22 }
  0x4c   : > { %432 = vst.msk [vmem:[#allocation2 + $0x40] sm:$0x3] %vm425_vm7, %v9691_v22  ;;  %435 = vst.msk [vmem:[#allocation2 + $0x58] sm:$0x3] %vm425_vm7, %v9691_v22 }
  0x4d   : > { %436 = vst.msk [vmem:[#allocation2 + $0x60] sm:$0xff] %vm422_vm6, %v9691_v22  ;;  %439 = vst.msk [vmem:[#allocation2 + $0x78] sm:$0xff] %vm422_vm6, %v9691_v22 }
  0x4e   : > { %438 = vst.msk [vmem:[#allocation2 + $0x70] sm:$0x3] %vm425_vm7, %v9691_v22  ;;  %441 = vst.msk [vmem:[#allocation2 + $0x88] sm:$0x3] %vm425_vm7, %v9691_v22 }
  0x4f   : > { %442 = vst.msk [vmem:[#allocation2 + $0x90] sm:$0xff] %vm422_vm6, %v9691_v22  ;;  %445 = vst.msk [vmem:[#allocation2 + $0xa8] sm:$0xff] %vm422_vm6, %v9691_v22 }
  0x50   : > { %444 = vst.msk [vmem:[#allocation2 + $0xa0] sm:$0x3] %vm425_vm7, %v9691_v22  ;;  %447 = vst.msk [vmem:[#allocation2 + $0xb8] sm:$0x3] %vm425_vm7, %v9691_v22 }
  0x51   : > { %488 = vst.msk [vmem:[#allocation3] sm:$0xff] %vm422_vm6, %v9691_v22  ;;  %491 = vst.msk [vmem:[#allocation3 + $0x18] sm:$0xff] %vm422_vm6, %v9691_v22 }
  0x52   : > { %490 = vst.msk [vmem:[#allocation3 + $0x10] sm:$0x3] %vm425_vm7, %v9691_v22  ;;  %493 = vst.msk [vmem:[#allocation3 + $0x28] sm:$0x3] %vm425_vm7, %v9691_v22 }
  0x53   : > { %494 = vst.msk [vmem:[#allocation3 + $0x30] sm:$0xff] %vm422_vm6, %v9691_v22  ;;  %497 = vst.msk [vmem:[#allocation3 + $0x48] sm:$0xff] %vm422_vm6, %v9691_v22 }
  0x54   : > { %496 = vst.msk [vmem:[#allocation3 + $0x40] sm:$0x3] %vm425_vm7, %v9691_v22  ;;  %499 = vst.msk [vmem:[#allocation3 + $0x58] sm:$0x3] %vm425_vm7, %v9691_v22 }
  0x55   : > { %500 = vst.msk [vmem:[#allocation3 + $0x60] sm:$0xff] %vm422_vm6, %v9691_v22  ;;  %503 = vst.msk [vmem:[#allocation3 + $0x78] sm:$0xff] %vm422_vm6, %v9691_v22 }
  0x56   : > { %502 = vst.msk [vmem:[#allocation3 + $0x70] sm:$0x3] %vm425_vm7, %v9691_v22  ;;  %505 = vst.msk [vmem:[#allocation3 + $0x88] sm:$0x3] %vm425_vm7, %v9691_v22 }
  0x57   : > { %506 = vst.msk [vmem:[#allocation3 + $0x90] sm:$0xff] %vm422_vm6, %v9691_v22  ;;  %509 = vst.msk [vmem:[#allocation3 + $0xa8] sm:$0xff] %vm422_vm6, %v9691_v22 }
  0x58   : > { %508 = vst.msk [vmem:[#allocation3 + $0xa0] sm:$0x3] %vm425_vm7, %v9691_v22  ;;  %511 = vst.msk [vmem:[#allocation3 + $0xb8] sm:$0x3] %vm425_vm7, %v9691_v22 }
  0x59   : > { %15712 = vst [vmem:[#allocation8_spill] sm:$0xff] %v10121_v43  ;;  %15713 = vst [vmem:[#allocation9_spill] sm:$0xff] %v10134_v46 }
  0x93   : > { %v8924_v24 = vpop.permute.xlu0 %8923 }
  0x94   : > { %v8926_v25 = vunpack.i.h.bf16 %v8924_v24  ;;  %v8925_v26 = vunpack.i.l.bf16 %v8924_v24 }
  0x96   : > { %v10105_v27 = vpop.permute.xlu1 %4444  ;;  %562 = vst.msk [vmem:[#allocation2 + $0x9] sm:$0xff] %vm560_vm8, %v8926_v25  ;;  %561 = vst.msk [vmem:[#allocation2 + $0x1] sm:$0xff] %vm560_vm8, %v8925_v26 }
  0x97   : > { %15711 = vst [vmem:[#allocation7_spill] sm:$0xff] %v10105_v27  ;;  %v8929_v28 = vpop.permute.xlu0 %8928 }
  0x98   : > { %v8931_v29 = vunpack.i.h.bf16 %v8929_v28  ;;  %v8930_v30 = vunpack.i.l.bf16 %v8929_v28 }
  0x9a   : > { %v8935_v31 = vpop.permute.xlu1 %8934  ;;  %564 = vst.msk [vmem:[#allocation2 + $0x21] sm:$0xff] %vm560_vm8, %v8931_v29  ;;  %563 = vst.msk [vmem:[#allocation2 + $0x19] sm:$0xff] %vm560_vm8, %v8930_v30 }
  0x9b   : > { %v8937_v32 = vunpack.i.h.bf16 %v8935_v31  ;;  %v8936_v33 = vunpack.i.l.bf16 %v8935_v31 }
  0x9d   : > { %566 = vst.msk [vmem:[#allocation2 + $0x39] sm:$0xff] %vm560_vm8, %v8937_v32  ;;  %565 = vst.msk [vmem:[#allocation2 + $0x31] sm:$0xff] %vm560_vm8, %v8936_v33  ;;  %v10113_v37 = vld [vmem:[#allocation2 + $0x8] sm:$0xff]  ;;  %v10115_v38 = vld [vmem:[#allocation2] sm:$0xff] }
  0x9e   : > { %v8940_v39 = vpop.permute.xlu1 %8939  ;;  %1293 = vrot.lane.b32.xlu0 %v10113_v37, %s9694_s30  ;;  %1291 = vrot.lane.b32.xlu1 %v10115_v38, %s9694_s30  ;;  %v10140_v49 = vld [vmem:[#allocation2 + $0x1] sm:$0xff]  ;;  %v10150_v54 = vld [vmem:[#allocation2 + $0x9] sm:$0xff] }
  0x9f   : > { %v8942_v40 = vunpack.i.h.bf16 %v8940_v39  ;;  %v8941_v41 = vunpack.i.l.bf16 %v8940_v39 }
  0xa1   : > { %568 = vst.msk [vmem:[#allocation2 + $0x51] sm:$0xff] %vm560_vm8, %v8942_v40  ;;  %567 = vst.msk [vmem:[#allocation2 + $0x49] sm:$0xff] %vm560_vm8, %v8941_v41  ;;  %v10125_v44 = vld [vmem:[#allocation2 + $0x20] sm:$0xff]  ;;  %v10127_v45 = vld [vmem:[#allocation2 + $0x18] sm:$0xff] }
  0xa2   : > { %1297 = vrot.lane.b32.xlu0 %v10125_v44, %s9694_s30  ;;  %1295 = vrot.lane.b32.xlu1 %v10127_v45, %s9694_s30  ;;  %v10184_v4 = vld [vmem:[#allocation2 + $0x19] sm:$0xff]  ;;  %v10203_v12 = vld [vmem:[#allocation2 + $0x21] sm:$0xff] }
  0xa4   : > { %v10136_v47 = vld [vmem:[#allocation2 + $0x38] sm:$0xff]  ;;  %v10138_v48 = vld [vmem:[#allocation2 + $0x30] sm:$0xff] }
  0xa5   : > { %v1062_v50 = vcombine.low %v10113_v37, %v10136_v47  ;;  %v1063_v51 = vcombine.high %v10113_v37, %v10136_v47  ;;  %v926_v52 = vcombine.low %v10115_v38, %v10138_v48  ;;  %v927_v53 = vcombine.high %v10115_v38, %v10138_v48  ;;  %v10152_v55 = vld [vmem:[#allocation2 + $0x31] sm:$0xff]  ;;  %v10154_v56 = vld [vmem:[#allocation2 + $0x39] sm:$0xff] }
  0xa6   : > { %v2087_v57 = vcombine.low %v10140_v49, %v10152_v55  ;;  %v2088_v58 = vcombine.high %v10140_v49, %v10152_v55  ;;  %v2223_v59 = vcombine.low %v10150_v54, %v10154_v56  ;;  %v2224_v60 = vcombine.high %v10150_v54, %v10154_v56  ;;  %1301 = vrot.lane.b32.xlu0 %v10136_v47, %s9694_s30 }
  0xa7   : > { %v10167_v61 = vrot.slane %v1062_v50, %v10134_v46  ;;  %v10170_v62 = vrot.slane %v1063_v51, %v10134_v46  ;;  %1299 = vrot.lane.b32.xlu1 %v10138_v48, %s9694_s30  ;;  %v10175_v63 = vrot.slane %v926_v52, %v10134_v46  ;;  %v10178_v0 = vrot.slane %v927_v53, %v10134_v46  ;;  %v3225_v52 = vld [vmem:[#allocation2 + $0x2] sm:$0xff]  ;;  %v10280_v53 = vld [vmem:[#allocation2 + $0x32] sm:$0xff] }
  0xa8   : > { %v10180_v1 = vld [vmem:[#allocation2 + $0x50] sm:$0xff]  ;;  %v10182_v3 = vld [vmem:[#allocation2 + $0x48] sm:$0xff]  ;;  %v10187_v5 = vrot.slane %v2087_v57, %v10134_v46  ;;  %v10190_v6 = vrot.slane %v2088_v58, %v10134_v46  ;;  %v10193_v7 = vrot.slane %v2223_v59, %v10134_v46  ;;  %v10210_v15 = vrot.slane %v2224_v60, %v10134_v46  ;;  %v3227_v60 = vld [vmem:[#allocation2 + $0x1a] sm:$0xff] }
  0xa9   : > { %v1078_v8 = vcombine.low %v10125_v44, %v10180_v1  ;;  %v1079_v9 = vcombine.high %v10125_v44, %v10180_v1  ;;  %v942_v10 = vcombine.low %v10127_v45, %v10182_v3  ;;  %v943_v11 = vcombine.high %v10127_v45, %v10182_v3  ;;  %v10205_v13 = vld [vmem:[#allocation2 + $0x49] sm:$0xff]  ;;  %v10207_v14 = vld [vmem:[#allocation2 + $0x51] sm:$0xff] }
  0xaa   : > { %v2103_v16 = vcombine.low %v10184_v4, %v10205_v13  ;;  %v2104_v17 = vcombine.high %v10184_v4, %v10205_v13  ;;  %v2239_v18 = vcombine.low %v10203_v12, %v10207_v14  ;;  %1305 = vrot.lane.b32.xlu0 %v10180_v1, %s9694_s30  ;;  %v2240_v26 = vcombine.high %v10203_v12, %v10207_v14 }
  0xab   : > { %v10219_v19 = vrot.slane %v1078_v8, %v10134_v46  ;;  %v10222_v20 = vrot.slane %v1079_v9, %v10134_v46  ;;  %v10227_v21 = vrot.slane %v942_v10, %v10134_v46  ;;  %v10230_v23 = vrot.slane %v943_v11, %v10134_v46  ;;  %1303 = vrot.lane.b32.xlu1 %v10182_v3, %s9694_s30  ;;  %v10290_v8 = vld [vmem:[#allocation2 + $0x4a] sm:$0xff] }
  0xac   : > { %v10235_v24 = vrot.slane %v2103_v16, %v10134_v46  ;;  %v10238_v25 = vrot.slane %v2104_v17, %v10134_v46  ;;  %v10243_v28 = vrot.slane %v2239_v18, %v10134_v46  ;;  %v10274_v50 = vrot.slane %v2240_v26, %v10134_v46 }
  0xad   : > { %v3241_v57 = vcombine.low %v3225_v52, %v10280_v53  ;;  %v3242_v58 = vcombine.high %v3225_v52, %v10280_v53  ;;  %v3257_v11 = vcombine.low %v3227_v60, %v10290_v8  ;;  %v3258_v16 = vcombine.high %v3227_v60, %v10290_v8 }
  0xae   : > { %1681 = vrot.lane.b32.xlu0 %v10115_v38, %s9695_s11 }
  0xaf   : > { %1683 = vrot.lane.b32.xlu1 %v10113_v37, %s9695_s11  ;;  %v10295_v9 = vrot.slane %v3241_v57, %v10134_v46  ;;  %v10298_v10 = vrot.slane %v3242_v58, %v10134_v46  ;;  %v10303_v17 = vrot.slane %v3257_v11, %v10134_v46  ;;  %v9575_v58 = vld [vmem:[%s15336_s2] sm:$0xff]  }
  0xb2   : > { %1685 = vrot.lane.b32.xlu0 %v10127_v45, %s9695_s11  ;;  %v10306_v45 = vrot.slane %v3258_v16, %v10134_v46 }
  0xb3   : > { %1687 = vrot.lane.b32.xlu1 %v10125_v44, %s9695_s11 }
  0xb6   : > { %1689 = vrot.lane.b32.xlu0 %v10138_v48, %s9695_s11  ;;  %v10361_v48 = vld [vmem:[#allocation2 + $0x22] sm:$0xff] }
  0xb7   : > { %1691 = vrot.lane.b32.xlu1 %v10136_v47, %s9695_s11  ;;  %v10356_v47 = vld [vmem:[#allocation2 + $0xa] sm:$0xff] }
  0xba   : > { %1693 = vrot.lane.b32.xlu0 %v10182_v3, %s9695_s11 }
  0xbb   : > { %1695 = vrot.lane.b32.xlu1 %v10180_v1, %s9695_s11 }
  0xbe   : > { %2445 = vrot.lane.b32.xlu0 %v10140_v49, %s9694_s30 }
  0xbf   : > { %2447 = vrot.lane.b32.xlu1 %v10150_v54, %s9694_s30 }
  0xc2   : > { %2449 = vrot.lane.b32.xlu0 %v10184_v4, %s9694_s30 }
  0xc3   : > { %2451 = vrot.lane.b32.xlu1 %v10203_v12, %s9694_s30 }
  0xc6   : > { %2453 = vrot.lane.b32.xlu0 %v10152_v55, %s9694_s30 }
  0xc7   : > { %2455 = vrot.lane.b32.xlu1 %v10154_v56, %s9694_s30 }
  0xca   : > { %2457 = vrot.lane.b32.xlu0 %v10205_v13, %s9694_s30 }
  0xcb   : > { %2459 = vrot.lane.b32.xlu1 %v10207_v14, %s9694_s30 }
  0xce   : > { %2837 = vrot.lane.b32.xlu0 %v10150_v54, %s9695_s11  ;;  %v10372_v54 = vld [vmem:[#allocation2 + $0x52] sm:$0xff] }
  0xcf   : > { %2835 = vrot.lane.b32.xlu1 %v10140_v49, %s9695_s11  ;;  %v10366_v49 = vld [vmem:[#allocation2 + $0x3a] sm:$0xff] }
  0xd2   : > { %2841 = vrot.lane.b32.xlu0 %v10203_v12, %s9695_s11 }
  0xd3   : > { %2839 = vrot.lane.b32.xlu1 %v10184_v4, %s9695_s11 }
  0xd6   : > { %2845 = vrot.lane.b32.xlu0 %v10154_v56, %s9695_s11 }
  0xd7   : > { %2843 = vrot.lane.b32.xlu1 %v10152_v55, %s9695_s11 }
  0xda   : > { %2849 = vrot.lane.b32.xlu0 %v10207_v14, %s9695_s11 }
  0xdb   : > { %2847 = vrot.lane.b32.xlu1 %v10205_v13, %s9695_s11 }
  0xde   : > { %3601 = vrot.lane.b32.xlu0 %v10356_v47, %s9694_s30 }
  0xdf   : > { %3599 = vrot.lane.b32.xlu1 %v3225_v52, %s9694_s30 }
  0xe2   : > { %3605 = vrot.lane.b32.xlu0 %v10361_v48, %s9694_s30 }
  0xe3   : > { %3603 = vrot.lane.b32.xlu1 %v3227_v60, %s9694_s30 }
  0xe6   : > { %3609 = vrot.lane.b32.xlu0 %v10366_v49, %s9694_s30 }
  0xe7   : > { %3607 = vrot.lane.b32.xlu1 %v10280_v53, %s9694_s30 }
  0xea   : > { %3613 = vrot.lane.b32.xlu0 %v10372_v54, %s9694_s30 }
  0xeb   : > { %3611 = vrot.lane.b32.xlu1 %v10290_v8, %s9694_s30 }
  0xee   : > { %3991 = vrot.lane.b32.xlu0 %v10356_v47, %s9695_s11 }
  0xef   : > { %3989 = vrot.lane.b32.xlu1 %v3225_v52, %s9695_s11 }
  0xf0   : > { %v8832_v55 = vpop.f32.mrb[0].mxu0 }
  0xf1   : > { %v629_v56 = vpop.f32.mrb[1].mxu0 }
  0xf2   : > { %v8833_v1 = vpop.f32.mrb[2].mxu0  ;;  %3995 = vrot.lane.b32.xlu0 %v10361_v48, %s9695_s11 }
  0xf3   : > { %v645_v3 = vpack.c.bf16 %v8833_v1, %v8832_v55  ;;  %v632_v4 = vpop.f32.mrb[3].mxu0  ;;  %3993 = vrot.lane.b32.xlu1 %v3227_v60, %s9695_s11  ;;  %v9576_v60 = vld [vmem:[%s15336_s2] sm:$0xff]  }
  0xf4   : > { %v644_v12 = vpack.c.bf16 %v632_v4, %v629_v56  ;;  %v9577_v55 = vld [vmem:[%s15336_s2] sm:$0xff]  }
  0xf5   : > { %v851_v52 = vrot.slane %v645_v3, 4  ;;  %v789_v16 = vsel %vm591_vm0, %v645_v3, 0  ;;  %v9578_v56 = vld [vmem:[%s15336_s2] sm:$0xff]  }
  0xf6   : > { %v719_v13 = vrot.slane %v644_v12, 4  ;;  %v657_v14 = vsel %vm591_vm0, %v644_v12, 0  ;;  %3999 = vrot.lane.b32.xlu0 %v10366_v49, %s9695_s11 }
  0xf7   : > { %8835 = vmatpush3.bf16.msra.mxu1 %v657_v14  ;;  %3997 = vrot.lane.b32.xlu1 %v10280_v53, %s9695_s11  ;;  %v856_v53 = vsel %vm591_vm0, %v851_v52, 0 }
  0xf8   : > { %v724_v11 = vsel %vm591_vm0, %v719_v13, 0  ;;  %8846 = vmatprep.subr.bf16.mxu1 %v9691_v22 }
  0xf9   : > { %8841 = vmatpush3.bf16.msra.mxu0 %v724_v11 }
  0xfa   : > { %8837 = vmatmul.mubr.msk.bf16.vlgmr.msra.gmra.mrb[0].mxu1 %vm584_vm1, %v9575_v58  ;;  %8852 = vmatprep.subr.bf16.mxu0 %v9691_v22 }
  0xfb   : > { %8847 = vmatpush3.bf16.msra.mxu1 %v789_v16  ;;  %8848 = vmatprep.mubr.msk.bf16.mxu1 %vm9692_vm2, %v9691_v22 }
  0xfc   : > { %8843 = vmatmul.mubr.msk.bf16.vlgmr.msra.gmra.mrb[4].mxu0 %vm584_vm1, %v9576_v60  ;;  %4003 = vrot.lane.b32.xlu0 %v10372_v54, %s9695_s11 }
  0xfd   : > { %8853 = vmatpush3.bf16.msra.mxu0 %v856_v53  ;;  %8854 = vmatprep.mubr.msk.bf16.mxu0 %vm9692_vm2, %v9691_v22  ;;  %v10420_v22 = vpop.permute.xlu0 %4452  ;;  %vm4565_vm2 = vcmask 131080  }
  0xfe   : > { %4001 = vrot.lane.b32.xlu1 %v10290_v8, %s9695_s11  ;;  %15714 = vst [vmem:[#allocation10_spill] sm:$0xff] %v10420_v22 }
 0x102   : > { %8849 = vmatmul.mubr.msk.bf16.vlgmr.msra.gmra.mrb[4].mxu1 %vm584_vm1, %v9577_v55 }
 0x103   : > { %4432 = vmatprep.mubr.bf16.mxu1 %v9689_v2 }
 0x104   : > { %8855 = vmatmul.mubr.msk.bf16.vlgmr.msra.gmra.mrb[8].mxu0 %vm584_vm1, %v9578_v56  ;;  %vm4390_vm1 = vcmask 588800  }
 0x105   : > { %8650 = vmatprep.mubr.bf16.mxu0 %v9689_v2 }
 0x110   : > { %v10422_v1 = vpop.permute.xlu0 %1293  ;;  %v10424_v3 = vpop.permute.xlu1 %1291 }
 0x111   : > { %15715 = vst [vmem:[#allocation11_spill] sm:$0xff] %v10422_v1  ;;  %15716 = vst [vmem:[#allocation12_spill] sm:$0xff] %v10424_v3 }
 0x114   : > { %v10426_v4 = vpop.permute.xlu0 %1297  ;;  %v10428_v8 = vpop.permute.xlu1 %1295 }
 0x115   : > { %15717 = vst [vmem:[#allocation13_spill] sm:$0xff] %v10426_v4  ;;  %15718 = vst [vmem:[#allocation14_spill] sm:$0xff] %v10428_v8 }
 0x118   : > { %v10430_v12 = vpop.permute.xlu0 %1301 }
 0x119   : > { %15719 = vst [vmem:[#allocation15_spill] sm:$0xff] %v10430_v12  ;;  %v10432_v13 = vpop.permute.xlu1 %1299 }
 0x11a   : > { %15720 = vst [vmem:[#allocation16_spill] sm:$0xff] %v10432_v13 }
 0x11c   : > { %v10434_v14 = vpop.permute.xlu0 %1305 }
 0x11d   : > { %15721 = vst [vmem:[#allocation17_spill] sm:$0xff] %v10434_v14  ;;  %v10436_v58 = vpop.permute.xlu1 %1303 }
 0x11e   : > { %15722 = vst [vmem:[#allocation18_spill] sm:$0xff] %v10436_v58 }
 0x120   : > { %v10438_v52 = vpop.permute.xlu0 %1681 }
 0x121   : > { %15723 = vst [vmem:[#allocation19_spill] sm:$0xff] %v10438_v52  ;;  %v10440_v2 = vpop.permute.xlu1 %1683 }
 0x122   : > { %15724 = vst [vmem:[#allocation20_spill] sm:$0xff] %v10440_v2 }
 0x124   : > { %v10442_v11 = vpop.permute.xlu0 %1685 }
 0x125   : > { %15725 = vst [vmem:[#allocation21_spill] sm:$0xff] %v10442_v11  ;;  %v10444_v16 = vpop.permute.xlu1 %1687 }
 0x126   : > { %15726 = vst [vmem:[#allocation22_spill] sm:$0xff] %v10444_v16 }
 0x128   : > { %v10450_v37 = vpop.permute.xlu0 %1689 }
 0x129   : > { %15727 = vst [vmem:[#allocation23_spill] sm:$0xff] %v10450_v37  ;;  %v10452_v59 = vpop.permute.xlu1 %1691 }
 0x12a   : > { %15728 = vst [vmem:[#allocation24_spill] sm:$0xff] %v10452_v59 }
 0x1cd   : > { %v693_v60 = vpop.f32.mrb[0].mxu1 }
 0x1ce   : > { %702 = vrot.lane.b32.xlu0 %v693_v60, %s9690_s27  ;;  %v8838_v53 = vpop.f32.mrb[1].mxu1 }
 0x1cf   : > { %v696_v55 = vpop.f32.mrb[2].mxu1  ;;  %v760_v56 = vpop.f32.mrb[4].mxu0 }
 0x1d0   : > { %704 = vrot.lane.b32.xlu1 %v696_v55, %s9690_s27  ;;  %v8839_v57 = vpop.f32.mrb[3].mxu1  ;;  %v8844_v26 = vpop.f32.mrb[5].mxu0 }
 0x1d1   : > { %v763_v44 = vpop.f32.mrb[6].mxu0 }
 0x1d2   : > { %769 = vrot.lane.b32.xlu0 %v760_v56, %s9690_s27  ;;  %v8845_v18 = vpop.f32.mrb[7].mxu0  ;;  %v10457_v56 = vpop.permute.xlu0 %1693 }
 0x1d3   : > { %15729 = vst [vmem:[#allocation25_spill] sm:$0xff] %v10457_v56 }
 0x1d4   : > { %771 = vrot.lane.b32.xlu1 %v763_v44, %s9690_s27  ;;  %v10460_v44 = vpop.permute.xlu1 %1695 }
 0x1d5   : > { %v825_v42 = vpop.f32.mrb[4].mxu1  ;;  %15730 = vst [vmem:[#allocation26_spill] sm:$0xff] %v10460_v44 }
 0x1d6   : > { %834 = vrot.lane.b32.xlu0 %v825_v42, %s9690_s27  ;;  %v8850_v60 = vpop.f32.mrb[5].mxu1  ;;  %v10462_v51 = vpop.permute.xlu0 %2445 }
 0x1d7   : > { %v828_v53 = vpop.f32.mrb[6].mxu1  ;;  %v892_v41 = vpop.f32.mrb[8].mxu0  ;;  %15731 = vst [vmem:[#allocation27_spill] sm:$0xff] %v10462_v51 }
 0x1d8   : > { %836 = vrot.lane.b32.xlu1 %v828_v53, %s9690_s27  ;;  %v8856_v57 = vpop.f32.mrb[9].mxu0  ;;  %v8851_v26 = vpop.f32.mrb[7].mxu1 }
 0x1d9   : > { %v895_v55 = vpop.f32.mrb[10].mxu0  ;;  %v10464_v42 = vpop.permute.xlu1 %2447 }
 0x1da   : > { %901 = vrot.lane.b32.xlu0 %v892_v41, %s9690_s27  ;;  %v8857_v18 = vpop.f32.mrb[11].mxu0  ;;  %15732 = vst [vmem:[#allocation28_spill] sm:$0xff] %v10464_v42  ;;  %v10466_v60 = vpop.permute.xlu0 %2449 }
 0x1db   : > { %15733 = vst [vmem:[#allocation29_spill] sm:$0xff] %v10466_v60 }
 0x1dc   : > { %903 = vrot.lane.b32.xlu1 %v895_v55, %s9690_s27 }
 0x1dd   : > { %v10468_v40 = vpop.permute.xlu1 %2451 }
 0x1de   : > { %15734 = vst [vmem:[#allocation30_spill] sm:$0xff] %v10468_v40  ;;  %v10470_v53 = vpop.permute.xlu0 %2453 }
 0x1df   : > { %15735 = vst [vmem:[#allocation31_spill] sm:$0xff] %v10470_v53 }
 0x1e1   : > { %v10472_v57 = vpop.permute.xlu1 %2455 }
 0x1e2   : > { %15736 = vst [vmem:[#allocation32_spill] sm:$0xff] %v10472_v57  ;;  %v10474_v41 = vpop.permute.xlu0 %2457 }
 0x1e3   : > { %15737 = vst [vmem:[#allocation33_spill] sm:$0xff] %v10474_v41 }
 0x1e5   : > { %v10476_v26 = vpop.permute.xlu1 %2459 }
 0x1e6   : > { %15738 = vst [vmem:[#allocation34_spill] sm:$0xff] %v10476_v26  ;;  %v10478_v18 = vpop.permute.xlu0 %2837 }
 0x1e7   : > { %15739 = vst [vmem:[#allocation35_spill] sm:$0xff] %v10478_v18 }
 0x1e9   : > { %v10480_v55 = vpop.permute.xlu1 %2835 }
 0x1ea   : > { %15740 = vst [vmem:[#allocation36_spill] sm:$0xff] %v10480_v55  ;;  %v10482_v38 = vpop.permute.xlu0 %2841 }
 0x1eb   : > { %15741 = vst [vmem:[#allocation37_spill] sm:$0xff] %v10482_v38 }
 0x1ed   : > { %v10484_v39 = vpop.permute.xlu1 %2839 }
 0x1ee   : > { %15742 = vst [vmem:[#allocation38_spill] sm:$0xff] %v10484_v39  ;;  %v10486_v32 = vpop.permute.xlu0 %2845 }
 0x1ef   : > { %15743 = vst [vmem:[#allocation39_spill] sm:$0xff] %v10486_v32 }
 0x1f1   : > { %v10488_v36 = vpop.permute.xlu1 %2843 }
 0x1f2   : > { %15744 = vst [vmem:[#allocation40_spill] sm:$0xff] %v10488_v36  ;;  %v10490_v31 = vpop.permute.xlu0 %2849 }
 0x1f3   : > { %15745 = vst [vmem:[#allocation41_spill] sm:$0xff] %v10490_v31 }
 0x1f5   : > { %v10492_v35 = vpop.permute.xlu1 %2847 }
 0x1f6   : > { %15746 = vst [vmem:[#allocation42_spill] sm:$0xff] %v10492_v35  ;;  %v10494_v29 = vpop.permute.xlu0 %3601 }
 0x1f7   : > { %15747 = vst [vmem:[#allocation43_spill] sm:$0xff] %v10494_v29 }
 0x1f9   : > { %v10496_v33 = vpop.permute.xlu1 %3599 }
 0x1fa   : > { %15748 = vst [vmem:[#allocation44_spill] sm:$0xff] %v10496_v33  ;;  %v10498_v30 = vpop.permute.xlu0 %3605 }
 0x1fb   : > { %15749 = vst [vmem:[#allocation45_spill] sm:$0xff] %v10498_v30 }
 0x1fd   : > { %v10500_v34 = vpop.permute.xlu1 %3603 }
 0x1fe   : > { %15750 = vst [vmem:[#allocation46_spill] sm:$0xff] %v10500_v34  ;;  %v10502_v22 = vpop.permute.xlu0 %3609 }
 0x1ff   : > { %15751 = vst [vmem:[#allocation47_spill] sm:$0xff] %v10502_v22 }
 0x201   : > { %v10504_v27 = vpop.permute.xlu1 %3607 }
 0x202   : > { %15752 = vst [vmem:[#allocation48_spill] sm:$0xff] %v10504_v27  ;;  %v10506_v38 = vpop.permute.xlu0 %3613  ;;  %v9696_v27 = vmov 1934713408  }
 0x203   : > { %15753 = vst [vmem:[#allocation49_spill] sm:$0xff] %v10506_v38  ;;  %v993_v38 = vunpack.c.l.s4 %v9696_v27 }
 0x205   : > { %v10508_v18 = vpop.permute.xlu1 %3611 }
 0x206   : > { %15754 = vst [vmem:[#allocation50_spill] sm:$0xff] %v10508_v18  ;;  %v10510_v32 = vpop.permute.xlu0 %3991 }
 0x207   : > { %15755 = vst [vmem:[#allocation51_spill] sm:$0xff] %v10510_v32  ;;  %v3378_v32 = vcombine.high %v10356_v47, %v10366_v49 }
 0x209   : > { %v10512_v31 = vpop.permute.xlu1 %3989  ;;  %v3392_v18 = vrot.slane %v3378_v32, %v10134_v46 }
 0x20a   : > { %15756 = vst [vmem:[#allocation52_spill] sm:$0xff] %v10512_v31  ;;  %v10514_v40 = vpop.permute.xlu0 %3995  ;;  %v3377_v31 = vcombine.low %v10356_v47, %v10366_v49 }
 0x20b   : > { %15757 = vst [vmem:[#allocation53_spill] sm:$0xff] %v10514_v40  ;;  %v3393_v40 = vcombine.low %v10361_v48, %v10372_v54 }
 0x20d   : > { %v10516_v29 = vpop.permute.xlu1 %3993 }
 0x20e   : > { %15758 = vst [vmem:[#allocation54_spill] sm:$0xff] %v10516_v29  ;;  %v10518_v33 = vpop.permute.xlu0 %3999 }
 0x20f   : > { %15759 = vst [vmem:[#allocation55_spill] sm:$0xff] %v10518_v33 }
 0x211   : > { %v10520_v30 = vpop.permute.xlu1 %3997 }
 0x212   : > { %15760 = vst [vmem:[#allocation56_spill] sm:$0xff] %v10520_v30  ;;  %v10522_v34 = vpop.permute.xlu0 %4003  ;;  %v994_v30 = vunpack.c.0.s8 %v993_v38 }
 0x213   : > { %15761 = vst [vmem:[#allocation57_spill] sm:$0xff] %v10522_v34  ;;  %v3394_v34 = vcombine.high %v10361_v48, %v10372_v54 }
 0x214   : > { %v10542_v47 = vsub.s32 %v994_v30, %v10121_v43  ;;  %v15763_v30 = vcombine.high %v10175_v63, %v10227_v21 }
 0x215   : > { %v10524_v22 = vpop.permute.xlu1 %4001  ;;  %v3408_v42 = vrot.slane %v3394_v34, %v10134_v46  ;;  %v15764_v34 = vcombine.high %v10167_v61, %v10219_v19 }
 0x216   : > { %15762 = vst [vmem:[#allocation58_spill] sm:$0xff] %v10524_v22  ;;  %v3401_v22 = vrot.slane %v3393_v40, %v10134_v46 }
 0x217   : > { %v3457_v49 = vcombine.low %v3392_v18, %v3408_v42  ;;  %v3458_v32 = vcombine.high %v3392_v18, %v3408_v42  ;;  %v10559_v54 = vrot.slane %v15764_v34, %v10542_v47  ;;  %v15767_v18 = vcombine.low %v10167_v61, %v10219_v19 }
 0x218   : > { %v15770_v34 = vcombine.low %v10170_v62, %v10222_v20  ;;  %v15771_v61 = vcombine.high %v10178_v0, %v10230_v23  ;;  %v15772_v19 = vcombine.high %v10170_v62, %v10222_v20  ;;  %v15777_v62 = vcombine.high %v10187_v5, %v10235_v24 }
 0x219   : > { %v10688_v39 = vrot.slane %v3457_v49, %v10542_v47  ;;  %v10697_v55 = vrot.slane %v3458_v32, %v10542_v47 }
 0x21a   : > { %v10583_v43 = vrot.slane %v15770_v34, %v10542_v47  ;;  %v10616_v20 = vrot.slane %v15777_v62, %v10542_v47  ;;  %v15778_v34 = vcombine.high %v10193_v7, %v10243_v28 }
 0x21b   : > { %15793 = vst [vmem:[#allocation69_spill] sm:$0xff] %v10697_v55 }
 0x240   : > { %v703_v26 = vpop.permute.xlu0 %702 }
 0x241   : > { %709 = vst.msk [vmem:[#allocation2 + $0x61] sm:$0xff] %vm560_vm8, %v703_v26  ;;  %v3385_v26 = vrot.slane %v3377_v31, %v10134_v46 }
 0x242   : > { %v705_v29 = vpop.permute.xlu1 %704 }
 0x243   : > { %710 = vst.msk [vmem:[#allocation2 + $0x69] sm:$0xff] %vm560_vm8, %v705_v29  ;;  %v3441_v29 = vcombine.low %v3385_v26, %v3401_v22  ;;  %v3442_v31 = vcombine.high %v3385_v26, %v3401_v22  ;;  %v15765_v22 = vcombine.low %v10175_v63, %v10227_v21  ;;  %v10571_v26 = vrot.slane %v15767_v18, %v10542_v47 }
 0x244   : > { %v770_v27 = vpop.permute.xlu0 %769  ;;  %v10592_v63 = vrot.slane %v15771_v61, %v10542_v47  ;;  %v10598_v21 = vrot.slane %v15772_v19, %v10542_v47  ;;  %v10622_v61 = vrot.slane %v15778_v34, %v10542_v47  ;;  %v15779_v19 = vcombine.low %v10190_v6, %v10238_v25 }
 0x245   : > { %776 = vst.msk [vmem:[#allocation2 + $0x79] sm:$0xff] %vm560_vm8, %v770_v27  ;;  %v10565_v42 = vrot.slane %v15765_v22, %v10542_v47  ;;  %15768 = vst [vmem:[#allocation60_spill] sm:$0xff] %v10571_v26 }
 0x246   : > { %v772_v33 = vpop.permute.xlu1 %771 }
 0x247   : > { %777 = vst.msk [vmem:[#allocation2 + $0x81] sm:$0xff] %vm560_vm8, %v772_v33  ;;  %v10553_v33 = vrot.slane %v15763_v30, %v10542_v47  ;;  %15766 = vst [vmem:[#allocation59_spill] sm:$0xff] %v10565_v42 }
 0x248   : > { %v835_v38 = vpop.permute.xlu0 %834  ;;  %v918_v48 = vld [vmem:[#allocation2 + $0x60] sm:$0xff] }
 0x249   : > { %841 = vst.msk [vmem:[#allocation2 + $0x91] sm:$0xff] %vm560_vm8, %v835_v38  ;;  %1697 = vrot.lane.b32.xlu0 %v918_v48, %s9695_s11  ;;  %1307 = vrot.lane.b32.xlu1 %v918_v48, %s9694_s30  ;;  %v2079_v38 = vld [vmem:[#allocation2 + $0x61] sm:$0xff] }
 0x24a   : > { %v837_v40 = vpop.permute.xlu1 %836  ;;  %v2080_v36 = vld [vmem:[#allocation2 + $0x69] sm:$0xff] }
 0x24b   : > { %842 = vst.msk [vmem:[#allocation2 + $0x99] sm:$0xff] %vm560_vm8, %v837_v40  ;;  %v15769_v40 = vcombine.low %v10178_v0, %v10230_v23  ;;  %v15775_v0 = vcombine.low %v10193_v7, %v10243_v28  ;;  %v15781_v7 = vcombine.high %v10190_v6, %v10238_v25  ;;  %v10660_v6 = vrot.slane %v3442_v31, %v10542_v47  ;;  %v10730_v44 = vld [vmem:[#allocation2 + $0x6a] sm:$0xff]  ;;  %v10742_v56 = vld [vmem:[#allocation2 + $0x62] sm:$0xff] }
 0x24c   : > { %v902_v27 = vpop.permute.xlu0 %901 }
 0x24d   : > { %v10577_v30 = vrot.slane %v15769_v40, %v10542_v47  ;;  %908 = vst.msk [vmem:[#allocation2 + $0xa9] sm:$0xff] %vm560_vm8, %v902_v27  ;;  %2461 = vrot.lane.b32.xlu0 %v2079_v38, %s9694_s30  ;;  %2851 = vrot.lane.b32.xlu1 %v2079_v38, %s9695_s11  ;;  %v15773_v27 = vcombine.low %v10187_v5, %v10235_v24  ;;  %v920_v40 = vld [vmem:[#allocation2 + $0x78] sm:$0xff] }
 0x24e   : > { %v904_v18 = vpop.permute.xlu1 %903  ;;  %v10610_v23 = vrot.slane %v15775_v0, %v10542_v47  ;;  %v15780_v5 = vcombine.low %v10210_v15, %v10274_v50  ;;  %v10641_v28 = vrot.slane %v15781_v7, %v10542_v47  ;;  %v15782_v0 = vcombine.high %v10210_v15, %v10274_v50  ;;  %v10801_v14 = vld [vmem:[#allocation2 + $0x81] sm:$0xff] }
 0x24f   : > { %v10604_v22 = vrot.slane %v15773_v27, %v10542_v47  ;;  %v10628_v27 = vrot.slane %v15779_v19, %v10542_v47  ;;  %909 = vst.msk [vmem:[#allocation2 + $0xb1] sm:$0xff] %vm560_vm8, %v904_v18  ;;  %v15783_v18 = vcombine.high %v10295_v9, %v10303_v17  ;;  %v919_v19 = vld [vmem:[#allocation2 + $0x68] sm:$0xff]  ;;  %v15785_v15 = vcombine.low %v10295_v9, %v10303_v17 }
 0x250   : > { %15776 = vst [vmem:[#allocation62_spill] sm:$0xff] %v10610_v23  ;;  %v10635_v24 = vrot.slane %v15780_v5, %v10542_v47  ;;  %v10647_v62 = vrot.slane %v15782_v0, %v10542_v47  ;;  %v10655_v5 = vld [vmem:[#allocation2 + $0x90] sm:$0xff]  ;;  %v10669_v50 = vrot.slane %v3441_v29, %v10542_v47  ;;  %v15788_v7 = vcombine.low %v10298_v10, %v10306_v45 }
 0x251   : > { %15774 = vst [vmem:[#allocation61_spill] sm:$0xff] %v10604_v22  ;;  %v10653_v34 = vrot.slane %v15783_v18, %v10542_v47  ;;  %v10657_v57 = vld [vmem:[#allocation2 + $0x91] sm:$0xff]  ;;  %v10666_v25 = vrot.slane %v15785_v15, %v10542_v47  ;;  %1309 = vrot.lane.b32.xlu0 %v919_v19, %s9694_s30  ;;  %1311 = vrot.lane.b32.xlu1 %v920_v40, %s9694_s30 }
 0x252   : > { %15784 = vst [vmem:[#allocation63_spill] sm:$0xff] %v10657_v57  ;;  %15787 = vst [vmem:[#allocation65_spill] sm:$0xff] %v10669_v50  ;;  %v10675_v0 = vrot.slane %v15788_v7, %v10542_v47  ;;  %v958_v31 = vcombine.low %v918_v48, %v10655_v5  ;;  %v959_v18 = vcombine.high %v918_v48, %v10655_v5  ;;  %v10683_v29 = vld [vmem:[#allocation2 + $0x98] sm:$0xff] }
 0x253   : > { %15786 = vst [vmem:[#allocation64_spill] sm:$0xff] %v10666_v25  ;;  %v2119_v9 = vcombine.low %v2079_v38, %v10657_v57  ;;  %v2120_v17 = vcombine.high %v2079_v38, %v10657_v57  ;;  %15789 = vst [vmem:[#allocation66_spill] sm:$0xff] %v10683_v29  ;;  %v10685_v15 = vld [vmem:[#allocation2 + $0x99] sm:$0xff]  ;;  %v15791_v7 = vcombine.high %v10298_v10, %v10306_v45 }
 0x254   : > { %15790 = vst [vmem:[#allocation67_spill] sm:$0xff] %v10685_v15  ;;  %v2081_v48 = vld [vmem:[#allocation2 + $0x79] sm:$0xff]  ;;  %v10700_v38 = vrot.slane %v958_v31, %v10134_v46  ;;  %v10703_v60 = vrot.slane %v959_v18, %v10134_v46  ;;  %v1094_v41 = vcombine.low %v919_v19, %v10683_v29  ;;  %v10712_v45 = vld [vmem:[#allocation2 + $0xa8] sm:$0xff]  ;;  %v1095_v32 = vcombine.high %v919_v19, %v10683_v29 }
 0x255   : > { %v10694_v35 = vrot.slane %v15791_v7, %v10542_v47  ;;  %v10706_v49 = vrot.slane %v2119_v9, %v10134_v46  ;;  %v10710_v10 = vrot.slane %v2120_v17, %v10134_v46  ;;  %15794 = vst [vmem:[#allocation70_spill] sm:$0xff] %v10712_v45  ;;  %v2255_v7 = vcombine.low %v2080_v36, %v10685_v15  ;;  %v10717_v51 = vld [vmem:[#allocation2 + $0xa9] sm:$0xff]  ;;  %v10719_v18 = vld [vmem:[#allocation2 + $0x9a] sm:$0xff]  ;;  %v10728_v16 = vld [vmem:[#allocation2 + $0x92] sm:$0xff] }
 0x256   : > { %v2256_v31 = vcombine.high %v2080_v36, %v10685_v15  ;;  %15795 = vst [vmem:[#allocation71_spill] sm:$0xff] %v10717_v51  ;;  %15796 = vst [vmem:[#allocation72_spill] sm:$0xff] %v10719_v18  ;;  %1701 = vrot.lane.b32.xlu0 %v920_v40, %s9695_s11  ;;  %1699 = vrot.lane.b32.xlu1 %v919_v19, %s9695_s11  ;;  %v974_v9 = vcombine.low %v920_v40, %v10712_v45  ;;  %v10770_v58 = vld [vmem:[#allocation2 + $0xb0] sm:$0xff] }
 0x257   : > { %15792 = vst [vmem:[#allocation68_spill] sm:$0xff] %v10694_v35  ;;  %v975_v17 = vcombine.high %v920_v40, %v10712_v45  ;;  %v10726_v53 = vrot.slane %v1094_v41, %v10134_v46  ;;  %15797 = vst [vmem:[#allocation73_spill] sm:$0xff] %v10728_v16  ;;  %v10733_v2 = vrot.slane %v1095_v32, %v10134_v46  ;;  %v10781_v1 = vld [vmem:[#allocation2 + $0xb1] sm:$0xff] }
 0x258   : > { %v10736_v59 = vrot.slane %v2255_v7, %v10134_v46  ;;  %v10739_v11 = vrot.slane %v2256_v31, %v10134_v46  ;;  %v2135_v19 = vcombine.low %v2081_v48, %v10717_v51  ;;  %v10745_v41 = vrot.slane %v974_v9, %v10134_v46  ;;  %15798 = vst [vmem:[#allocation74_spill] sm:$0xff] %v10770_v58  ;;  %v10799_v12 = vld [vmem:[#allocation2 + $0xaa] sm:$0xff] }
 0x259   : > { %v10748_v40 = vrot.slane %v975_v17, %v10134_v46  ;;  %v2136_v52 = vcombine.high %v2081_v48, %v10717_v51  ;;  %v3409_v32 = vcombine.low %v10730_v44, %v10719_v18  ;;  %v3410_v31 = vcombine.high %v10730_v44, %v10719_v18  ;;  %15799 = vst [vmem:[#allocation75_spill] sm:$0xff] %v10781_v1 }
 0x25a   : > { %v10754_v7 = vrot.slane %v2135_v19, %v10134_v46  ;;  %v3273_v37 = vcombine.low %v10742_v56, %v10728_v16  ;;  %v3274_v9 = vcombine.high %v10742_v56, %v10728_v16  ;;  %2465 = vrot.lane.b32.xlu0 %v2081_v48, %s9694_s30  ;;  %2463 = vrot.lane.b32.xlu1 %v2080_v36, %s9694_s30  ;;  %v10803_v16 = vld [vmem:[#allocation2 + $0x82] sm:$0xff] }
 0x25b   : > { %v1022_v17 = vcombine.low %v10700_v38, %v10745_v41  ;;  %v1023_v19 = vcombine.high %v10700_v38, %v10745_v41  ;;  %v10775_v13 = vrot.slane %v2136_v52, %v10134_v46  ;;  %v10783_v38 = vld [vmem:[#allocation2 + $0xb2] sm:$0xff]  ;;  %v10785_v41 = vld [vmem:[#allocation2 + $0x80] sm:$0xff]  ;;  %v10788_v8 = vrot.slane %v3409_v32, %v10134_v46  ;;  %15801 = vst [vmem:[#allocation77_spill] sm:$0xff] %v10799_v12 }
 0x25c   : > { %15800 = vst [vmem:[#allocation76_spill] sm:$0xff] %v10783_v38  ;;  %v10791_v3 = vrot.slane %v3410_v31, %v10134_v46  ;;  %v10794_v52 = vrot.slane %v3273_v37, %v10134_v46  ;;  %v10797_v4 = vrot.slane %v3274_v9, %v10134_v46  ;;  %v1110_v31 = vcombine.low %v10785_v41, %v10770_v58  ;;  %v10815_v9 = vld [vmem:[#allocation2 + $0x7a] sm:$0xff] }
 0x25d   : > { %v1111_v37 = vcombine.high %v10785_v41, %v10770_v58  ;;  %v2271_v51 = vcombine.low %v10801_v14, %v10781_v1  ;;  %v2272_v18 = vcombine.high %v10801_v14, %v10781_v1  ;;  %v3425_v32 = vcombine.low %v10803_v16, %v10783_v38 }
 0x25e   : > { %2853 = vrot.lane.b32.xlu0 %v2080_v36, %s9695_s11  ;;  %2855 = vrot.lane.b32.xlu1 %v2081_v48, %s9695_s11  ;;  %v1118_v15 = vrot.slane %v1110_v31, %v10134_v46  ;;  %v3426_v36 = vcombine.high %v10803_v16, %v10783_v38  ;;  %v3289_v48 = vcombine.low %v10815_v9, %v10799_v12 }
 0x25f   : > { %v1125_v29 = vrot.slane %v1111_v37, %v10134_v46  ;;  %v10830_v58 = vrot.slane %v2271_v51, %v10134_v46  ;;  %v10833_v45 = vrot.slane %v2272_v18, %v10134_v46  ;;  %v10836_v1 = vrot.slane %v3425_v32, %v10134_v46 }
 0x260   : > { %v3290_v31 = vcombine.high %v10815_v9, %v10799_v12  ;;  %v1158_v37 = vcombine.low %v10726_v53, %v1118_v15  ;;  %v1159_v57 = vcombine.high %v10726_v53, %v1118_v15  ;;  %v10864_v12 = vrot.slane %v3289_v48, %v10134_v46 }
 0x261   : > { %v1174_v38 = vcombine.low %v10733_v2, %v1125_v29  ;;  %v1175_v55 = vcombine.high %v10733_v2, %v1125_v29  ;;  %v2319_v51 = vcombine.low %v10736_v59, %v10830_v58  ;;  %v2320_v18 = vcombine.high %v10736_v59, %v10830_v58 }
 0x262   : > { %3617 = vrot.lane.b32.xlu0 %v10730_v44, %s9694_s30  ;;  %3615 = vrot.lane.b32.xlu1 %v10742_v56, %s9694_s30  ;;  %v2335_v32 = vcombine.low %v10739_v11, %v10833_v45  ;;  %v2336_v53 = vcombine.high %v10739_v11, %v10833_v45  ;;  %v10857_v2 = vrot.slane %v3426_v36, %v10134_v46 }
 0x263   : > { %v10867_v59 = vrot.slane %v3290_v31, %v10134_v46  ;;  %v1037_v58 = vrot.slane %v1023_v19, %v10542_v47  ;;  %v1173_v35 = vrot.slane %v1159_v57, %v10542_v47  ;;  %v10876_v36 = vrot.slane %v1022_v17, %v10542_v47 }
 0x264   : > { %v10879_v29 = vrot.slane %v1158_v37, %v10542_v47  ;;  %v3338_v19 = vcombine.high %v10794_v52, %v10864_v12  ;;  %v15804_v45 = vcombine.low %v10703_v60, %v10748_v40  ;;  %v1182_v48 = vrot.slane %v1174_v38, %v10542_v47 }
 0x265   : > { %15802 = vst [vmem:[#allocation78_spill] sm:$0xff] %v10876_v36  ;;  %v1056_v31 = vcombine.low %v10553_v33, %v1037_v58  ;;  %v1192_v37 = vcombine.low %v10559_v54, %v1173_v35  ;;  %v1057_v57 = vcombine.high %v10553_v33, %v1037_v58  ;;  %v1193_v15 = vcombine.high %v10559_v54, %v1173_v35 }
 0x266   : > { %15803 = vst [vmem:[#allocation79_spill] sm:$0xff] %v10879_v29  ;;  %4007 = vrot.lane.b32.xlu0 %v10730_v44, %s9695_s11  ;;  %4005 = vrot.lane.b32.xlu1 %v10742_v56, %s9695_s11  ;;  %v1055_v44 = vcombine.high %v10565_v42, %v10876_v36  ;;  %v1191_v56 = vcombine.high %v10571_v26, %v10879_v29  ;;  %v15878_v29 = vld [vmem:[#allocation33_spill] sm:$0xff] }
 0x267   : > { %v1046_v11 = vrot.slane %v15804_v45, %v10542_v47  ;;  %v10905_v17 = vpack.i.bf16 %v1192_v37, %v1056_v31  ;;  %v15805_v46 = vcombine.high %v10703_v60, %v10748_v40  ;;  %v1189_v26 = vrot.slane %v1175_v55, %v10542_v47 }
 0x268   : > { %v10917_v38 = vpack.i.bf16 %v1191_v56, %v1055_v44  ;;  %v1194_v58 = vcombine.low %v10583_v43, %v1182_v48  ;;  %v10921_v35 = vpack.i.bf16 %v1193_v15, %v1057_v57  ;;  %v1195_v40 = vcombine.high %v10583_v43, %v1182_v48 }
 0x269   : > { %v1053_v42 = vrot.slane %v15805_v46, %v10542_v47  ;;  %v1058_v33 = vcombine.low %v10577_v30, %v1046_v11  ;;  %v1196_v46 = vcombine.low %v10598_v21, %v1189_v26  ;;  %v1059_v60 = vcombine.high %v10577_v30, %v1046_v11 }
 0x26a   : > { %1313 = vrot.lane.b32.xlu0 %v10785_v41, %s9694_s30  ;;  %1703 = vrot.lane.b32.xlu1 %v10785_v41, %s9695_s11  ;;  %v15806_v41 = vcombine.low %v10706_v49, %v10754_v7  ;;  %v10936_v31 = vrot.slane %v2319_v51, %v10542_v47  ;;  %v1197_v37 = vcombine.high %v10598_v21, %v1189_v26 }
 0x26b   : > { %v1060_v54 = vcombine.low %v10592_v63, %v1053_v42  ;;  %v10926_v55 = vpack.i.bf16 %v1194_v58, %v1058_v33  ;;  %v1061_v57 = vcombine.high %v10592_v63, %v1053_v42  ;;  %v15809_v30 = vcombine.high %v10706_v49, %v10754_v7 }
 0x26c   : > { %v10933_v45 = vrot.slane %v15806_v41, %v10542_v47  ;;  %15808 = vst [vmem:[#allocation81_spill] sm:$0xff] %v10936_v31  ;;  %v10950_v11 = vpack.i.bf16 %v1195_v40, %v1059_v60  ;;  %v2352_v42 = vcombine.high %v10610_v23, %v10936_v31  ;;  %v2334_v21 = vrot.slane %v2320_v18, %v10542_v47 }
 0x26d   : > { %v10938_v15 = vpack.i.bf16 %v1196_v46, %v1060_v54  ;;  %v2198_v43 = vrot.slane %v15809_v30, %v10542_v47  ;;  %v10956_v26 = vpack.i.bf16 %v1197_v37, %v1061_v57  ;;  %v2343_v44 = vrot.slane %v2335_v32, %v10542_v47 }
 0x26e   : > { %15807 = vst [vmem:[#allocation80_spill] sm:$0xff] %v10933_v45  ;;  %2857 = vrot.lane.b32.xlu0 %v10801_v14, %s9695_s11  ;;  %2467 = vrot.lane.b32.xlu1 %v10801_v14, %s9694_s30  ;;  %v2216_v51 = vcombine.high %v10604_v22, %v10933_v45  ;;  %v15810_v14 = vcombine.low %v10710_v10, %v10775_v13 }
 0x26f   : > { %v2218_v63 = vcombine.high %v10616_v20, %v2198_v43  ;;  %v2217_v49 = vcombine.low %v10616_v20, %v2198_v43  ;;  %v15811_v56 = vcombine.high %v10710_v10, %v10775_v13  ;;  %v2354_v58 = vcombine.high %v10622_v61, %v2334_v21 }
 0x270   : > { %v10961_v7 = vpack.i.bf16 %v2352_v42, %v2216_v51  ;;  %v2207_v48 = vrot.slane %v15810_v14, %v10542_v47  ;;  %v2353_v18 = vcombine.low %v10622_v61, %v2334_v21  ;;  %v2350_v20 = vrot.slane %v2336_v53, %v10542_v47 }
 0x271   : > { %v2214_v33 = vrot.slane %v15811_v56, %v10542_v47  ;;  %v3352_v54 = vrot.slane %v3338_v19, %v10542_v47  ;;  %v2356_v46 = vcombine.high %v10635_v24, %v2343_v44  ;;  %v10983_v10 = vpack.i.bf16 %v2354_v58, %v2218_v63 }
 0x272   : > { %3621 = vrot.lane.b32.xlu0 %v10803_v16, %s9694_s30  ;;  %3619 = vrot.lane.b32.xlu1 %v10815_v9, %s9694_s30  ;;  %v2220_v32 = vcombine.high %v10628_v27, %v2207_v48  ;;  %v2219_v13 = vcombine.low %v10628_v27, %v2207_v48  ;;  %v10985_v60 = vpack.i.bf16 %v2353_v18, %v2217_v49 }
 0x273   : > { %v2355_v61 = vcombine.low %v10635_v24, %v2343_v44  ;;  %v2222_v53 = vcombine.high %v10641_v28, %v2214_v33  ;;  %v2358_v40 = vcombine.high %v10647_v62, %v2350_v20  ;;  %v2221_v41 = vcombine.low %v10641_v28, %v2214_v33 }
 0x274   : > { %v10989_v19 = vpack.i.bf16 %v2356_v46, %v2220_v32  ;;  %v2357_v57 = vcombine.low %v10647_v62, %v2350_v20  ;;  %v3371_v27 = vcombine.low %v10653_v34, %v3352_v54  ;;  %v15812_v30 = vcombine.high %v10788_v8, %v10836_v1  ;;  %v15822_v32 = vld [vmem:[#allocation69_spill] sm:$0xff] }
 0x275   : > { %v10994_v37 = vpack.i.bf16 %v2355_v61, %v2219_v13  ;;  %v15813_v24 = vcombine.low %v10794_v52, %v10864_v12  ;;  %v11011_v28 = vpack.i.bf16 %v2358_v40, %v2222_v53  ;;  %v15815_v42 = vcombine.low %v10788_v8, %v10836_v1  ;;  %v15879_v40 = vld [vmem:[#allocation29_spill] sm:$0xff] }
 0x276   : > { %v3488_v43 = vrot.slane %v15812_v30, %v10542_v47  ;;  %4011 = vrot.lane.b32.xlu0 %v10803_v16, %s9695_s11  ;;  %4009 = vrot.lane.b32.xlu1 %v10815_v9, %s9695_s11  ;;  %v11013_v62 = vpack.i.bf16 %v2357_v57, %v2221_v41  ;;  %v15817_v16 = vcombine.low %v10797_v4, %v10867_v59  ;;  %v15868_v41 = vld [vmem:[#allocation22_spill] sm:$0xff] }
 0x277   : > { %v11005_v51 = vrot.slane %v15813_v24, %v10542_v47  ;;  %v11019_v63 = vrot.slane %v15815_v42, %v10542_v47  ;;  %v15818_v21 = vcombine.low %v10791_v3, %v10857_v2  ;;  %v3372_v8 = vcombine.high %v10653_v34, %v3352_v54  ;;  %v15864_v24 = vld [vmem:[#allocation21_spill] sm:$0xff]  ;;  %v15866_v42 = vld [vmem:[#allocation20_spill] sm:$0xff] }
 0x278   : > { %v3507_v12 = vcombine.low %v10660_v6, %v3488_v43  ;;  %v3361_v9 = vrot.slane %v15817_v16, %v10542_v47  ;;  %v3508_v14 = vcombine.high %v10660_v6, %v3488_v43  ;;  %v15819_v48 = vcombine.high %v10797_v4, %v10867_v59  ;;  %v15821_v6 = vld [vmem:[#allocation68_spill] sm:$0xff]  ;;  %v15828_v16 = vld [vmem:[#allocation67_spill] sm:$0xff] }
 0x279   : > { %15814 = vst [vmem:[#allocation82_spill] sm:$0xff] %v11005_v51  ;;  %15816 = vst [vmem:[#allocation83_spill] sm:$0xff] %v11019_v63  ;;  %v3370_v52 = vcombine.high %v10666_v25, %v11005_v51  ;;  %v3497_v49 = vrot.slane %v15818_v21, %v10542_v47  ;;  %v3506_v1 = vcombine.high %v10669_v50, %v11019_v63  ;;  %v15830_v21 = vld [vmem:[#allocation72_spill] sm:$0xff] }
 0x27a   : > { %v3368_v44 = vrot.slane %v15819_v48, %v10542_v47  ;;  %v11040_v56 = vpack.i.bf16 %v3507_v12, %v3371_v27  ;;  %v3373_v33 = vcombine.low %v10675_v0, %v3361_v9  ;;  %v15820_v18 = vcombine.high %v10791_v3, %v10857_v2  ;;  %1705 = vrot.lane.b32.xlu0 %v10655_v5, %s9695_s11  ;;  %v15826_v12 = vld [vmem:[#allocation70_spill] sm:$0xff]  ;;  %v15835_v48 = vld [vmem:[#allocation77_spill] sm:$0xff] }
 0x27b   : > { %v3509_v58 = vcombine.low %v10688_v39, %v3497_v49  ;;  %1315 = vrot.lane.b32.xlu1 %v10655_v5, %s9694_s30  ;;  %v11052_v34 = vpack.i.bf16 %v3506_v1, %v3370_v52  ;;  %v11054_v4 = vpack.i.bf16 %v3508_v14, %v3372_v8  ;;  %v3374_v13 = vcombine.high %v10675_v0, %v3361_v9  ;;  %v15825_v0 = vld [vmem:[#allocation63_spill] sm:$0xff]  ;;  %v15827_v52 = vld [vmem:[#allocation66_spill] sm:$0xff]  ;;  %v15834_v14 = vld [vmem:[#allocation76_spill] sm:$0xff] }
 0x27c   : > { %v3504_v20 = vrot.slane %v15820_v18, %v10542_v47  ;;  %v3375_v59 = vcombine.low %v15821_v6, %v3368_v44  ;;  %v3510_v3 = vcombine.high %v10688_v39, %v3497_v49  ;;  %v3376_v2 = vcombine.high %v15821_v6, %v3368_v44  ;;  %v15829_v9 = vld [vmem:[#allocation71_spill] sm:$0xff]  ;;  %v15831_v49 = vld [vmem:[#allocation73_spill] sm:$0xff]  ;;  %v15832_v1 = vld [vmem:[#allocation74_spill] sm:$0xff] }
 0x27d   : > { %v11057_v54 = vpack.i.bf16 %v3509_v58, %v3373_v33  ;;  %v15833_v8 = vld [vmem:[#allocation75_spill] sm:$0xff]  ;;  %v15867_v39 = vld [vmem:[#allocation26_spill] sm:$0xff]  ;;  %v2509_v36 = vcombine.low %v15879_v40, %v15878_v29 }
 0x27e   : > { %v3511_v46 = vcombine.low %v15822_v32, %v3504_v20  ;;  %v3512_v61 = vcombine.high %v15822_v32, %v3504_v20  ;;  %v11070_v27 = vpack.i.bf16 %v3510_v3, %v3374_v13  ;;  %2469 = vrot.lane.b32.xlu0 %v15825_v0, %s9694_s30  ;;  %v15849_v6 = vld [vmem:[#allocation15_spill] sm:$0xff]  ;;  %v15852_v13 = vld [vmem:[#allocation13_spill] sm:$0xff] }
 0x27f   : > { %2859 = vrot.lane.b32.xlu1 %v15825_v0, %s9695_s11  ;;  %v15855_v0 = vld [vmem:[#allocation18_spill] sm:$0xff] }
 0x280   : > { %v11068_v57 = vpack.i.bf16 %v3511_v46, %v3375_v59  ;;  %v9043_v43 = vpack.i.bf16 %v3512_v61, %v3376_v2  ;;  %v15850_v59 = vld [vmem:[#allocation11_spill] sm:$0xff]  ;;  %v15851_v46 = vld [vmem:[#allocation17_spill] sm:$0xff]  ;;  %v15853_v61 = vld [vmem:[#allocation16_spill] sm:$0xff] }
 0x281   : > { %v1476_v32 = vcombine.high %v15850_v59, %v15849_v6  ;;  %v1491_v3 = vcombine.low %v15852_v13, %v15851_v46  ;;  %v1492_v2 = vcombine.high %v15852_v13, %v15851_v46 }
 0x282   : > { %1317 = vrot.lane.b32.xlu0 %v15827_v52, %s9694_s30 }
 0x283   : > { %1319 = vrot.lane.b32.xlu1 %v15826_v12, %s9694_s30 }
 0x286   : > { %1709 = vrot.lane.b32.xlu0 %v15826_v12, %s9695_s11 }
 0x287   : > { %1707 = vrot.lane.b32.xlu1 %v15827_v52, %s9695_s11 }
 0x28a   : > { %2473 = vrot.lane.b32.xlu0 %v15829_v9, %s9694_s30 }
 0x28b   : > { %2471 = vrot.lane.b32.xlu1 %v15828_v16, %s9694_s30 }
 0x28e   : > { %2861 = vrot.lane.b32.xlu0 %v15828_v16, %s9695_s11 }
 0x28f   : > { %2863 = vrot.lane.b32.xlu1 %v15829_v9, %s9695_s11 }
 0x292   : > { %4015 = vrot.lane.b32.xlu0 %v15830_v21, %s9695_s11 }
 0x293   : > { %3625 = vrot.lane.b32.xlu1 %v15830_v21, %s9694_s30 }
 0x296   : > { %1321 = vrot.lane.b32.xlu0 %v15832_v1, %s9694_s30 }
 0x297   : > { %3623 = vrot.lane.b32.xlu1 %v15831_v49, %s9694_s30 }
 0x29a   : > { %2865 = vrot.lane.b32.xlu0 %v15833_v8, %s9695_s11 }
 0x29b   : > { %4013 = vrot.lane.b32.xlu1 %v15831_v49, %s9695_s11  ;;  %v15859_v49 = vld [vmem:[#allocation9_spill] sm:$0xff] }
 0x29e   : > { %3629 = vrot.lane.b32.xlu0 %v15834_v14, %s9694_s30 }
 0x29f   : > { %1711 = vrot.lane.b32.xlu1 %v15832_v1, %s9695_s11 }
 0x2a2   : > { %3627 = vrot.lane.b32.xlu0 %v15835_v48, %s9694_s30 }
 0x2a3   : > { %2475 = vrot.lane.b32.xlu1 %v15833_v8, %s9694_s30  ;;  %v1490_v8 = vrot.slane %v1476_v32, %v15859_v49  ;;  %v15863_v32 = vld [vmem:[#allocation25_spill] sm:$0xff] }
 0x2a4   : > { %v1746_v30 = vcombine.high %v15864_v24, %v15863_v32 }
 0x2a6   : > { %4019 = vrot.lane.b32.xlu0 %v15834_v14, %s9695_s11  ;;  %v1499_v14 = vrot.slane %v1491_v3, %v15859_v49  ;;  %v1745_v3 = vcombine.low %v15864_v24, %v15863_v32 }
 0x2a7   : > { %4017 = vrot.lane.b32.xlu1 %v15835_v48, %s9695_s11  ;;  %v1506_v48 = vrot.slane %v1492_v2, %v15859_v49 }
 0x2a9   : > { %v1555_v51 = vcombine.low %v1490_v8, %v1506_v48  ;;  %v1556_v25 = vcombine.high %v1490_v8, %v1506_v48  ;;  %v1760_v48 = vrot.slane %v1746_v30, %v15859_v49 }
 0x2aa   : > { %8944 = vrot.lane.b32.xlu0 %v10917_v38, %s9698_s18 }
 0x2ab   : > { %8949 = vrot.lane.b32.xlu1 %v10905_v17, %s15532_s12 }
 0x2ae   : > { %8954 = vrot.lane.b32.xlu0 %v10921_v35, %s15536_s21 }
 0x2af   : > { %8959 = vrot.lane.b32.xlu1 %v10926_v55, %s15528_s20 }
 0x2b2   : > { %8964 = vrot.lane.b32.xlu0 %v10950_v11, %s15534_s26 }
 0x2b3   : > { %8969 = vrot.lane.b32.xlu1 %v10938_v15, %s15526_s25 }
 0x2b6   : > { %8974 = vrot.lane.b32.xlu0 %v10956_v26, %s15530_s28 }
 0x2b7   : > { %8979 = vrot.lane.b32.xlu1 %v10961_v7, %s9698_s18 }
 0x2ba   : > { %8984 = vrot.lane.b32.xlu0 %v10985_v60, %s15532_s12 }
 0x2bb   : > { %8989 = vrot.lane.b32.xlu1 %v10983_v10, %s15536_s21  ;;  %v11144_v17 = vpop.permute.xlu0 %1697  ;;  %v11146_v38 = vpop.permute.xlu1 %1307 }
 0x2bc   : > { %15836 = vst [vmem:[#allocation68_spill] sm:$0xff] %v11144_v17 }
 0x2be   : > { %8994 = vrot.lane.b32.xlu0 %v10994_v37, %s15528_s20 }
 0x2bf   : > { %8999 = vrot.lane.b32.xlu1 %v10989_v19, %s15534_s26  ;;  %v11152_v35 = vpop.permute.xlu0 %2461  ;;  %v11154_v55 = vpop.permute.xlu1 %2851 }
 0x2c0   : > { %15837 = vst [vmem:[#allocation69_spill] sm:$0xff] %v11152_v35  ;;  %15838 = vst [vmem:[#allocation63_spill] sm:$0xff] %v11154_v55 }
 0x2c2   : > { %9004 = vrot.lane.b32.xlu0 %v11013_v62, %s15526_s25 }
 0x2c3   : > { %9009 = vrot.lane.b32.xlu1 %v11011_v28, %s15530_s28  ;;  %v11160_v15 = vpop.permute.xlu0 %1309  ;;  %v11162_v11 = vpop.permute.xlu1 %1311 }
 0x2c6   : > { %9014 = vrot.lane.b32.xlu0 %v11052_v34, %s9698_s18 }
 0x2c7   : > { %9019 = vrot.lane.b32.xlu1 %v11040_v56, %s15532_s12 }
 0x2c8   : > { %v11168_v26 = vpop.permute.xlu0 %1701  ;;  %v11170_v7 = vpop.permute.xlu1 %1699 }
 0x2c9   : > { %15839 = vst [vmem:[#allocation70_spill] sm:$0xff] %v11168_v26 }
 0x2ca   : > { %9024 = vrot.lane.b32.xlu0 %v11054_v4, %s15536_s21 }
 0x2cb   : > { %9029 = vrot.lane.b32.xlu1 %v11057_v54, %s15528_s20  ;;  %v1475_v54 = vcombine.low %v15850_v59, %v15849_v6 }
 0x2cc   : > { %v11176_v10 = vpop.permute.xlu0 %2465  ;;  %v11178_v60 = vpop.permute.xlu1 %2463 }
 0x2cd   : > { %15840 = vst [vmem:[#allocation66_spill] sm:$0xff] %v11176_v10  ;;  %v1483_v1 = vrot.slane %v1475_v54, %v15859_v49  ;;  %v15862_v54 = vld [vmem:[#allocation19_spill] sm:$0xff] }
 0x2ce   : > { %9034 = vrot.lane.b32.xlu0 %v11070_v27, %s15534_s26 }
 0x2cf   : > { %9039 = vrot.lane.b32.xlu1 %v11068_v57, %s15526_s25  ;;  %v15854_v57 = vld [vmem:[#allocation12_spill] sm:$0xff]  ;;  %v1539_v53 = vcombine.low %v1483_v1, %v1499_v14 }
 0x2d0   : > { %v11184_v19 = vpop.permute.xlu0 %2853  ;;  %v11186_v37 = vpop.permute.xlu1 %2855  ;;  %v1339_v27 = vcombine.low %v15854_v57, %v15853_v61  ;;  %v1340_v9 = vcombine.high %v15854_v57, %v15853_v61 }
 0x2d1   : > { %15841 = vst [vmem:[#allocation67_spill] sm:$0xff] %v11184_v19  ;;  %15842 = vst [vmem:[#allocation71_spill] sm:$0xff] %v11186_v37 }
 0x2d2   : > { %9044 = vrot.lane.b32.xlu0 %v9043_v43, %s15530_s28  ;;  %v15856_v43 = vld [vmem:[#allocation14_spill] sm:$0xff]  ;;  %v1347_v6 = vrot.slane %v1339_v27, %v15859_v49  ;;  %v1354_v61 = vrot.slane %v1340_v9, %v15859_v49  ;;  %v15865_v27 = vld [vmem:[#allocation24_spill] sm:$0xff]  ;;  %v1881_v9 = vcombine.low %v15868_v41, %v15867_v39 }
 0x2d3   : > { %v1355_v12 = vcombine.low %v15856_v43, %v15855_v0  ;;  %v1356_v21 = vcombine.high %v15856_v43, %v15855_v0  ;;  %v15861_v0 = vld [vmem:[#allocation23_spill] sm:$0xff]  ;;  %v1866_v45 = vcombine.high %v15866_v42, %v15865_v27 }
 0x2d4   : > { %v11189_v28 = vpop.permute.xlu0 %3617  ;;  %v11191_v62 = vpop.permute.xlu1 %3615  ;;  %v1729_v43 = vcombine.low %v15862_v54, %v15861_v0  ;;  %v1730_v2 = vcombine.high %v15862_v54, %v15861_v0  ;;  %v1882_v0 = vcombine.high %v15868_v41, %v15867_v39  ;;  %v11268_v41 = vrot.slane %v1539_v53, %v10542_v47 }
 0x2d5   : > { %15843 = vst [vmem:[#allocation72_spill] sm:$0xff] %v11189_v28  ;;  %15844 = vst [vmem:[#allocation73_spill] sm:$0xff] %v11191_v62  ;;  %v1363_v59 = vrot.slane %v1355_v12, %v15859_v49  ;;  %v1370_v57 = vrot.slane %v1356_v21, %v15859_v49  ;;  %v1865_v12 = vcombine.low %v15866_v42, %v15865_v27 }
 0x2d6   : > { %v1540_v21 = vcombine.high %v1483_v1, %v1499_v14  ;;  %v1737_v31 = vrot.slane %v1729_v43, %v15859_v49  ;;  %v1753_v1 = vrot.slane %v1745_v3, %v15859_v49  ;;  %v1744_v8 = vrot.slane %v1730_v2, %v15859_v49  ;;  %15871 = vst [vmem:[#allocation12_spill] sm:$0xff] %v11268_v41 }
 0x2d7   : > { %v1403_v63 = vcombine.low %v1347_v6, %v1363_v59  ;;  %v1404_v50 = vcombine.high %v1347_v6, %v1363_v59  ;;  %v1419_v24 = vcombine.low %v1354_v61, %v1370_v57  ;;  %v1420_v32 = vcombine.high %v1354_v61, %v1370_v57 }
 0x2d8   : > { %v11193_v44 = vpop.permute.xlu0 %4007  ;;  %v11195_v56 = vpop.permute.xlu1 %4005  ;;  %v1873_v14 = vrot.slane %v1865_v12, %v15859_v49  ;;  %v1889_v42 = vrot.slane %v1881_v9, %v15859_v49  ;;  %v11271_v39 = vrot.slane %v1540_v21, %v10542_v47  ;;  %v11274_v6 = vrot.slane %v1555_v51, %v10542_v47  ;;  %v15876_v21 = vld [vmem:[#allocation31_spill] sm:$0xff] }
 0x2d9   : > { %15845 = vst [vmem:[#allocation74_spill] sm:$0xff] %v11193_v44  ;;  %15846 = vst [vmem:[#allocation75_spill] sm:$0xff] %v11195_v56  ;;  %v11279_v61 = vrot.slane %v1556_v25, %v10542_v47  ;;  %v11282_v57 = vrot.slane %v1403_v63, %v10542_v47  ;;  %v11285_v30 = vrot.slane %v1866_v45, %v15859_v49  ;;  %v15911_v56 = vld [vmem:[#allocation37_spill] sm:$0xff] }
 0x2da   : > { %15872 = vst [vmem:[#allocation18_spill] sm:$0xff] %v11274_v6  ;;  %v1896_v53 = vrot.slane %v1882_v0, %v15859_v49  ;;  %v11293_v51 = vrot.slane %v1404_v50, %v10542_v47  ;;  %v1793_v2 = vcombine.low %v1737_v31, %v1753_v1  ;;  %v1794_v27 = vcombine.high %v1737_v31, %v1753_v1  ;;  %v15877_v0 = vld [vmem:[#allocation27_spill] sm:$0xff] }
 0x2db   : > { %15873 = vst [vmem:[#allocation14_spill] sm:$0xff] %v11279_v61  ;;  %15874 = vst [vmem:[#allocation9_spill] sm:$0xff] %v11282_v57  ;;  %v11298_v63 = vrot.slane %v1419_v24, %v10542_v47  ;;  %v1809_v12 = vcombine.low %v1744_v8, %v1760_v48  ;;  %v1810_v45 = vcombine.high %v1744_v8, %v1760_v48 }
 0x2dc   : > { %v11197_v33 = vpop.permute.xlu0 %1313  ;;  %v11199_v58 = vpop.permute.xlu1 %1703  ;;  %v1929_v9 = vcombine.low %v1873_v14, %v1889_v42  ;;  %v2493_v23 = vcombine.low %v15877_v0, %v15876_v21  ;;  %v11311_v1 = vrot.slane %v1420_v32, %v10542_v47  ;;  %v1930_v24 = vcombine.high %v1873_v14, %v1889_v42 }
 0x2dd   : > { %15875 = vst [vmem:[#allocation23_spill] sm:$0xff] %v11298_v63  ;;  %v1945_v5 = vcombine.low %v11285_v30, %v1896_v53  ;;  %v11321_v6 = vrot.slane %v1793_v2, %v10542_v47  ;;  %v11330_v14 = vrot.slane %v1809_v12, %v10542_v47  ;;  %v11333_v42 = vrot.slane %v1810_v45, %v10542_v47  ;;  %v15908_v63 = vld [vmem:[#allocation39_spill] sm:$0xff] }
 0x2de   : > { %15880 = vst [vmem:[#allocation19_spill] sm:$0xff] %v11311_v1  ;;  %v11336_v1 = vrot.slane %v1929_v9, %v10542_v47  ;;  %v2494_v45 = vcombine.high %v15877_v0, %v15876_v21  ;;  %v2510_v9 = vcombine.high %v15879_v40, %v15878_v29  ;;  %v11374_v40 = vrot.slane %v1930_v24, %v10542_v47 }
 0x2df   : > { %15882 = vst [vmem:[#allocation21_spill] sm:$0xff] %v11321_v6  ;;  %15884 = vst [vmem:[#allocation20_spill] sm:$0xff] %v11330_v14  ;;  %v11377_v0 = vrot.slane %v1945_v5, %v10542_v47  ;;  %v15915_v6 = vld [vmem:[#allocation47_spill] sm:$0xff] }
 0x2e0   : > { %v11201_v18 = vpop.permute.xlu0 %2857  ;;  %v11203_v20 = vpop.permute.xlu1 %2467  ;;  %15885 = vst [vmem:[#allocation26_spill] sm:$0xff] %v11333_v42  ;;  %15894 = vst [vmem:[#allocation29_spill] sm:$0xff] %v11374_v40  ;;  %v2508_v5 = vrot.slane %v2494_v45, %v15859_v49 }
 0x2e4   : > { %v11205_v34 = vpop.permute.xlu0 %3621  ;;  %v11207_v4 = vpop.permute.xlu1 %3619 }
 0x2e5   : > { %15847 = vst [vmem:[#allocation76_spill] sm:$0xff] %v11205_v34  ;;  %15848 = vst [vmem:[#allocation77_spill] sm:$0xff] %v11207_v4 }
 0x2e8   : > { %v11221_v52 = vpop.permute.xlu0 %4011  ;;  %v11223_v16 = vpop.permute.xlu1 %4009 }
 0x2e9   : > { %15857 = vst [vmem:[#allocation15_spill] sm:$0xff] %v11221_v52  ;;  %15858 = vst [vmem:[#allocation11_spill] sm:$0xff] %v11223_v16  ;;  %v15910_v52 = vld [vmem:[#allocation41_spill] sm:$0xff] }
 0x2ec   : > { %v11235_v46 = vpop.permute.xlu0 %1705 }
 0x2ed   : > { %15860 = vst [vmem:[#allocation17_spill] sm:$0xff] %v11235_v46  ;;  %v11237_v13 = vpop.permute.xlu1 %1315  ;;  %v1761_v8 = vcombine.low %v11144_v17, %v11235_v46  ;;  %v15893_v17 = vld [vmem:[#allocation38_spill] sm:$0xff] }
 0x2ee   : > { %v1371_v59 = vcombine.low %v11146_v38, %v11237_v13 }
 0x2ef   : > { %v11356_v42 = vrot.slane %v1761_v8, %v15859_v49  ;;  %v15896_v8 = vld [vmem:[#allocation32_spill] sm:$0xff] }
 0x2f0   : > { %v11257_v54 = vpop.permute.xlu0 %2469  ;;  %v11305_v50 = vrot.slane %v1371_v59, %v15859_v49  ;;  %v11324_v59 = vrot.slane %v1794_v27, %v10542_v47  ;;  %v11341_v27 = vrot.slane %v2493_v23, %v15859_v49 }
 0x2f1   : > { %15869 = vst [vmem:[#allocation13_spill] sm:$0xff] %v11257_v54  ;;  %v11259_v22 = vpop.permute.xlu1 %2859  ;;  %15887 = vst [vmem:[#allocation31_spill] sm:$0xff] %v11356_v42 }
 0x2f2   : > { %15870 = vst [vmem:[#allocation16_spill] sm:$0xff] %v11259_v22  ;;  %15883 = vst [vmem:[#allocation24_spill] sm:$0xff] %v11324_v59  ;;  %v15892_v59 = vld [vmem:[#allocation42_spill] sm:$0xff] }
 0x2f3   : > { %v2899_v46 = vcombine.low %v15893_v17, %v15892_v59 }
 0x2f4   : > { %v11288_v43 = vpop.permute.xlu0 %1317 }
 0x2f5   : > { %v11290_v3 = vpop.permute.xlu1 %1319  ;;  %v11410_v45 = vrot.slane %v2899_v46, %v15859_v49  ;;  %v15909_v46 = vld [vmem:[#allocation35_spill] sm:$0xff] }
 0x2f6   : > { %v1387_v25 = vcombine.low %v11162_v11, %v11290_v3  ;;  %v3019_v16 = vcombine.low %v15909_v46, %v15908_v63 }
 0x2f7   : > { %15905 = vst [vmem:[#allocation84_spill] sm:$0xff] %v11410_v45 }
 0x2f8   : > { %v11308_v31 = vrot.slane %v1387_v25, %v15859_v49  ;;  %v11316_v48 = vpop.permute.xlu0 %1709  ;;  %v1946_v25 = vcombine.high %v11285_v30, %v1896_v53  ;;  %v11344_v30 = vrot.slane %v2509_v36, %v15859_v49  ;;  %v2525_v53 = vcombine.low %v11152_v35, %v11257_v54  ;;  %v15890_v35 = vld [vmem:[#allocation40_spill] sm:$0xff] }
 0x2f9   : > { %15881 = vst [vmem:[#allocation25_spill] sm:$0xff] %v11316_v48  ;;  %v11318_v61 = vpop.permute.xlu1 %1707  ;;  %v1777_v2 = vcombine.low %v11168_v26, %v11316_v48  ;;  %v15891_v54 = vld [vmem:[#allocation36_spill] sm:$0xff]  ;;  %15895 = vst [vmem:[#allocation40_spill] sm:$0xff] %v11377_v0  ;;  %v15900_v0 = vld [vmem:[#allocation34_spill] sm:$0xff] }
 0x2fa   : > { %v1435_v32 = vcombine.low %v11305_v50, %v11308_v31  ;;  %v2557_v21 = vcombine.low %v11341_v27, %v11344_v30 }
 0x2fb   : > { %v11359_v23 = vrot.slane %v1777_v2, %v15859_v49  ;;  %v15897_v2 = vld [vmem:[#allocation28_spill] sm:$0xff] }
 0x2fc   : > { %v11349_v12 = vrot.slane %v1435_v32, %v10542_v47  ;;  %v11361_v36 = vpop.permute.xlu0 %2473  ;;  %v2883_v32 = vcombine.low %v15891_v54, %v15890_v35  ;;  %v2629_v26 = vcombine.low %v15897_v2, %v15896_v8  ;;  %v2630_v17 = vcombine.high %v15897_v2, %v15896_v8 }
 0x2fd   : > { %15888 = vst [vmem:[#allocation27_spill] sm:$0xff] %v11359_v23  ;;  %15889 = vst [vmem:[#allocation33_spill] sm:$0xff] %v11361_v36  ;;  %v11363_v14 = vpop.permute.xlu1 %2471  ;;  %v2541_v29 = vcombine.low %v11176_v10, %v11361_v36  ;;  %v1825_v48 = vcombine.low %v11356_v42, %v11359_v23  ;;  %v11388_v10 = vrot.slane %v2525_v53, %v15859_v49  ;;  %v15901_v36 = vld [vmem:[#allocation30_spill] sm:$0xff] }
 0x2fe   : > { %15886 = vst [vmem:[#allocation22_spill] sm:$0xff] %v11349_v12  ;;  %v2645_v40 = vcombine.low %v15901_v36, %v15900_v0  ;;  %v2646_v42 = vcombine.high %v15901_v36, %v15900_v0  ;;  %v2524_v53 = vrot.slane %v2510_v9, %v15859_v49  ;;  %v11415_v36 = vrot.slane %v1946_v25, %v10542_v47 }
 0x2ff   : > { %15898 = vst [vmem:[#allocation36_spill] sm:$0xff] %v11388_v10  ;;  %v11391_v24 = vrot.slane %v2541_v29, %v15859_v49  ;;  %v11399_v23 = vrot.slane %v1825_v48, %v10542_v47  ;;  %v11407_v29 = vrot.slane %v2883_v32, %v15859_v49  ;;  %v2637_v48 = vrot.slane %v2629_v26, %v15859_v49 }
 0x300   : > { %v11401_v8 = vpop.permute.xlu0 %2861  ;;  %15906 = vst [vmem:[#allocation85_spill] sm:$0xff] %v11415_v36  ;;  %v2915_v0 = vcombine.low %v11154_v55, %v11259_v22  ;;  %v11423_v32 = vrot.slane %v2557_v21, %v10542_v47  ;;  %v11433_v26 = vrot.slane %v2630_v17, %v15859_v49  ;;  %v2653_v55 = vrot.slane %v2645_v40, %v15859_v49 }
 0x301   : > { %15899 = vst [vmem:[#allocation32_spill] sm:$0xff] %v11391_v24  ;;  %15902 = vst [vmem:[#allocation28_spill] sm:$0xff] %v11399_v23  ;;  %v11403_v2 = vpop.permute.xlu1 %2863  ;;  %v2589_v59 = vcombine.low %v11388_v10, %v11391_v24  ;;  %v3035_v10 = vcombine.low %v15911_v56, %v15910_v52  ;;  %v11437_v22 = vrot.slane %v2646_v42, %v15859_v49  ;;  %v15916_v42 = vld [vmem:[#allocation43_spill] sm:$0xff]  ;;  %v15917_v56 = vld [vmem:[#allocation49_spill] sm:$0xff] }
 0x302   : > { %15903 = vst [vmem:[#allocation34_spill] sm:$0xff] %v11403_v2  ;;  %15904 = vst [vmem:[#allocation30_spill] sm:$0xff] %v11407_v29  ;;  %v2931_v21 = vcombine.low %v11186_v37, %v11403_v2  ;;  %v2558_v24 = vcombine.high %v11341_v27, %v11344_v30  ;;  %v2947_v17 = vcombine.low %v11407_v29, %v11410_v45  ;;  %v15918_v52 = vld [vmem:[#allocation45_spill] sm:$0xff] }
 0x303   : > { %15907 = vst [vmem:[#allocation86_spill] sm:$0xff] %v11423_v32  ;;  %v11430_v25 = vrot.slane %v2589_v59, %v10542_v47  ;;  %v2573_v59 = vcombine.low %v2508_v5, %v2524_v53  ;;  %v3783_v23 = vcombine.low %v15916_v42, %v15915_v6  ;;  %v3799_v37 = vcombine.low %v15918_v52, %v15917_v56  ;;  %v15922_v42 = vld [vmem:[#allocation44_spill] sm:$0xff]  ;;  %v15923_v56 = vld [vmem:[#allocation50_spill] sm:$0xff] }
 0x304   : > { %v11441_v9 = vpop.permute.xlu0 %4015  ;;  %v11456_v2 = vrot.slane %v2915_v0, %v15859_v49  ;;  %v11459_v44 = vrot.slane %v2931_v21, %v15859_v49  ;;  %v2574_v27 = vcombine.high %v2508_v5, %v2524_v53  ;;  %v11462_v30 = vrot.slane %v3019_v16, %v15859_v49  ;;  %v15924_v0 = vld [vmem:[#allocation46_spill] sm:$0xff] }
 0x305   : > { %15912 = vst [vmem:[#allocation39_spill] sm:$0xff] %v11430_v25  ;;  %15913 = vst [vmem:[#allocation35_spill] sm:$0xff] %v11441_v9  ;;  %v11443_v36 = vpop.permute.xlu1 %3625  ;;  %v11465_v29 = vrot.slane %v3035_v10, %v15859_v49  ;;  %v1507_v40 = vcombine.low %v11160_v15, %v11288_v43  ;;  %v2693_v32 = vcombine.low %v2637_v48, %v2653_v55  ;;  %v15921_v25 = vld [vmem:[#allocation48_spill] sm:$0xff] }
 0x306   : > { %15914 = vst [vmem:[#allocation87_spill] sm:$0xff] %v11443_v36  ;;  %15919 = vst [vmem:[#allocation88_spill] sm:$0xff] %v11456_v2  ;;  %v3647_v52 = vcombine.low %v15922_v42, %v15921_v25  ;;  %v3663_v6 = vcombine.low %v15924_v0, %v15923_v56  ;;  %v2979_v21 = vcombine.low %v11456_v2, %v11459_v44 }
 0x307   : > { %15920 = vst [vmem:[#allocation89_spill] sm:$0xff] %v11459_v44  ;;  %v2694_v16 = vcombine.high %v2637_v48, %v2653_v55  ;;  %v2709_v10 = vcombine.low %v11433_v26, %v11437_v22  ;;  %v11483_v42 = vrot.slane %v2947_v17, %v10542_v47  ;;  %v11486_v0 = vrot.slane %v3783_v23, %v15859_v49 }
 0x308   : > { %v1322_v5 = vpop.permute.xlu0 %1321  ;;  %v11489_v2 = vrot.slane %v3799_v37, %v15859_v49  ;;  %v11492_v44 = vrot.slane %v2979_v21, %v10542_v47  ;;  %v11495_v55 = vrot.slane %v2558_v24, %v10542_v47  ;;  %v3083_v48 = vcombine.low %v11462_v30, %v11465_v29 }
 0x309   : > { %v11475_v53 = vpop.permute.xlu1 %3623  ;;  %v1523_v9 = vcombine.low %v11197_v33, %v1322_v5  ;;  %15926 = vst [vmem:[#allocation91_spill] sm:$0xff] %v11483_v42  ;;  %15927 = vst [vmem:[#allocation92_spill] sm:$0xff] %v11486_v0  ;;  %v1515_v45 = vrot.slane %v1507_v40, %v15859_v49  ;;  %v11502_v56 = vrot.slane %v3647_v52, %v15859_v49 }
 0x30a   : > { %15925 = vst [vmem:[#allocation90_spill] sm:$0xff] %v11475_v53  ;;  %15928 = vst [vmem:[#allocation93_spill] sm:$0xff] %v11489_v2  ;;  %v11505_v23 = vrot.slane %v3663_v6, %v15859_v49  ;;  %v3051_v37 = vcombine.low %v11184_v19, %v11401_v8  ;;  %v11516_v40 = vrot.slane %v2573_v59, %v10542_v47 }
 0x30b   : > { %15929 = vst [vmem:[#allocation94_spill] sm:$0xff] %v11492_v44  ;;  %15930 = vst [vmem:[#allocation95_spill] sm:$0xff] %v11495_v55  ;;  %v1531_v17 = vrot.slane %v1523_v9, %v15859_v49  ;;  %v11519_v9 = vrot.slane %v2574_v27, %v10542_v47  ;;  %v11522_v52 = vrot.slane %v2693_v32, %v10542_v47 }
 0x30c   : > { %15931 = vst [vmem:[#allocation96_spill] sm:$0xff] %v11502_v56  ;;  %15932 = vst [vmem:[#allocation97_spill] sm:$0xff] %v11505_v23  ;;  %v11511_v21 = vpop.permute.xlu0 %2865  ;;  %v11525_v25 = vrot.slane %v2694_v16, %v10542_v47  ;;  %v11528_v19 = vrot.slane %v2709_v10, %v10542_v47  ;;  %v3847_v24 = vcombine.low %v11486_v0, %v11489_v2 }
 0x30d   : > { %v11513_v55 = vpop.permute.xlu1 %4013  ;;  %15934 = vst [vmem:[#allocation99_spill] sm:$0xff] %v11516_v40  ;;  %15935 = vst [vmem:[#allocation100_spill] sm:$0xff] %v11519_v9  ;;  %v1571_v6 = vcombine.low %v1515_v45, %v1531_v17  ;;  %v3067_v59 = vcombine.low %v11201_v18, %v11511_v21  ;;  %v3815_v42 = vcombine.low %v11189_v28, %v11443_v36 }
 0x30e   : > { %15933 = vst [vmem:[#allocation98_spill] sm:$0xff] %v11513_v55  ;;  %v11544_v10 = vrot.slane %v3083_v48, %v10542_v47  ;;  %v3711_v44 = vcombine.low %v11502_v56, %v11505_v23  ;;  %v11549_v9 = vrot.slane %v3051_v37, %v15859_v49  ;;  %v1897_v48 = vcombine.low %v11170_v7, %v11318_v61  ;;  %v15943_v23 = vld [vmem:[#allocation51_spill] sm:$0xff] }
 0x30f   : > { %v11541_v16 = vrot.slane %v1571_v6, %v10542_v47  ;;  %v11552_v27 = vrot.slane %v3067_v59, %v15859_v49  ;;  %v1388_v6 = vcombine.high %v11162_v11, %v11290_v3  ;;  %v11567_v36 = vrot.slane %v3847_v24, %v10542_v47  ;;  %v15942_v3 = vld [vmem:[#allocation55_spill] sm:$0xff] }
 0x310   : > { %15937 = vst [vmem:[#allocation102_spill] sm:$0xff] %v11544_v10  ;;  %15938 = vst [vmem:[#allocation103_spill] sm:$0xff] %v11549_v9  ;;  %v11554_v0 = vpop.permute.xlu0 %3629  ;;  %v1524_v59 = vcombine.high %v11197_v33, %v1322_v5  ;;  %v4173_v2 = vcombine.low %v15943_v23, %v15942_v3  ;;  %v1436_v28 = vcombine.high %v11305_v50, %v11308_v31 }
 0x311   : > { %15936 = vst [vmem:[#allocation101_spill] sm:$0xff] %v11541_v16  ;;  %15939 = vst [vmem:[#allocation104_spill] sm:$0xff] %v11552_v27  ;;  %v11556_v32 = vpop.permute.xlu1 %1711  ;;  %v3831_v37 = vcombine.low %v11205_v34, %v11554_v0  ;;  %v3115_v56 = vcombine.low %v11549_v9, %v11552_v27  ;;  %v11579_v40 = vrot.slane %v3815_v42, %v15859_v49 }
 0x312   : > { %15940 = vst [vmem:[#allocation105_spill] sm:$0xff] %v11554_v0  ;;  %15941 = vst [vmem:[#allocation106_spill] sm:$0xff] %v11567_v36  ;;  %v1913_v11 = vcombine.low %v11199_v58, %v11556_v32  ;;  %v1372_v33 = vcombine.high %v11146_v38, %v11237_v13  ;;  %v1508_v5 = vcombine.high %v11160_v15, %v11288_v43 }
 0x313   : > { %15944 = vst [vmem:[#allocation107_spill] sm:$0xff] %v11579_v40  ;;  %v11582_v24 = vrot.slane %v3831_v37, %v15859_v49  ;;  %v1572_v34 = vcombine.high %v1515_v45, %v1531_v17  ;;  %v11589_v0 = vrot.slane %v3115_v56, %v10542_v47  ;;  %v11594_v50 = vrot.slane %v1388_v6, %v15859_v49  ;;  %v15948_v17 = vld [vmem:[#allocation56_spill] sm:$0xff] }
 0x314   : > { %v11591_v23 = vpop.permute.xlu0 %3627  ;;  %v11597_v31 = vrot.slane %v1897_v48, %v15859_v49  ;;  %v3679_v42 = vcombine.low %v11191_v62, %v11475_v53  ;;  %v11604_v15 = vrot.slane %v1524_v59, %v15859_v49  ;;  %v11609_v13 = vrot.slane %v1913_v11, %v15859_v49  ;;  %v15949_v6 = vld [vmem:[#allocation52_spill] sm:$0xff] }
 0x315   : > { %15945 = vst [vmem:[#allocation108_spill] sm:$0xff] %v11582_v24  ;;  %15946 = vst [vmem:[#allocation109_spill] sm:$0xff] %v11589_v0  ;;  %v3879_v38 = vcombine.low %v11579_v40, %v11582_v24  ;;  %v3695_v43 = vcombine.low %v11207_v4, %v11591_v23  ;;  %v11613_v45 = vpop.permute.xlu1 %2475  ;;  %v4037_v48 = vcombine.low %v15949_v6, %v15948_v17  ;;  %v15963_v0 = vld [vmem:[#allocation74_spill] sm:$0xff] }
 0x316   : > { %15947 = vst [vmem:[#allocation110_spill] sm:$0xff] %v11591_v23  ;;  %v11618_v37 = vrot.slane %v1436_v28, %v10542_v47  ;;  %v2661_v59 = vcombine.low %v11178_v60, %v11363_v14  ;;  %v1386_v11 = vrot.slane %v1372_v33, %v15859_v49  ;;  %v1522_v56 = vrot.slane %v1508_v5, %v15859_v49  ;;  %v15954_v5 = vld [vmem:[#allocation53_spill] sm:$0xff]  ;;  %v15956_v23 = vld [vmem:[#allocation54_spill] sm:$0xff] }
 0x317   : > { %v11623_v3 = vrot.slane %v3879_v38, %v10542_v47  ;;  %v11628_v40 = vrot.slane %v1572_v34, %v10542_v47  ;;  %v1961_v24 = vcombine.low %v11597_v31, %v11609_v13  ;;  %v11633_v6 = vrot.slane %v3679_v42, %v15859_v49  ;;  %v15953_v38 = vld [vmem:[#allocation57_spill] sm:$0xff]  ;;  %v15955_v42 = vld [vmem:[#allocation58_spill] sm:$0xff] }
 0x318   : > { %v11638_v17 = vrot.slane %v3695_v43, %v15859_v49  ;;  %v2677_v33 = vcombine.low %v11203_v20, %v11613_v45  ;;  %v4189_v62 = vcombine.low %v15954_v5, %v15953_v38  ;;  %v1451_v34 = vcombine.low %v1386_v11, %v11594_v50 }
 0x319   : > { %15950 = vst [vmem:[#allocation111_spill] sm:$0xff] %v11623_v3  ;;  %15951 = vst [vmem:[#allocation112_spill] sm:$0xff] %v11633_v6  ;;  %v1587_v53 = vcombine.low %v1522_v56, %v11604_v15  ;;  %v11647_v4 = vrot.slane %v1961_v24, %v10542_v47  ;;  %v4053_v10 = vcombine.low %v15956_v23, %v15955_v42 }
 0x31a   : > { %15952 = vst [vmem:[#allocation113_spill] sm:$0xff] %v11638_v17  ;;  %v11652_v28 = vrot.slane %v2661_v59, %v15859_v49  ;;  %v3743_v43 = vcombine.low %v11633_v6, %v11638_v17  ;;  %v1469_v36 = vcombine.low %v11293_v51, %v11618_v37  ;;  %v11661_v5 = vrot.slane %v2677_v33, %v15859_v49  ;;  %v15962_v17 = vld [vmem:[#allocation35_spill] sm:$0xff] }
 0x31b   : > { %v1605_v24 = vcombine.low %v11271_v39, %v11628_v40  ;;  %v1604_v23 = vcombine.high %v11268_v41, %v11541_v16  ;;  %v11668_v59 = vrot.slane %v3711_v44, %v10542_v47  ;;  %v11671_v42 = vrot.slane %v4173_v2, %v15859_v49  ;;  %v11686_v41 = vpop.permute.xlu0 %4019  ;;  %v11688_v2 = vpop.permute.xlu1 %4017 }
 0x31c   : > { %v11674_v38 = vrot.slane %v3743_v43, %v10542_v47  ;;  %v1468_v3 = vcombine.high %v11282_v57, %v11349_v12  ;;  %v11679_v33 = vrot.slane %v1451_v34, %v10542_v47  ;;  %v11682_v6 = vrot.slane %v1587_v53, %v10542_v47  ;;  %15960 = vst [vmem:[#allocation117_spill] sm:$0xff] %v11688_v2 }
 0x31d   : > { %15957 = vst [vmem:[#allocation114_spill] sm:$0xff] %v11668_v59  ;;  %15958 = vst [vmem:[#allocation115_spill] sm:$0xff] %v11671_v42  ;;  %v2725_v16 = vcombine.low %v11652_v28, %v11661_v5  ;;  %v9053_v44 = vpack.i.bf16 %v1605_v24, %v1469_v36  ;;  %v11691_v43 = vrot.slane %v4189_v62, %v15859_v49  ;;  %v15966_v36 = vld [vmem:[#allocation75_spill] sm:$0xff] }
 0x31e   : > { %15959 = vst [vmem:[#allocation116_spill] sm:$0xff] %v11674_v38  ;;  %v4205_v12 = vcombine.low %v15963_v0, %v15962_v17  ;;  %v9048_v57 = vpack.i.bf16 %v1604_v23, %v1468_v3  ;;  %v11698_v53 = vrot.slane %v4037_v48, %v15859_v49  ;;  %v11701_v9 = vrot.slane %v4053_v10, %v15859_v49  ;;  %v15968_v10 = vld [vmem:[#allocation15_spill] sm:$0xff] }
 0x31f   : > { %15961 = vst [vmem:[#allocation118_spill] sm:$0xff] %v11691_v43  ;;  %v4069_v24 = vcombine.low %v15966_v36, %v11513_v55  ;;  %v11706_v27 = vrot.slane %v2725_v16, %v10542_v47  ;;  %9054 = vrot.lane.b32.xlu0 %v9053_v44, %s15532_s12  ;;  %v15967_v62 = vcombine.high %v15909_v46, %v15908_v63  ;;  %v15969_v48 = vld [vmem:[#allocation11_spill] sm:$0xff]  ;;  %v15971_v46 = vld [vmem:[#allocation18_spill] sm:$0xff]  ;;  %v15973_v44 = vld [vmem:[#allocation37_spill] sm:$0xff] }
 0x320   : > { %15964 = vst [vmem:[#allocation119_spill] sm:$0xff] %v11698_v53  ;;  %15965 = vst [vmem:[#allocation120_spill] sm:$0xff] %v11701_v9  ;;  %v1452_v23 = vcombine.high %v1386_v11, %v11594_v50  ;;  %9049 = vrot.lane.b32.xlu1 %v9048_v57, %s9698_s18  ;;  %v4221_v3 = vcombine.low %v15968_v10, %v11686_v41  ;;  %v4085_v36 = vcombine.low %v15969_v48, %v11688_v2  ;;  %v15970_v55 = vld [vmem:[#allocation23_spill] sm:$0xff] }
 0x321   : > { %v11713_v34 = vrot.slane %v15967_v62, %v15859_v49  ;;  %v1588_v16 = vcombine.high %v1522_v56, %v11604_v15  ;;  %v1471_v63 = vcombine.low %v15970_v55, %v11679_v33  ;;  %v1607_v62 = vcombine.low %v15971_v46, %v11682_v6  ;;  %v15972_v56 = vld [vmem:[#allocation41_spill] sm:$0xff] }
 0x322   : > { %v4237_v57 = vcombine.low %v11671_v42, %v11691_v43  ;;  %v11731_v50 = vrot.slane %v4205_v12, %v15859_v49  ;;  %v11734_v11 = vrot.slane %v4221_v3, %v15859_v49  ;;  %v11737_v15 = vrot.slane %v4085_v36, %v15859_v49  ;;  %v15974_v42 = vld [vmem:[#allocation42_spill] sm:$0xff] }
 0x323   : > { %v3036_v48 = vcombine.high %v15973_v44, %v15972_v56  ;;  %v4101_v2 = vcombine.low %v11698_v53, %v11701_v9  ;;  %v11744_v0 = vrot.slane %v4069_v24, %v15859_v49  ;;  %v9063_v17 = vpack.i.bf16 %v1607_v62, %v1471_v63  ;;  %v15975_v43 = vld [vmem:[#allocation38_spill] sm:$0xff]  ;;  %v15976_v56 = vld [vmem:[#allocation25_spill] sm:$0xff]  ;;  %v15980_v62 = vld [vmem:[#allocation19_spill] sm:$0xff] }
 0x324   : > { %v2900_v12 = vcombine.high %v15975_v43, %v15974_v42  ;;  %v1914_v3 = vcombine.high %v11199_v58, %v11556_v32  ;;  %v4269_v36 = vcombine.low %v11731_v50, %v11734_v11  ;;  %v1606_v10 = vcombine.high %v11271_v39, %v11628_v40  ;;  %v15977_v53 = vld [vmem:[#allocation70_spill] sm:$0xff] }
 0x325   : > { %v1466_v44 = vrot.slane %v1452_v23, %v10542_v47  ;;  %v1778_v9 = vcombine.high %v15977_v53, %v15976_v56  ;;  %v1602_v24 = vrot.slane %v1588_v16, %v10542_v47  ;;  %v4133_v63 = vcombine.low %v11744_v0, %v11737_v15  ;;  %9064 = vrot.lane.b32.xlu0 %v9063_v17, %s15528_s20  ;;  %v15978_v53 = vld [vmem:[#allocation17_spill] sm:$0xff]  ;;  %v15979_v17 = vld [vmem:[#allocation68_spill] sm:$0xff] }
 0x326   : > { %v11762_v58 = vrot.slane %v4237_v57, %v10542_v47  ;;  %v1898_v32 = vcombine.high %v11170_v7, %v11318_v61  ;;  %v11767_v39 = vrot.slane %v4269_v36, %v10542_v47  ;;  %v1470_v40 = vcombine.high %v11293_v51, %v11618_v37  ;;  %v15981_v36 = vld [vmem:[#allocation14_spill] sm:$0xff] }
 0x327   : > { %v11772_v42 = vrot.slane %v3036_v48, %v15859_v49  ;;  %v11775_v43 = vrot.slane %v4101_v2, %v10542_v47  ;;  %v1762_v23 = vcombine.high %v15979_v17, %v15978_v53  ;;  %v11780_v16 = vrot.slane %v4133_v63, %v10542_v47  ;;  %v15982_v63 = vld [vmem:[#allocation27_spill] sm:$0xff]  ;;  %v15992_v2 = vld [vmem:[#allocation66_spill] sm:$0xff] }
 0x328   : > { %v1928_v7 = vrot.slane %v1914_v3, %v15859_v49  ;;  %v1962_v61 = vcombine.high %v11597_v31, %v11609_v13  ;;  %v9058_v37 = vpack.i.bf16 %v1606_v10, %v1470_v40  ;;  %v1792_v48 = vrot.slane %v1778_v9, %v15859_v49  ;;  %v15983_v53 = vld [vmem:[#allocation31_spill] sm:$0xff] }
 0x329   : > { %v1473_v57 = vcombine.low %v15980_v62, %v1466_v44  ;;  %v1609_v56 = vcombine.low %v15981_v36, %v1602_v24  ;;  %v1826_v17 = vcombine.high %v15983_v53, %v15982_v63  ;;  %v1912_v3 = vrot.slane %v1898_v32, %v15859_v49 }
 0x32a   : > { %9059 = vrot.lane.b32.xlu1 %v9058_v37, %s15536_s21  ;;  %v1472_v31 = vcombine.high %v15970_v55, %v11679_v33  ;;  %v1608_v9 = vcombine.high %v15971_v46, %v11682_v6  ;;  %v15984_v13 = vcombine.high %v11433_v26, %v11437_v22  ;;  %v15985_v40 = vcombine.high %v15891_v54, %v15890_v35 }
 0x32b   : > { %v1776_v32 = vrot.slane %v1762_v23, %v15859_v49  ;;  %v9073_v37 = vpack.i.bf16 %v1609_v56, %v1473_v57  ;;  %v11814_v55 = vrot.slane %v2900_v12, %v15859_v49  ;;  %v1976_v6 = vrot.slane %v1962_v61, %v10542_v47  ;;  %v15986_v23 = vld [vmem:[#allocation28_spill] sm:$0xff]  ;;  %v15987_v61 = vld [vmem:[#allocation21_spill] sm:$0xff] }
 0x32c   : > { %v11804_v10 = vrot.slane %v15984_v13, %v10542_v47  ;;  %v11810_v63 = vrot.slane %v15985_v40, %v15859_v49  ;;  %v1977_v33 = vcombine.low %v1912_v3, %v1928_v7  ;;  %v9068_v46 = vpack.i.bf16 %v1608_v9, %v1472_v31  ;;  %v15988_v56 = vld [vmem:[#allocation84_spill] sm:$0xff]  ;;  %v15989_v31 = vld [vmem:[#allocation30_spill] sm:$0xff] }
 0x32d   : > { %v3084_v22 = vcombine.high %v11462_v30, %v11465_v29  ;;  %v3099_v26 = vcombine.low %v11713_v34, %v11772_v42  ;;  %v1841_v53 = vcombine.low %v1776_v32, %v1792_v48  ;;  %9074 = vrot.lane.b32.xlu0 %v9073_v37, %s15526_s25  ;;  %v1610_v35 = vcombine.high %v15981_v36, %v1602_v24 }
 0x32e   : > { %v1840_v54 = vrot.slane %v1826_v17, %v10542_v47  ;;  %9069 = vrot.lane.b32.xlu1 %v9068_v46, %s15534_s26  ;;  %v1474_v12 = vcombine.high %v15980_v62, %v1466_v44  ;;  %v1858_v57 = vcombine.high %v15987_v61, %v15986_v23  ;;  %v1994_v29 = vcombine.high %v11336_v1, %v11647_v4  ;;  %v15990_v62 = vld [vmem:[#allocation29_spill] sm:$0xff] }
 0x32f   : > { %v3100_v30 = vcombine.high %v11713_v34, %v11772_v42  ;;  %v2948_v9 = vcombine.high %v15989_v31, %v15988_v56  ;;  %v1978_v13 = vcombine.high %v1912_v3, %v1928_v7  ;;  %v2678_v24 = vcombine.high %v11203_v20, %v11613_v45  ;;  %v15991_v46 = vld [vmem:[#allocation33_spill] sm:$0xff]  ;;  %v15993_v20 = vld [vmem:[#allocation24_spill] sm:$0xff] }
 0x330   : > { %v1985_v36 = vrot.slane %v1977_v33, %v10542_v47  ;;  %v9078_v17 = vpack.i.bf16 %v1610_v35, %v1474_v12  ;;  %v9083_v44 = vpack.i.bf16 %v1994_v29, %v1858_v57  ;;  %v1995_v40 = vcombine.low %v15990_v62, %v1976_v6  ;;  %v15994_v33 = vld [vmem:[#allocation13_spill] sm:$0xff] }
 0x331   : > { %v1842_v37 = vcombine.high %v1776_v32, %v1792_v48  ;;  %v2542_v51 = vcombine.high %v15992_v2, %v15991_v46  ;;  %v2662_v34 = vcombine.high %v11178_v60, %v11363_v14  ;;  %v1996_v42 = vcombine.high %v15990_v62, %v1976_v6  ;;  %v15995_v48 = vld [vmem:[#allocation69_spill] sm:$0xff] }
 0x332   : > { %v1849_v7 = vrot.slane %v1841_v53, %v10542_v47  ;;  %9079 = vrot.lane.b32.xlu1 %v9078_v17, %s15530_s28  ;;  %9084 = vrot.lane.b32.xlu0 %v9083_v44, %s9698_s18  ;;  %v1859_v45 = vcombine.low %v15993_v20, %v1840_v54  ;;  %v1860_v3 = vcombine.high %v15993_v20, %v1840_v54  ;;  %v15996_v53 = vld [vmem:[#allocation40_spill] sm:$0xff] }
 0x333   : > { %v2526_v32 = vcombine.high %v15995_v48, %v15994_v33  ;;  %v1992_v2 = vrot.slane %v1978_v13, %v10542_v47  ;;  %v2692_v35 = vrot.slane %v2678_v24, %v15859_v49  ;;  %v2726_v60 = vcombine.high %v11652_v28, %v11661_v5  ;;  %v15997_v13 = vld [vmem:[#allocation32_spill] sm:$0xff]  ;;  %v16001_v33 = vld [vmem:[#allocation26_spill] sm:$0xff] }
 0x334   : > { %v9088_v14 = vpack.i.bf16 %v1995_v40, %v1859_v45  ;;  %v9093_v6 = vpack.i.bf16 %v1996_v42, %v1860_v3  ;;  %v1997_v12 = vcombine.low %v15996_v53, %v1985_v36  ;;  %v1998_v57 = vcombine.high %v15996_v53, %v1985_v36  ;;  %v15998_v24 = vld [vmem:[#allocation36_spill] sm:$0xff] }
 0x335   : > { %v2963_v29 = vcombine.low %v11810_v63, %v11814_v55  ;;  %v1856_v54 = vrot.slane %v1842_v37, %v10542_v47  ;;  %v2556_v56 = vrot.slane %v2542_v51, %v15859_v49  ;;  %v2676_v31 = vrot.slane %v2662_v34, %v15859_v49  ;;  %v15999_v28 = vld [vmem:[#allocation20_spill] sm:$0xff]  ;;  %v16000_v34 = vld [vmem:[#allocation85_spill] sm:$0xff] }
 0x336   : > { %v2590_v17 = vcombine.high %v15998_v24, %v15997_v13  ;;  %9089 = vrot.lane.b32.xlu1 %v9088_v14, %s15532_s12  ;;  %9094 = vrot.lane.b32.xlu0 %v9093_v6, %s15536_s21  ;;  %v1861_v5 = vcombine.low %v15999_v28, %v1849_v7  ;;  %v1862_v36 = vcombine.high %v15999_v28, %v1849_v7  ;;  %v16005_v24 = vld [vmem:[#allocation44_spill] sm:$0xff] }
 0x337   : > { %v2964_v44 = vcombine.high %v11810_v63, %v11814_v55  ;;  %v2540_v62 = vrot.slane %v2526_v32, %v15859_v49  ;;  %v2740_v51 = vrot.slane %v2726_v60, %v10542_v47  ;;  %v2741_v40 = vcombine.low %v2676_v31, %v2692_v35 }
 0x338   : > { %v9098_v37 = vpack.i.bf16 %v1997_v12, %v1861_v5  ;;  %v9103_v46 = vpack.i.bf16 %v1998_v57, %v1862_v36  ;;  %v1999_v42 = vcombine.low %v16000_v34, %v1992_v2  ;;  %v2000_v20 = vcombine.high %v16000_v34, %v1992_v2  ;;  %v16002_v2 = vld [vmem:[#allocation47_spill] sm:$0xff] }
 0x339   : > { %v11874_v45 = vrot.slane %v3084_v22, %v10542_v47  ;;  %v11877_v3 = vrot.slane %v3099_v26, %v10542_v47  ;;  %v11880_v7 = vrot.slane %v3100_v30, %v10542_v47  ;;  %v2605_v63 = vcombine.low %v2540_v62, %v2556_v56  ;;  %v16003_v26 = vld [vmem:[#allocation43_spill] sm:$0xff] }
 0x33a   : > { %v2604_v55 = vrot.slane %v2590_v17, %v10542_v47  ;;  %9099 = vrot.lane.b32.xlu1 %v9098_v37, %s15528_s20  ;;  %9104 = vrot.lane.b32.xlu0 %v9103_v46, %s15534_s26  ;;  %v1863_v48 = vcombine.low %v16001_v33, %v1856_v54  ;;  %v1864_v32 = vcombine.high %v16001_v33, %v1856_v54  ;;  %v16007_v36 = vld [vmem:[#allocation39_spill] sm:$0xff]  ;;  %v16010_v46 = vld [vmem:[#allocation45_spill] sm:$0xff] }
 0x33b   : > { %v11888_v22 = vrot.slane %v2948_v9, %v10542_v47  ;;  %v3784_v60 = vcombine.high %v16003_v26, %v16002_v2  ;;  %v2742_v14 = vcombine.high %v2676_v31, %v2692_v35  ;;  %v2749_v30 = vrot.slane %v2741_v40, %v10542_v47  ;;  %v16004_v9 = vld [vmem:[#allocation48_spill] sm:$0xff]  ;;  %v16006_v31 = vld [vmem:[#allocation95_spill] sm:$0xff]  ;;  %v16008_v40 = vld [vmem:[#allocation86_spill] sm:$0xff] }
 0x33c   : > { %v9108_v6 = vpack.i.bf16 %v1999_v42, %v1863_v48  ;;  %v9113_v53 = vpack.i.bf16 %v2000_v20, %v1864_v32  ;;  %v2759_v12 = vcombine.low %v11525_v25, %v2740_v51  ;;  %v2758_v57 = vcombine.high %v11522_v52, %v11706_v27  ;;  %v16011_v32 = vld [vmem:[#allocation50_spill] sm:$0xff] }
 0x33d   : > { %v11897_v13 = vrot.slane %v2963_v29, %v10542_v47  ;;  %v11900_v54 = vrot.slane %v2964_v44, %v10542_v47  ;;  %v3648_v17 = vcombine.high %v16005_v24, %v16004_v9  ;;  %v2606_v28 = vcombine.high %v2540_v62, %v2556_v56  ;;  %v16009_v44 = vld [vmem:[#allocation49_spill] sm:$0xff]  ;;  %v16012_v2 = vld [vmem:[#allocation46_spill] sm:$0xff]  ;;  %v16015_v9 = vld [vmem:[#allocation71_spill] sm:$0xff] }
 0x33e   : > { %v2613_v35 = vrot.slane %v2605_v63, %v10542_v47  ;;  %9109 = vrot.lane.b32.xlu1 %v9108_v6, %s15526_s25  ;;  %9114 = vrot.lane.b32.xlu0 %v9113_v53, %s15530_s28  ;;  %v2623_v5 = vcombine.low %v16006_v31, %v2604_v55  ;;  %v2622_v37 = vcombine.high %v16008_v40, %v16007_v36  ;;  %v16014_v53 = vld [vmem:[#allocation34_spill] sm:$0xff]  ;;  %v16018_v24 = vld [vmem:[#allocation63_spill] sm:$0xff] }
 0x33f   : > { %v11911_v29 = vrot.slane %v3784_v60, %v15859_v49  ;;  %v3800_v34 = vcombine.high %v16010_v46, %v16009_v44  ;;  %v3068_v56 = vcombine.high %v11201_v18, %v11511_v21  ;;  %v2756_v62 = vrot.slane %v2742_v14, %v10542_v47  ;;  %v16013_v60 = vld [vmem:[#allocation67_spill] sm:$0xff] }
 0x340   : > { %v9123_v42 = vpack.i.bf16 %v2759_v12, %v2623_v5  ;;  %v9118_v20 = vpack.i.bf16 %v2758_v57, %v2622_v37  ;;  %v2761_v63 = vcombine.low %v11528_v19, %v2749_v30  ;;  %v2760_v33 = vcombine.high %v11525_v25, %v2740_v51  ;;  %v16016_v14 = vld [vmem:[#allocation99_spill] sm:$0xff]  ;;  %v16017_v57 = vld [vmem:[#allocation16_spill] sm:$0xff] }
 0x341   : > { %v11921_v48 = vrot.slane %v3648_v17, %v15859_v49  ;;  %v3664_v26 = vcombine.high %v16012_v2, %v16011_v32  ;;  %v3052_v6 = vcombine.high %v16013_v60, %v11401_v8  ;;  %v2932_v18 = vcombine.high %v16015_v9, %v16014_v53  ;;  %v16019_v5 = vld [vmem:[#allocation104_spill] sm:$0xff]  ;;  %v16020_v37 = vld [vmem:[#allocation103_spill] sm:$0xff]  ;;  %v16021_v32 = vld [vmem:[#allocation93_spill] sm:$0xff] }
 0x342   : > { %v2620_v21 = vrot.slane %v2606_v28, %v10542_v47  ;;  %9124 = vrot.lane.b32.xlu1 %v9123_v42, %s15532_s12  ;;  %9119 = vrot.lane.b32.xlu0 %v9118_v20, %s9698_s18  ;;  %v2625_v25 = vcombine.low %v16016_v14, %v2613_v35  ;;  %v2624_v51 = vcombine.high %v16006_v31, %v2604_v55  ;;  %v16022_v2 = vld [vmem:[#allocation92_spill] sm:$0xff] }
 0x343   : > { %v11935_v12 = vrot.slane %v3800_v34, %v15859_v49  ;;  %v2916_v17 = vcombine.high %v16018_v24, %v16017_v57  ;;  %v3082_v8 = vrot.slane %v3068_v56, %v15859_v49  ;;  %v3116_v44 = vcombine.high %v16020_v37, %v16019_v5  ;;  %v16023_v56 = vld [vmem:[#allocation89_spill] sm:$0xff]  ;;  %v16024_v53 = vld [vmem:[#allocation88_spill] sm:$0xff]  ;;  %v16027_v24 = vld [vmem:[#allocation102_spill] sm:$0xff] }
 0x344   : > { %v9133_v28 = vpack.i.bf16 %v2761_v63, %v2625_v25  ;;  %v9128_v46 = vpack.i.bf16 %v2760_v33, %v2624_v51  ;;  %v2763_v42 = vcombine.low %v11804_v10, %v2756_v62  ;;  %v2762_v20 = vcombine.high %v11528_v19, %v2749_v30  ;;  %v16025_v63 = vld [vmem:[#allocation100_spill] sm:$0xff]  ;;  %v16026_v57 = vld [vmem:[#allocation109_spill] sm:$0xff] }
 0x345   : > { %v3848_v55 = vcombine.high %v16022_v2, %v16021_v32  ;;  %v11947_v31 = vrot.slane %v3664_v26, %v15859_v49  ;;  %v3066_v34 = vrot.slane %v3052_v6, %v15859_v49  ;;  %v2946_v60 = vrot.slane %v2932_v18, %v15859_v49 }
 0x346   : > { %v2980_v9 = vcombine.high %v16024_v53, %v16023_v56  ;;  %9134 = vrot.lane.b32.xlu1 %v9133_v28, %s15528_s20  ;;  %9129 = vrot.lane.b32.xlu0 %v9128_v46, %s15536_s21  ;;  %v2627_v33 = vcombine.low %v16025_v63, %v2620_v21  ;;  %v2626_v19 = vcombine.high %v16016_v14, %v2613_v35  ;;  %v16028_v46 = vld [vmem:[#allocation97_spill] sm:$0xff]  ;;  %v16029_v35 = vld [vmem:[#allocation96_spill] sm:$0xff]  ;;  %v16032_v56 = vld [vmem:[#allocation110_spill] sm:$0xff] }
 0x347   : > { %v3863_v30 = vcombine.low %v11911_v29, %v11935_v12  ;;  %v2930_v26 = vrot.slane %v2916_v17, %v15859_v49  ;;  %v3130_v6 = vrot.slane %v3116_v44, %v10542_v47  ;;  %v3131_v25 = vcombine.low %v3066_v34, %v3082_v8  ;;  %v16033_v53 = vld [vmem:[#allocation77_spill] sm:$0xff] }
 0x348   : > { %v9143_v18 = vpack.i.bf16 %v2763_v42, %v2627_v33  ;;  %v9138_v51 = vpack.i.bf16 %v2762_v20, %v2626_v19  ;;  %v3148_v5 = vcombine.high %v16027_v24, %v16026_v57  ;;  %v2764_v37 = vcombine.high %v11804_v10, %v2756_v62  ;;  %v16030_v42 = vld [vmem:[#allocation94_spill] sm:$0xff]  ;;  %v16031_v20 = vld [vmem:[#allocation91_spill] sm:$0xff] }
 0x349   : > { %v3864_v28 = vcombine.high %v11911_v29, %v11935_v12  ;;  %v3712_v14 = vcombine.high %v16029_v35, %v16028_v46  ;;  %v3727_v32 = vcombine.low %v11921_v48, %v11947_v31  ;;  %v2995_v17 = vcombine.low %v2930_v26, %v2946_v60 }
 0x34a   : > { %v2994_v44 = vrot.slane %v2980_v9, %v10542_v47  ;;  %9144 = vrot.lane.b32.xlu1 %v9143_v18, %s15526_s25  ;;  %9139 = vrot.lane.b32.xlu0 %v9138_v51, %s15534_s26  ;;  %v3012_v2 = vcombine.high %v16031_v20, %v16030_v42  ;;  %v2628_v10 = vcombine.high %v16025_v63, %v2620_v21  ;;  %v16034_v21 = vld [vmem:[#allocation90_spill] sm:$0xff]  ;;  %v16035_v63 = vld [vmem:[#allocation73_spill] sm:$0xff] }
 0x34b   : > { %v3728_v29 = vcombine.high %v11921_v48, %v11947_v31  ;;  %v3132_v62 = vcombine.high %v3066_v34, %v3082_v8  ;;  %v3139_v12 = vrot.slane %v3131_v25, %v10542_v47  ;;  %v3696_v33 = vcombine.high %v16033_v53, %v16032_v56  ;;  %v16036_v48 = vld [vmem:[#allocation105_spill] sm:$0xff]  ;;  %v16037_v8 = vld [vmem:[#allocation76_spill] sm:$0xff] }
 0x34c   : > { %v9153_v19 = vpack.i.bf16 %v3148_v5, %v3012_v2  ;;  %v9148_v9 = vpack.i.bf16 %v2764_v37, %v2628_v10  ;;  %v3150_v18 = vcombine.high %v11874_v45, %v3130_v6  ;;  %v3149_v51 = vcombine.low %v11874_v45, %v3130_v6  ;;  %v16038_v6 = vld [vmem:[#allocation87_spill] sm:$0xff]  ;;  %v16040_v37 = vld [vmem:[#allocation113_spill] sm:$0xff]  ;;  %v16041_v2 = vld [vmem:[#allocation112_spill] sm:$0xff] }
 0x34d   : > { %v11984_v46 = vrot.slane %v3848_v55, %v10542_v47  ;;  %v2996_v35 = vcombine.high %v2930_v26, %v2946_v60  ;;  %v3680_v42 = vcombine.high %v16035_v63, %v16034_v21  ;;  %v3832_v31 = vcombine.high %v16037_v8, %v16036_v48  ;;  %v16039_v55 = vld [vmem:[#allocation72_spill] sm:$0xff] }
 0x34e   : > { %v3003_v34 = vrot.slane %v2995_v17, %v10542_v47  ;;  %9154 = vrot.lane.b32.xlu1 %v9153_v19, %s9698_s18  ;;  %9149 = vrot.lane.b32.xlu0 %v9148_v9, %s15530_s28  ;;  %v3014_v25 = vcombine.high %v11888_v22, %v2994_v44  ;;  %v3013_v45 = vcombine.low %v11888_v22, %v2994_v44  ;;  %v16042_v21 = vld [vmem:[#allocation108_spill] sm:$0xff] }
 0x34f   : > { %v3816_v5 = vcombine.high %v16039_v55, %v16038_v6  ;;  %v3146_v60 = vrot.slane %v3132_v62, %v10542_v47  ;;  %v3710_v26 = vrot.slane %v3696_v33, %v15859_v49  ;;  %v3744_v10 = vcombine.high %v16041_v2, %v16040_v37  ;;  %v16043_v33 = vld [vmem:[#allocation107_spill] sm:$0xff] }
 0x350   : > { %v9163_v56 = vpack.i.bf16 %v3150_v18, %v3014_v25  ;;  %v9158_v17 = vpack.i.bf16 %v3149_v51, %v3013_v45  ;;  %v3152_v53 = vcombine.high %v11877_v3, %v3139_v12  ;;  %v3151_v19 = vcombine.low %v11877_v3, %v3139_v12 }
 0x351   : > { %v12004_v9 = vrot.slane %v3863_v30, %v10542_v47  ;;  %v3010_v22 = vrot.slane %v2996_v35, %v10542_v47  ;;  %v3694_v44 = vrot.slane %v3680_v42, %v15859_v49  ;;  %v3846_v62 = vrot.slane %v3832_v31, %v15859_v49  ;;  %v12020_v35 = vpop.permute.xlu0 %8944 }
 0x352   : > { %v3880_v63 = vcombine.high %v16043_v33, %v16042_v21  ;;  %9164 = vrot.lane.b32.xlu1 %v9163_v56, %s15536_s21  ;;  %9159 = vrot.lane.b32.xlu0 %v9158_v17, %s15532_s12  ;;  %v3016_v18 = vcombine.high %v11897_v13, %v3003_v34  ;;  %v3015_v3 = vcombine.low %v11897_v13, %v3003_v34  ;;  %v16045_v34 = vld [vmem:[#allocation51_spill] sm:$0xff] }
 0x353   : > { %v12016_v30 = vrot.slane %v3864_v28, %v10542_v47  ;;  %v3830_v12 = vrot.slane %v3816_v5, %v15859_v49  ;;  %v3758_v42 = vrot.slane %v3744_v10, %v10542_v47  ;;  %v3759_v51 = vcombine.low %v3694_v44, %v3710_v26  ;;  %v16044_v28 = vld [vmem:[#allocation55_spill] sm:$0xff] }
 0x354   : > { %v9173_v48 = vpack.i.bf16 %v3152_v53, %v3016_v18  ;;  %v9168_v8 = vpack.i.bf16 %v3151_v19, %v3015_v3  ;;  %v3154_v31 = vcombine.high %v11880_v7, %v3146_v60  ;;  %v3153_v25 = vcombine.low %v11880_v7, %v3146_v60 }
 0x355   : > { %v3726_v45 = vrot.slane %v3712_v14, %v10542_v47  ;;  %v12026_v13 = vrot.slane %v3727_v32, %v10542_v47  ;;  %v4174_v6 = vcombine.high %v16045_v34, %v16044_v28  ;;  %v3895_v55 = vcombine.low %v3830_v12, %v3846_v62  ;;  %v16046_v14 = vld [vmem:[#allocation56_spill] sm:$0xff]  ;;  %v12049_v3 = vpop.permute.xlu0 %8954  ;;  %v16054_v28 = vld [vmem:[#allocation74_spill] sm:$0xff] }
 0x356   : > { %v3894_v5 = vrot.slane %v3880_v63, %v10542_v47  ;;  %9174 = vrot.lane.b32.xlu1 %v9173_v48, %s15534_s26  ;;  %9169 = vrot.lane.b32.xlu0 %v9168_v8, %s15528_s20  ;;  %v3018_v37 = vcombine.high %v11900_v54, %v3010_v22  ;;  %v3017_v2 = vcombine.low %v11900_v54, %v3010_v22  ;;  %v16047_v32 = vld [vmem:[#allocation52_spill] sm:$0xff]  ;;  %v16048_v63 = vld [vmem:[#allocation57_spill] sm:$0xff]  ;;  %v16051_v48 = vld [vmem:[#allocation111_spill] sm:$0xff] }
 0x357   : > { %v12036_v7 = vrot.slane %v3728_v29, %v10542_v47  ;;  %v4038_v60 = vcombine.high %v16047_v32, %v16046_v14  ;;  %v3760_v10 = vcombine.high %v3694_v44, %v3710_v26  ;;  %v3767_v56 = vrot.slane %v3759_v51, %v10542_v47  ;;  %v16049_v54 = vld [vmem:[#allocation53_spill] sm:$0xff]  ;;  %v16050_v26 = vld [vmem:[#allocation15_spill] sm:$0xff]  ;;  %v12053_v51 = vpop.permute.xlu1 %8949  ;;  %v16052_v8 = vld [vmem:[#allocation106_spill] sm:$0xff] }
 0x358   : > { %v9183_v17 = vpack.i.bf16 %v3154_v31, %v3018_v37  ;;  %v9178_v53 = vpack.i.bf16 %v3153_v25, %v3017_v2  ;;  %v3776_v19 = vcombine.high %v11668_v59, %v11674_v38  ;;  %v3777_v21 = vcombine.low %v3726_v45, %v3758_v42  ;;  %v16060_v38 = vld [vmem:[#allocation75_spill] sm:$0xff] }
 0x359   : > { %v12044_v33 = vrot.slane %v4174_v6, %v15859_v49  ;;  %v4190_v22 = vcombine.high %v16049_v54, %v16048_v63  ;;  %v3896_v29 = vcombine.high %v3830_v12, %v3846_v62  ;;  %v3903_v18 = vrot.slane %v3895_v55, %v10542_v47  ;;  %v16053_v12 = vld [vmem:[#allocation35_spill] sm:$0xff]  ;;  %v16057_v63 = vld [vmem:[#allocation58_spill] sm:$0xff] }
 0x35a   : > { %v4222_v44 = vcombine.high %v16050_v26, %v11686_v41  ;;  %9184 = vrot.lane.b32.xlu1 %v9183_v17, %s15530_s28  ;;  %9179 = vrot.lane.b32.xlu0 %v9178_v53, %s15526_s25  ;;  %v3912_v31 = vcombine.high %v16052_v8, %v16051_v48  ;;  %v3913_v25 = vcombine.low %v11984_v46, %v3894_v5  ;;  %v16055_v41 = vld [vmem:[#allocation117_spill] sm:$0xff]  ;;  %v16056_v55 = vld [vmem:[#allocation11_spill] sm:$0xff]  ;;  %v16058_v54 = vld [vmem:[#allocation54_spill] sm:$0xff] }
 0x35b   : > { %v12061_v62 = vrot.slane %v4038_v60, %v15859_v49  ;;  %v4206_v34 = vcombine.high %v16054_v28, %v16053_v12  ;;  %v3774_v6 = vrot.slane %v3760_v10, %v10542_v47  ;;  %v4086_v37 = vcombine.high %v16056_v55, %v16055_v41  ;;  %v16059_v26 = vld [vmem:[#allocation98_spill] sm:$0xff]  ;;  %v16064_v55 = vld [vmem:[#allocation119_spill] sm:$0xff] }
 0x35c   : > { %v9188_v2 = vpack.i.bf16 %v3912_v31, %v3776_v19  ;;  %v9193_v14 = vpack.i.bf16 %v3913_v25, %v3777_v21  ;;  %v3778_v32 = vcombine.high %v3726_v45, %v3758_v42  ;;  %v3779_v17 = vcombine.low %v12026_v13, %v3767_v56  ;;  %v16061_v28 = vld [vmem:[#allocation118_spill] sm:$0xff] }
 0x35d   : > { %v12070_v53 = vrot.slane %v4190_v22, %v15859_v49  ;;  %v4054_v60 = vcombine.high %v16058_v54, %v16057_v63  ;;  %v4070_v59 = vcombine.high %v16060_v38, %v16059_v26  ;;  %v3910_v12 = vrot.slane %v3896_v29, %v10542_v47  ;;  %v12088_v29 = vpop.permute.xlu0 %8964 }
 0x35e   : > { %v4236_v10 = vrot.slane %v4222_v44, %v15859_v49  ;;  %9189 = vrot.lane.b32.xlu1 %v9188_v2, %s9698_s18  ;;  %9194 = vrot.lane.b32.xlu0 %v9193_v14, %s15532_s12  ;;  %v3914_v42 = vcombine.high %v11984_v46, %v3894_v5  ;;  %v3915_v45 = vcombine.low %v12004_v9, %v3903_v18  ;;  %v12090_v44 = vpop.permute.xlu1 %8959 }
 0x35f   : > { %v4220_v19 = vrot.slane %v4206_v34, %v15859_v49  ;;  %v4270_v21 = vcombine.high %v11731_v50, %v11734_v11  ;;  %v4100_v22 = vrot.slane %v4086_v37, %v15859_v49  ;;  %v4134_v38 = vcombine.high %v11744_v0, %v11737_v15  ;;  %v16062_v34 = vld [vmem:[#allocation115_spill] sm:$0xff]  ;;  %v16063_v11 = vld [vmem:[#allocation120_spill] sm:$0xff] }
 0x360   : > { %v9198_v31 = vpack.i.bf16 %v3914_v42, %v3778_v32  ;;  %v9203_v25 = vpack.i.bf16 %v3915_v45, %v3779_v17  ;;  %v3780_v46 = vcombine.high %v12026_v13, %v3767_v56  ;;  %v3781_v5 = vcombine.low %v12036_v7, %v3774_v6 }
 0x361   : > { %v4238_v41 = vcombine.high %v16062_v34, %v16061_v28  ;;  %v4068_v50 = vrot.slane %v4054_v60, %v15859_v49  ;;  %v4102_v37 = vcombine.high %v16064_v55, %v16063_v11  ;;  %v4084_v0 = vrot.slane %v4070_v59, %v15859_v49  ;;  %v12115_v42 = vpop.permute.xlu0 %8974 }
 0x362   : > { %v4285_v15 = vcombine.low %v4220_v19, %v4236_v10  ;;  %9199 = vrot.lane.b32.xlu1 %v9198_v31, %s15536_s21  ;;  %9204 = vrot.lane.b32.xlu0 %v9203_v25, %s15528_s20  ;;  %v3916_v2 = vcombine.high %v12004_v9, %v3903_v18  ;;  %v3917_v13 = vcombine.low %v12016_v30, %v3910_v12 }
 0x363   : > { %v4284_v56 = vrot.slane %v4270_v21, %v10542_v47  ;;  %v4148_v14 = vrot.slane %v4134_v38, %v10542_v47  ;;  %v4149_v32 = vcombine.low %v4084_v0, %v4100_v22  ;;  %v3782_v17 = vcombine.high %v12036_v7, %v3774_v6  ;;  %v12119_v38 = vpop.permute.xlu1 %8969 }
 0x364   : > { %v9208_v63 = vpack.i.bf16 %v3916_v2, %v3780_v46  ;;  %v9213_v54 = vpack.i.bf16 %v3917_v13, %v3781_v5  ;;  %v4166_v59 = vcombine.high %v11775_v43, %v11780_v16  ;;  %v4302_v60 = vcombine.high %v11762_v58, %v11767_v39 }
 0x365   : > { %v4253_v9 = vcombine.low %v12044_v33, %v12070_v53  ;;  %v4116_v18 = vrot.slane %v4102_v37, %v10542_v47  ;;  %v4117_v26 = vcombine.low %v12061_v62, %v4068_v50  ;;  %v3918_v45 = vcombine.high %v12016_v30, %v3910_v12  ;;  %v12134_v37 = vpop.permute.xlu0 %8984 }
 0x366   : > { %v4252_v7 = vrot.slane %v4238_v41, %v10542_v47  ;;  %v4286_v6 = vcombine.high %v4220_v19, %v4236_v10  ;;  %v4150_v21 = vcombine.high %v4084_v0, %v4100_v22  ;;  %9209 = vrot.lane.b32.xlu1 %v9208_v63, %s15534_s26  ;;  %9214 = vrot.lane.b32.xlu0 %v9213_v54, %s15526_s25 }
 0x367   : > { %v4293_v31 = vrot.slane %v4285_v15, %v10542_v47  ;;  %v4157_v25 = vrot.slane %v4149_v32, %v10542_v47  ;;  %v9218_v46 = vpack.i.bf16 %v3918_v45, %v3782_v17  ;;  %v4167_v5 = vcombine.low %v4116_v18, %v4148_v14  ;;  %v12136_v2 = vpop.permute.xlu1 %8979 }
 0x368   : > { %v9223_v28 = vpack.i.bf16 %v4302_v60, %v4166_v59  ;;  %v4303_v34 = vcombine.low %v4252_v7, %v4284_v56  ;;  %v4168_v11 = vcombine.high %v4116_v18, %v4148_v14  ;;  %v4304_v30 = vcombine.high %v4252_v7, %v4284_v56 }
 0x369   : > { %v4261_v12 = vrot.slane %v4253_v9, %v10542_v47  ;;  %v4118_v10 = vcombine.high %v12061_v62, %v4068_v50  ;;  %v4125_v19 = vrot.slane %v4117_v26, %v10542_v47  ;;  %v4254_v22 = vcombine.high %v12044_v33, %v12070_v53  ;;  %v12142_v60 = vpop.permute.xlu0 %8994 }
 0x36a   : > { %9219 = vrot.lane.b32.xlu1 %v9218_v46, %s15530_s28  ;;  %9224 = vrot.lane.b32.xlu0 %v9223_v28, %s9698_s18  ;;  %v4300_v41 = vrot.slane %v4286_v6, %v10542_v47  ;;  %v4164_v55 = vrot.slane %v4150_v21, %v10542_v47  ;;  %v9228_v62 = vpack.i.bf16 %v4303_v34, %v4167_v5 }
 0x36b   : > { %v4169_v0 = vcombine.low %v4125_v19, %v4157_v25  ;;  %v4305_v15 = vcombine.low %v4261_v12, %v4293_v31  ;;  %v9233_v50 = vpack.i.bf16 %v4304_v30, %v4168_v11  ;;  %v4170_v13 = vcombine.high %v4125_v19, %v4157_v25  ;;  %v12144_v9 = vpop.permute.xlu1 %8989 }
 0x36c   : > { %v4306_v56 = vcombine.high %v4261_v12, %v4293_v31  ;;  %v4132_v33 = vrot.slane %v4118_v10, %v10542_v47  ;;  %v4268_v53 = vrot.slane %v4254_v22, %v10542_v47  ;;  %v8946_v11 = vunpack.i.l.bf16 %v12020_v35  ;;  %v16065_v22 = vld [vmem:[#allocation59_spill] sm:$0xff] }
 0x36d   : > { %v9238_v14 = vpack.i.bf16 %v4305_v15, %v4169_v0  ;;  %v12150_v45 = vpop.permute.xlu0 %9004  ;;  %v8947_v12 = vunpack.i.h.bf16 %v12020_v35  ;;  %v8951_v10 = vunpack.i.l.bf16 %v12053_v51  ;;  %v8956_v15 = vunpack.i.l.bf16 %v12049_v3 }
 0x36e   : > { %9229 = vrot.lane.b32.xlu1 %v9228_v62, %s15532_s12  ;;  %9234 = vrot.lane.b32.xlu0 %v9233_v50, %s15536_s21  ;;  %v4171_v32 = vcombine.low %v4132_v33, %v4164_v55  ;;  %v9243_v17 = vpack.i.bf16 %v4306_v56, %v4170_v13  ;;  %v4307_v63 = vcombine.low %v4268_v53, %v4300_v41  ;;  %v8952_v62 = vunpack.i.h.bf16 %v12053_v51  ;;  %v16068_v56 = vld [vmem:[#allocation60_spill] sm:$0xff]  ;;  %s9709_s12 = smov 49   ;;  %s9711_s21 = smov 17  }
 0x36f   : > { %v4172_v54 = vcombine.high %v4132_v33, %v4164_v55  ;;  %v4308_v59 = vcombine.high %v4268_v53, %v4300_v41  ;;  %v12152_v7 = vpop.permute.xlu1 %8999  ;;  %v16066_v41 = vld [vmem:[#allocation78_spill] sm:$0xff]  ;;  %v16069_v33 = vld [vmem:[#allocation79_spill] sm:$0xff] }
 0x370   : > { %v9248_v18 = vpack.i.bf16 %v4307_v63, %v4171_v32  ;;  %v16067_v55 = vcombine.low %v16065_v22, %v16066_v41  ;;  %v16070_v53 = vcombine.low %v16068_v56, %v16069_v33  ;;  %v8957_v32 = vunpack.i.h.bf16 %v12049_v3  ;;  %v16074_v22 = vld [vmem:[#allocation9_spill] sm:$0xff]  ;;  %v16075_v41 = vld [vmem:[#allocation22_spill] sm:$0xff] }
 0x371   : > { %v9253_v26 = vpack.i.bf16 %v4308_v59, %v4172_v54  ;;  %v12154_v6 = vpop.permute.xlu0 %9014  ;;  %v8966_v54 = vunpack.i.l.bf16 %v12088_v29  ;;  %v8971_v33 = vunpack.i.l.bf16 %v12119_v38 }
 0x372   : > { %9239 = vrot.lane.b32.xlu1 %v9238_v14, %s15528_s20  ;;  %9244 = vrot.lane.b32.xlu0 %v9243_v17, %s15534_s26  ;;  %v1255_v0 = vsel %vm1254_vm9, %v16067_v55, %v8946_v11  ;;  %v1268_v35 = vsel %vm1254_vm9, %v16070_v53, %v8947_v12  ;;  %v8961_v17 = vunpack.i.l.bf16 %v12090_v44  ;;  %v8962_v11 = vunpack.i.h.bf16 %v12090_v44  ;;  %v16071_v12 = vld [vmem:[#allocation12_spill] sm:$0xff]  ;;  %s9707_s20 = smov 81   ;;  %s9710_s26 = smov 33  }
 0x373   : > { %v12156_v21 = vpop.permute.xlu1 %9009  ;;  %v1257_v14 = vsel %vm1256_vm10, %v1255_v0, %v8951_v10  ;;  %v16072_v10 = vld [vmem:[#allocation101_spill] sm:$0xff]  ;;  %v16076_v55 = vcombine.low %v16074_v22, %v16075_v41 }
 0x374   : > { %v1259_v63 = vsel %vm1258_vm11, %v1257_v14, %v8956_v15 }
 0x375   : > { %v12158_v31 = vpop.permute.xlu0 %9024  ;;  %v1261_v56 = vsel %vm1260_vm12, %v1259_v63, %v8961_v17  ;;  %v8976_v17 = vunpack.i.l.bf16 %v12115_v42 }
 0x376   : > { %9249 = vrot.lane.b32.xlu1 %v9248_v18, %s15526_s25  ;;  %9254 = vrot.lane.b32.xlu0 %v9253_v26, %s15530_s28  ;;  %v1269_v26 = vsel %vm1256_vm10, %v1268_v35, %v8952_v62  ;;  %v1263_v44 = vsel %vm1262_vm13, %v1261_v56, %v8966_v54  ;;  %s9705_s25 = smov 113   ;;  %s9708_s28 = smov 65  }
 0x377   : > { %v12160_v25 = vpop.permute.xlu1 %9019  ;;  %v1270_v15 = vsel %vm1258_vm11, %v1269_v26, %v8957_v32 }
 0x378   : > { %v1271_v32 = vsel %vm1260_vm12, %v1270_v15, %v8962_v11  ;;  %v8977_v11 = vunpack.i.h.bf16 %v12115_v42 }
 0x379   : > { %v12162_v46 = vpop.permute.xlu0 %9034 }
 0x37b   : > { %v12164_v5 = vpop.permute.xlu1 %9029 }
 0x37d   : > { %v12166_v28 = vpop.permute.xlu0 %9044 }
 0x37f   : > { %v12168_v34 = vpop.permute.xlu1 %9039 }
 0x391   : > { %v9055_v30 = vpop.permute.xlu0 %9054 }
 0x392   : > { %v9050_v19 = vpop.permute.xlu1 %9049  ;;  %v9057_v51 = vunpack.i.h.bf16 %v9055_v30  ;;  %v9056_v18 = vunpack.i.l.bf16 %v9055_v30  ;;  %v8967_v30 = vunpack.i.h.bf16 %v12088_v29 }
 0x393   : > { %v9052_v50 = vunpack.i.h.bf16 %v9050_v19  ;;  %v9051_v13 = vunpack.i.l.bf16 %v9050_v19  ;;  %v16073_v19 = vcombine.low %v16071_v12, %v16072_v10  ;;  %v8972_v10 = vunpack.i.h.bf16 %v12119_v38 }
 0x394   : > { %v1272_v54 = vsel %vm1262_vm13, %v1271_v32, %v8967_v30  ;;  %v8986_v38 = vunpack.i.l.bf16 %v12134_v37 }
 0x395   : > { %v1674_v3 = vsel %vm1254_vm9, %v16073_v19, %v9052_v50  ;;  %v1667_v0 = vsel %vm1254_vm9, %v16076_v55, %v9051_v13  ;;  %v8982_v19 = vunpack.i.h.bf16 %v12136_v2 }
 0x396   : > { %v1668_v12 = vsel %vm1256_vm10, %v1667_v0, %v9056_v18  ;;  %v1675_v13 = vsel %vm1256_vm10, %v1674_v3, %v9057_v51  ;;  %v1265_v51 = vsel %vm1264_vm14, %v1263_v44, %v8971_v33  ;;  %v16078_v44 = vld [vmem:[#allocation81_spill] sm:$0xff] }
 0x397   : > { %v9065_v59 = vpop.permute.xlu0 %9064  ;;  %v1267_v56 = vsel %vm1266_vm15, %v1265_v51, %v8976_v17 }
 0x398   : > { %v9067_v50 = vunpack.i.h.bf16 %v9065_v59  ;;  %v9066_v14 = vunpack.i.l.bf16 %v9065_v59  ;;  %v8981_v59 = vunpack.i.l.bf16 %v12136_v2 }
 0x39c   : > { %v9060_v62 = vpop.permute.xlu1 %9059 }
 0x39d   : > { %v9062_v53 = vunpack.i.h.bf16 %v9060_v62  ;;  %v9061_v35 = vunpack.i.l.bf16 %v9060_v62  ;;  %v16077_v62 = vld [vmem:[#allocation62_spill] sm:$0xff] }
 0x39e   : > { %v16079_v33 = vcombine.low %v16077_v62, %v16078_v44  ;;  %v8997_v62 = vunpack.i.h.bf16 %v12142_v60 }
 0x39f   : > { %v1669_v29 = vsel %vm1258_vm11, %v1668_v12, %v9061_v35  ;;  %v1676_v63 = vsel %vm1258_vm11, %v1675_v13, %v9062_v53  ;;  %v9075_v26 = vpop.permute.xlu0 %9074  ;;  %v16080_v53 = vld [vmem:[#allocation61_spill] sm:$0xff]  ;;  %v16081_v35 = vld [vmem:[#allocation80_spill] sm:$0xff]  ;;  %v8992_v13 = vunpack.i.h.bf16 %v12144_v9 }
 0x3a0   : > { %v9070_v18 = vpop.permute.xlu1 %9069  ;;  %v9077_v41 = vunpack.i.h.bf16 %v9075_v26  ;;  %v9076_v55 = vunpack.i.l.bf16 %v9075_v26  ;;  %v1670_v0 = vsel %vm1260_vm12, %v1669_v29, %v9066_v14  ;;  %v1677_v15 = vsel %vm1260_vm12, %v1676_v63, %v9067_v50 }
 0x3a1   : > { %v9072_v3 = vunpack.i.h.bf16 %v9070_v18  ;;  %v9071_v22 = vunpack.i.l.bf16 %v9070_v18  ;;  %v2422_v42 = vsel %vm1254_vm9, %v16079_v33, %v8982_v19  ;;  %v16082_v12 = vcombine.low %v16080_v53, %v16081_v35 }
 0x3a2   : > { %v8987_v50 = vunpack.i.h.bf16 %v12134_v37  ;;  %v8991_v29 = vunpack.i.l.bf16 %v12144_v9  ;;  %v1273_v18 = vsel %vm1264_vm14, %v1272_v54, %v8972_v10 }
 0x3a3   : > { %v1671_v30 = vsel %vm1262_vm13, %v1670_v0, %v9071_v22  ;;  %v1678_v2 = vsel %vm1262_vm13, %v1677_v15, %v9072_v3  ;;  %v2415_v14 = vsel %vm1254_vm9, %v16082_v12, %v8981_v59  ;;  %v1274_v0 = vsel %vm1266_vm15, %v1273_v18, %v8977_v11 }
 0x3a4   : > { %v9085_v32 = vpop.permute.xlu0 %9084  ;;  %v9080_v17 = vpop.permute.xlu1 %9079  ;;  %v1672_v19 = vsel %vm1264_vm14, %v1671_v30, %v9076_v55  ;;  %v1679_v22 = vsel %vm1264_vm14, %v1678_v2, %v9077_v41  ;;  %v2416_v59 = vsel %vm1256_vm10, %v2415_v14, %v8986_v38  ;;  %v2423_v9 = vsel %vm1256_vm10, %v2422_v42, %v8987_v50 }
 0x3a5   : > { %v9082_v63 = vunpack.i.h.bf16 %v9080_v17  ;;  %v9081_v26 = vunpack.i.l.bf16 %v9080_v17  ;;  %v9087_v51 = vunpack.i.h.bf16 %v9085_v32  ;;  %v9086_v3 = vunpack.i.l.bf16 %v9085_v32 }
 0x3a6   : > { %v8996_v55 = vunpack.i.l.bf16 %v12142_v60  ;;  %v16083_v38 = vcombine.low %v15987_v61, %v15986_v23  ;;  %v16084_v11 = vcombine.low %v11336_v1, %v11647_v4  ;;  %v2417_v12 = vsel %vm1258_vm11, %v2416_v59, %v8991_v29 }
 0x3a7   : > { %v1673_v37 = vsel %vm1266_vm15, %v1672_v19, %v9081_v26  ;;  %v1680_v15 = vsel %vm1266_vm15, %v1679_v22, %v9082_v63  ;;  %v9002_v61 = vunpack.i.h.bf16 %v12152_v7  ;;  %v9001_v4 = vunpack.i.l.bf16 %v12152_v7 }
 0x3a8   : > { %v9095_v44 = vpop.permute.xlu0 %9094  ;;  %v9090_v54 = vpop.permute.xlu1 %9089  ;;  %v4380_v10 = vpack.c.bf16 %v1680_v15, %v1274_v0  ;;  %v4379_v33 = vpack.c.bf16 %v1673_v37, %v1267_v56  ;;  %v2057_v2 = vsel %vm1254_vm9, %v16083_v38, %v9086_v3  ;;  %v2064_v42 = vsel %vm1254_vm9, %v16084_v11, %v9087_v51 }
 0x3a9   : > { %v9092_v30 = vunpack.i.h.bf16 %v9090_v54  ;;  %v9091_v41 = vunpack.i.l.bf16 %v9090_v54  ;;  %v9097_v53 = vunpack.i.h.bf16 %v9095_v44  ;;  %v9096_v35 = vunpack.i.l.bf16 %v9095_v44 }
 0x3aa   : > { %4400 = vmatprep.subr.bf16.mxu1 %v4380_v10  ;;  %v2424_v56 = vsel %vm1258_vm11, %v2423_v9, %v8992_v13  ;;  %v9007_v1 = vunpack.i.h.bf16 %v12150_v45  ;;  %v2418_v17 = vsel %vm1260_vm12, %v2417_v12, %v8996_v55  ;;  %v9006_v29 = vunpack.i.l.bf16 %v12150_v45 }
 0x3ab   : > { %v2065_v60 = vsel %vm1256_vm10, %v2064_v42, %v9092_v30  ;;  %v2058_v14 = vsel %vm1256_vm10, %v2057_v2, %v9091_v41  ;;  %4401 = vmatpush1.bf16.msra.mxu1 %v4379_v33  ;;  %v2425_v23 = vsel %vm1260_vm12, %v2424_v56, %v8997_v62  ;;  %v2419_v22 = vsel %vm1262_vm13, %v2418_v17, %v9001_v4 }
 0x3ac   : > { %v9105_v50 = vpop.permute.xlu0 %9104  ;;  %v9100_v32 = vpop.permute.xlu1 %9099  ;;  %v2059_v51 = vsel %vm1258_vm11, %v2058_v14, %v9096_v35  ;;  %v2066_v3 = vsel %vm1258_vm11, %v2065_v60, %v9097_v53  ;;  %v2426_v59 = vsel %vm1262_vm13, %v2425_v23, %v9002_v61  ;;  %v9012_v37 = vunpack.i.h.bf16 %v12156_v21 }
 0x3ad   : > { %v9102_v13 = vunpack.i.h.bf16 %v9100_v32  ;;  %v9101_v63 = vunpack.i.l.bf16 %v9100_v32  ;;  %v9107_v26 = vunpack.i.h.bf16 %v9105_v50  ;;  %v9106_v18 = vunpack.i.l.bf16 %v9105_v50 }
 0x3ae   : > { %v9011_v45 = vunpack.i.l.bf16 %v12156_v21  ;;  %v2420_v10 = vsel %vm1264_vm14, %v2419_v22, %v9006_v29  ;;  %v2427_v30 = vsel %vm1264_vm14, %v2426_v59, %v9007_v1  ;;  %v9017_v22 = vunpack.i.h.bf16 %v12154_v6 }
 0x3af   : > { %v2060_v19 = vsel %vm1260_vm12, %v2059_v51, %v9101_v63  ;;  %v2067_v7 = vsel %vm1260_vm12, %v2066_v3, %v9102_v13  ;;  %v2428_v35 = vsel %vm1266_vm15, %v2427_v30, %v9012_v37  ;;  %v16085_v13 = vcombine.low %v16008_v40, %v16007_v36 }
 0x3b0   : > { %v9115_v0 = vpop.permute.xlu0 %9114  ;;  %v9110_v15 = vpop.permute.xlu1 %9109  ;;  %v2061_v33 = vsel %vm1262_vm13, %v2060_v19, %v9106_v18  ;;  %v2068_v55 = vsel %vm1262_vm13, %v2067_v7, %v9107_v26  ;;  %v2421_v53 = vsel %vm1266_vm15, %v2420_v10, %v9011_v45  ;;  %v16086_v26 = vcombine.low %v11522_v52, %v11706_v27 }
 0x3b1   : > { %v9117_v9 = vunpack.i.h.bf16 %v9115_v0  ;;  %v9116_v62 = vunpack.i.l.bf16 %v9115_v0  ;;  %v9112_v44 = vunpack.i.h.bf16 %v9110_v15  ;;  %v9111_v54 = vunpack.i.l.bf16 %v9110_v15 }
 0x3b3   : > { %v2062_v41 = vsel %vm1264_vm14, %v2061_v33, %v9111_v54  ;;  %v2069_v38 = vsel %vm1264_vm14, %v2068_v55, %v9112_v44  ;;  %v16088_v54 = vld [vmem:[#allocation94_spill] sm:$0xff] }
 0x3b4   : > { %v9120_v2 = vpop.permute.xlu0 %9119  ;;  %v9125_v21 = vpop.permute.xlu1 %9124  ;;  %v2070_v11 = vsel %vm1266_vm15, %v2069_v38, %v9117_v9  ;;  %v2063_v42 = vsel %vm1266_vm15, %v2062_v41, %v9116_v62  ;;  %v16087_v62 = vcombine.low %v16027_v24, %v16026_v57  ;;  %v16089_v10 = vcombine.low %v16031_v20, %v16088_v54 }
 0x3b5   : > { %v4382_v12 = vpack.c.bf16 %v2428_v35, %v2070_v11  ;;  %v4381_v56 = vpack.c.bf16 %v2421_v53, %v2063_v42  ;;  %v9122_v4 = vunpack.i.h.bf16 %v9120_v2  ;;  %v9121_v1 = vunpack.i.l.bf16 %v9120_v2  ;;  %v16091_v11 = vld [vmem:[#allocation83_spill] sm:$0xff] }
 0x3b6   : > { %v9127_v50 = vunpack.i.h.bf16 %v9125_v21  ;;  %v9126_v32 = vunpack.i.l.bf16 %v9125_v21  ;;  %v9016_v41 = vunpack.i.l.bf16 %v12154_v6  ;;  %v16090_v21 = vld [vmem:[#allocation65_spill] sm:$0xff]  ;;  %v9022_v24 = vunpack.i.h.bf16 %v12160_v25 }
 0x3b7   : > { %4402 = vmatprep.subr.bf16.mxu1 %v4382_v12  ;;  %v2821_v63 = vsel %vm1254_vm9, %v16085_v13, %v9121_v1  ;;  %v2828_v18 = vsel %vm1254_vm9, %v16086_v26, %v9122_v4  ;;  %v16092_v42 = vcombine.low %v16090_v21, %v16091_v11 }
 0x3b8   : > { %v9130_v60 = vpop.permute.xlu0 %9129  ;;  %v9135_v14 = vpop.permute.xlu1 %9134  ;;  %4403 = vmatpush1.bf16.msra.mxu1 %v4381_v56  ;;  %v2829_v59 = vsel %vm1256_vm10, %v2828_v18, %v9127_v50  ;;  %v2822_v37 = vsel %vm1256_vm10, %v2821_v63, %v9126_v32 }
 0x3b9   : > { %v9132_v51 = vunpack.i.h.bf16 %v9130_v60  ;;  %v9131_v3 = vunpack.i.l.bf16 %v9130_v60  ;;  %v9137_v45 = vunpack.i.h.bf16 %v9135_v14  ;;  %v9136_v0 = vunpack.i.l.bf16 %v9135_v14 }
 0x3ba   : > { %v3576_v57 = vsel %vm1254_vm9, %v16092_v42, %v9017_v22 }
 0x3bb   : > { %v2823_v15 = vsel %vm1258_vm11, %v2822_v37, %v9131_v3  ;;  %v2830_v52 = vsel %vm1258_vm11, %v2829_v59, %v9132_v51 }
 0x3bc   : > { %v9140_v23 = vpop.permute.xlu0 %9139  ;;  %v12278_v61 = vpop.permute.xlu1 %9144  ;;  %v2824_v56 = vsel %vm1260_vm12, %v2823_v15, %v9136_v0  ;;  %v2831_v60 = vsel %vm1260_vm12, %v2830_v52, %v9137_v45  ;;  %v16093_v0 = vld [vmem:[#allocation64_spill] sm:$0xff]  ;;  %v9021_v15 = vunpack.i.l.bf16 %v12160_v25 }
 0x3bd   : > { %v9142_v53 = vunpack.i.h.bf16 %v9140_v23  ;;  %v9141_v35 = vunpack.i.l.bf16 %v9140_v23  ;;  %v9146_v13 = vunpack.i.l.bf16 %v12278_v61 }
 0x3bf   : > { %v2825_v26 = vsel %vm1262_vm13, %v2824_v56, %v9141_v35  ;;  %v2832_v18 = vsel %vm1262_vm13, %v2831_v60, %v9142_v53  ;;  %v3577_v35 = vsel %vm1256_vm10, %v3576_v57, %v9022_v24  ;;  %v16097_v60 = vld [vmem:[#allocation114_spill] sm:$0xff]  ;;  %v9031_v57 = vunpack.i.l.bf16 %v12164_v5 }
 0x3c0   : > { %v12280_v17 = vpop.permute.xlu0 %9149  ;;  %v9155_v29 = vpop.permute.xlu1 %9154  ;;  %v2826_v54 = vsel %vm1264_vm14, %v2825_v26, %v9146_v13 }
 0x3c1   : > { %v9157_v19 = vunpack.i.h.bf16 %v9155_v29  ;;  %v9156_v7 = vunpack.i.l.bf16 %v9155_v29  ;;  %v9147_v29 = vunpack.i.h.bf16 %v12278_v61  ;;  %v9152_v51 = vunpack.i.h.bf16 %v12280_v17  ;;  %v16094_v61 = vld [vmem:[#allocation82_spill] sm:$0xff] }
 0x3c2   : > { %v9151_v3 = vunpack.i.l.bf16 %v12280_v17  ;;  %v9026_v17 = vunpack.i.l.bf16 %v12158_v31 }
 0x3c3   : > { %v3218_v44 = vsel %vm1254_vm9, %v16087_v62, %v9157_v19  ;;  %v3211_v33 = vsel %vm1254_vm9, %v16089_v10, %v9156_v7  ;;  %v2833_v25 = vsel %vm1264_vm14, %v2832_v18, %v9147_v29 }
 0x3c4   : > { %v9160_v36 = vpop.permute.xlu0 %9159  ;;  %v9165_v40 = vpop.permute.xlu1 %9164 }
 0x3c5   : > { %v9162_v27 = vunpack.i.h.bf16 %v9160_v36  ;;  %v9161_v9 = vunpack.i.l.bf16 %v9160_v36  ;;  %v9167_v55 = vunpack.i.h.bf16 %v9165_v40  ;;  %v9166_v30 = vunpack.i.l.bf16 %v9165_v40 }
 0x3c6   : > { %v16095_v36 = vcombine.low %v16093_v0, %v16094_v61 }
 0x3c7   : > { %v3212_v38 = vsel %vm1256_vm10, %v3211_v33, %v9161_v9  ;;  %v3219_v2 = vsel %vm1256_vm10, %v3218_v44, %v9162_v27  ;;  %v9027_v9 = vunpack.i.h.bf16 %v12158_v31  ;;  %v2834_v31 = vsel %vm1266_vm15, %v2833_v25, %v9152_v51 }
 0x3c8   : > { %v9170_v20 = vpop.permute.xlu0 %9169  ;;  %v9175_v12 = vpop.permute.xlu1 %9174  ;;  %v3213_v4 = vsel %vm1258_vm11, %v3212_v38, %v9166_v30  ;;  %v3220_v1 = vsel %vm1258_vm11, %v3219_v2, %v9167_v55  ;;  %v3569_v40 = vsel %vm1254_vm9, %v16095_v36, %v9016_v41  ;;  %v2827_v41 = vsel %vm1266_vm15, %v2826_v54, %v9151_v3 }
 0x3c9   : > { %v9172_v6 = vunpack.i.h.bf16 %v9170_v20  ;;  %v9171_v14 = vunpack.i.l.bf16 %v9170_v20  ;;  %v9177_v50 = vunpack.i.h.bf16 %v9175_v12  ;;  %v9176_v32 = vunpack.i.l.bf16 %v9175_v12 }
 0x3ca   : > { %v3570_v20 = vsel %vm1256_vm10, %v3569_v40, %v9021_v15  ;;  %v16096_v12 = vcombine.low %v16052_v8, %v16051_v48  ;;  %v9037_v48 = vunpack.i.h.bf16 %v12162_v46  ;;  %v9036_v8 = vunpack.i.l.bf16 %v12162_v46 }
 0x3cb   : > { %v3214_v23 = vsel %vm1260_vm12, %v3213_v4, %v9171_v14  ;;  %v3221_v63 = vsel %vm1260_vm12, %v3220_v1, %v9172_v6  ;;  %v16098_v6 = vld [vmem:[#allocation116_spill] sm:$0xff]  ;;  %v3571_v1 = vsel %vm1258_vm11, %v3570_v20, %v9026_v17  ;;  %v9041_v46 = vunpack.i.l.bf16 %v12168_v34 }
 0x3cc   : > { %v9180_v19 = vpop.permute.xlu0 %9179  ;;  %v9185_v7 = vpop.permute.xlu1 %9184  ;;  %v3215_v52 = vsel %vm1262_vm13, %v3214_v23, %v9176_v32  ;;  %v3222_v27 = vsel %vm1262_vm13, %v3221_v63, %v9177_v50  ;;  %v16099_v14 = vcombine.low %v16097_v60, %v16098_v6  ;;  %v3578_v50 = vsel %vm1258_vm11, %v3577_v35, %v9027_v9 }
 0x3cd   : > { %v9182_v22 = vunpack.i.h.bf16 %v9180_v19  ;;  %v9181_v59 = vunpack.i.l.bf16 %v9180_v19  ;;  %v9187_v37 = vunpack.i.h.bf16 %v9185_v7  ;;  %v9186_v45 = vunpack.i.l.bf16 %v9185_v7 }
 0x3ce   : > { %v9032_v32 = vunpack.i.h.bf16 %v12164_v5  ;;  %v3572_v19 = vsel %vm1260_vm12, %v3571_v1, %v9031_v57  ;;  %v9047_v9 = vunpack.i.h.bf16 %v12166_v28  ;;  %v9046_v17 = vunpack.i.l.bf16 %v12166_v28 }
 0x3cf   : > { %v3216_v62 = vsel %vm1264_vm14, %v3215_v52, %v9181_v59  ;;  %v3223_v44 = vsel %vm1264_vm14, %v3222_v27, %v9182_v22  ;;  %v9042_v22 = vunpack.i.h.bf16 %v12168_v34  ;;  %v16100_v60 = vcombine.low %v11762_v58, %v11767_v39 }
 0x3d0   : > { %v3217_v10 = vsel %vm1266_vm15, %v3216_v62, %v9186_v45  ;;  %v9195_v33 = vpop.permute.xlu0 %9194  ;;  %v9190_v55 = vpop.permute.xlu1 %9189  ;;  %v3224_v30 = vsel %vm1266_vm15, %v3223_v44, %v9187_v37  ;;  %v3579_v7 = vsel %vm1260_vm12, %v3578_v50, %v9032_v32  ;;  %v3573_v45 = vsel %vm1262_vm13, %v3572_v19, %v9036_v8 }
 0x3d1   : > { %v9192_v38 = vunpack.i.h.bf16 %v9190_v55  ;;  %v9191_v2 = vunpack.i.l.bf16 %v9190_v55  ;;  %v9197_v21 = vunpack.i.h.bf16 %v9195_v33  ;;  %v9196_v11 = vunpack.i.l.bf16 %v9195_v33 }
 0x3d2   : > { %v4384_v42 = vpack.c.bf16 %v3224_v30, %v2834_v31  ;;  %v4383_v53 = vpack.c.bf16 %v3217_v10, %v2827_v41  ;;  %v3580_v0 = vsel %vm1262_vm13, %v3579_v7, %v9037_v48  ;;  %v3574_v10 = vsel %vm1264_vm14, %v3573_v45, %v9041_v46 }
 0x3d3   : > { %v3982_v56 = vsel %vm1254_vm9, %v16096_v12, %v9192_v38  ;;  %v3975_v4 = vsel %vm1254_vm9, %v16099_v14, %v9191_v2  ;;  %v3581_v25 = vsel %vm1264_vm14, %v3580_v0, %v9042_v22  ;;  %v3575_v28 = vsel %vm1266_vm15, %v3574_v10, %v9046_v17 }
 0x3d4   : > { %4404 = vmatprep.subr.bf16.mxu1 %v4384_v42  ;;  %v9205_v24 = vpop.permute.xlu0 %9204  ;;  %v9200_v29 = vpop.permute.xlu1 %9199  ;;  %v3976_v18 = vsel %vm1256_vm10, %v3975_v4, %v9196_v11  ;;  %v3983_v51 = vsel %vm1256_vm10, %v3982_v56, %v9197_v21  ;;  %v3582_v21 = vsel %vm1266_vm15, %v3581_v25, %v9047_v9  ;;  %v16101_v14 = vcombine.low %v11775_v43, %v11780_v16  ;;  %v16102_v9 = vld [vmem:[#allocation7_spill] sm:$0xff] }
 0x3d5   : > { %v9202_v13 = vunpack.i.h.bf16 %v9200_v29  ;;  %v9201_v23 = vunpack.i.l.bf16 %v9200_v29  ;;  %4405 = vmatpush1.bf16.msra.mxu1 %v4383_v53  ;;  %v9207_v63 = vunpack.i.h.bf16 %v9205_v24  ;;  %v9206_v26 = vunpack.i.l.bf16 %v9205_v24 }
 0x3d7   : > { %v3977_v3 = vsel %vm1258_vm11, %v3976_v18, %v9201_v23  ;;  %v3984_v5 = vsel %vm1258_vm11, %v3983_v51, %v9202_v13 }
 0x3d8   : > { %v9215_v59 = vpop.permute.xlu0 %9214  ;;  %v9210_v37 = vpop.permute.xlu1 %9209  ;;  %v3978_v52 = vsel %vm1260_vm12, %v3977_v3, %v9206_v26  ;;  %v3985_v27 = vsel %vm1260_vm12, %v3984_v5, %v9207_v63 }
 0x3d9   : > { %v9212_v61 = vunpack.i.h.bf16 %v9210_v37  ;;  %v9211_v36 = vunpack.i.l.bf16 %v9210_v37  ;;  %v9217_v40 = vunpack.i.h.bf16 %v9215_v59  ;;  %v9216_v15 = vunpack.i.l.bf16 %v9215_v59 }
 0x3db   : > { %v3979_v34 = vsel %vm1262_vm13, %v3978_v52, %v9211_v36  ;;  %v3986_v62 = vsel %vm1262_vm13, %v3985_v27, %v9212_v61  ;;  %v4389_v36 = vld [vmem:[%s15338_s4] sm:$0xf] }
 0x3dc   : > { %v9225_v44 = vpop.permute.xlu0 %9224  ;;  %v9220_v54 = vpop.permute.xlu1 %9219  ;;  %v3980_v38 = vsel %vm1264_vm14, %v3979_v34, %v9216_v15  ;;  %v3987_v2 = vsel %vm1264_vm14, %v3986_v62, %v9217_v40  ;;  %v9704_v40 = vmov 1966171168  }
 0x3dd   : > { %v9222_v33 = vunpack.i.h.bf16 %v9220_v54  ;;  %v9221_v55 = vunpack.i.l.bf16 %v9220_v54  ;;  %v9227_v30 = vunpack.i.h.bf16 %v9225_v44  ;;  %v9226_v41 = vunpack.i.l.bf16 %v9225_v44  ;;  %v16103_v54 = vld [vmem:[#allocation10_spill] sm:$0xff] }
 0x3de   : > { %v4462_v15 = vunpack.c.l.s4 %v9704_v40 }
 0x3df   : > { %v3981_v31 = vsel %vm1266_vm15, %v3980_v38, %v9221_v55  ;;  %v3988_v11 = vsel %vm1266_vm15, %v3987_v2, %v9222_v33  ;;  %v4372_v6 = vsel %vm1254_vm9, %v16100_v60, %v9227_v30  ;;  %v4365_v4 = vsel %vm1254_vm9, %v16101_v14, %v9226_v41  ;;  %v16104_v33 = vld [vmem:[#allocation8_spill] sm:$0xff] }
 0x3e0   : > { %v9235_v42 = vpop.permute.xlu0 %9234  ;;  %v9230_v53 = vpop.permute.xlu1 %9229  ;;  %v4386_v35 = vpack.c.bf16 %v3988_v11, %v3582_v21  ;;  %v4385_v20 = vpack.c.bf16 %v3981_v31, %v3575_v28  ;;  %v4463_v52 = vunpack.c.0.s8 %v4462_v15  ;;  %v12412_v31 = vsub.s32 0, %v16104_v33 }
 0x3e1   : > { %v9232_v12 = vunpack.i.h.bf16 %v9230_v53  ;;  %v9231_v56 = vunpack.i.l.bf16 %v9230_v53  ;;  %v9237_v1 = vunpack.i.h.bf16 %v9235_v42  ;;  %v9236_v50 = vunpack.i.l.bf16 %v9235_v42 }
 0x3e2   : > { %4406 = vmatprep.subr.bf16.mxu1 %v4386_v35  ;;  %v4466_v55 = vsub.s32 %v4463_v52, %v16104_v33 }
 0x3e3   : > { %v4373_v32 = vsel %vm1256_vm10, %v4372_v6, %v9232_v12  ;;  %v4366_v57 = vsel %vm1256_vm10, %v4365_v4, %v9231_v56  ;;  %4407 = vmatpush1.bf16.msra.mxu1 %v4385_v20 }
 0x3e4   : > { %v9245_v24 = vpop.permute.xlu0 %9244  ;;  %v9240_v29 = vpop.permute.xlu1 %9239  ;;  %v4367_v13 = vsel %vm1258_vm11, %v4366_v57, %v9236_v50  ;;  %v4374_v43 = vsel %vm1258_vm11, %v4373_v32, %v9237_v1 }
 0x3e5   : > { %v9242_v48 = vunpack.i.h.bf16 %v9240_v29  ;;  %v9241_v8 = vunpack.i.l.bf16 %v9240_v29  ;;  %v9247_v58 = vunpack.i.h.bf16 %v9245_v24  ;;  %v9246_v39 = vunpack.i.l.bf16 %v9245_v24 }
 0x3e7   : > { %v4368_v16 = vsel %vm1260_vm12, %v4367_v13, %v9241_v8  ;;  %v4375_v23 = vsel %vm1260_vm12, %v4374_v43, %v9242_v48 }
 0x3e8   : > { %v9255_v63 = vpop.permute.xlu0 %9254  ;;  %v9250_v26 = vpop.permute.xlu1 %9249  ;;  %v4376_v19 = vsel %vm1262_vm13, %v4375_v23, %v9247_v58  ;;  %v4369_v7 = vsel %vm1262_vm13, %v4368_v16, %v9246_v39 }
 0x3e9   : > { %v9257_v18 = vunpack.i.h.bf16 %v9255_v63  ;;  %v9256_v51 = vunpack.i.l.bf16 %v9255_v63  ;;  %v9252_v3 = vunpack.i.h.bf16 %v9250_v26  ;;  %v9251_v5 = vunpack.i.l.bf16 %v9250_v26 }
 0x3eb   : > { %v4377_v22 = vsel %vm1264_vm14, %v4376_v19, %v9252_v3  ;;  %v4370_v46 = vsel %vm1264_vm14, %v4369_v7, %v9251_v5 }
 0x3ec   : > { %v4378_v59 = vsel %vm1266_vm15, %v4377_v22, %v9257_v18  ;;  %v4371_v37 = vsel %vm1266_vm15, %v4370_v46, %v9256_v51 }
 0x3ed   : > { %v4388_v45 = vpack.c.bf16 %v4378_v59, %v4378_v59  ;;  %v4387_v0 = vpack.c.bf16 %v4371_v37, %v4371_v37 }
 0x3ef   : > { %8786 = vmatprep.subr.msk.bf16.mxu1 %vm591_vm0, %v4388_v45  ;;  %v4395_v61 = vsel %vm591_vm0, %v4387_v0, 0 }
 0x3f0   : > { %4409 = vmatpush1.bf16.msra.mxu1 %v4395_v61 }
 0x3f3   : > { %8787 = vmatmul.mubr.msk.bf16.vlgmr.msra.gmra.mrb[8].mxu1 %vm4390_vm1, %v4389_v36 }
 0x4c6   : > { %v4434_v27 = vpop.f32.mrb[8].mxu1 }
 0x4c7   : > { %v4447_v17 = vmul.f32 %v16102_v9, %v4434_v27  ;;  %v4436_v34 = vpop.f32.mrb[9].mxu1 }
 0x4c8   : > { %v4448_v62 = vmul.f32 %v16102_v9, %v4436_v34  ;;  %v4438_v44 = vpop.f32.mrb[10].mxu1 }
 0x4c9   : > { %v4455_v10 = vadd.f32 %v16103_v54, %v4447_v17  ;;  %v4439_v25 = vpop.f32.mrb[11].mxu1 }
 0x4ca   : > { %v4456_v30 = vadd.f32 %v16103_v54, %v4448_v62 }
 0x4cb   : > { %v4457_v41 = vmax.f32 %v4455_v10, 0.0 }
 0x4cc   : > { %v4458_v38 = vmax.f32 %v4456_v30, 0.0 }
 0x4cd   : > { %v4460_v2 = vcombine.high %v4457_v41, %v4457_v41  ;;  %v4467_v28 = vrot.slane %v4457_v41, %v4466_v55 }
 0x4ce   : > { %v4799_v21 = vcombine.high %v4458_v38, %v4458_v38  ;;  %v4806_v11 = vrot.slane %v4458_v38, %v4466_v55 }
 0x4cf   : > { %v4474_v42 = vrot.slane %v4460_v2, %v4466_v55  ;;  %v4475_v53 = vcombine.high %v4467_v28, %v4467_v28  ;;  %v12414_v35 = vrot.slane %v4467_v28, %v4466_v55 }
 0x4d0   : > { %v4813_v20 = vrot.slane %v4799_v21, %v4466_v55  ;;  %v4814_v12 = vcombine.high %v4806_v11, %v4806_v11  ;;  %v4822_v56 = vrot.slane %v4806_v11, %v4466_v55 }
 0x4d1   : > { %v4476_v60 = vcombine.high %v4474_v42, %v4474_v42  ;;  %v4490_v6 = vrot.slane %v4474_v42, %v4466_v55  ;;  %v4497_v14 = vrot.slane %v4475_v53, %v4466_v55  ;;  %v4512_v4 = vrot.slane %v12414_v35, %v12412_v31 }
 0x4d2   : > { %v4815_v1 = vcombine.high %v4813_v20, %v4813_v20  ;;  %v4829_v50 = vrot.slane %v4813_v20, %v4466_v55  ;;  %v4836_v32 = vrot.slane %v4814_v12, %v4466_v55  ;;  %v4844_v58 = vcombine.high %v4822_v56, %v4822_v56 }
 0x4d3   : > { %v4504_v57 = vrot.slane %v4476_v60, %v4466_v55  ;;  %v4506_v24 = vcombine.high %v4490_v6, %v4490_v6  ;;  %v4507_v29 = vcombine.high %v4497_v14, %v4497_v14  ;;  %v12419_v48 = vrot.slane %v4490_v6, %v12412_v31  ;;  %4574 = vrot.lane.b32.xlu0 %v4512_v4, %s9705_s25 }
 0x4d4   : > { %v4843_v8 = vrot.slane %v4815_v1, %v4466_v55  ;;  %4541 = vrot.lane.b32.xlu1 %v4512_v4, %s9690_s27  ;;  %v4845_v23 = vcombine.high %v4829_v50, %v4829_v50  ;;  %v4846_v63 = vcombine.high %v4836_v32, %v4836_v32  ;;  %v4516_v18 = vrot.slane %v4497_v14, %v12412_v31 }
 0x4d5   : > { %v4508_v39 = vcombine.high %v4504_v57, %v4504_v57  ;;  %v12423_v13 = vrot.slane %v4507_v29, %v12412_v31  ;;  %v12426_v43 = vrot.slane %v4504_v57, %v12412_v31  ;;  %v12429_v16 = vrot.slane %v4506_v24, %v12412_v31 }
 0x4d6   : > { %v4847_v26 = vcombine.high %v4843_v8, %v4843_v8  ;;  %v12437_v3 = vrot.slane %v4844_v58, %v12412_v31  ;;  %v12440_v5 = vrot.slane %v4829_v50, %v12412_v31  ;;  %v12443_v19 = vrot.slane %v4846_v63, %v12412_v31 }
 0x4d7   : > { %v12434_v51 = vrot.slane %v4508_v39, %v12412_v31  ;;  %v12446_v7 = vrot.slane %v4843_v8, %v12412_v31  ;;  %v12449_v22 = vrot.slane %v4845_v23, %v12412_v31  ;;  %4606 = vrot.lane.b32.xlu0 %v4512_v4, %s9706_s29  ;;  %v4851_v59 = vrot.slane %v4822_v56, %v12412_v31 }
 0x4d8   : > { %v12452_v46 = vrot.slane %v4847_v26, %v12412_v31  ;;  %4543 = vrot.lane.b32.xlu1 %v4516_v18, %s9690_s27  ;;  %v4855_v37 = vrot.slane %v4836_v32, %v12412_v31  ;;  %v4505_v45 = vcombine.high %v12414_v35, %v12414_v35 }
 0x4da   : > { %v4520_v0 = vrot.slane %v4505_v45, %v12412_v31 }
 0x4db   : > { %4638 = vrot.lane.b32.xlu0 %v4512_v4, %s9707_s20 }
 0x4dc   : > { %4576 = vrot.lane.b32.xlu1 %v4516_v18, %s9705_s25 }
 0x4df   : > { %4670 = vrot.lane.b32.xlu0 %v4512_v4, %s9708_s28 }
 0x4e0   : > { %4608 = vrot.lane.b32.xlu1 %v4516_v18, %s9706_s29 }
 0x4e3   : > { %4702 = vrot.lane.b32.xlu0 %v4512_v4, %s9709_s12 }
 0x4e4   : > { %4640 = vrot.lane.b32.xlu1 %v4516_v18, %s9707_s20 }
 0x4e7   : > { %4734 = vrot.lane.b32.xlu0 %v4512_v4, %s9710_s26 }
 0x4e8   : > { %4672 = vrot.lane.b32.xlu1 %v4516_v18, %s9708_s28 }
 0x4eb   : > { %4766 = vrot.lane.b32.xlu0 %v4512_v4, %s9711_s21 }
 0x4ec   : > { %4704 = vrot.lane.b32.xlu1 %v4516_v18, %s9709_s12 }
 0x4ef   : > { %4880 = vrot.lane.b32.xlu0 %v4851_v59, %s9690_s27 }
 0x4f0   : > { %4736 = vrot.lane.b32.xlu1 %v4516_v18, %s9710_s26 }
 0x4f3   : > { %4912 = vrot.lane.b32.xlu0 %v4851_v59, %s9705_s25 }
 0x4f4   : > { %4768 = vrot.lane.b32.xlu1 %v4516_v18, %s9711_s21 }
 0x4f7   : > { %4944 = vrot.lane.b32.xlu0 %v4851_v59, %s9706_s29 }
 0x4f8   : > { %4882 = vrot.lane.b32.xlu1 %v4855_v37, %s9690_s27 }
 0x4fb   : > { %4976 = vrot.lane.b32.xlu0 %v4851_v59, %s9707_s20 }
 0x4fc   : > { %4914 = vrot.lane.b32.xlu1 %v4855_v37, %s9705_s25 }
 0x4ff   : > { %5008 = vrot.lane.b32.xlu0 %v4851_v59, %s9708_s28 }
 0x500   : > { %4946 = vrot.lane.b32.xlu1 %v4855_v37, %s9706_s29 }
 0x503   : > { %5040 = vrot.lane.b32.xlu0 %v4851_v59, %s9709_s12 }
 0x504   : > { %4978 = vrot.lane.b32.xlu1 %v4855_v37, %s9707_s20 }
 0x507   : > { %5072 = vrot.lane.b32.xlu0 %v4851_v59, %s9710_s26 }
 0x508   : > { %5010 = vrot.lane.b32.xlu1 %v4855_v37, %s9708_s28 }
 0x50b   : > { %5104 = vrot.lane.b32.xlu0 %v4851_v59, %s9711_s21 }
 0x50c   : > { %5042 = vrot.lane.b32.xlu1 %v4855_v37, %s9709_s12 }
 0x50f   : > { %4545 = vrot.lane.b32.xlu0 %v4520_v0, %s9690_s27 }
 0x510   : > { %5074 = vrot.lane.b32.xlu1 %v4855_v37, %s9710_s26 }
 0x513   : > { %4549 = vrot.lane.b32.xlu0 %v12419_v48, %s9690_s27 }
 0x514   : > { %5106 = vrot.lane.b32.xlu1 %v4855_v37, %s9711_s21 }
 0x517   : > { %4578 = vrot.lane.b32.xlu0 %v4520_v0, %s9705_s25 }
 0x518   : > { %4547 = vrot.lane.b32.xlu1 %v12423_v13, %s9690_s27 }
 0x51b   : > { %4582 = vrot.lane.b32.xlu0 %v12419_v48, %s9705_s25 }
 0x51c   : > { %4551 = vrot.lane.b32.xlu1 %v12426_v43, %s9690_s27 }
 0x51f   : > { %4610 = vrot.lane.b32.xlu0 %v4520_v0, %s9706_s29 }
 0x520   : > { %4580 = vrot.lane.b32.xlu1 %v12423_v13, %s9705_s25 }
 0x523   : > { %4614 = vrot.lane.b32.xlu0 %v12419_v48, %s9706_s29 }
 0x524   : > { %4584 = vrot.lane.b32.xlu1 %v12426_v43, %s9705_s25 }
 0x527   : > { %4642 = vrot.lane.b32.xlu0 %v4520_v0, %s9707_s20 }
 0x528   : > { %4612 = vrot.lane.b32.xlu1 %v12423_v13, %s9706_s29 }
 0x52b   : > { %4646 = vrot.lane.b32.xlu0 %v12419_v48, %s9707_s20 }
 0x52c   : > { %4616 = vrot.lane.b32.xlu1 %v12426_v43, %s9706_s29 }
 0x52f   : > { %4674 = vrot.lane.b32.xlu0 %v4520_v0, %s9708_s28 }
 0x530   : > { %4644 = vrot.lane.b32.xlu1 %v12423_v13, %s9707_s20 }
 0x533   : > { %4678 = vrot.lane.b32.xlu0 %v12419_v48, %s9708_s28 }
 0x534   : > { %4648 = vrot.lane.b32.xlu1 %v12426_v43, %s9707_s20 }
 0x537   : > { %4706 = vrot.lane.b32.xlu0 %v4520_v0, %s9709_s12 }
 0x538   : > { %4676 = vrot.lane.b32.xlu1 %v12423_v13, %s9708_s28 }
 0x53b   : > { %4710 = vrot.lane.b32.xlu0 %v12419_v48, %s9709_s12 }
 0x53c   : > { %4680 = vrot.lane.b32.xlu1 %v12426_v43, %s9708_s28 }
 0x53f   : > { %4738 = vrot.lane.b32.xlu0 %v4520_v0, %s9710_s26 }
 0x540   : > { %4708 = vrot.lane.b32.xlu1 %v12423_v13, %s9709_s12 }
 0x543   : > { %4742 = vrot.lane.b32.xlu0 %v12419_v48, %s9710_s26 }
 0x544   : > { %4712 = vrot.lane.b32.xlu1 %v12426_v43, %s9709_s12 }
 0x545   : > { %v4575_v61 = vpop.permute.xlu0 %4574 }
 0x546   : > { %4598 = vst.msk [vmem:[#allocation3 + $0x2] sm:$0x1] %vm4565_vm2, %v4575_v61  ;;  %v4542_v36 = vpop.permute.xlu1 %4541 }
 0x547   : > { %4566 = vst.msk [vmem:[#allocation3 + $0x1] sm:$0x1] %vm4565_vm2, %v4542_v36  ;;  %4770 = vrot.lane.b32.xlu0 %v4520_v0, %s9711_s21 }
 0x548   : > { %4740 = vrot.lane.b32.xlu1 %v12423_v13, %s9710_s26 }
 0x549   : > { %v4607_v40 = vpop.permute.xlu0 %4606 }
 0x54a   : > { %4630 = vst.msk [vmem:[#allocation3 + $0x3] sm:$0x1] %vm4565_vm2, %v4607_v40  ;;  %v4544_v15 = vpop.permute.xlu1 %4543 }
 0x54b   : > { %4567 = vst.msk [vmem:[#allocation3 + $0x19] sm:$0x1] %vm4565_vm2, %v4544_v15  ;;  %4774 = vrot.lane.b32.xlu0 %v12419_v48, %s9711_s21 }
 0x54c   : > { %4744 = vrot.lane.b32.xlu1 %v12426_v43, %s9710_s26 }
 0x54d   : > { %v4639_v52 = vpop.permute.xlu0 %4638 }
 0x54e   : > { %4662 = vst.msk [vmem:[#allocation3 + $0x4] sm:$0x1] %vm4565_vm2, %v4639_v52  ;;  %v4577_v27 = vpop.permute.xlu1 %4576 }
 0x54f   : > { %4599 = vst.msk [vmem:[#allocation3 + $0x1a] sm:$0x1] %vm4565_vm2, %v4577_v27  ;;  %4884 = vrot.lane.b32.xlu0 %v12437_v3, %s9690_s27 }
 0x550   : > { %4772 = vrot.lane.b32.xlu1 %v12423_v13, %s9711_s21 }
 0x551   : > { %v4671_v9 = vpop.permute.xlu0 %4670 }
 0x552   : > { %4694 = vst.msk [vmem:[#allocation3 + $0x5] sm:$0x1] %vm4565_vm2, %v4671_v9  ;;  %v4609_v17 = vpop.permute.xlu1 %4608 }
 0x553   : > { %4631 = vst.msk [vmem:[#allocation3 + $0x1b] sm:$0x1] %vm4565_vm2, %v4609_v17  ;;  %4888 = vrot.lane.b32.xlu0 %v12440_v5, %s9690_s27 }
 0x554   : > { %4776 = vrot.lane.b32.xlu1 %v12426_v43, %s9711_s21 }
 0x555   : > { %v4703_v34 = vpop.permute.xlu0 %4702 }
 0x556   : > { %4726 = vst.msk [vmem:[#allocation3 + $0x6] sm:$0x1] %vm4565_vm2, %v4703_v34  ;;  %v4641_v62 = vpop.permute.xlu1 %4640 }
 0x557   : > { %4663 = vst.msk [vmem:[#allocation3 + $0x1c] sm:$0x1] %vm4565_vm2, %v4641_v62  ;;  %4916 = vrot.lane.b32.xlu0 %v12437_v3, %s9705_s25 }
 0x558   : > { %4886 = vrot.lane.b32.xlu1 %v12443_v19, %s9690_s27 }
 0x559   : > { %v4735_v44 = vpop.permute.xlu0 %4734 }
 0x55a   : > { %4758 = vst.msk [vmem:[#allocation3 + $0x7] sm:$0x1] %vm4565_vm2, %v4735_v44  ;;  %v4673_v54 = vpop.permute.xlu1 %4672 }
 0x55b   : > { %4695 = vst.msk [vmem:[#allocation3 + $0x1d] sm:$0x1] %vm4565_vm2, %v4673_v54  ;;  %4920 = vrot.lane.b32.xlu0 %v12440_v5, %s9705_s25 }
 0x55c   : > { %4890 = vrot.lane.b32.xlu1 %v12446_v7, %s9690_s27 }
 0x55d   : > { %v4767_v10 = vpop.permute.xlu0 %4766 }
 0x55e   : > { %4790 = vst.msk [vmem:[#allocation3 + $0x8] sm:$0x1] %vm4565_vm2, %v4767_v10  ;;  %v4705_v33 = vpop.permute.xlu1 %4704 }
 0x55f   : > { %4727 = vst.msk [vmem:[#allocation3 + $0x1e] sm:$0x1] %vm4565_vm2, %v4705_v33  ;;  %4948 = vrot.lane.b32.xlu0 %v12437_v3, %s9706_s29 }
 0x560   : > { %4918 = vrot.lane.b32.xlu1 %v12443_v19, %s9705_s25 }
 0x561   : > { %v4881_v55 = vpop.permute.xlu0 %4880  ;;  %v12707_v61 = vld [vmem:[#allocation3] sm:$0xff] }
 0x562   : > { %v4737_v25 = vpop.permute.xlu1 %4736  ;;  %4904 = vst.msk [vmem:[#allocation3 + $0x9] sm:$0x1] %vm4565_vm2, %v4881_v55 }
 0x563   : > { %4759 = vst.msk [vmem:[#allocation3 + $0x1f] sm:$0x1] %vm4565_vm2, %v4737_v25  ;;  %4952 = vrot.lane.b32.xlu0 %v12440_v5, %s9706_s29 }
 0x564   : > { %4922 = vrot.lane.b32.xlu1 %v12446_v7, %s9705_s25 }
 0x565   : > { %v4913_v30 = vpop.permute.xlu0 %4912 }
 0x566   : > { %v4769_v41 = vpop.permute.xlu1 %4768  ;;  %4936 = vst.msk [vmem:[#allocation3 + $0xa] sm:$0x1] %vm4565_vm2, %v4913_v30 }
 0x567   : > { %4791 = vst.msk [vmem:[#allocation3 + $0x20] sm:$0x1] %vm4565_vm2, %v4769_v41  ;;  %4980 = vrot.lane.b32.xlu0 %v12437_v3, %s9707_s20 }
 0x568   : > { %4950 = vrot.lane.b32.xlu1 %v12443_v19, %s9706_s29 }
 0x569   : > { %v4945_v38 = vpop.permute.xlu0 %4944 }
 0x56a   : > { %4968 = vst.msk [vmem:[#allocation3 + $0xb] sm:$0x1] %vm4565_vm2, %v4945_v38  ;;  %v4883_v2 = vpop.permute.xlu1 %4882  ;;  %v12728_v34 = vld [vmem:[#allocation3 + $0x18] sm:$0xff] }
 0x56b   : > { %4905 = vst.msk [vmem:[#allocation3 + $0x21] sm:$0x1] %vm4565_vm2, %v4883_v2  ;;  %4984 = vrot.lane.b32.xlu0 %v12440_v5, %s9707_s20 }
 0x56c   : > { %4954 = vrot.lane.b32.xlu1 %v12446_v7, %s9706_s29 }
 0x56d   : > { %v4977_v28 = vpop.permute.xlu0 %4976 }
 0x56e   : > { %5000 = vst.msk [vmem:[#allocation3 + $0xc] sm:$0x1] %vm4565_vm2, %v4977_v28  ;;  %v4915_v31 = vpop.permute.xlu1 %4914 }
 0x56f   : > { %4937 = vst.msk [vmem:[#allocation3 + $0x22] sm:$0x1] %vm4565_vm2, %v4915_v31  ;;  %5012 = vrot.lane.b32.xlu0 %v12437_v3, %s9708_s28 }
 0x570   : > { %4982 = vrot.lane.b32.xlu1 %v12443_v19, %s9707_s20 }
 0x571   : > { %v5009_v21 = vpop.permute.xlu0 %5008 }
 0x572   : > { %5032 = vst.msk [vmem:[#allocation3 + $0xd] sm:$0x1] %vm4565_vm2, %v5009_v21  ;;  %v4947_v11 = vpop.permute.xlu1 %4946 }
 0x573   : > { %4969 = vst.msk [vmem:[#allocation3 + $0x23] sm:$0x1] %vm4565_vm2, %v4947_v11  ;;  %5016 = vrot.lane.b32.xlu0 %v12440_v5, %s9708_s28  ;;  %v6290_v11 = vld [vmem:[#allocation3 + $0x1] sm:$0xff] }
 0x574   : > { %4986 = vrot.lane.b32.xlu1 %v12446_v7, %s9707_s20 }
 0x575   : > { %v5041_v42 = vpop.permute.xlu0 %5040 }
 0x576   : > { %5064 = vst.msk [vmem:[#allocation3 + $0xe] sm:$0x1] %vm4565_vm2, %v5041_v42  ;;  %v4979_v53 = vpop.permute.xlu1 %4978 }
 0x577   : > { %5001 = vst.msk [vmem:[#allocation3 + $0x24] sm:$0x1] %vm4565_vm2, %v4979_v53  ;;  %5044 = vrot.lane.b32.xlu0 %v12437_v3, %s9709_s12 }
 0x578   : > { %5014 = vrot.lane.b32.xlu1 %v12443_v19, %s9708_s28 }
 0x579   : > { %v5073_v35 = vpop.permute.xlu0 %5072 }
 0x57a   : > { %5096 = vst.msk [vmem:[#allocation3 + $0xf] sm:$0x1] %vm4565_vm2, %v5073_v35  ;;  %v5011_v20 = vpop.permute.xlu1 %5010 }
 0x57b   : > { %5033 = vst.msk [vmem:[#allocation3 + $0x25] sm:$0x1] %vm4565_vm2, %v5011_v20  ;;  %5048 = vrot.lane.b32.xlu0 %v12440_v5, %s9709_s12 }
 0x57c   : > { %5018 = vrot.lane.b32.xlu1 %v12446_v7, %s9708_s28 }
 0x57d   : > { %v5105_v12 = vpop.permute.xlu0 %5104 }
 0x57e   : > { %5128 = vst.msk [vmem:[#allocation3 + $0x10] sm:$0x1] %vm4565_vm2, %v5105_v12  ;;  %v5043_v56 = vpop.permute.xlu1 %5042  ;;  %v12772_v12 = vld [vmem:[#allocation3 + $0x19] sm:$0xff] }
 0x57f   : > { %5065 = vst.msk [vmem:[#allocation3 + $0x26] sm:$0x1] %vm4565_vm2, %v5043_v56  ;;  %5076 = vrot.lane.b32.xlu0 %v12437_v3, %s9710_s26 }
 0x580   : > { %5046 = vrot.lane.b32.xlu1 %v12443_v19, %s9709_s12 }
 0x581   : > { %v4546_v60 = vpop.permute.xlu0 %4545 }
 0x582   : > { %4568 = vst.msk [vmem:[#allocation3 + $0x31] sm:$0x1] %vm4565_vm2, %v4546_v60  ;;  %v5075_v6 = vpop.permute.xlu1 %5074 }
 0x583   : > { %5097 = vst.msk [vmem:[#allocation3 + $0x27] sm:$0x1] %vm4565_vm2, %v5075_v6  ;;  %5080 = vrot.lane.b32.xlu0 %v12440_v5, %s9710_s26 }
 0x584   : > { %5050 = vrot.lane.b32.xlu1 %v12446_v7, %s9709_s12 }
 0x585   : > { %v4550_v14 = vpop.permute.xlu0 %4549 }
 0x586   : > { %4570 = vst.msk [vmem:[#allocation3 + $0x61] sm:$0x1] %vm4565_vm2, %v4550_v14  ;;  %v5107_v4 = vpop.permute.xlu1 %5106 }
 0x587   : > { %5129 = vst.msk [vmem:[#allocation3 + $0x28] sm:$0x1] %vm4565_vm2, %v5107_v4  ;;  %5108 = vrot.lane.b32.xlu0 %v12437_v3, %s9711_s21 }
 0x588   : > { %5078 = vrot.lane.b32.xlu1 %v12443_v19, %s9710_s26 }
 0x589   : > { %v4579_v1 = vpop.permute.xlu0 %4578 }
 0x58a   : > { %4600 = vst.msk [vmem:[#allocation3 + $0x32] sm:$0x1] %vm4565_vm2, %v4579_v1  ;;  %v4548_v50 = vpop.permute.xlu1 %4547 }
 0x58b   : > { %4569 = vst.msk [vmem:[#allocation3 + $0x49] sm:$0x1] %vm4565_vm2, %v4548_v50  ;;  %5112 = vrot.lane.b32.xlu0 %v12440_v5, %s9711_s21 }
 0x58c   : > { %5082 = vrot.lane.b32.xlu1 %v12446_v7, %s9710_s26 }
 0x58d   : > { %v4583_v32 = vpop.permute.xlu0 %4582 }
 0x58e   : > { %4602 = vst.msk [vmem:[#allocation3 + $0x62] sm:$0x1] %vm4565_vm2, %v4583_v32  ;;  %v4552_v57 = vpop.permute.xlu1 %4551 }
 0x58f   : > { %4571 = vst.msk [vmem:[#allocation3 + $0x79] sm:$0x1] %vm4565_vm2, %v4552_v57  ;;  %4553 = vrot.lane.b32.xlu0 %v12429_v16, %s9690_s27 }
 0x590   : > { %5110 = vrot.lane.b32.xlu1 %v12443_v19, %s9711_s21 }
 0x591   : > { %v4611_v24 = vpop.permute.xlu0 %4610 }
 0x592   : > { %4632 = vst.msk [vmem:[#allocation3 + $0x33] sm:$0x1] %vm4565_vm2, %v4611_v24  ;;  %v4581_v29 = vpop.permute.xlu1 %4580 }
 0x593   : > { %4601 = vst.msk [vmem:[#allocation3 + $0x4a] sm:$0x1] %vm4565_vm2, %v4581_v29  ;;  %4586 = vrot.lane.b32.xlu0 %v12429_v16, %s9705_s25 }
 0x594   : > { %5114 = vrot.lane.b32.xlu1 %v12446_v7, %s9711_s21 }
 0x595   : > { %v4615_v48 = vpop.permute.xlu0 %4614 }
 0x596   : > { %4634 = vst.msk [vmem:[#allocation3 + $0x63] sm:$0x1] %vm4565_vm2, %v4615_v48  ;;  %v4585_v8 = vpop.permute.xlu1 %4584 }
 0x597   : > { %4603 = vst.msk [vmem:[#allocation3 + $0x7a] sm:$0x1] %vm4565_vm2, %v4585_v8  ;;  %4618 = vrot.lane.b32.xlu0 %v12429_v16, %s9706_s29 }
 0x598   : > { %4555 = vrot.lane.b32.xlu1 %v12434_v51, %s9690_s27 }
 0x599   : > { %v4643_v58 = vpop.permute.xlu0 %4642 }
 0x59a   : > { %4664 = vst.msk [vmem:[#allocation3 + $0x34] sm:$0x1] %vm4565_vm2, %v4643_v58  ;;  %v4613_v39 = vpop.permute.xlu1 %4612 }
 0x59b   : > { %4633 = vst.msk [vmem:[#allocation3 + $0x4b] sm:$0x1] %vm4565_vm2, %v4613_v39  ;;  %4650 = vrot.lane.b32.xlu0 %v12429_v16, %s9707_s20 }
 0x59c   : > { %4588 = vrot.lane.b32.xlu1 %v12434_v51, %s9705_s25 }
 0x59d   : > { %v4647_v13 = vpop.permute.xlu0 %4646 }
 0x59e   : > { %4666 = vst.msk [vmem:[#allocation3 + $0x64] sm:$0x1] %vm4565_vm2, %v4647_v13  ;;  %v4617_v43 = vpop.permute.xlu1 %4616 }
 0x59f   : > { %4635 = vst.msk [vmem:[#allocation3 + $0x7b] sm:$0x1] %vm4565_vm2, %v4617_v43  ;;  %4682 = vrot.lane.b32.xlu0 %v12429_v16, %s9708_s28 }
 0x5a0   : > { %4620 = vrot.lane.b32.xlu1 %v12434_v51, %s9706_s29 }
 0x5a1   : > { %v4675_v23 = vpop.permute.xlu0 %4674 }
 0x5a2   : > { %4696 = vst.msk [vmem:[#allocation3 + $0x35] sm:$0x1] %vm4565_vm2, %v4675_v23  ;;  %v4645_v63 = vpop.permute.xlu1 %4644 }
 0x5a3   : > { %4665 = vst.msk [vmem:[#allocation3 + $0x4c] sm:$0x1] %vm4565_vm2, %v4645_v63  ;;  %4714 = vrot.lane.b32.xlu0 %v12429_v16, %s9709_s12  ;;  %v12822_v63 = vld [vmem:[#allocation3 + $0x8] sm:$0xff] }
 0x5a4   : > { %4652 = vrot.lane.b32.xlu1 %v12434_v51, %s9707_s20 }
 0x5a5   : > { %v4679_v26 = vpop.permute.xlu0 %4678 }
 0x5a6   : > { %4698 = vst.msk [vmem:[#allocation3 + $0x65] sm:$0x1] %vm4565_vm2, %v4679_v26  ;;  %v4649_v18 = vpop.permute.xlu1 %4648 }
 0x5a7   : > { %4667 = vst.msk [vmem:[#allocation3 + $0x7c] sm:$0x1] %vm4565_vm2, %v4649_v18  ;;  %4746 = vrot.lane.b32.xlu0 %v12429_v16, %s9710_s26 }
 0x5a8   : > { %4684 = vrot.lane.b32.xlu1 %v12434_v51, %s9708_s28 }
 0x5a9   : > { %v4707_v3 = vpop.permute.xlu0 %4706 }
 0x5aa   : > { %4728 = vst.msk [vmem:[#allocation3 + $0x36] sm:$0x1] %vm4565_vm2, %v4707_v3  ;;  %v4677_v5 = vpop.permute.xlu1 %4676 }
 0x5ab   : > { %4697 = vst.msk [vmem:[#allocation3 + $0x4d] sm:$0x1] %vm4565_vm2, %v4677_v5  ;;  %4778 = vrot.lane.b32.xlu0 %v12429_v16, %s9711_s21 }
 0x5ac   : > { %4716 = vrot.lane.b32.xlu1 %v12434_v51, %s9709_s12 }
 0x5ad   : > { %v4711_v19 = vpop.permute.xlu0 %4710 }
 0x5ae   : > { %4730 = vst.msk [vmem:[#allocation3 + $0x66] sm:$0x1] %vm4565_vm2, %v4711_v19  ;;  %v4681_v7 = vpop.permute.xlu1 %4680  ;;  %v12838_v19 = vld [vmem:[#allocation3 + $0x9] sm:$0xff] }
 0x5af   : > { %4699 = vst.msk [vmem:[#allocation3 + $0x7d] sm:$0x1] %vm4565_vm2, %v4681_v7  ;;  %4892 = vrot.lane.b32.xlu0 %v12449_v22, %s9690_s27 }
 0x5b0   : > { %4748 = vrot.lane.b32.xlu1 %v12434_v51, %s9710_s26 }
 0x5b1   : > { %v4739_v59 = vpop.permute.xlu0 %4738 }
 0x5b2   : > { %4760 = vst.msk [vmem:[#allocation3 + $0x37] sm:$0x1] %vm4565_vm2, %v4739_v59  ;;  %v4709_v37 = vpop.permute.xlu1 %4708 }
 0x5b3   : > { %4729 = vst.msk [vmem:[#allocation3 + $0x4e] sm:$0x1] %vm4565_vm2, %v4709_v37  ;;  %4924 = vrot.lane.b32.xlu0 %v12449_v22, %s9705_s25 }
 0x5b4   : > { %4780 = vrot.lane.b32.xlu1 %v12434_v51, %s9711_s21 }
 0x5b5   : > { %v4743_v16 = vpop.permute.xlu0 %4742 }
 0x5b6   : > { %4762 = vst.msk [vmem:[#allocation3 + $0x67] sm:$0x1] %vm4565_vm2, %v4743_v16  ;;  %v4713_v45 = vpop.permute.xlu1 %4712 }
 0x5b7   : > { %4731 = vst.msk [vmem:[#allocation3 + $0x7e] sm:$0x1] %vm4565_vm2, %v4713_v45  ;;  %4956 = vrot.lane.b32.xlu0 %v12449_v22, %s9706_s29 }
 0x5b8   : > { %4894 = vrot.lane.b32.xlu1 %v12452_v46, %s9690_s27  ;;  %s16174_s27 = smov 48  }
 0x5b9   : > { %v4771_v0 = vpop.permute.xlu0 %4770  ;;  %v12709_v36 = vld [vmem:[#allocation3 + $0x30] sm:$0xff] }
 0x5ba   : > { %4792 = vst.msk [vmem:[#allocation3 + $0x38] sm:$0x1] %vm4565_vm2, %v4771_v0  ;;  %v4741_v51 = vpop.permute.xlu1 %4740  ;;  %v5152_v40 = vcombine.low %v12707_v61, %v12709_v36  ;;  %v5153_v15 = vcombine.high %v12707_v61, %v12709_v36 }
 0x5bb   : > { %4761 = vst.msk [vmem:[#allocation3 + $0x4f] sm:$0x1] %vm4565_vm2, %v4741_v51  ;;  %4988 = vrot.lane.b32.xlu0 %v12449_v22, %s9707_s20  ;;  %v12860_v51 = vld [vmem:[#allocation3 + $0x2] sm:$0xff] }
 0x5bc   : > { %4926 = vrot.lane.b32.xlu1 %v12452_v46, %s9705_s25  ;;  %v12742_v33 = vrot.slane %v5152_v40, %v15859_v49  ;;  %v12745_v55 = vrot.slane %v5153_v15, %v15859_v49 }
 0x5bd   : > { %v4775_v52 = vpop.permute.xlu0 %4774  ;;  %v12849_v37 = vld [vmem:[#allocation3 + $0x60] sm:$0xff] }
 0x5be   : > { %4794 = vst.msk [vmem:[#allocation3 + $0x68] sm:$0x1] %vm4565_vm2, %v4775_v52  ;;  %v4745_v27 = vpop.permute.xlu1 %4744 }
 0x5bf   : > { %4763 = vst.msk [vmem:[#allocation3 + $0x7f] sm:$0x1] %vm4565_vm2, %v4745_v27  ;;  %5020 = vrot.lane.b32.xlu0 %v12449_v22, %s9708_s28 }
 0x5c0   : > { %4958 = vrot.lane.b32.xlu1 %v12452_v46, %s9706_s29 }
 0x5c1   : > { %v4885_v9 = vpop.permute.xlu0 %4884  ;;  %v12754_v38 = vld [vmem:[#allocation3 + $0x31] sm:$0xff] }
 0x5c2   : > { %4906 = vst.msk [vmem:[#allocation3 + $0x39] sm:$0x1] %vm4565_vm2, %v4885_v9  ;;  %v4773_v17 = vpop.permute.xlu1 %4772  ;;  %v12730_v62 = vld [vmem:[#allocation3 + $0x48] sm:$0xff]  ;;  %v6306_v53 = vcombine.low %v6290_v11, %v12754_v38  ;;  %v6307_v35 = vcombine.high %v6290_v11, %v12754_v38  ;;  %v12877_v9 = vld [vmem:[#allocation3 + $0x20] sm:$0xff] }
 0x5c3   : > { %4793 = vst.msk [vmem:[#allocation3 + $0x50] sm:$0x1] %vm4565_vm2, %v4773_v17  ;;  %5052 = vrot.lane.b32.xlu0 %v12449_v22, %s9709_s12  ;;  %v5168_v44 = vcombine.low %v12728_v34, %v12730_v62  ;;  %v5169_v54 = vcombine.high %v12728_v34, %v12730_v62 }
 0x5c4   : > { %4990 = vrot.lane.b32.xlu1 %v12452_v46, %s9707_s20  ;;  %v12786_v4 = vrot.slane %v6306_v53, %v15859_v49  ;;  %v12789_v1 = vrot.slane %v6307_v35, %v15859_v49  ;;  %s16177_s20 = smov 32  }
 0x5c5   : > { %v4889_v10 = vpop.permute.xlu0 %4888  ;;  %v12748_v25 = vrot.slane %v5168_v44, %v15859_v49  ;;  %v12751_v30 = vrot.slane %v5169_v54, %v15859_v49 }
 0x5c6   : > { %v4777_v41 = vpop.permute.xlu1 %4776  ;;  %4908 = vst.msk [vmem:[#allocation3 + $0x69] sm:$0x1] %vm4565_vm2, %v4889_v10 }
 0x5c7   : > { %4795 = vst.msk [vmem:[#allocation3 + $0x80] sm:$0x1] %vm4565_vm2, %v4777_v41  ;;  %5084 = vrot.lane.b32.xlu0 %v12449_v22, %s9710_s26  ;;  %v5216_v2 = vcombine.low %v12742_v33, %v12748_v25  ;;  %v5217_v28 = vcombine.high %v12742_v33, %v12748_v25  ;;  %v5232_v31 = vcombine.low %v12745_v55, %v12751_v30 }
 0x5c8   : > { %v5233_v21 = vcombine.high %v12745_v55, %v12751_v30  ;;  %5022 = vrot.lane.b32.xlu1 %v12452_v46, %s9708_s28 }
 0x5c9   : > { %v4917_v42 = vpop.permute.xlu0 %4916 }
 0x5ca   : > { %v4887_v20 = vpop.permute.xlu1 %4886  ;;  %4938 = vst.msk [vmem:[#allocation3 + $0x3a] sm:$0x1] %vm4565_vm2, %v4917_v42  ;;  %v12774_v56 = vld [vmem:[#allocation3 + $0x49] sm:$0xff]  ;;  %v13108_v25 = vrot.slane %v5233_v21, %v10542_v47 }
 0x5cb   : > { %4907 = vst.msk [vmem:[#allocation3 + $0x51] sm:$0x1] %vm4565_vm2, %v4887_v20  ;;  %5116 = vrot.lane.b32.xlu0 %v12449_v22, %s9711_s21  ;;  %v6322_v60 = vcombine.low %v12772_v12, %v12774_v56  ;;  %v6323_v6 = vcombine.high %v12772_v12, %v12774_v56 }
 0x5cc   : > { %5054 = vrot.lane.b32.xlu1 %v12452_v46, %s9709_s12  ;;  %s16175_s12 = smov 80  }
 0x5cd   : > { %v4921_v14 = vpop.permute.xlu0 %4920  ;;  %v12792_v50 = vrot.slane %v6322_v60, %v15859_v49  ;;  %v12795_v22 = vrot.slane %v6323_v6, %v15859_v49  ;;  %v13130_v21 = vld [vmem:[#allocation3 + $0x62] sm:$0xff] }
 0x5ce   : > { %4940 = vst.msk [vmem:[#allocation3 + $0x6a] sm:$0x1] %vm4565_vm2, %v4921_v14  ;;  %v4891_v32 = vpop.permute.xlu1 %4890 }
 0x5cf   : > { %4909 = vst.msk [vmem:[#allocation3 + $0x81] sm:$0x1] %vm4565_vm2, %v4891_v32  ;;  %5900 = vrot.lane.b32.xlu0 %v12707_v61, %s9695_s11  ;;  %v6370_v57 = vcombine.low %v12786_v4, %v12792_v50  ;;  %v6371_v24 = vcombine.high %v12786_v4, %v12792_v50  ;;  %v6386_v29 = vcombine.low %v12789_v1, %v12795_v22 }
 0x5d0   : > { %v6387_v48 = vcombine.high %v12789_v1, %v12795_v22  ;;  %5086 = vrot.lane.b32.xlu1 %v12452_v46, %s9710_s26 }
 0x5d1   : > { %v4949_v8 = vpop.permute.xlu0 %4948  ;;  %v13127_v55 = vrot.slane %v6370_v57, %v10542_v47 }
 0x5d2   : > { %4970 = vst.msk [vmem:[#allocation3 + $0x3b] sm:$0x1] %vm4565_vm2, %v4949_v8  ;;  %v4919_v58 = vpop.permute.xlu1 %4918 }
 0x5d3   : > { %4939 = vst.msk [vmem:[#allocation3 + $0x52] sm:$0x1] %vm4565_vm2, %v4919_v58  ;;  %6664 = vrot.lane.b32.xlu0 %v6290_v11, %s9694_s30  ;;  %v7447_v58 = vld [vmem:[#allocation3 + $0x22] sm:$0xff]  ;;  %16109 = vst [vmem:[#allocation42_spill] sm:$0xff] %v13127_v55 }
 0x5d4   : > { %5118 = vrot.lane.b32.xlu1 %v12452_v46, %s9711_s21  ;;  %v12827_v46 = vld [vmem:[#allocation3 + $0xa] sm:$0xff]  ;;  %s16179_s21 = smov 64  }
 0x5d5   : > { %v4953_v39 = vpop.permute.xlu0 %4952 }
 0x5d6   : > { %4972 = vst.msk [vmem:[#allocation3 + $0x6b] sm:$0x1] %vm4565_vm2, %v4953_v39  ;;  %v4923_v13 = vpop.permute.xlu1 %4922 }
 0x5d7   : > { %4941 = vst.msk [vmem:[#allocation3 + $0x82] sm:$0x1] %vm4565_vm2, %v4923_v13  ;;  %7054 = vrot.lane.b32.xlu0 %v6290_v11, %s9695_s11 }
 0x5d8   : > { %5510 = vrot.lane.b32.xlu1 %v12707_v61, %s9694_s30 }
 0x5d9   : > { %v4981_v43 = vpop.permute.xlu0 %4980 }
 0x5da   : > { %5002 = vst.msk [vmem:[#allocation3 + $0x3c] sm:$0x1] %vm4565_vm2, %v4981_v43  ;;  %v4951_v23 = vpop.permute.xlu1 %4950 }
 0x5db   : > { %4971 = vst.msk [vmem:[#allocation3 + $0x53] sm:$0x1] %vm4565_vm2, %v4951_v23  ;;  %5512 = vrot.lane.b32.xlu0 %v12822_v63, %s9694_s30 }
 0x5dc   : > { %8210 = vrot.lane.b32.xlu1 %v12827_v46, %s9695_s11 }
 0x5dd   : > { %v4985_v26 = vpop.permute.xlu0 %4984 }
 0x5de   : > { %5004 = vst.msk [vmem:[#allocation3 + $0x6c] sm:$0x1] %vm4565_vm2, %v4985_v26  ;;  %v4955_v18 = vpop.permute.xlu1 %4954 }
 0x5df   : > { %4973 = vst.msk [vmem:[#allocation3 + $0x83] sm:$0x1] %vm4565_vm2, %v4955_v18  ;;  %5902 = vrot.lane.b32.xlu0 %v12822_v63, %s9695_s11 }
 0x5e0   : > { %5514 = vrot.lane.b32.xlu1 %v12728_v34, %s9694_s30 }
 0x5e1   : > { %v5013_v3 = vpop.permute.xlu0 %5012 }
 0x5e2   : > { %5034 = vst.msk [vmem:[#allocation3 + $0x3d] sm:$0x1] %vm4565_vm2, %v5013_v3  ;;  %v4983_v5 = vpop.permute.xlu1 %4982  ;;  %v12938_v3 = vld [vmem:[#allocation3 + $0x1a] sm:$0xff] }
 0x5e3   : > { %5003 = vst.msk [vmem:[#allocation3 + $0x54] sm:$0x1] %vm4565_vm2, %v4983_v5  ;;  %6666 = vrot.lane.b32.xlu0 %v12838_v19, %s9694_s30 }
 0x5e4   : > { %5518 = vrot.lane.b32.xlu1 %v12709_v36, %s9694_s30 }
 0x5e5   : > { %v5017_v7 = vpop.permute.xlu0 %5016 }
 0x5e6   : > { %5036 = vst.msk [vmem:[#allocation3 + $0x6d] sm:$0x1] %vm4565_vm2, %v5017_v7  ;;  %v4987_v59 = vpop.permute.xlu1 %4986 }
 0x5e7   : > { %5005 = vst.msk [vmem:[#allocation3 + $0x84] sm:$0x1] %vm4565_vm2, %v4987_v59  ;;  %7056 = vrot.lane.b32.xlu0 %v12838_v19, %s9695_s11 }
 0x5e8   : > { %5526 = vrot.lane.b32.xlu1 %v12849_v37, %s9694_s30 }
 0x5e9   : > { %v5045_v16 = vpop.permute.xlu0 %5044 }
 0x5ea   : > { %5066 = vst.msk [vmem:[#allocation3 + $0x3e] sm:$0x1] %vm4565_vm2, %v5045_v16  ;;  %v5015_v45 = vpop.permute.xlu1 %5014 }
 0x5eb   : > { %5035 = vst.msk [vmem:[#allocation3 + $0x55] sm:$0x1] %vm4565_vm2, %v5015_v45  ;;  %7820 = vrot.lane.b32.xlu0 %v12827_v46, %s9694_s30 }
 0x5ec   : > { %5904 = vrot.lane.b32.xlu1 %v12728_v34, %s9695_s11 }
 0x5ed   : > { %v5049_v0 = vpop.permute.xlu0 %5048 }
 0x5ee   : > { %5068 = vst.msk [vmem:[#allocation3 + $0x6e] sm:$0x1] %vm4565_vm2, %v5049_v0  ;;  %v5019_v61 = vpop.permute.xlu1 %5018 }
 0x5ef   : > { %5037 = vst.msk [vmem:[#allocation3 + $0x85] sm:$0x1] %vm4565_vm2, %v5019_v61  ;;  %7818 = vrot.lane.b32.xlu0 %v12860_v51, %s9694_s30 }
 0x5f0   : > { %6668 = vrot.lane.b32.xlu1 %v12772_v12, %s9694_s30 }
 0x5f1   : > { %v5077_v40 = vpop.permute.xlu0 %5076 }
 0x5f2   : > { %5098 = vst.msk [vmem:[#allocation3 + $0x3f] sm:$0x1] %vm4565_vm2, %v5077_v40  ;;  %v5047_v15 = vpop.permute.xlu1 %5046 }
 0x5f3   : > { %5067 = vst.msk [vmem:[#allocation3 + $0x56] sm:$0x1] %vm4565_vm2, %v5047_v15  ;;  %8208 = vrot.lane.b32.xlu0 %v12860_v51, %s9695_s11 }
 0x5f4   : > { %7058 = vrot.lane.b32.xlu1 %v12772_v12, %s9695_s11  ;;  %v12902_v12 = vld [vmem:[#allocation3 + $0x61] sm:$0xff] }
 0x5f5   : > { %v5081_v52 = vpop.permute.xlu0 %5080 }
 0x5f6   : > { %5100 = vst.msk [vmem:[#allocation3 + $0x6f] sm:$0x1] %vm4565_vm2, %v5081_v52  ;;  %v5051_v27 = vpop.permute.xlu1 %5050 }
 0x5f7   : > { %5069 = vst.msk [vmem:[#allocation3 + $0x86] sm:$0x1] %vm4565_vm2, %v5051_v27  ;;  %5908 = vrot.lane.b32.xlu0 %v12709_v36, %s9695_s11  ;;  %v6293_v36 = vld [vmem:[#allocation3 + $0x21] sm:$0xff] }
 0x5f8   : > { %5906 = vrot.lane.b32.xlu1 %v12877_v9, %s9695_s11 }
 0x5f9   : > { %v5109_v17 = vpop.permute.xlu0 %5108  ;;  %v12881_v34 = vld [vmem:[#allocation3 + $0x38] sm:$0xff] }
 0x5fa   : > { %5130 = vst.msk [vmem:[#allocation3 + $0x40] sm:$0x1] %vm4565_vm2, %v5109_v17  ;;  %v5079_v44 = vpop.permute.xlu1 %5078  ;;  %v5288_v54 = vcombine.low %v12822_v63, %v12881_v34  ;;  %v5289_v10 = vcombine.high %v12822_v63, %v12881_v34 }
 0x5fb   : > { %5099 = vst.msk [vmem:[#allocation3 + $0x57] sm:$0x1] %vm4565_vm2, %v5079_v44  ;;  %5916 = vrot.lane.b32.xlu0 %v12849_v37, %s9695_s11 }
 0x5fc   : > { %6670 = vrot.lane.b32.xlu1 %v6293_v36, %s9694_s30  ;;  %v12923_v23 = vrot.slane %v5288_v54, %v15859_v49  ;;  %v12926_v63 = vrot.slane %v5289_v10, %v15859_v49 }
 0x5fd   : > { %v5113_v41 = vpop.permute.xlu0 %5112 }
 0x5fe   : > { %5132 = vst.msk [vmem:[#allocation3 + $0x70] sm:$0x1] %vm4565_vm2, %v5113_v41  ;;  %v5083_v11 = vpop.permute.xlu1 %5082 }
 0x5ff   : > { %5101 = vst.msk [vmem:[#allocation3 + $0x87] sm:$0x1] %vm4565_vm2, %v5083_v11  ;;  %6672 = vrot.lane.b32.xlu0 %v12754_v38, %s9694_s30 }
 0x600   : > { %7060 = vrot.lane.b32.xlu1 %v6293_v36, %s9695_s11 }
 0x601   : > { %v4554_v42 = vpop.permute.xlu0 %4553  ;;  %v12897_v53 = vld [vmem:[#allocation3 + $0x3a] sm:$0xff] }
 0x602   : > { %v12899_v35 = vld [vmem:[#allocation3 + $0x39] sm:$0xff]  ;;  %4572 = vst.msk [vmem:[#allocation3 + $0x91] sm:$0x1] %vm4565_vm2, %v4554_v42  ;;  %v5111_v20 = vpop.permute.xlu1 %5110  ;;  %v7596_v60 = vcombine.low %v12827_v46, %v12897_v53  ;;  %v7597_v6 = vcombine.high %v12827_v46, %v12897_v53  ;;  %v12912_v8 = vld [vmem:[#allocation3 + $0x50] sm:$0xff] }
 0x603   : > { %v6442_v14 = vcombine.low %v12838_v19, %v12899_v35  ;;  %v6443_v32 = vcombine.high %v12838_v19, %v12899_v35  ;;  %5131 = vst.msk [vmem:[#allocation3 + $0x58] sm:$0x1] %vm4565_vm2, %v5111_v20  ;;  %6680 = vrot.lane.b32.xlu0 %v12902_v12, %s9694_s30  ;;  %v5304_v39 = vcombine.low %v12877_v9, %v12912_v8 }
 0x604   : > { %v5305_v13 = vcombine.high %v12877_v9, %v12912_v8  ;;  %7824 = vrot.lane.b32.xlu1 %v7447_v58, %s9694_s30  ;;  %v12983_v42 = vrot.slane %v7596_v60, %v15859_v49  ;;  %v12986_v20 = vrot.slane %v7597_v6, %v15859_v49 }
 0x605   : > { %v4587_v43 = vpop.permute.xlu0 %4586  ;;  %v12929_v46 = vrot.slane %v5304_v39, %v15859_v49  ;;  %v12964_v27 = vrot.slane %v6442_v14, %v15859_v49  ;;  %v12967_v17 = vrot.slane %v6443_v32, %v15859_v49  ;;  %v13067_v32 = vld [vmem:[#allocation3 + $0x69] sm:$0xff] }
 0x606   : > { %v12932_v26 = vrot.slane %v5305_v13, %v15859_v49  ;;  %4604 = vst.msk [vmem:[#allocation3 + $0x92] sm:$0x1] %vm4565_vm2, %v4587_v43  ;;  %v5115_v18 = vpop.permute.xlu1 %5114 }
 0x607   : > { %5133 = vst.msk [vmem:[#allocation3 + $0x88] sm:$0x1] %vm4565_vm2, %v5115_v18  ;;  %7062 = vrot.lane.b32.xlu0 %v12754_v38, %s9695_s11 }
 0x608   : > { %7822 = vrot.lane.b32.xlu1 %v12938_v3, %s9694_s30 }
 0x609   : > { %v4619_v16 = vpop.permute.xlu0 %4618 }
 0x60a   : > { %4636 = vst.msk [vmem:[#allocation3 + $0x93] sm:$0x1] %vm4565_vm2, %v4619_v16  ;;  %v4556_v38 = vpop.permute.xlu1 %4555  ;;  %v12951_v45 = vld [vmem:[#allocation3 + $0x51] sm:$0xff] }
 0x60b   : > { %v12953_v0 = vld [vmem:[#allocation3 + $0x52] sm:$0xff]  ;;  %4573 = vst.msk [vmem:[#allocation3 + $0xa9] sm:$0x1] %vm4565_vm2, %v4556_v38  ;;  %7070 = vrot.lane.b32.xlu0 %v12902_v12, %s9695_s11  ;;  %v6458_v61 = vcombine.low %v6293_v36, %v12951_v45  ;;  %v6459_v40 = vcombine.high %v6293_v36, %v12951_v45  ;;  %v13013_v16 = vld [vmem:[#allocation3 + $0x6a] sm:$0xff] }
 0x60c   : > { %v7612_v15 = vcombine.low %v7447_v58, %v12953_v0  ;;  %v7613_v52 = vcombine.high %v7447_v58, %v12953_v0  ;;  %8214 = vrot.lane.b32.xlu1 %v7447_v58, %s9695_s11 }
 0x60d   : > { %v4651_v44 = vpop.permute.xlu0 %4650  ;;  %v12970_v54 = vrot.slane %v6458_v61, %v15859_v49  ;;  %v12973_v10 = vrot.slane %v6459_v40, %v15859_v49  ;;  %v13018_v40 = vld [vmem:[#allocation3 + $0x68] sm:$0xff] }
 0x60e   : > { %v12976_v36 = vrot.slane %v7612_v15, %v15859_v49  ;;  %v12979_v41 = vrot.slane %v7613_v52, %v15859_v49  ;;  %4668 = vst.msk [vmem:[#allocation3 + $0x94] sm:$0x1] %vm4565_vm2, %v4651_v44  ;;  %v4589_v11 = vpop.permute.xlu1 %4588  ;;  %v13029_v44 = vld [vmem:[#allocation3 + $0x78] sm:$0xff] }
 0x60f   : > { %4605 = vst.msk [vmem:[#allocation3 + $0xaa] sm:$0x1] %vm4565_vm2, %v4589_v11  ;;  %5516 = vrot.lane.b32.xlu0 %v12877_v9, %s9694_s30 }
 0x610   : > { %8218 = vrot.lane.b32.xlu1 %v12897_v53, %s9695_s11 }
 0x611   : > { %v4683_v43 = vpop.permute.xlu0 %4682 }
 0x612   : > { %4700 = vst.msk [vmem:[#allocation3 + $0x95] sm:$0x1] %vm4565_vm2, %v4683_v43  ;;  %v4621_v18 = vpop.permute.xlu1 %4620  ;;  %v13033_v43 = vld [vmem:[#allocation3 + $0x4a] sm:$0xff] }
 0x613   : > { %4637 = vst.msk [vmem:[#allocation3 + $0xab] sm:$0x1] %vm4565_vm2, %v4621_v18  ;;  %5520 = vrot.lane.b32.xlu0 %v12881_v34, %s9694_s30  ;;  %v7477_v39 = vcombine.high %v12938_v3, %v13033_v43 }
 0x614   : > { %8226 = vrot.lane.b32.xlu1 %v13013_v16, %s9695_s11 }
 0x615   : > { %v4715_v38 = vpop.permute.xlu0 %4714 }
 0x616   : > { %4732 = vst.msk [vmem:[#allocation3 + $0x96] sm:$0x1] %vm4565_vm2, %v4715_v38  ;;  %v4653_v61 = vpop.permute.xlu1 %4652  ;;  %v13039_v38 = vld [vmem:[#allocation3 + $0x32] sm:$0xff] }
 0x617   : > { %4669 = vst.msk [vmem:[#allocation3 + $0xac] sm:$0x1] %vm4565_vm2, %v4653_v61  ;;  %5528 = vrot.lane.b32.xlu0 %v13018_v40, %s9694_s30  ;;  %v7460_v13 = vcombine.low %v12860_v51, %v13039_v38 }
 0x618   : > { %5522 = vrot.lane.b32.xlu1 %v12730_v62, %s9694_s30 }
 0x619   : > { %v4747_v15 = vpop.permute.xlu0 %4746 }
 0x61a   : > { %4764 = vst.msk [vmem:[#allocation3 + $0x97] sm:$0x1] %vm4565_vm2, %v4747_v15  ;;  %v4685_v52 = vpop.permute.xlu1 %4684 }
 0x61b   : > { %4701 = vst.msk [vmem:[#allocation3 + $0xad] sm:$0x1] %vm4565_vm2, %v4685_v52  ;;  %5910 = vrot.lane.b32.xlu0 %v12881_v34, %s9695_s11  ;;  %v7476_v34 = vcombine.low %v12938_v3, %v13033_v43 }
 0x61c   : > { %5530 = vrot.lane.b32.xlu1 %v13029_v44, %s9694_s30 }
 0x61d   : > { %v4779_v11 = vpop.permute.xlu0 %4778  ;;  %v7484_v9 = vrot.slane %v7476_v34, %v15859_v49  ;;  %v7491_v34 = vrot.slane %v7477_v39, %v15859_v49 }
 0x61e   : > { %4796 = vst.msk [vmem:[#allocation3 + $0x98] sm:$0x1] %vm4565_vm2, %v4779_v11  ;;  %v4717_v18 = vpop.permute.xlu1 %4716 }
 0x61f   : > { %4733 = vst.msk [vmem:[#allocation3 + $0xae] sm:$0x1] %vm4565_vm2, %v4717_v18  ;;  %5918 = vrot.lane.b32.xlu0 %v13018_v40, %s9695_s11 }
 0x621   : > { %v4893_v61 = vpop.permute.xlu0 %4892  ;;  %v13043_v15 = vld [vmem:[#allocation3 + $0x90] sm:$0xff] }
 0x622   : > { %4910 = vst.msk [vmem:[#allocation3 + $0x99] sm:$0x1] %vm4565_vm2, %v4893_v61  ;;  %v4749_v52 = vpop.permute.xlu1 %4748  ;;  %v5184_v11 = vcombine.low %v12849_v37, %v13043_v15  ;;  %v5185_v18 = vcombine.high %v12849_v37, %v13043_v15  ;;  %5534 = vrot.lane.b32.xlu1 %v13043_v15, %s9694_s30  ;;  %v7461_v61 = vcombine.high %v12860_v51, %v13039_v38 }
 0x623   : > { %4765 = vst.msk [vmem:[#allocation3 + $0xaf] sm:$0x1] %vm4565_vm2, %v4749_v52  ;;  %6674 = vrot.lane.b32.xlu0 %v12899_v35, %s9694_s30  ;;  %v7468_v52 = vrot.slane %v7460_v13, %v15859_v49  ;;  %v13083_v13 = vrot.slane %v5216_v2, %v10542_v47 }
 0x624   : > { %v5192_v30 = vrot.slane %v5184_v11, %v15859_v49  ;;  %v5199_v57 = vrot.slane %v5185_v18, %v15859_v49 }
 0x625   : > { %v4925_v37 = vpop.permute.xlu0 %4924  ;;  %v13062_v6 = vld [vmem:[#allocation3 + $0x91] sm:$0xff]  ;;  %16105 = vst [vmem:[#allocation23_spill] sm:$0xff] %v13083_v13  ;;  %v7525_v2 = vcombine.high %v7468_v52, %v7484_v9 }
 0x626   : > { %4942 = vst.msk [vmem:[#allocation3 + $0x9a] sm:$0x1] %vm4565_vm2, %v4925_v37  ;;  %v4781_v58 = vpop.permute.xlu1 %4780  ;;  %5912 = vrot.lane.b32.xlu1 %v12730_v62, %s9695_s11  ;;  %v6338_v14 = vcombine.low %v12902_v12, %v13062_v6  ;;  %v6339_v51 = vcombine.high %v12902_v12, %v13062_v6  ;;  %v7475_v37 = vrot.slane %v7461_v61, %v15859_v49 }
 0x627   : > { %4797 = vst.msk [vmem:[#allocation3 + $0xb0] sm:$0x1] %vm4565_vm2, %v4781_v58  ;;  %6682 = vrot.lane.b32.xlu0 %v13067_v32, %s9694_s30  ;;  %v7524_v62 = vcombine.low %v7468_v52, %v7484_v9  ;;  %v13089_v12 = vrot.slane %v5217_v28, %v10542_v47  ;;  %v13095_v58 = vrot.slane %v5232_v31, %v10542_v47 }
 0x628   : > { %v7540_v61 = vcombine.low %v7475_v37, %v7491_v34  ;;  %v7541_v59 = vcombine.high %v7475_v37, %v7491_v34  ;;  %v6300_v34 = vld [vmem:[#allocation3 + $0x79] sm:$0xff] }
 0x629   : > { %v4957_v60 = vpop.permute.xlu0 %4956  ;;  %v13102_v33 = vld [vmem:[#allocation3 + $0x92] sm:$0xff]  ;;  %v13145_v9 = vrot.slane %v7524_v62, %v10542_v47 }
 0x62a   : > { %4974 = vst.msk [vmem:[#allocation3 + $0x9b] sm:$0x1] %vm4565_vm2, %v4957_v60  ;;  %v4895_v39 = vpop.permute.xlu1 %4894  ;;  %5920 = vrot.lane.b32.xlu1 %v13029_v44, %s9695_s11  ;;  %v13100_v7 = vld [vmem:[#allocation3 + $0xa8] sm:$0xff]  ;;  %16107 = vst [vmem:[#allocation41_spill] sm:$0xff] %v13102_v33  ;;  %v13121_v60 = vrot.slane %v6386_v29, %v10542_v47  ;;  %v13142_v29 = vrot.slane %v6387_v48, %v10542_v47  ;;  %v7492_v4 = vcombine.low %v13130_v21, %v13102_v33 }
 0x62b   : > { %16106 = vst [vmem:[#allocation18_spill] sm:$0xff] %v13100_v7  ;;  %4911 = vst.msk [vmem:[#allocation3 + $0xb1] sm:$0x1] %vm4565_vm2, %v4895_v39  ;;  %7064 = vrot.lane.b32.xlu0 %v12899_v35, %s9695_s11  ;;  %v5200_v28 = vcombine.low %v13029_v44, %v13100_v7  ;;  %v5201_v31 = vcombine.high %v13029_v44, %v13100_v7  ;;  %v13136_v35 = vrot.slane %v6371_v24, %v10542_v47  ;;  %v6301_v7 = vld [vmem:[#allocation3 + $0x81] sm:$0xff] }
 0x62c   : > { %16108 = vst [vmem:[#allocation37_spill] sm:$0xff] %v13121_v60  ;;  %16111 = vst [vmem:[#allocation25_spill] sm:$0xff] %v13142_v29  ;;  %v7493_v1 = vcombine.high %v13130_v21, %v13102_v33  ;;  %v13160_v24 = vrot.slane %v7525_v2, %v10542_v47  ;;  %v13163_v48 = vrot.slane %v7540_v61, %v10542_v47 }
 0x62d   : > { %16110 = vst [vmem:[#allocation38_spill] sm:$0xff] %v13136_v35  ;;  %16112 = vst [vmem:[#allocation70_spill] sm:$0xff] %v13145_v9  ;;  %v4989_v44 = vpop.permute.xlu0 %4988  ;;  %v5208_v11 = vrot.slane %v5200_v28, %v15859_v49  ;;  %v5215_v52 = vrot.slane %v5201_v31, %v15859_v49  ;;  %v13166_v18 = vrot.slane %v7541_v59, %v10542_v47 }
 0x62e   : > { %5006 = vst.msk [vmem:[#allocation3 + $0x9c] sm:$0x1] %vm4565_vm2, %v4989_v44  ;;  %v4927_v50 = vpop.permute.xlu1 %4926  ;;  %6676 = vrot.lane.b32.xlu1 %v12774_v56, %s9694_s30  ;;  %v13157_v22 = vld [vmem:[#allocation3 + $0xa9] sm:$0xff]  ;;  %16114 = vst [vmem:[#allocation68_spill] sm:$0xff] %v13160_v24  ;;  %v6346_v31 = vrot.slane %v6338_v14, %v15859_v49  ;;  %v6353_v2 = vrot.slane %v6339_v51, %v15859_v49  ;;  %v7500_v19 = vrot.slane %v7492_v4, %v15859_v49  ;;  %v13187_v51 = vld [vmem:[#allocation3 + $0x7a] sm:$0xff] }
 0x62f   : > { %16113 = vst [vmem:[#allocation17_spill] sm:$0xff] %v13157_v22  ;;  %16115 = vst [vmem:[#allocation19_spill] sm:$0xff] %v13163_v48  ;;  %7072 = vrot.lane.b32.xlu0 %v13067_v32, %s9695_s11  ;;  %v5248_v37 = vcombine.low %v5192_v30, %v5208_v11  ;;  %v5249_v62 = vcombine.high %v5192_v30, %v5208_v11  ;;  %v5264_v39 = vcombine.low %v5199_v57, %v5215_v52 }
 0x630   : > { %16116 = vst [vmem:[#allocation14_spill] sm:$0xff] %v13166_v18  ;;  %4943 = vst.msk [vmem:[#allocation3 + $0xb2] sm:$0x1] %vm4565_vm2, %v4927_v50  ;;  %v5265_v28 = vcombine.high %v5199_v57, %v5215_v52  ;;  %v6354_v61 = vcombine.low %v6300_v34, %v13157_v22  ;;  %v6355_v44 = vcombine.high %v6300_v34, %v13157_v22 }
 0x631   : > { %v5021_v59 = vpop.permute.xlu0 %5020  ;;  %v13177_v50 = vrot.slane %v5248_v37, %v10542_v47  ;;  %v13180_v5 = vrot.slane %v5249_v62, %v10542_v47  ;;  %v13183_v30 = vrot.slane %v5264_v39, %v10542_v47  ;;  %v7507_v57 = vrot.slane %v7493_v1, %v15859_v49 }
 0x632   : > { %5038 = vst.msk [vmem:[#allocation3 + $0x9d] sm:$0x1] %vm4565_vm2, %v5021_v59  ;;  %v4959_v14 = vpop.permute.xlu1 %4958  ;;  %6684 = vrot.lane.b32.xlu1 %v6300_v34, %s9694_s30  ;;  %v6362_v11 = vrot.slane %v6354_v61, %v15859_v49  ;;  %v6369_v52 = vrot.slane %v6355_v44, %v15859_v49  ;;  %v13192_v4 = vld [vmem:[#allocation3 + $0xaa] sm:$0xff]  ;;  %v13195_v37 = vrot.slane %v5265_v28, %v10542_v47 }
 0x633   : > { %16117 = vst [vmem:[#allocation27_spill] sm:$0xff] %v13177_v50  ;;  %16118 = vst [vmem:[#allocation31_spill] sm:$0xff] %v13192_v4  ;;  %7828 = vrot.lane.b32.xlu0 %v12897_v53, %s9694_s30  ;;  %v7508_v62 = vcombine.low %v13187_v51, %v13192_v4  ;;  %v7509_v1 = vcombine.high %v13187_v51, %v13192_v4  ;;  %v16136_v24 = vcombine.low %v12964_v27, %v12970_v54 }
 0x634   : > { %4975 = vst.msk [vmem:[#allocation3 + $0xb3] sm:$0x1] %vm4565_vm2, %v4959_v14  ;;  %v6402_v44 = vcombine.low %v6346_v31, %v6362_v11  ;;  %v6403_v28 = vcombine.high %v6346_v31, %v6362_v11  ;;  %v6418_v59 = vcombine.low %v6353_v2, %v6369_v52  ;;  %v6419_v22 = vcombine.high %v6353_v2, %v6369_v52 }
 0x635   : > { %v5053_v14 = vpop.permute.xlu0 %5052  ;;  %v7516_v33 = vrot.slane %v7508_v62, %v15859_v49  ;;  %v7523_v53 = vrot.slane %v7509_v1, %v15859_v49 }
 0x636   : > { %5070 = vst.msk [vmem:[#allocation3 + $0x9e] sm:$0x1] %vm4565_vm2, %v5053_v14  ;;  %v4991_v39 = vpop.permute.xlu1 %4990  ;;  %7066 = vrot.lane.b32.xlu1 %v12774_v56, %s9695_s11  ;;  %v13224_v52 = vrot.slane %v6418_v59, %v10542_v47  ;;  %v13232_v2 = vrot.slane %v6402_v44, %v10542_v47  ;;  %v13235_v11 = vrot.slane %v6403_v28, %v10542_v47 }
 0x637   : > { %5007 = vst.msk [vmem:[#allocation3 + $0xb4] sm:$0x1] %vm4565_vm2, %v4991_v39  ;;  %7836 = vrot.lane.b32.xlu0 %v13013_v16, %s9694_s30  ;;  %v7556_v62 = vcombine.low %v7500_v19, %v7516_v33  ;;  %v7557_v1 = vcombine.high %v7500_v19, %v7516_v33  ;;  %v7572_v56 = vcombine.low %v7507_v57, %v7523_v53 }
 0x638   : > { %16119 = vst [vmem:[#allocation28_spill] sm:$0xff] %v13224_v52  ;;  %v7573_v14 = vcombine.high %v7507_v57, %v7523_v53  ;;  %16120 = vst [vmem:[#allocation21_spill] sm:$0xff] %v13232_v2  ;;  %v13242_v19 = vrot.slane %v6419_v22, %v10542_v47 }
 0x639   : > { %16121 = vst [vmem:[#allocation84_spill] sm:$0xff] %v13235_v11  ;;  %v5085_v39 = vpop.permute.xlu0 %5084  ;;  %v13245_v33 = vrot.slane %v7556_v62, %v10542_v47  ;;  %v13248_v57 = vrot.slane %v7557_v1, %v10542_v47  ;;  %v13259_v62 = vrot.slane %v7572_v56, %v10542_v47 }
 0x63a   : > { %16122 = vst [vmem:[#allocation30_spill] sm:$0xff] %v13242_v19  ;;  %5102 = vst.msk [vmem:[#allocation3 + $0x9f] sm:$0x1] %vm4565_vm2, %v5085_v39  ;;  %v5023_v44 = vpop.permute.xlu1 %5022  ;;  %7074 = vrot.lane.b32.xlu1 %v6300_v34, %s9695_s11  ;;  %v13279_v34 = vrot.slane %v7573_v14, %v10542_v47  ;;  %v13297_v39 = vld [vmem:[#allocation3 + $0x80] sm:$0xff] }
 0x63b   : > { %16123 = vst [vmem:[#allocation29_spill] sm:$0xff] %v13245_v33  ;;  %16124 = vst [vmem:[#allocation33_spill] sm:$0xff] %v13248_v57  ;;  %7826 = vrot.lane.b32.xlu0 %v13039_v38, %s9694_s30  ;;  %v13376_v33 = vrot.slane %v16136_v24, %v10542_v47 }
 0x63c   : > { %16125 = vst [vmem:[#allocation66_spill] sm:$0xff] %v13259_v62  ;;  %5039 = vst.msk [vmem:[#allocation3 + $0xb5] sm:$0x1] %vm4565_vm2, %v5023_v44 }
 0x63d   : > { %16126 = vst [vmem:[#allocation24_spill] sm:$0xff] %v13279_v34  ;;  %v5117_v22 = vpop.permute.xlu0 %5116  ;;  %16137 = vst [vmem:[#allocation36_spill] sm:$0xff] %v13376_v33 }
 0x63e   : > { %5134 = vst.msk [vmem:[#allocation3 + $0xa0] sm:$0x1] %vm4565_vm2, %v5117_v22  ;;  %v5055_v59 = vpop.permute.xlu1 %5054  ;;  %5914 = vrot.lane.b32.xlu1 %v12912_v8, %s9695_s11 }
 0x63f   : > { %5071 = vst.msk [vmem:[#allocation3 + $0xb6] sm:$0x1] %vm4565_vm2, %v5055_v59  ;;  %7834 = vrot.lane.b32.xlu0 %v13130_v21, %s9694_s30 }
 0x641   : > { %v13295_v1 = vpop.permute.xlu0 %5900  ;;  %v13312_v56 = vld [vmem:[#allocation3 + $0x98] sm:$0xff] }
 0x642   : > { %v5087_v22 = vpop.permute.xlu1 %5086  ;;  %5922 = vrot.lane.b32.xlu1 %v13297_v39, %s9695_s11  ;;  %v5320_v61 = vcombine.low %v13018_v40, %v13312_v56 }
 0x643   : > { %5103 = vst.msk [vmem:[#allocation3 + $0xb7] sm:$0x1] %vm4565_vm2, %v5087_v22  ;;  %8212 = vrot.lane.b32.xlu0 %v12938_v3, %s9695_s11 }
 0x645   : > { %v13304_v44 = vpop.permute.xlu0 %6664  ;;  %v13306_v14 = vld [vmem:[#allocation3 + $0x99] sm:$0xff] }
 0x646   : > { %16127 = vst [vmem:[#allocation13_spill] sm:$0xff] %v13304_v44  ;;  %v13308_v59 = vld [vmem:[#allocation3 + $0x9a] sm:$0xff]  ;;  %v5119_v4 = vpop.permute.xlu1 %5118  ;;  %6678 = vrot.lane.b32.xlu1 %v12951_v45, %s9694_s30  ;;  %v6474_v53 = vcombine.low %v13067_v32, %v13306_v14  ;;  %v6475_v22 = vcombine.high %v13067_v32, %v13306_v14  ;;  %v5321_v32 = vcombine.high %v13018_v40, %v13312_v56 }
 0x647   : > { %v7628_v3 = vcombine.low %v13013_v16, %v13308_v59  ;;  %v7629_v28 = vcombine.high %v13013_v16, %v13308_v59  ;;  %5135 = vst.msk [vmem:[#allocation3 + $0xb8] sm:$0x1] %vm4565_vm2, %v5119_v4  ;;  %8216 = vrot.lane.b32.xlu0 %v13039_v38, %s9695_s11  ;;  %v16129_v16 = vcombine.low %v12923_v23, %v12929_v46 }
 0x648   : > { %v16131_v4 = vcombine.high %v12923_v23, %v12929_v46  ;;  %v16133_v23 = vcombine.high %v12926_v63, %v12932_v26  ;;  %v5335_v19 = vrot.slane %v5321_v32, %v15859_v49 }
 0x649   : > { %v13325_v31 = vpop.permute.xlu0 %7054  ;;  %v13340_v38 = vrot.slane %v16129_v16, %v10542_v47  ;;  %v16132_v16 = vcombine.low %v12926_v63, %v12932_v26  ;;  %v16140_v63 = vcombine.low %v12967_v17, %v12973_v10 }
 0x64a   : > { %16128 = vst [vmem:[#allocation69_spill] sm:$0xff] %v13325_v31  ;;  %v13331_v34 = vpop.permute.xlu1 %5510  ;;  %6686 = vrot.lane.b32.xlu1 %v6301_v7, %s9694_s30  ;;  %v13334_v18 = vld [vmem:[#allocation3 + $0xb0] sm:$0xff]  ;;  %v13346_v62 = vrot.slane %v16131_v4, %v10542_v47  ;;  %v13364_v46 = vrot.slane %v16133_v23, %v10542_v47 }
 0x64b   : > { %16130 = vst [vmem:[#allocation40_spill] sm:$0xff] %v13340_v38  ;;  %8224 = vrot.lane.b32.xlu0 %v13130_v21, %s9695_s11  ;;  %v5336_v40 = vcombine.low %v13297_v39, %v13334_v18  ;;  %v5337_v48 = vcombine.high %v13297_v39, %v13334_v18  ;;  %v13358_v57 = vrot.slane %v16132_v16, %v10542_v47 }
 0x64c   : > { %v16134_v21 = vcombine.high %v12967_v17, %v12973_v10  ;;  %v16138_v16 = vcombine.high %v12964_v27, %v12970_v54  ;;  %v13388_v26 = vrot.slane %v16140_v63, %v10542_v47  ;;  %v13401_v27 = vrot.slane %v6474_v53, %v15859_v49 }
 0x64d   : > { %v13390_v23 = vpop.permute.xlu0 %5512  ;;  %v5344_v24 = vrot.slane %v5336_v40, %v15859_v49  ;;  %v5351_v29 = vrot.slane %v5337_v48, %v15859_v49  ;;  %v13404_v17 = vrot.slane %v6475_v22, %v15859_v49  ;;  %v13407_v54 = vrot.slane %v7628_v3, %v15859_v49 }
 0x64e   : > { %v13370_v4 = vrot.slane %v16134_v21, %v10542_v47  ;;  %v13382_v9 = vrot.slane %v16138_v16, %v10542_v47  ;;  %16141 = vst [vmem:[#allocation85_spill] sm:$0xff] %v13388_v26  ;;  %16142 = vst [vmem:[#allocation26_spill] sm:$0xff] %v13390_v23  ;;  %v5328_v21 = vrot.slane %v5320_v61, %v15859_v49  ;;  %v13396_v11 = vpop.permute.xlu1 %8210  ;;  %7068 = vrot.lane.b32.xlu1 %v12951_v45, %s9695_s11  ;;  %v13412_v61 = vld [vmem:[#allocation3 + $0xb1] sm:$0xff]  ;;  %v13418_v45 = vld [vmem:[#allocation3 + $0x82] sm:$0xff] }
 0x64f   : > { %16143 = vst [vmem:[#allocation47_spill] sm:$0xff] %v13396_v11  ;;  %v13410_v10 = vrot.slane %v7629_v28, %v15859_v49  ;;  %v13414_v48 = vld [vmem:[#allocation3 + $0xb2] sm:$0xff]  ;;  %5924 = vrot.lane.b32.xlu0 %v13043_v15, %s9695_s11  ;;  %v5400_v40 = vcombine.low %v5335_v19, %v5351_v29  ;;  %v5401_v22 = vcombine.high %v5335_v19, %v5351_v29 }
 0x650   : > { %16135 = vst [vmem:[#allocation32_spill] sm:$0xff] %v13370_v4  ;;  %16139 = vst [vmem:[#allocation20_spill] sm:$0xff] %v13382_v9  ;;  %v5384_v53 = vcombine.low %v5328_v21, %v5344_v24  ;;  %v5385_v32 = vcombine.high %v5328_v21, %v5344_v24  ;;  %v6490_v16 = vcombine.low %v6301_v7, %v13412_v61  ;;  %v16188_v4 = vld [vmem:[#allocation13_spill] sm:$0xff] }
 0x651   : > { %v6491_v3 = vcombine.high %v6301_v7, %v13412_v61  ;;  %v7644_v28 = vcombine.low %v13418_v45, %v13414_v48  ;;  %v7645_v63 = vcombine.high %v13418_v45, %v13414_v48  ;;  %v13426_v35 = vpop.permute.xlu0 %5902  ;;  %v5408_v21 = vrot.slane %v5400_v40, %v10542_v47 }
 0x652   : > { %16144 = vst [vmem:[#allocation43_spill] sm:$0xff] %v13426_v35  ;;  %v13429_v15 = vrot.slane %v5384_v53, %v10542_v47  ;;  %v5399_v2 = vrot.slane %v5385_v32, %v10542_v47  ;;  %v5415_v29 = vrot.slane %v5401_v22, %v10542_v47  ;;  %v13434_v19 = vpop.permute.xlu1 %5514  ;;  %7076 = vrot.lane.b32.xlu1 %v6301_v7, %s9695_s11 }
 0x653   : > { %v6498_v24 = vrot.slane %v6490_v16, %v15859_v49  ;;  %v6505_v55 = vrot.slane %v6491_v3, %v15859_v49  ;;  %v7652_v52 = vrot.slane %v7644_v28, %v15859_v49  ;;  %v7659_v60 = vrot.slane %v7645_v63, %v15859_v49  ;;  %6688 = vrot.lane.b32.xlu0 %v13062_v6, %s9694_s30 }
 0x654   : > { %16145 = vst [vmem:[#allocation48_spill] sm:$0xff] %v13429_v15  ;;  %v5417_v53 = vcombine.high %v13340_v38, %v13429_v15  ;;  %v5419_v32 = vcombine.high %v13346_v62, %v5399_v2  ;;  %v5421_v40 = vcombine.high %v13358_v57, %v5408_v21  ;;  %v5418_v7 = vcombine.low %v13346_v62, %v5399_v2 }
 0x655   : > { %v6538_v22 = vcombine.low %v13401_v27, %v6498_v24  ;;  %v6539_v16 = vcombine.high %v13401_v27, %v6498_v24  ;;  %v6554_v3 = vcombine.low %v13404_v17, %v6505_v55  ;;  %v6555_v28 = vcombine.high %v13404_v17, %v6505_v55  ;;  %v13452_v63 = vpop.permute.xlu0 %6666 }
 0x656   : > { %v7692_v35 = vcombine.low %v13407_v54, %v7652_v52  ;;  %v7693_v23 = vcombine.high %v13407_v54, %v7652_v52  ;;  %v7708_v11 = vcombine.low %v13410_v10, %v7659_v60  ;;  %v7709_v31 = vcombine.high %v13410_v10, %v7659_v60  ;;  %v13458_v44 = vpop.permute.xlu1 %5518  ;;  %7832 = vrot.lane.b32.xlu1 %v12953_v0, %s9694_s30 }
 0x657   : > { %v16146_v2 = vcombine.high %v13083_v13, %v13177_v50  ;;  %v16147_v55 = vcombine.high %v13089_v12, %v13180_v5  ;;  %v16148_v52 = vcombine.high %v13095_v58, %v13183_v30  ;;  %v16149_v60 = vcombine.low %v13089_v12, %v13180_v5  ;;  %7078 = vrot.lane.b32.xlu0 %v13062_v6, %s9695_s11  ;;  %v16173_v50 = vld [vmem:[#allocation31_spill] sm:$0xff] }
 0x658   : > { %v5423_v10 = vcombine.high %v13364_v46, %v5415_v29  ;;  %v5420_v24 = vcombine.low %v13358_v57, %v5408_v21  ;;  %v5422_v12 = vcombine.low %v13364_v46, %v5415_v29  ;;  %v13505_v57 = vrot.slane %v6538_v22, %v10542_v47 }
 0x659   : > { %v13465_v62 = vpack.i.bf16 %v5417_v53, %v16146_v2  ;;  %v13470_v27 = vpack.i.bf16 %v5419_v32, %v16147_v55  ;;  %v13475_v17 = vpack.i.bf16 %v5421_v40, %v16148_v52  ;;  %v13480_v54 = vpack.i.bf16 %v5418_v7, %v16149_v60  ;;  %v13507_v21 = vpop.permute.xlu0 %7056 }
 0x65a   : > { %v16150_v53 = vcombine.low %v12983_v42, %v12976_v36  ;;  %v16152_v40 = vcombine.high %v12983_v42, %v12976_v36  ;;  %v13502_v7 = vrot.slane %v6555_v28, %v10542_v47  ;;  %16155 = vst [vmem:[#allocation86_spill] sm:$0xff] %v13505_v57  ;;  %v16156_v2 = vcombine.high %v13108_v25, %v13195_v37  ;;  %v13531_v52 = vpop.permute.xlu1 %5526 }
 0x65b   : > { %v16157_v36 = vcombine.low %v13095_v58, %v13183_v30  ;;  %v16158_v46 = vcombine.low %v12986_v20, %v12979_v41  ;;  %v16160_v22 = vcombine.high %v12986_v20, %v12979_v41  ;;  %7840 = vrot.lane.b32.xlu1 %v13418_v45, %s9694_s30  ;;  %v16162_v58 = vcombine.low %v13108_v25, %v13195_v37 }
 0x65c   : > { %v13490_v32 = vrot.slane %v16150_v53, %v10542_v47  ;;  %v13496_v5 = vrot.slane %v16152_v40, %v10542_v47  ;;  %16154 = vst [vmem:[#allocation39_spill] sm:$0xff] %v13502_v7  ;;  %v13512_v55 = vpack.i.bf16 %v5423_v10, %v16156_v2  ;;  %v13545_v41 = vrot.slane %v6539_v16, %v10542_v47 }
 0x65d   : > { %v13517_v42 = vpack.i.bf16 %v5420_v24, %v16157_v36  ;;  %v13523_v29 = vrot.slane %v16158_v46, %v10542_v47  ;;  %v13529_v28 = vrot.slane %v16160_v22, %v10542_v47  ;;  %v13538_v30 = vpack.i.bf16 %v5422_v12, %v16162_v58  ;;  %5524 = vrot.lane.b32.xlu0 %v12912_v8, %s9694_s30  ;;  %v16169_v46 = vld [vmem:[#allocation18_spill] sm:$0xff] }
 0x65e   : > { %16151 = vst [vmem:[#allocation44_spill] sm:$0xff] %v13490_v32  ;;  %16153 = vst [vmem:[#allocation95_spill] sm:$0xff] %v13496_v5  ;;  %v13552_v24 = vrot.slane %v6554_v3, %v10542_v47  ;;  %v13555_v25 = vrot.slane %v7692_v35, %v10542_v47  ;;  %v13558_v37 = vrot.slane %v7693_v23, %v10542_v47  ;;  %v13570_v3 = vpop.permute.xlu0 %7820  ;;  %v13580_v36 = vpop.permute.xlu1 %5904  ;;  %v16171_v23 = vld [vmem:[#allocation17_spill] sm:$0xff] }
 0x65f   : > { %16159 = vst [vmem:[#allocation49_spill] sm:$0xff] %v13523_v29  ;;  %16161 = vst [vmem:[#allocation45_spill] sm:$0xff] %v13529_v28  ;;  %v13565_v8 = vrot.slane %v7708_v11, %v10542_v47  ;;  %v13568_v40 = vrot.slane %v7709_v31, %v10542_v47  ;;  %7830 = vrot.lane.b32.xlu1 %v13033_v43, %s9694_s30  ;;  %v16170_v31 = vld [vmem:[#allocation41_spill] sm:$0xff]  ;;  %v5559_v29 = vcombine.high %v13331_v34, %v13458_v44 }
 0x660   : > { %16163 = vst [vmem:[#allocation50_spill] sm:$0xff] %v13545_v41  ;;  %16164 = vst [vmem:[#allocation46_spill] sm:$0xff] %v13552_v24 }
 0x661   : > { %16165 = vst [vmem:[#allocation67_spill] sm:$0xff] %v13555_v25  ;;  %16166 = vst [vmem:[#allocation34_spill] sm:$0xff] %v13558_v37  ;;  %5532 = vrot.lane.b32.xlu0 %v13297_v39, %s9694_s30  ;;  %v5573_v7 = vrot.slane %v5559_v29, %v15859_v49 }
 0x662   : > { %16167 = vst [vmem:[#allocation71_spill] sm:$0xff] %v13565_v8  ;;  %16168 = vst [vmem:[#allocation99_spill] sm:$0xff] %v13568_v40  ;;  %v13600_v35 = vpop.permute.xlu0 %7818  ;;  %v13602_v16 = vpop.permute.xlu1 %6668 }
 0x663   : > { %7838 = vrot.lane.b32.xlu1 %v13187_v51, %s9694_s30 }
 0x665   : > { %5536 = vrot.lane.b32.xlu0 %v13312_v56, %s9694_s30 }
 0x666   : > { %v13608_v39 = vpop.permute.xlu0 %8208  ;;  %v13610_v53 = vpop.permute.xlu1 %7058 }
 0x667   : > { %8222 = vrot.lane.b32.xlu1 %v12953_v0, %s9695_s11 }
 0x669   : > { %5926 = vrot.lane.b32.xlu0 %v13312_v56, %s9695_s11 }
 0x66a   : > { %v13616_v12 = vpop.permute.xlu0 %5908  ;;  %v13618_v6 = vpop.permute.xlu1 %5906 }
 0x66b   : > { %8230 = vrot.lane.b32.xlu1 %v13418_v45, %s9695_s11  ;;  %v5948_v25 = vcombine.low %v13295_v1, %v13616_v12  ;;  %v5949_v57 = vcombine.high %v13295_v1, %v13616_v12 }
 0x66d   : > { %6690 = vrot.lane.b32.xlu0 %v13306_v14, %s9694_s30  ;;  %v5956_v29 = vrot.slane %v5948_v25, %v15859_v49 }
 0x66e   : > { %v13624_v58 = vpop.permute.xlu0 %5916  ;;  %v13626_v22 = vpop.permute.xlu1 %6670 }
 0x66f   : > { %8234 = vrot.lane.b32.xlu1 %v13308_v59, %s9695_s11 }
 0x671   : > { %7080 = vrot.lane.b32.xlu0 %v13306_v14, %s9695_s11 }
 0x672   : > { %v13632_v0 = vpop.permute.xlu0 %6672  ;;  %v13634_v56 = vpop.permute.xlu1 %7060 }
 0x673   : > { %5538 = vrot.lane.b32.xlu1 %v16169_v46, %s9694_s30 }
 0x675   : > { %7844 = vrot.lane.b32.xlu0 %v13308_v59, %s9694_s30 }
 0x676   : > { %v13640_v45 = vpop.permute.xlu0 %6680  ;;  %v13642_v11 = vpop.permute.xlu1 %7824 }
 0x677   : > { %5928 = vrot.lane.b32.xlu1 %v16169_v46, %s9695_s11 }
 0x679   : > { %7842 = vrot.lane.b32.xlu0 %v16170_v31, %s9694_s30 }
 0x67a   : > { %v13648_v14 = vpop.permute.xlu0 %7062  ;;  %v13650_v2 = vpop.permute.xlu1 %7822 }
 0x67b   : > { %6692 = vrot.lane.b32.xlu1 %v16171_v23, %s9694_s30 }
 0x67d   : > { %8220 = vrot.lane.b32.xlu0 %v13033_v43, %s9695_s11 }
 0x67e   : > { %v13656_v59 = vpop.permute.xlu0 %7070  ;;  %v13658_v20 = vpop.permute.xlu1 %8214 }
 0x67f   : > { %7082 = vrot.lane.b32.xlu1 %v16171_v23, %s9695_s11 }
 0x681   : > { %8228 = vrot.lane.b32.xlu0 %v13187_v51, %s9695_s11 }
 0x682   : > { %v13664_v46 = vpop.permute.xlu0 %5516  ;;  %v13666_v10 = vpop.permute.xlu1 %8218 }
 0x683   : > { %5930 = vrot.lane.b32.xlu1 %v13334_v18, %s9695_s11 }
 0x685   : > { %8232 = vrot.lane.b32.xlu0 %v16170_v31, %s9695_s11 }
 0x686   : > { %v13672_v43 = vpop.permute.xlu0 %5520  ;;  %v13674_v60 = vpop.permute.xlu1 %8226 }
 0x687   : > { %16172 = vst [vmem:[#allocation16_spill] sm:$0xff] %v13674_v60  ;;  %6694 = vrot.lane.b32.xlu1 %v13412_v61, %s9694_s30 }
 0x689   : > { %5540 = vrot.lane.b32.xlu0 %v13334_v18, %s9694_s30 }
 0x68a   : > { %v13680_v51 = vpop.permute.xlu0 %5528  ;;  %v5523_v23 = vpop.permute.xlu1 %5522 }
 0x68b   : > { %7084 = vrot.lane.b32.xlu1 %v13412_v61, %s9695_s11  ;;  %v5574_v37 = vcombine.low %v13434_v19, %v5523_v23 }
 0x68d   : > { %8236 = vrot.lane.b32.xlu0 %v16173_v50, %s9695_s11  ;;  %v5582_v1 = vrot.slane %v5574_v37, %v15859_v49 }
 0x68e   : > { %v13686_v31 = vpop.permute.xlu0 %5910  ;;  %v13692_v13 = vpop.permute.xlu1 %5530 }
 0x68f   : > { %7848 = vrot.lane.b32.xlu1 %v13414_v48, %s9694_s30 }
 0x691   : > { %9259 = vrot.lane.b32.xlu0 %v13465_v62, %s9698_s18 }
 0x692   : > { %v13694_v18 = vpop.permute.xlu0 %5918 }
 0x693   : > { %7846 = vrot.lane.b32.xlu1 %v16173_v50, %s9694_s30  ;;  %s16178_s30 = smov 112  }
 0x694   : > { %v13700_v61 = vpop.permute.xlu1 %5534 }
 0x695   : > { %9269 = vrot.lane.b32.xlu0 %v13470_v27, %s16174_s27 }
 0x696   : > { %v13702_v15 = vpop.permute.xlu0 %6674 }
 0x697   : > { %8238 = vrot.lane.b32.xlu1 %v13414_v48, %s9695_s11  ;;  %s16181_s11 = smov 96  }
 0x698   : > { %v5913_v62 = vpop.permute.xlu1 %5912 }
 0x699   : > { %9279 = vrot.lane.b32.xlu0 %v13475_v17, %s16175_s12  ;;  %v5965_v25 = vcombine.high %v13580_v36, %v5913_v62 }
 0x69a   : > { %v13708_v38 = vpop.permute.xlu0 %6682 }
 0x69b   : > { %16176 = vst [vmem:[#allocation63_spill] sm:$0xff] %v13708_v38  ;;  %9264 = vrot.lane.b32.xlu1 %v13480_v54, %s16177_s20 }
 0x69c   : > { %v13714_v50 = vpop.permute.xlu1 %5920 }
 0x69d   : > { %9289 = vrot.lane.b32.xlu0 %v13512_v55, %s16178_s30 }
 0x69e   : > { %v13716_v27 = vpop.permute.xlu0 %7064 }
 0x69f   : > { %9274 = vrot.lane.b32.xlu1 %v13517_v42, %s16179_s21 }
 0x6a0   : > { %v13720_v48 = vpop.permute.xlu1 %6676 }
 0x6a2   : > { %v13722_v24 = vpop.permute.xlu0 %7072 }
 0x6a3   : > { %16180 = vst [vmem:[#allocation104_spill] sm:$0xff] %v13722_v24  ;;  %9284 = vrot.lane.b32.xlu1 %v13538_v30, %s16181_s11  ;;  %v5558_v30 = vcombine.low %v13331_v34, %v13458_v44  ;;  %v5575_v34 = vcombine.high %v13434_v19, %v5523_v23  ;;  %v6713_v44 = vcombine.high %v16188_v4, %v13632_v0 }
 0x6a4   : > { %v13726_v17 = vpop.permute.xlu1 %6684  ;;  %v5963_v23 = vrot.slane %v5949_v57, %v15859_v49 }
 0x6a5   : > { %16182 = vst [vmem:[#allocation103_spill] sm:$0xff] %v13726_v17  ;;  %v5566_v33 = vrot.slane %v5558_v30, %v15859_v49  ;;  %v16191_v30 = vld [vmem:[#allocation47_spill] sm:$0xff]  ;;  %v5589_v24 = vrot.slane %v5575_v34, %v15859_v49  ;;  %v13796_v57 = vrot.slane %v6713_v44, %v15859_v49 }
 0x6a6   : > { %v13728_v54 = vpop.permute.xlu0 %7828  ;;  %v8393_v19 = vcombine.high %v16191_v30, %v13666_v10 }
 0x6a7   : > { %v5638_v17 = vcombine.low %v5573_v7, %v5589_v24  ;;  %v5639_v38 = vcombine.high %v5573_v7, %v5589_v24  ;;  %v6848_v24 = vcombine.low %v13452_v63, %v13702_v15 }
 0x6a8   : > { %v13730_v26 = vpop.permute.xlu1 %7066  ;;  %v13810_v34 = vrot.slane %v8393_v19, %v15859_v49 }
 0x6aa   : > { %v13732_v55 = vpop.permute.xlu0 %7836  ;;  %16195 = vst [vmem:[#allocation97_spill] sm:$0xff] %v13810_v34 }
 0x6ab   : > { %16183 = vst [vmem:[#allocation93_spill] sm:$0xff] %v13732_v55 }
 0x6ac   : > { %v13734_v41 = vpop.permute.xlu1 %7074 }
 0x6ad   : > { %16184 = vst [vmem:[#allocation92_spill] sm:$0xff] %v13734_v41  ;;  %v8392_v41 = vcombine.low %v16191_v30, %v13666_v10  ;;  %v16194_v10 = vld [vmem:[#allocation43_spill] sm:$0xff] }
 0x6ae   : > { %v13736_v9 = vpop.permute.xlu0 %7826  ;;  %v6084_v30 = vcombine.low %v16194_v10, %v13686_v31 }
 0x6b0   : > { %v13738_v42 = vpop.permute.xlu1 %5914  ;;  %v13825_v19 = vrot.slane %v6084_v30, %v15859_v49 }
 0x6b2   : > { %v13740_v40 = vpop.permute.xlu0 %7834 }
 0x6b3   : > { %16185 = vst [vmem:[#allocation89_spill] sm:$0xff] %v13740_v40  ;;  %v16189_v40 = vld [vmem:[#allocation69_spill] sm:$0xff] }
 0x6b4   : > { %v13742_v28 = vpop.permute.xlu1 %5922  ;;  %v7103_v55 = vcombine.high %v16189_v40, %v13648_v14 }
 0x6b5   : > { %16186 = vst [vmem:[#allocation88_spill] sm:$0xff] %v13742_v28  ;;  %v7102_v28 = vcombine.low %v16189_v40, %v13648_v14  ;;  %v16193_v40 = vld [vmem:[#allocation26_spill] sm:$0xff] }
 0x6b6   : > { %v13744_v8 = vpop.permute.xlu0 %8212  ;;  %v5694_v14 = vcombine.low %v16193_v40, %v13672_v43  ;;  %v5695_v37 = vcombine.high %v16193_v40, %v13672_v43  ;;  %v13802_v43 = vrot.slane %v7103_v55, %v15859_v49  ;;  %v5623_v40 = vcombine.high %v5566_v33, %v5582_v1 }
 0x6b7   : > { %16187 = vst [vmem:[#allocation100_spill] sm:$0xff] %v13744_v8  ;;  %v6712_v8 = vcombine.low %v16188_v4, %v13632_v0  ;;  %v5964_v4 = vcombine.low %v13580_v36, %v5913_v62  ;;  %v13799_v60 = vrot.slane %v7102_v28, %v15859_v49  ;;  %v5622_v36 = vcombine.low %v5566_v33, %v5582_v1 }
 0x6b8   : > { %v13751_v5 = vpop.permute.xlu1 %6678  ;;  %v13807_v62 = vrot.slane %v8392_v41, %v15859_v49  ;;  %v13816_v28 = vrot.slane %v5694_v14, %v15859_v49  ;;  %v13819_v55 = vrot.slane %v5695_v37, %v15859_v49  ;;  %v6728_v41 = vcombine.low %v13602_v16, %v13720_v48 }
 0x6b9   : > { %v13831_v1 = vrot.slane %v5622_v36, %v10542_v47  ;;  %v5591_v14 = vcombine.high %v13531_v52, %v13700_v61  ;;  %v6729_v37 = vcombine.high %v13602_v16, %v13720_v48  ;;  %v13842_v7 = vrot.slane %v5623_v40, %v10542_v47 }
 0x6ba   : > { %v13755_v32 = vpop.permute.xlu0 %8216  ;;  %v7118_v16 = vcombine.low %v13610_v53, %v13730_v26  ;;  %v13857_v48 = vrot.slane %v5639_v38, %v10542_v47  ;;  %v13873_v38 = vrot.slane %v6848_v24, %v15859_v49 }
 0x6bb   : > { %16197 = vst [vmem:[#allocation91_spill] sm:$0xff] %v13831_v1  ;;  %16198 = vst [vmem:[#allocation110_spill] sm:$0xff] %v13842_v7 }
 0x6bc   : > { %v13771_v12 = vpop.permute.xlu1 %6686  ;;  %16200 = vst [vmem:[#allocation90_spill] sm:$0xff] %v13857_v48  ;;  %v7126_v24 = vrot.slane %v7118_v16, %v15859_v49  ;;  %v6101_v16 = vcombine.high %v13618_v6, %v13738_v42 }
 0x6bd   : > { %16190 = vst [vmem:[#allocation109_spill] sm:$0xff] %v13771_v12  ;;  %v13788_v12 = vrot.slane %v6712_v8, %v15859_v49 }
 0x6be   : > { %v13779_v0 = vpop.permute.xlu0 %8224 }
 0x6bf   : > { %16192 = vst [vmem:[#allocation102_spill] sm:$0xff] %v13779_v0  ;;  %v6085_v0 = vcombine.high %v16194_v10, %v13686_v31  ;;  %v5972_v31 = vrot.slane %v5964_v4, %v15859_v49  ;;  %v5979_v10 = vrot.slane %v5965_v25, %v15859_v49  ;;  %v5590_v4 = vcombine.low %v13531_v52, %v13700_v61 }
 0x6c0   : > { %v13804_v8 = vpop.permute.xlu1 %7068  ;;  %v6736_v52 = vrot.slane %v6728_v41, %v15859_v49  ;;  %v13854_v61 = vrot.slane %v5638_v17, %v10542_v47  ;;  %v6743_v41 = vrot.slane %v6729_v37, %v15859_v49 }
 0x6c1   : > { %v13828_v33 = vrot.slane %v6085_v0, %v15859_v49  ;;  %v6849_v0 = vcombine.high %v13452_v63, %v13702_v15  ;;  %v6012_v30 = vcombine.low %v5956_v29, %v5972_v31  ;;  %v6013_v1 = vcombine.high %v5956_v29, %v5972_v31 }
 0x6c2   : > { %v13813_v44 = vpop.permute.xlu0 %5924  ;;  %v6028_v34 = vcombine.low %v5963_v23, %v5979_v10  ;;  %16199 = vst [vmem:[#allocation77_spill] sm:$0xff] %v13854_v61  ;;  %v6029_v40 = vcombine.high %v5963_v23, %v5979_v10  ;;  %v7119_v15 = vcombine.high %v13610_v53, %v13730_v26  ;;  %v13862_v63 = vrot.slane %v5590_v4, %v15859_v49 }
 0x6c3   : > { %16196 = vst [vmem:[#allocation96_spill] sm:$0xff] %v13828_v33  ;;  %v13865_v29 = vrot.slane %v5591_v14, %v15859_v49  ;;  %v7238_v31 = vcombine.low %v13507_v21, %v13716_v27  ;;  %v13876_v23 = vrot.slane %v6849_v0, %v15859_v49  ;;  %v13879_v26 = vrot.slane %v6012_v30, %v10542_v47 }
 0x6c4   : > { %v13839_v25 = vpop.permute.xlu1 %7076  ;;  %v7239_v53 = vcombine.high %v13507_v21, %v13716_v27  ;;  %v13886_v4 = vrot.slane %v6013_v1, %v10542_v47  ;;  %v13889_v14 = vrot.slane %v6028_v34, %v10542_v47  ;;  %v6776_v37 = vcombine.low %v13788_v12, %v6736_v52 }
 0x6c5   : > { %16201 = vst [vmem:[#allocation73_spill] sm:$0xff] %v13879_v26  ;;  %v13894_v0 = vrot.slane %v6029_v40, %v10542_v47  ;;  %v6777_v30 = vcombine.high %v13788_v12, %v6736_v52  ;;  %v7133_v48 = vrot.slane %v7119_v15, %v15859_v49  ;;  %v6100_v21 = vcombine.low %v13618_v6, %v13738_v42 }
 0x6c6   : > { %v13848_v36 = vpop.permute.xlu0 %6688  ;;  %v13901_v27 = vrot.slane %v7238_v31, %v15859_v49  ;;  %v6792_v34 = vcombine.low %v13796_v57, %v6743_v41  ;;  %v6793_v1 = vcombine.high %v13796_v57, %v6743_v41  ;;  %v8002_v12 = vcombine.low %v13570_v3, %v13728_v54 }
 0x6c7   : > { %v8003_v52 = vcombine.high %v13570_v3, %v13728_v54  ;;  %v6864_v40 = vcombine.low %v13626_v22, %v13751_v5  ;;  %v6865_v15 = vcombine.high %v13626_v22, %v13751_v5  ;;  %v13920_v57 = vrot.slane %v7239_v53, %v15859_v49 }
 0x6c8   : > { %v13870_v17 = vpop.permute.xlu1 %7832  ;;  %v13923_v6 = vrot.slane %v6776_v37, %v10542_v47  ;;  %v7166_v42 = vcombine.low %v13799_v60, %v7126_v24  ;;  %v7167_v41 = vcombine.high %v13799_v60, %v7126_v24  ;;  %v13928_v3 = vrot.slane %v6777_v30, %v10542_v47 }
 0x6c9   : > { %v7182_v54 = vcombine.low %v13802_v43, %v7133_v48  ;;  %v7183_v7 = vcombine.high %v13802_v43, %v7133_v48  ;;  %v6108_v5 = vrot.slane %v6100_v21, %v15859_v49  ;;  %v13934_v22 = vrot.slane %v6792_v34, %v10542_v47 }
 0x6ca   : > { %v13883_v10 = vpop.permute.xlu0 %7078  ;;  %16202 = vst [vmem:[#allocation105_spill] sm:$0xff] %v13923_v6  ;;  %16203 = vst [vmem:[#allocation76_spill] sm:$0xff] %v13928_v3  ;;  %v13937_v53 = vrot.slane %v6793_v1, %v10542_v47  ;;  %v7866_v37 = vcombine.low %v13600_v35, %v13736_v9  ;;  %v13942_v60 = vrot.slane %v6101_v16, %v15859_v49 }
 0x6cb   : > { %16204 = vst [vmem:[#allocation87_spill] sm:$0xff] %v13934_v22  ;;  %v13947_v30 = vrot.slane %v8002_v12, %v15859_v49  ;;  %v13950_v43 = vrot.slane %v8003_v52, %v15859_v49  ;;  %v6872_v48 = vrot.slane %v6864_v40, %v15859_v49  ;;  %v6879_v21 = vrot.slane %v6865_v15, %v15859_v49 }
 0x6cc   : > { %16205 = vst [vmem:[#allocation72_spill] sm:$0xff] %v13937_v53  ;;  %16206 = vst [vmem:[#allocation113_spill] sm:$0xff] %v13942_v60  ;;  %v13957_v1 = vrot.slane %v7166_v42, %v10542_v47  ;;  %v13960_v16 = vrot.slane %v7167_v41, %v10542_v47  ;;  %v7867_v53 = vcombine.high %v13600_v35, %v13736_v9 }
 0x6cd   : > { %v13907_v61 = vpop.permute.xlu1 %7840  ;;  %v7254_v12 = vcombine.low %v13634_v56, %v13804_v8  ;;  %v13967_v52 = vrot.slane %v7182_v54, %v10542_v47  ;;  %v13970_v40 = vrot.slane %v7183_v7, %v10542_v47  ;;  %v6148_v15 = vcombine.low %v13825_v19, %v6108_v5 }
 0x6ce   : > { %16207 = vst [vmem:[#allocation112_spill] sm:$0xff] %v13957_v1  ;;  %16208 = vst [vmem:[#allocation108_spill] sm:$0xff] %v13960_v16  ;;  %v6149_v42 = vcombine.high %v13825_v19, %v6108_v5  ;;  %v13975_v22 = vrot.slane %v7866_v37, %v15859_v49  ;;  %v6165_v41 = vcombine.high %v13828_v33, %v13942_v60 }
 0x6cf   : > { %v13917_v31 = vpop.permute.xlu0 %5524  ;;  %16209 = vst [vmem:[#allocation107_spill] sm:$0xff] %v13967_v52  ;;  %16210 = vst [vmem:[#allocation55_spill] sm:$0xff] %v13970_v40  ;;  %v8256_v9 = vcombine.low %v13608_v39, %v13755_v32  ;;  %v7255_v35 = vcombine.high %v13634_v56, %v13804_v8  ;;  %v6912_v7 = vcombine.low %v13873_v38, %v6872_v48 }
 0x6d0   : > { %v6913_v40 = vcombine.high %v13873_v38, %v6872_v48  ;;  %v6928_v19 = vcombine.low %v13876_v23, %v6879_v21  ;;  %v8257_v5 = vcombine.high %v13608_v39, %v13755_v32  ;;  %v13993_v52 = vrot.slane %v7867_v53, %v15859_v49 }
 0x6d1   : > { %v13944_v24 = vpop.permute.xlu1 %7830  ;;  %v6929_v56 = vcombine.high %v13876_v23, %v6879_v21  ;;  %v7262_v8 = vrot.slane %v7254_v12, %v15859_v49  ;;  %v14000_v3 = vrot.slane %v6148_v15, %v10542_v47  ;;  %v14003_v38 = vrot.slane %v6149_v42, %v10542_v47 }
 0x6d2   : > { %v5980_v32 = vcombine.low %v13624_v58, %v13813_v44  ;;  %v8018_v39 = vcombine.low %v13642_v11, %v13870_v17  ;;  %v14010_v53 = vrot.slane %v6165_v41, %v10542_v47  ;;  %v14013_v48 = vrot.slane %v8256_v9, %v15859_v49 }
 0x6d3   : > { %v13954_v34 = vpop.permute.xlu0 %5532  ;;  %16212 = vst [vmem:[#allocation56_spill] sm:$0xff] %v14000_v3  ;;  %16213 = vst [vmem:[#allocation52_spill] sm:$0xff] %v14003_v38  ;;  %v7269_v23 = vrot.slane %v7255_v35, %v15859_v49  ;;  %v8019_v21 = vcombine.high %v13642_v11, %v13870_v17  ;;  %v14021_v15 = vrot.slane %v6912_v7, %v10542_v47 }
 0x6d4   : > { %16214 = vst [vmem:[#allocation57_spill] sm:$0xff] %v14010_v53  ;;  %v14024_v42 = vrot.slane %v6913_v40, %v10542_v47  ;;  %v14027_v16 = vrot.slane %v6928_v19, %v10542_v47  ;;  %v14030_v41 = vrot.slane %v8257_v5, %v15859_v49  ;;  %v14035_v35 = vrot.slane %v6929_v56, %v10542_v47 }
 0x6d5   : > { %v13983_v54 = vpop.permute.xlu1 %7838  ;;  %16215 = vst [vmem:[#allocation53_spill] sm:$0xff] %v14021_v15  ;;  %v7302_v11 = vcombine.low %v13901_v27, %v7262_v8  ;;  %v5981_v17 = vcombine.high %v13624_v58, %v13813_v44  ;;  %v5710_v40 = vcombine.low %v13664_v46, %v13917_v31  ;;  %v7303_v7 = vcombine.high %v13901_v27, %v7262_v8 }
 0x6d6   : > { %16211 = vst [vmem:[#allocation51_spill] sm:$0xff] %v13983_v54  ;;  %16216 = vst [vmem:[#allocation15_spill] sm:$0xff] %v14024_v42  ;;  %v14044_v19 = vrot.slane %v5980_v32, %v15859_v49  ;;  %v8026_v5 = vrot.slane %v8018_v39, %v15859_v49  ;;  %v5711_v60 = vcombine.high %v13664_v46, %v13917_v31 }
 0x6d7   : > { %v13990_v37 = vpop.permute.xlu0 %5536  ;;  %16217 = vst [vmem:[#allocation111_spill] sm:$0xff] %v14027_v16  ;;  %16218 = vst [vmem:[#allocation106_spill] sm:$0xff] %v14035_v35  ;;  %v7318_v56 = vcombine.low %v13920_v57, %v7269_v23  ;;  %v7319_v33 = vcombine.high %v13920_v57, %v7269_v23  ;;  %v8033_v16 = vrot.slane %v8019_v21, %v15859_v49 }
 0x6d8   : > { %v7882_v58 = vcombine.low %v13650_v2, %v13944_v24  ;;  %v6744_v27 = vcombine.low %v13640_v45, %v13848_v36  ;;  %v6745_v8 = vcombine.high %v13640_v45, %v13848_v36  ;;  %v7134_v46 = vcombine.low %v13656_v59, %v13883_v10 }
 0x6d9   : > { %v14018_v12 = vpop.permute.xlu1 %8222  ;;  %v7883_v31 = vcombine.high %v13650_v2, %v13944_v24  ;;  %v14067_v32 = vrot.slane %v7302_v11, %v10542_v47  ;;  %v14070_v39 = vrot.slane %v5981_v17, %v15859_v49  ;;  %v7135_v23 = vcombine.high %v13656_v59, %v13883_v10 }
 0x6da   : > { %v5718_v21 = vrot.slane %v5710_v40, %v15859_v49  ;;  %v14076_v45 = vrot.slane %v7303_v7, %v10542_v47  ;;  %v8066_v36 = vcombine.low %v13947_v30, %v8026_v5  ;;  %v8067_v2 = vcombine.high %v13947_v30, %v8026_v5 }
 0x6db   : > { %v14032_v9 = vpop.permute.xlu0 %5926  ;;  %16220 = vst [vmem:[#allocation74_spill] sm:$0xff] %v14067_v32  ;;  %v5725_v24 = vrot.slane %v5711_v60, %v15859_v49  ;;  %v14082_v11 = vrot.slane %v7318_v56, %v10542_v47  ;;  %v14085_v17 = vrot.slane %v7319_v33, %v10542_v47  ;;  %v8082_v35 = vcombine.low %v13950_v43, %v8033_v16 }
 0x6dc   : > { %16221 = vst [vmem:[#allocation117_spill] sm:$0xff] %v14076_v45  ;;  %v7890_v59 = vrot.slane %v7882_v58, %v15859_v49  ;;  %v14092_v40 = vrot.slane %v6744_v27, %v15859_v49  ;;  %v14095_v7 = vrot.slane %v6745_v8, %v15859_v49  ;;  %v14098_v60 = vrot.slane %v7134_v46, %v15859_v49 }
 0x6dd   : > { %v14054_v44 = vpop.permute.xlu1 %8230  ;;  %16222 = vst [vmem:[#allocation11_spill] sm:$0xff] %v14082_v11  ;;  %16223 = vst [vmem:[#allocation58_spill] sm:$0xff] %v14085_v17  ;;  %v7897_v30 = vrot.slane %v7883_v31, %v15859_v49  ;;  %v8083_v33 = vcombine.high %v13950_v43, %v8033_v16  ;;  %v14105_v56 = vrot.slane %v7135_v23, %v15859_v49 }
 0x6de   : > { %16219 = vst [vmem:[#allocation35_spill] sm:$0xff] %v14054_v44  ;;  %v5758_v58 = vcombine.low %v13816_v28, %v5718_v21  ;;  %v5759_v27 = vcombine.high %v13816_v28, %v5718_v21  ;;  %v14110_v11 = vrot.slane %v8066_v36, %v10542_v47  ;;  %v14113_v8 = vrot.slane %v8067_v2, %v10542_v47 }
 0x6df   : > { %v14064_v57 = vpop.permute.xlu0 %6690  ;;  %v5774_v46 = vcombine.low %v13819_v55, %v5725_v24  ;;  %v8408_v31 = vcombine.low %v13658_v20, %v14018_v12  ;;  %v14119_v43 = vrot.slane %v8082_v35, %v10542_v47  ;;  %v5775_v16 = vcombine.high %v13819_v55, %v5725_v24 }
 0x6e0   : > { %16224 = vst [vmem:[#allocation54_spill] sm:$0xff] %v14110_v11  ;;  %16225 = vst [vmem:[#allocation98_spill] sm:$0xff] %v14113_v8  ;;  %v7930_v23 = vcombine.low %v13975_v22, %v7890_v59  ;;  %v8409_v28 = vcombine.high %v13658_v20, %v14018_v12  ;;  %v7931_v36 = vcombine.high %v13975_v22, %v7890_v59 }
 0x6e1   : > { %v14089_v10 = vpop.permute.xlu1 %8234  ;;  %16226 = vst [vmem:[#allocation75_spill] sm:$0xff] %v14119_v43  ;;  %v7946_v2 = vcombine.low %v13993_v52, %v7897_v30  ;;  %v7947_v8 = vcombine.high %v13993_v52, %v7897_v30  ;;  %v14132_v35 = vrot.slane %v8083_v33, %v10542_v47  ;;  %v14135_v55 = vrot.slane %v5758_v58, %v10542_v47 }
 0x6e2   : > { %v14138_v24 = vrot.slane %v5759_v27, %v10542_v47  ;;  %v5726_v20 = vcombine.low %v13680_v51, %v13990_v37  ;;  %v14143_v22 = vrot.slane %v5774_v46, %v10542_v47  ;;  %v5727_v52 = vcombine.high %v13680_v51, %v13990_v37 }
 0x6e3   : > { %v14101_v5 = vpop.permute.xlu0 %7080  ;;  %16227 = vst [vmem:[#allocation118_spill] sm:$0xff] %v14132_v35  ;;  %v8416_v12 = vrot.slane %v8408_v31, %v15859_v49  ;;  %v14152_v30 = vrot.slane %v5775_v16, %v10542_v47  ;;  %v14155_v33 = vrot.slane %v7930_v23, %v10542_v47  ;;  %v8423_v58 = vrot.slane %v8409_v28, %v15859_v49 }
 0x6e4   : > { %16228 = vst [vmem:[#allocation115_spill] sm:$0xff] %v14138_v24  ;;  %16229 = vst [vmem:[#allocation120_spill] sm:$0xff] %v14143_v22  ;;  %v6116_v27 = vcombine.low %v13694_v18, %v14032_v9  ;;  %v14161_v35 = vrot.slane %v7931_v36, %v10542_v47  ;;  %v14164_v51 = vrot.slane %v7946_v2, %v10542_v47 }
 0x6e5   : > { %v5539_v21 = vpop.permute.xlu1 %5538  ;;  %16230 = vst [vmem:[#allocation119_spill] sm:$0xff] %v14152_v30  ;;  %16231 = vst [vmem:[#allocation59_spill] sm:$0xff] %v14155_v33  ;;  %v14167_v37 = vrot.slane %v7947_v8, %v10542_v47  ;;  %v14174_v16 = vrot.slane %v5726_v20, %v15859_v49  ;;  %v6117_v23 = vcombine.high %v13694_v18, %v14032_v9  ;;  %v16243_v30 = vld [vmem:[#allocation16_spill] sm:$0xff] }
 0x6e6   : > { %v5606_v17 = vcombine.low %v13692_v13, %v5539_v21  ;;  %16232 = vst [vmem:[#allocation78_spill] sm:$0xff] %v14161_v35  ;;  %16233 = vst [vmem:[#allocation60_spill] sm:$0xff] %v14164_v51  ;;  %v14181_v2 = vrot.slane %v5727_v52, %v15859_v49  ;;  %v8456_v8 = vcombine.low %v13807_v62, %v8416_v12  ;;  %v16237_v51 = vld [vmem:[#allocation97_spill] sm:$0xff]  ;;  %v16238_v52 = vld [vmem:[#allocation63_spill] sm:$0xff] }
 0x6e7   : > { %v14129_v38 = vpop.permute.xlu0 %7844  ;;  %16234 = vst [vmem:[#allocation79_spill] sm:$0xff] %v14167_v37  ;;  %v8457_v37 = vcombine.high %v13807_v62, %v8416_v12  ;;  %v8472_v20 = vcombine.low %v16237_v51, %v8423_v58  ;;  %v8473_v35 = vcombine.high %v16237_v51, %v8423_v58  ;;  %v14191_v18 = vrot.slane %v6116_v27, %v15859_v49 }
 0x6e8   : > { %v14149_v59 = vrot.slane %v5606_v17, %v15859_v49  ;;  %16235 = vst [vmem:[#allocation12_spill] sm:$0xff] %v14181_v2  ;;  %v14207_v58 = vrot.slane %v6117_v23, %v15859_v49  ;;  %v6881_v27 = vcombine.high %v16238_v52, %v14064_v57  ;;  %v5607_v51 = vcombine.high %v13692_v13, %v5539_v21  ;;  %v16251_v2 = vld [vmem:[#allocation93_spill] sm:$0xff] }
 0x6e9   : > { %v5929_v46 = vpop.permute.xlu1 %5928  ;;  %v14215_v62 = vrot.slane %v8456_v8, %v10542_v47  ;;  %v8424_v22 = vcombine.low %v16243_v30, %v14089_v10  ;;  %v14226_v24 = vrot.slane %v8472_v20, %v10542_v47  ;;  %v14229_v13 = vrot.slane %v8473_v35, %v10542_v47 }
 0x6ea   : > { %v5654_v17 = vcombine.low %v13862_v63, %v14149_v59  ;;  %v5996_v28 = vcombine.low %v13714_v50, %v5929_v46  ;;  %v5997_v36 = vcombine.high %v13714_v50, %v5929_v46  ;;  %v6880_v46 = vcombine.low %v16238_v52, %v14064_v57 }
 0x6eb   : > { %v14171_v31 = vpop.permute.xlu0 %7842  ;;  %16241 = vst [vmem:[#allocation9_spill] sm:$0xff] %v14215_v62  ;;  %16244 = vst [vmem:[#allocation62_spill] sm:$0xff] %v14226_v24  ;;  %v8425_v57 = vcombine.high %v16243_v30, %v14089_v10  ;;  %v5621_v30 = vrot.slane %v5607_v51, %v15859_v49  ;;  %v14260_v62 = vrot.slane %v8424_v22, %v15859_v49 }
 0x6ec   : > { %v14186_v43 = vrot.slane %v5654_v17, %v10542_v47  ;;  %v14194_v9 = vrot.slane %v5996_v28, %v15859_v49  ;;  %v14201_v12 = vrot.slane %v5997_v36, %v15859_v49  ;;  %v16240_v17 = vld [vmem:[#allocation103_spill] sm:$0xff]  ;;  %v14218_v36 = vrot.slane %v8457_v37, %v10542_v47  ;;  %16245 = vst [vmem:[#allocation81_spill] sm:$0xff] %v14229_v13 }
 0x6ed   : > { %v6693_v50 = vpop.permute.xlu1 %6692  ;;  %v14239_v8 = vrot.slane %v6880_v46, %v15859_v49  ;;  %16250 = vst [vmem:[#allocation94_spill] sm:$0xff] %v14260_v62  ;;  %v8034_v33 = vcombine.low %v16251_v2, %v14129_v38  ;;  %v5655_v51 = vcombine.high %v13862_v63, %v14149_v59 }
 0x6ee   : > { %16236 = vst [vmem:[#allocation101_spill] sm:$0xff] %v14186_v43  ;;  %v6760_v45 = vcombine.low %v16240_v17, %v6693_v50  ;;  %v6044_v28 = vcombine.low %v14044_v19, %v14194_v9  ;;  %16242 = vst [vmem:[#allocation22_spill] sm:$0xff] %v14218_v36  ;;  %v6060_v20 = vcombine.low %v14070_v39, %v14201_v12  ;;  %v16278_v43 = vld [vmem:[#allocation84_spill] sm:$0xff] }
 0x6ef   : > { %v14204_v53 = vpop.permute.xlu0 %8220  ;;  %v14257_v36 = vrot.slane %v6881_v27, %v15859_v49  ;;  %v6761_v27 = vcombine.high %v16240_v17, %v6693_v50  ;;  %v5671_v50 = vcombine.high %v13865_v29, %v5621_v30  ;;  %v14298_v17 = vrot.slane %v8034_v33, %v15859_v49 }
 0x6f0   : > { %v14223_v23 = vrot.slane %v6760_v45, %v15859_v49  ;;  %v14234_v21 = vrot.slane %v6044_v28, %v10542_v47  ;;  %v16247_v45 = vld [vmem:[#allocation104_spill] sm:$0xff]  ;;  %v14278_v22 = vrot.slane %v6060_v20, %v10542_v47  ;;  %v14319_v11 = vrot.slane %v5655_v51, %v10542_v47 }
 0x6f1   : > { %v14236_v37 = vpop.permute.xlu1 %7082  ;;  %v7270_v52 = vcombine.low %v16247_v45, %v14101_v5  ;;  %v7271_v10 = vcombine.high %v16247_v45, %v14101_v5  ;;  %v16248_v28 = vld [vmem:[#allocation92_spill] sm:$0xff]  ;;  %16249 = vst [vmem:[#allocation80_spill] sm:$0xff] %v14257_v36  ;;  %v14268_v5 = vrot.slane %v8425_v57, %v15859_v49  ;;  %v8035_v45 = vcombine.high %v16251_v2, %v14129_v38 }
 0x6f2   : > { %16246 = vst [vmem:[#allocation61_spill] sm:$0xff] %v14234_v21  ;;  %v6808_v35 = vcombine.low %v14092_v40, %v14223_v23  ;;  %v7150_v24 = vcombine.low %v16248_v28, %v14236_v37  ;;  %v16254_v57 = vld [vmem:[#allocation88_spill] sm:$0xff]  ;;  %v5670_v2 = vcombine.low %v13865_v29, %v5621_v30  ;;  %16259 = vst [vmem:[#allocation114_spill] sm:$0xff] %v14319_v11 }
 0x6f3   : > { %v14247_v13 = vpop.permute.xlu0 %8228  ;;  %16253 = vst [vmem:[#allocation83_spill] sm:$0xff] %v14268_v5  ;;  %v14290_v38 = vrot.slane %v7270_v52, %v15859_v49  ;;  %v14293_v59 = vrot.slane %v7271_v10, %v15859_v49  ;;  %v14307_v62 = vrot.slane %v8035_v45, %v15859_v49  ;;  %v6045_v10 = vcombine.high %v14044_v19, %v14194_v9  ;;  %v16258_v29 = vld [vmem:[#allocation100_spill] sm:$0xff] }
 0x6f4   : > { %v14265_v44 = vrot.slane %v6808_v35, %v10542_v47  ;;  %v14283_v36 = vrot.slane %v7150_v24, %v15859_v49  ;;  %v16256_v24 = vld [vmem:[#allocation89_spill] sm:$0xff]  ;;  %v8272_v30 = vcombine.low %v16258_v29, %v14204_v53  ;;  %v6081_v45 = vcombine.high %v13889_v14, %v14278_v22 }
 0x6f5   : > { %v14275_v46 = vpop.permute.xlu1 %5930  ;;  %16255 = vst [vmem:[#allocation64_spill] sm:$0xff] %v14293_v59  ;;  %v7898_v20 = vcombine.low %v16256_v24, %v14171_v31  ;;  %v7899_v35 = vcombine.high %v16256_v24, %v14171_v31  ;;  %16257 = vst [vmem:[#allocation82_spill] sm:$0xff] %v14307_v62  ;;  %v6775_v31 = vrot.slane %v6761_v27, %v15859_v49 }
 0x6f6   : > { %16252 = vst [vmem:[#allocation65_spill] sm:$0xff] %v14265_v44  ;;  %v6132_v5 = vcombine.low %v16254_v57, %v14275_v46  ;;  %v7198_v52 = vcombine.low %v14098_v60, %v14283_v36  ;;  %v14328_v19 = vrot.slane %v5670_v2, %v10542_v47  ;;  %v14331_v9 = vrot.slane %v5671_v50, %v10542_v47 }
 0x6f7   : > { %v14287_v63 = vpop.permute.xlu0 %8232  ;;  %v6061_v27 = vcombine.high %v14070_v39, %v14201_v12  ;;  %v14343_v11 = vrot.slane %v7899_v35, %v15859_v49  ;;  %v6824_v12 = vcombine.low %v14095_v7, %v6775_v31  ;;  %v16266_v35 = vld [vmem:[#allocation37_spill] sm:$0xff]  ;;  %v6077_v2 = vcombine.high %v13879_v26, %v14234_v21 }
 0x6f8   : > { %v14314_v33 = vrot.slane %v6132_v5, %v15859_v49  ;;  %v14323_v24 = vrot.slane %v7198_v52, %v10542_v47  ;;  %16261 = vst [vmem:[#allocation7_spill] sm:$0xff] %v14328_v19  ;;  %16262 = vst [vmem:[#allocation10_spill] sm:$0xff] %v14331_v9  ;;  %v8273_v5 = vcombine.high %v16258_v29, %v14204_v53  ;;  %v16271_v21 = vld [vmem:[#allocation21_spill] sm:$0xff] }
 0x6f9   : > { %v14316_v59 = vpop.permute.xlu1 %6694  ;;  %v14340_v52 = vrot.slane %v7898_v20, %v15859_v49  ;;  %16264 = vst [vmem:[#allocation18_spill] sm:$0xff] %v14343_v11  ;;  %v14350_v9 = vrot.slane %v6045_v10, %v10542_v47  ;;  %v6809_v53 = vcombine.high %v14092_v40, %v14223_v23  ;;  %v8280_v29 = vrot.slane %v8272_v30, %v15859_v49  ;;  %v16267_v20 = vld [vmem:[#allocation28_spill] sm:$0xff]  ;;  %v16269_v10 = vld [vmem:[#allocation109_spill] sm:$0xff] }
 0x6fa   : > { %16260 = vst [vmem:[#allocation116_spill] sm:$0xff] %v14323_v24  ;;  %v6180_v51 = vcombine.low %v14191_v18, %v14314_v33  ;;  %v16268_v19 = vcombine.high %v16266_v35, %v16267_v20  ;;  %v6825_v62 = vcombine.high %v14095_v7, %v6775_v31  ;;  %v8287_v40 = vrot.slane %v8273_v5, %v15859_v49 }
 0x6fb   : > { %16263 = vst [vmem:[#allocation8_spill] sm:$0xff] %v14340_v52  ;;  %v14347_v50 = vpop.permute.xlu0 %5540  ;;  %v6896_v52 = vcombine.low %v16269_v10, %v14316_v59  ;;  %v14386_v5 = vrot.slane %v6061_v27, %v10542_v47  ;;  %v8320_v23 = vcombine.low %v14013_v48, %v8280_v29 }
 0x6fc   : > { %v14356_v39 = vrot.slane %v6180_v51, %v10542_v47  ;;  %v9313_v11 = vpack.i.bf16 %v16268_v19, %v6081_v45  ;;  %v5742_v30 = vcombine.low %v13954_v34, %v14347_v50  ;;  %v7151_v45 = vcombine.high %v16248_v28, %v14236_v37  ;;  %v16270_v19 = vld [vmem:[#allocation42_spill] sm:$0xff] }
 0x6fd   : > { %v14372_v51 = vpop.permute.xlu1 %7084  ;;  %v16272_v26 = vcombine.high %v16270_v19, %v16271_v21  ;;  %v14381_v7 = vrot.slane %v6896_v52, %v15859_v49  ;;  %v14395_v37 = vrot.slane %v6809_v53, %v10542_v47  ;;  %v14406_v52 = vrot.slane %v6825_v62, %v10542_v47 }
 0x6fe   : > { %16265 = vst [vmem:[#allocation41_spill] sm:$0xff] %v14356_v39  ;;  %9314 = vrot.lane.b32.xlu0 %v9313_v11, %s16175_s12  ;;  %v14390_v3 = vrot.slane %v5742_v30, %v15859_v49  ;;  %v6078_v11 = vcombine.low %v13886_v4, %v14350_v9  ;;  %v7286_v27 = vcombine.low %v13839_v25, %v14372_v51  ;;  %v16277_v39 = vld [vmem:[#allocation38_spill] sm:$0xff] }
 0x6ff   : > { %v9293_v54 = vpack.i.bf16 %v16272_v26, %v6077_v2  ;;  %v14398_v26 = vrot.slane %v6824_v12, %v10542_v47  ;;  %v6944_v28 = vcombine.low %v14239_v8, %v14381_v7  ;;  %16274 = vst [vmem:[#allocation31_spill] sm:$0xff] %v14406_v52  ;;  %v8321_v2 = vcombine.high %v14013_v48, %v8280_v29  ;;  %v8237_v12 = vpop.permute.xlu0 %8236 }
 0x700   : > { %v8336_v30 = vcombine.low %v14030_v41, %v8287_v40  ;;  %v5790_v53 = vcombine.low %v14174_v16, %v14390_v3  ;;  %v7165_v31 = vrot.slane %v7151_v45, %v15859_v49  ;;  %v16279_v62 = vcombine.low %v16277_v39, %v16278_v43 }
 0x701   : > { %16273 = vst [vmem:[#allocation17_spill] sm:$0xff] %v14398_v26  ;;  %9294 = vrot.lane.b32.xlu1 %v9293_v54, %s9698_s18  ;;  %v16275_v54 = vld [vmem:[#allocation102_spill] sm:$0xff]  ;;  %v14416_v19 = vrot.slane %v6944_v28, %v10542_v47  ;;  %v14422_v48 = vrot.slane %v8320_v23, %v10542_v47  ;;  %v8337_v29 = vcombine.high %v14030_v41, %v8287_v40 }
 0x702   : > { %v8288_v21 = vcombine.low %v16275_v54, %v14287_v63  ;;  %v9298_v52 = vpack.i.bf16 %v16279_v62, %v6078_v11  ;;  %v8289_v42 = vcombine.high %v16275_v54, %v14287_v63  ;;  %v14428_v45 = vrot.slane %v5790_v53, %v10542_v47 }
 0x703   : > { %16276 = vst [vmem:[#allocation13_spill] sm:$0xff] %v14416_v19  ;;  %16280 = vst [vmem:[#allocation69_spill] sm:$0xff] %v14422_v48  ;;  %v6133_v26 = vcombine.high %v16254_v57, %v14275_v46  ;;  %v14436_v11 = vrot.slane %v7286_v27, %v15859_v49  ;;  %v8304_v23 = vcombine.low %v14247_v13, %v8237_v12  ;;  %v7849_v57 = vpop.permute.xlu1 %7848 }
 0x704   : > { %16281 = vst [vmem:[#allocation47_spill] sm:$0xff] %v14428_v45  ;;  %v14440_v41 = vrot.slane %v8321_v2, %v10542_v47  ;;  %v14443_v63 = vrot.slane %v8336_v30, %v10542_v47  ;;  %v8305_v46 = vcombine.high %v14247_v13, %v8237_v12  ;;  %v7214_v27 = vcombine.low %v14105_v56, %v7165_v31 }
 0x705   : > { %9299 = vrot.lane.b32.xlu1 %v9298_v52, %s16177_s20  ;;  %v7199_v52 = vcombine.high %v14098_v60, %v14283_v36  ;;  %v14452_v53 = vrot.slane %v8288_v21, %v15859_v49  ;;  %v7334_v2 = vcombine.low %v14290_v38, %v14436_v11  ;;  %v14457_v30 = vrot.slane %v8289_v42, %v15859_v49 }
 0x706   : > { %v14460_v54 = vrot.slane %v8304_v23, %v15859_v49  ;;  %v14463_v13 = vrot.slane %v8305_v46, %v15859_v49  ;;  %v6079_v60 = vcombine.high %v13886_v4, %v14350_v9  ;;  %v7215_v36 = vcombine.high %v14105_v56, %v7165_v31 }
 0x707   : > { %v14469_v21 = vrot.slane %v6133_v26, %v15859_v49  ;;  %v14472_v12 = vrot.slane %v7334_v2, %v10542_v47  ;;  %v6841_v42 = vcombine.high %v13923_v6, %v14265_v44  ;;  %v16283_v31 = vcombine.high %v16277_v39, %v16278_v43  ;;  %v7847_v9 = vpop.permute.xlu1 %7846 }
 0x708   : > { %v8352_v62 = vcombine.low %v14452_v53, %v14460_v54  ;;  %v7231_v46 = vcombine.high %v13957_v1, %v14323_v24  ;;  %v8050_v2 = vcombine.low %v13907_v61, %v7849_v57  ;;  %v14493_v28 = vrot.slane %v8337_v29, %v10542_v47  ;;  %v16300_v24 = vld [vmem:[#allocation18_spill] sm:$0xff] }
 0x709   : > { %16282 = vst [vmem:[#allocation26_spill] sm:$0xff] %v14472_v12  ;;  %v9303_v26 = vpack.i.bf16 %v16283_v31, %v6079_v60  ;;  %v7213_v40 = vrot.slane %v7199_v52, %v10542_v47  ;;  %v6181_v56 = vcombine.high %v14191_v18, %v14314_v33  ;;  %v14502_v43 = vrot.slane %v7214_v27, %v10542_v47 }
 0x70a   : > { %16284 = vst [vmem:[#allocation43_spill] sm:$0xff] %v14493_v28  ;;  %v14499_v4 = vrot.slane %v8352_v62, %v10542_v47  ;;  %v9318_v39 = vpack.i.bf16 %v7231_v46, %v6841_v42  ;;  %v8051_v60 = vcombine.high %v13907_v61, %v7849_v57  ;;  %v14507_v29 = vrot.slane %v8050_v2, %v15859_v49  ;;  %v16289_v46 = vld [vmem:[#allocation82_spill] sm:$0xff] }
 0x70b   : > { %9304 = vrot.lane.b32.xlu1 %v9303_v26, %s16174_s27  ;;  %v6196_v52 = vcombine.low %v14207_v58, %v14469_v21  ;;  %v6080_v33 = vcombine.low %v13889_v14, %v14278_v22  ;;  %v6082_v27 = vcombine.low %v13894_v0, %v14386_v5  ;;  %v14518_v62 = vrot.slane %v7215_v36, %v10542_v47  ;;  %v16287_v26 = vld [vmem:[#allocation51_spill] sm:$0xff] }
 0x70c   : > { %16285 = vst [vmem:[#allocation97_spill] sm:$0xff] %v14499_v4  ;;  %v6897_v61 = vcombine.high %v16269_v10, %v14316_v59  ;;  %9319 = vrot.lane.b32.xlu0 %v9318_v39, %s9698_s18  ;;  %v14524_v57 = vrot.slane %v8051_v60, %v15859_v49  ;;  %v8098_v42 = vcombine.low %v14298_v17, %v14507_v29  ;;  %v16291_v60 = vld [vmem:[#allocation30_spill] sm:$0xff] }
 0x70d   : > { %v14529_v31 = vrot.slane %v6181_v56, %v10542_v47  ;;  %v6197_v14 = vcombine.high %v14207_v58, %v14469_v21  ;;  %v16286_v22 = vcombine.low %v16266_v35, %v16267_v20  ;;  %v7914_v59 = vcombine.low %v16287_v26, %v7847_v9  ;;  %v16290_v56 = vld [vmem:[#allocation25_spill] sm:$0xff] }
 0x70e   : > { %v14538_v10 = vrot.slane %v8098_v42, %v10542_v47  ;;  %v16292_v18 = vcombine.low %v16290_v56, %v16291_v60  ;;  %v14548_v58 = vrot.slane %v6196_v52, %v10542_v47  ;;  %v5743_v35 = vcombine.high %v13954_v34, %v14347_v50  ;;  %v16295_v34 = vld [vmem:[#allocation76_spill] sm:$0xff] }
 0x70f   : > { %v9308_v36 = vpack.i.bf16 %v16286_v22, %v6080_v33  ;;  %v7915_v20 = vcombine.high %v16287_v26, %v7847_v9  ;;  %v14555_v21 = vrot.slane %v7914_v59, %v15859_v49  ;;  %v8239_v33 = vpop.permute.xlu1 %8238  ;;  %v6911_v42 = vrot.slane %v6897_v61, %v15859_v49  ;;  %v16296_v9 = vld [vmem:[#allocation8_spill] sm:$0xff] }
 0x710   : > { %16288 = vst [vmem:[#allocation63_spill] sm:$0xff] %v14538_v10  ;;  %v9323_v23 = vpack.i.bf16 %v16292_v18, %v6082_v27  ;;  %16293 = vst [vmem:[#allocation103_spill] sm:$0xff] %v14548_v58  ;;  %v7287_v22 = vcombine.high %v13839_v25, %v14372_v51  ;;  %v16294_v18 = vld [vmem:[#allocation54_spill] sm:$0xff]  ;;  %v6843_v50 = vcombine.high %v16295_v34, %v14395_v37  ;;  %v16297_v26 = vld [vmem:[#allocation108_spill] sm:$0xff] }
 0x711   : > { %9309 = vrot.lane.b32.xlu1 %v9308_v36, %s16179_s21  ;;  %v14566_v27 = vrot.slane %v7915_v20, %v15859_v49  ;;  %v7962_v36 = vcombine.low %v16296_v9, %v14555_v21  ;;  %v7233_v59 = vcombine.high %v16297_v26, %v7213_v40  ;;  %v6842_v25 = vcombine.low %v16295_v34, %v14395_v37 }
 0x712   : > { %9324 = vrot.lane.b32.xlu0 %v9323_v23, %s16181_s11  ;;  %v7232_v51 = vcombine.low %v16297_v26, %v7213_v40  ;;  %v16298_v23 = vld [vmem:[#allocation35_spill] sm:$0xff]  ;;  %v5757_v20 = vrot.slane %v5743_v35, %v15859_v49  ;;  %v6945_v35 = vcombine.high %v14239_v8, %v14381_v7  ;;  %v7301_v34 = vrot.slane %v7287_v22, %v15859_v49 }
 0x713   : > { %v8440_v52 = vcombine.low %v16298_v23, %v8239_v33  ;;  %v8441_v39 = vcombine.high %v16298_v23, %v8239_v33  ;;  %v14580_v2 = vrot.slane %v7962_v36, %v10542_v47  ;;  %v9338_v44 = vpack.i.bf16 %v7233_v59, %v6843_v50  ;;  %v16301_v36 = vld [vmem:[#allocation59_spill] sm:$0xff] }
 0x714   : > { %v9328_v6 = vpack.i.bf16 %v7232_v51, %v6842_v25  ;;  %v5791_v33 = vcombine.high %v14174_v16, %v14390_v3  ;;  %v16303_v8 = vld [vmem:[#allocation83_spill] sm:$0xff]  ;;  %v14616_v25 = vrot.slane %v6197_v14, %v10542_v47  ;;  %v16307_v51 = vld [vmem:[#allocation80_spill] sm:$0xff]  ;;  %v16310_v1 = vcombine.high %v16290_v56, %v16291_v60 }
 0x715   : > { %16299 = vst [vmem:[#allocation16_spill] sm:$0xff] %v14580_v2  ;;  %v14587_v37 = vrot.slane %v8440_v52, %v15859_v49  ;;  %v14590_v40 = vrot.slane %v8441_v39, %v15859_v49  ;;  %9339 = vrot.lane.b32.xlu1 %v9338_v44, %s16174_s27  ;;  %v16302_v52 = vld [vmem:[#allocation94_spill] sm:$0xff]  ;;  %v16304_v49 = vld [vmem:[#allocation17_spill] sm:$0xff]  ;;  %v16305_v16 = vld [vmem:[#allocation87_spill] sm:$0xff]  ;;  %v6960_v23 = vcombine.low %v16307_v51, %v6911_v42 }
 0x716   : > { %9329 = vrot.lane.b32.xlu0 %v9328_v6, %s16177_s20  ;;  %v6844_v22 = vcombine.low %v16305_v16, %v16304_v49  ;;  %v16306_v59 = vld [vmem:[#allocation107_spill] sm:$0xff]  ;;  %v6083_v6 = vcombine.high %v13894_v0, %v14386_v5  ;;  %v6961_v3 = vcombine.high %v16307_v51, %v6911_v42  ;;  %v14625_v7 = vrot.slane %v5791_v33, %v10542_v47  ;;  %v16312_v42 = vld [vmem:[#allocation64_spill] sm:$0xff] }
 0x717   : > { %v8488_v50 = vcombine.low %v16302_v52, %v14587_v37  ;;  %v8489_v39 = vcombine.high %v16302_v52, %v14587_v37  ;;  %v7234_v44 = vcombine.low %v16306_v59, %v14502_v43  ;;  %v16308_v37 = vld [vmem:[#allocation12_spill] sm:$0xff]  ;;  %v14631_v5 = vrot.slane %v6945_v35, %v10542_v47  ;;  %v16313_v35 = vld [vmem:[#allocation91_spill] sm:$0xff] }
 0x718   : > { %v5806_v52 = vcombine.low %v16308_v37, %v5757_v20  ;;  %v9333_v0 = vpack.i.bf16 %v16310_v1, %v6083_v6  ;;  %v5807_v14 = vcombine.high %v16308_v37, %v5757_v20  ;;  %v7335_v58 = vcombine.high %v14290_v38, %v14436_v11  ;;  %v16316_v6 = vld [vmem:[#allocation115_spill] sm:$0xff] }
 0x719   : > { %v14621_v26 = vrot.slane %v8488_v50, %v10542_v47  ;;  %v9343_v61 = vpack.i.bf16 %v7234_v44, %v6844_v22  ;;  %v16311_v50 = vld [vmem:[#allocation9_spill] sm:$0xff]  ;;  %v7350_v51 = vcombine.low %v16312_v42, %v7301_v34  ;;  %v7351_v33 = vcombine.high %v16312_v42, %v7301_v34 }
 0x71a   : > { %9334 = vrot.lane.b32.xlu0 %v9333_v0, %s16178_s30  ;;  %v5823_v1 = vcombine.high %v14135_v55, %v14428_v45  ;;  %v14645_v56 = vrot.slane %v6960_v23, %v10542_v47  ;;  %v5814_v60 = vrot.slane %v5806_v52, %v10542_v47  ;;  %v6845_v38 = vcombine.high %v16305_v16, %v16304_v49  ;;  %v16314_v34 = vld [vmem:[#allocation101_spill] sm:$0xff]  ;;  %v16320_v0 = vld [vmem:[#allocation110_spill] sm:$0xff] }
 0x71b   : > { %16309 = vst [vmem:[#allocation104_spill] sm:$0xff] %v14621_v26  ;;  %9344 = vrot.lane.b32.xlu1 %v9343_v61, %s16179_s21  ;;  %v7235_v11 = vcombine.high %v16306_v59, %v14502_v43  ;;  %v14653_v20 = vrot.slane %v6961_v3, %v10542_v47  ;;  %v8099_v61 = vcombine.high %v14298_v17, %v14507_v29  ;;  %v16317_v43 = vld [vmem:[#allocation55_spill] sm:$0xff] }
 0x71c   : > { %v16315_v22 = vcombine.high %v16313_v35, %v16314_v34  ;;  %v5825_v23 = vcombine.high %v16316_v6, %v14625_v7  ;;  %v5821_v37 = vrot.slane %v5807_v14, %v10542_v47  ;;  %v14664_v49 = vrot.slane %v7335_v58, %v10542_v47  ;;  %v16319_v58 = vld [vmem:[#allocation114_spill] sm:$0xff]  ;;  %v16329_v34 = vld [vmem:[#allocation7_spill] sm:$0xff]  ;;  %v16330_v35 = vld [vmem:[#allocation77_spill] sm:$0xff] }
 0x71d   : > { %v9348_v16 = vpack.i.bf16 %v7235_v11, %v6845_v38  ;;  %v7236_v3 = vcombine.low %v16317_v43, %v14518_v62  ;;  %v14669_v59 = vrot.slane %v7350_v51, %v10542_v47  ;;  %v14672_v17 = vrot.slane %v7351_v33, %v10542_v47  ;;  %v16325_v11 = vld [vmem:[#allocation120_spill] sm:$0xff] }
 0x71e   : > { %v9363_v44 = vpack.i.bf16 %v5823_v1, %v16315_v22  ;;  %v16318_v29 = vcombine.high %v14452_v53, %v14460_v54  ;;  %v5689_v14 = vcombine.high %v16320_v0, %v16319_v58  ;;  %v16321_v42 = vcombine.low %v14457_v30, %v14463_v13  ;;  %v16323_v53 = vld [vmem:[#allocation31_spill] sm:$0xff]  ;;  %v16324_v54 = vld [vmem:[#allocation72_spill] sm:$0xff] }
 0x71f   : > { %v16322_v33 = vcombine.high %v14457_v30, %v14463_v13  ;;  %9349 = vrot.lane.b32.xlu0 %v9348_v16, %s16175_s12  ;;  %v6846_v38 = vcombine.low %v16324_v54, %v16323_v53  ;;  %v5827_v22 = vcombine.high %v16325_v11, %v5814_v60  ;;  %v16327_v30 = vcombine.high %v16289_v46, %v14524_v57 }
 0x720   : > { %v14678_v52 = vrot.slane %v16318_v29, %v10542_v47  ;;  %9364 = vrot.lane.b32.xlu1 %v9363_v44, %s9698_s18  ;;  %v14687_v51 = vrot.slane %v16321_v42, %v10542_v47  ;;  %v14700_v44 = vrot.slane %v8099_v61, %v10542_v47  ;;  %v16326_v29 = vcombine.low %v16289_v46, %v14524_v57 }
 0x721   : > { %v14693_v1 = vrot.slane %v16322_v33, %v10542_v47  ;;  %v14712_v13 = vrot.slane %v16327_v30, %v10542_v47  ;;  %v9373_v16 = vpack.i.bf16 %v5825_v23, %v5689_v14  ;;  %v16328_v33 = vcombine.high %v16296_v9, %v14555_v21  ;;  %v16334_v14 = vld [vmem:[#allocation90_spill] sm:$0xff]  ;;  %v16335_v30 = vld [vmem:[#allocation119_spill] sm:$0xff] }
 0x722   : > { %v14706_v42 = vrot.slane %v16326_v29, %v10542_v47  ;;  %v9353_v61 = vpack.i.bf16 %v7236_v3, %v6846_v38  ;;  %v5691_v45 = vcombine.high %v16330_v35, %v16329_v34  ;;  %v7237_v29 = vcombine.high %v16317_v43, %v14518_v62  ;;  %v16333_v3 = vld [vmem:[#allocation10_spill] sm:$0xff] }
 0x723   : > { %v14718_v28 = vrot.slane %v16328_v33, %v10542_v47  ;;  %v16331_v57 = vcombine.low %v16300_v24, %v14566_v27  ;;  %v16332_v23 = vcombine.high %v16300_v24, %v14566_v27  ;;  %v14737_v9 = vrot.slane %v8489_v39, %v10542_v47 }
 0x724   : > { %9374 = vrot.lane.b32.xlu1 %v9373_v16, %s16174_s27  ;;  %v6847_v62 = vcombine.high %v16324_v54, %v16323_v53  ;;  %9354 = vrot.lane.b32.xlu0 %v9353_v61, %s16181_s11  ;;  %v9383_v43 = vpack.i.bf16 %v5827_v22, %v5691_v45  ;;  %v5693_v38 = vcombine.high %v16334_v14, %v16333_v3  ;;  %v16336_v22 = vld [vmem:[#allocation57_spill] sm:$0xff] }
 0x725   : > { %v14728_v46 = vrot.slane %v16331_v57, %v10542_v47  ;;  %v14734_v21 = vrot.slane %v16332_v23, %v10542_v47  ;;  %v5829_v33 = vcombine.high %v16335_v30, %v5821_v37  ;;  %v5824_v24 = vcombine.low %v16316_v6, %v14625_v7  ;;  %v16337_v57 = vld [vmem:[#allocation41_spill] sm:$0xff]  ;;  %v16338_v23 = vld [vmem:[#allocation56_spill] sm:$0xff] }
 0x726   : > { %v5688_v27 = vcombine.low %v16320_v0, %v16319_v58  ;;  %v5826_v39 = vcombine.low %v16325_v11, %v5814_v60  ;;  %v7367_v16 = vcombine.high %v14067_v32, %v14472_v12  ;;  %v5828_v53 = vcombine.low %v16335_v30, %v5821_v37  ;;  %v16339_v37 = vld [vmem:[#allocation117_spill] sm:$0xff]  ;;  %v16346_v32 = vld [vmem:[#allocation36_spill] sm:$0xff] }
 0x727   : > { %v9358_v54 = vpack.i.bf16 %v7237_v29, %v6847_v62  ;;  %v5690_v45 = vcombine.low %v16330_v35, %v16329_v34  ;;  %v6218_v61 = vcombine.low %v16336_v22, %v14616_v25  ;;  %v6213_v7 = vcombine.high %v16338_v23, %v16337_v57  ;;  %v16347_v57 = vld [vmem:[#allocation86_spill] sm:$0xff] }
 0x728   : > { %9384 = vrot.lane.b32.xlu1 %v9383_v43, %s16175_s12  ;;  %v6977_v60 = vcombine.high %v14021_v15, %v14416_v19  ;;  %v5692_v6 = vcombine.low %v16334_v14, %v16333_v3  ;;  %v7368_v58 = vcombine.low %v16339_v37, %v14664_v49  ;;  %v6219_v35 = vcombine.high %v16336_v22, %v14616_v25  ;;  %v16342_v25 = vld [vmem:[#allocation15_spill] sm:$0xff]  ;;  %v16343_v19 = vld [vmem:[#allocation32_spill] sm:$0xff] }
 0x729   : > { %v16340_v34 = vcombine.low %v16303_v8, %v14590_v40  ;;  %v16341_v11 = vcombine.high %v16303_v8, %v14590_v40  ;;  %9359 = vrot.lane.b32.xlu0 %v9358_v54, %s16178_s30  ;;  %v9393_v62 = vpack.i.bf16 %v5829_v33, %v5693_v38  ;;  %v9368_v43 = vpack.i.bf16 %v5824_v24, %v5688_v27  ;;  %v16344_v15 = vld [vmem:[#allocation39_spill] sm:$0xff]  ;;  %v16349_v8 = vld [vmem:[#allocation52_spill] sm:$0xff] }
 0x72a   : > { %v9378_v3 = vpack.i.bf16 %v5826_v39, %v5690_v45  ;;  %v9423_v14 = vpack.i.bf16 %v7367_v16, %v6977_v60  ;;  %v9388_v30 = vpack.i.bf16 %v5828_v53, %v5692_v6  ;;  %v6978_v22 = vcombine.low %v16342_v25, %v14631_v5  ;;  %v16351_v39 = vld [vmem:[#allocation106_spill] sm:$0xff]  ;;  %v16353_v45 = vld [vmem:[#allocation44_spill] sm:$0xff]  ;;  %v16356_v60 = vld [vmem:[#allocation111_spill] sm:$0xff] }
 0x72b   : > { %v14773_v0 = vrot.slane %v16340_v34, %v10542_v47  ;;  %v14779_v29 = vrot.slane %v16341_v11, %v10542_v47  ;;  %v16345_v34 = vcombine.low %v16343_v19, %v16344_v15  ;;  %v16348_v23 = vcombine.high %v16346_v32, %v16347_v57  ;;  %v16352_v53 = vld [vmem:[#allocation58_spill] sm:$0xff] }
 0x72c   : > { %v8131_v38 = vcombine.high %v16294_v18, %v14538_v10  ;;  %9394 = vrot.lane.b32.xlu1 %v9393_v62, %s16178_s30  ;;  %v9433_v33 = vpack.i.bf16 %v7368_v58, %v6978_v22  ;;  %v16350_v24 = vcombine.high %v16343_v19, %v16344_v15  ;;  %v6982_v16 = vcombine.low %v16351_v39, %v14653_v20  ;;  %v16357_v15 = vld [vmem:[#allocation11_spill] sm:$0xff]  ;;  %v16358_v58 = vld [vmem:[#allocation98_spill] sm:$0xff] }
 0x72d   : > { %v9428_v12 = vpack.i.bf16 %v16345_v34, %v6218_v61  ;;  %v9398_v40 = vpack.i.bf16 %v16348_v23, %v6213_v7  ;;  %v7372_v54 = vcombine.low %v16352_v53, %v14672_v17  ;;  %9369 = vrot.lane.b32.xlu0 %v9368_v43, %s16177_s20  ;;  %v16354_v61 = vld [vmem:[#allocation67_spill] sm:$0xff]  ;;  %v6980_v6 = vcombine.low %v16356_v60, %v14645_v56 }
 0x72e   : > { %v14798_v27 = vpack.i.bf16 %v16350_v24, %v6219_v35  ;;  %v16355_v23 = vcombine.high %v16353_v45, %v16354_v61  ;;  %v7370_v19 = vcombine.low %v16357_v15, %v14669_v59  ;;  %v8132_v35 = vcombine.low %v16358_v58, %v14700_v44  ;;  %v16359_v24 = vld [vmem:[#allocation95_spill] sm:$0xff] }
 0x72f   : > { %v14816_v62 = vpack.i.bf16 %v7372_v54, %v6982_v16  ;;  %v6981_v22 = vcombine.high %v16356_v60, %v14645_v56  ;;  %v7371_v43 = vcombine.high %v16357_v15, %v14669_v59  ;;  %v6983_v34 = vcombine.high %v16351_v39, %v14653_v20  ;;  %v16362_v59 = vld [vmem:[#allocation78_spill] sm:$0xff] }
 0x730   : > { %v14808_v7 = vpack.i.bf16 %v8131_v38, %v16355_v23  ;;  %v14824_v38 = vpack.i.bf16 %v7370_v19, %v6980_v6  ;;  %v16360_v23 = vld [vmem:[#allocation34_spill] sm:$0xff]  ;;  %v7373_v16 = vcombine.high %v16352_v53, %v14672_v17  ;;  %v8133_v54 = vcombine.high %v16358_v58, %v14700_v44  ;;  %9424 = vrot.lane.b32.xlu1 %v9423_v14, %s9698_s18  ;;  %v16364_v14 = vld [vmem:[#allocation60_spill] sm:$0xff]  ;;  %v16365_v6 = vld [vmem:[#allocation75_spill] sm:$0xff] }
 0x731   : > { %v16361_v11 = vcombine.low %v16359_v24, %v16360_v23  ;;  %v14836_v56 = vpack.i.bf16 %v7371_v43, %v6981_v22  ;;  %v7995_v20 = vcombine.high %v16301_v36, %v14580_v2  ;;  %v7997_v39 = vcombine.high %v16362_v59, %v14718_v28  ;;  %9379 = vrot.lane.b32.xlu0 %v9378_v3, %s16179_s21  ;;  %v16366_v19 = vld [vmem:[#allocation70_spill] sm:$0xff]  ;;  %v16367_v58 = vld [vmem:[#allocation29_spill] sm:$0xff] }
 0x732   : > { %v14845_v60 = vpack.i.bf16 %v7373_v16, %v6983_v34  ;;  %v16363_v17 = vcombine.high %v16359_v24, %v16360_v23  ;;  %v7998_v53 = vcombine.low %v16364_v14, %v14728_v46  ;;  %v8134_v15 = vcombine.low %v16365_v6, %v14706_v42  ;;  %v16370_v3 = vld [vmem:[#allocation33_spill] sm:$0xff] }
 0x733   : > { %v14829_v10 = vpack.i.bf16 %v8132_v35, %v16361_v11  ;;  %v7996_v11 = vcombine.low %v16362_v59, %v14718_v28  ;;  %v16368_v35 = vcombine.high %v16366_v19, %v16367_v58  ;;  %v16369_v28 = vld [vmem:[#allocation68_spill] sm:$0xff]  ;;  %v8135_v16 = vcombine.high %v16365_v6, %v14706_v42  ;;  %v16374_v59 = vld [vmem:[#allocation66_spill] sm:$0xff] }
 0x734   : > { %v14850_v44 = vpack.i.bf16 %v8133_v54, %v16363_v17  ;;  %v16371_v43 = vcombine.high %v16369_v28, %v16370_v3  ;;  %v16372_v24 = vcombine.low %v16369_v28, %v16370_v3  ;;  %v16373_v54 = vld [vmem:[#allocation19_spill] sm:$0xff]  ;;  %9429 = vrot.lane.b32.xlu1 %v9428_v12, %s16181_s11  ;;  %v16380_v28 = vld [vmem:[#allocation118_spill] sm:$0xff] }
 0x735   : > { %v14859_v22 = vpack.i.bf16 %v7995_v20, %v16368_v35  ;;  %v16375_v17 = vcombine.low %v16373_v54, %v16374_v59  ;;  %v16376_v20 = vld [vmem:[#allocation49_spill] sm:$0xff]  ;;  %v16377_v35 = vld [vmem:[#allocation71_spill] sm:$0xff]  ;;  %9389 = vrot.lane.b32.xlu0 %v9388_v30, %s16181_s11  ;;  %v8387_v30 = vcombine.high %v14440_v41, %v14678_v52 }
 0x736   : > { %v14864_v34 = vpack.i.bf16 %v7997_v39, %v16371_v43  ;;  %v14869_v23 = vpack.i.bf16 %v7996_v11, %v16372_v24  ;;  %v16378_v2 = vcombine.low %v16376_v20, %v16377_v35  ;;  %v8385_v39 = vcombine.high %v14422_v48, %v14499_v4  ;;  %v16381_v43 = vld [vmem:[#allocation22_spill] sm:$0xff]  ;;  %v16382_v24 = vld [vmem:[#allocation79_spill] sm:$0xff] }
 0x737   : > { %v14876_v18 = vpack.i.bf16 %v7998_v53, %v16375_v17  ;;  %v8521_v11 = vcombine.high %v16311_v50, %v14621_v26  ;;  %v16379_v42 = vcombine.high %v16376_v20, %v16377_v35  ;;  %v7999_v53 = vcombine.high %v16364_v14, %v14728_v46  ;;  %v16384_v20 = vld [vmem:[#allocation45_spill] sm:$0xff]  ;;  %v16385_v35 = vld [vmem:[#allocation99_spill] sm:$0xff]  ;;  %v16387_v48 = vld [vmem:[#allocation14_spill] sm:$0xff] }
 0x738   : > { %v14881_v36 = vpack.i.bf16 %v8134_v15, %v16378_v2  ;;  %v8136_v2 = vcombine.low %v16380_v28, %v14712_v13  ;;  %v8386_v15 = vcombine.low %v14440_v41, %v14678_v52  ;;  %v8522_v12 = vcombine.low %v16381_v43, %v14737_v9  ;;  %v16388_v26 = vld [vmem:[#allocation24_spill] sm:$0xff]  ;;  %9434 = vrot.lane.b32.xlu1 %v9433_v33, %s16177_s20  ;;  %v16391_v52 = vld [vmem:[#allocation62_spill] sm:$0xff]  ;;  %v16393_v33 = vld [vmem:[#allocation43_spill] sm:$0xff] }
 0x739   : > { %v14891_v6 = vpack.i.bf16 %v8135_v16, %v16379_v42  ;;  %v9513_v3 = vpack.i.bf16 %v8521_v11, %v8385_v39  ;;  %v8000_v17 = vcombine.low %v16382_v24, %v14734_v21  ;;  %v8137_v16 = vcombine.high %v16380_v28, %v14712_v13  ;;  %9399 = vrot.lane.b32.xlu0 %v9398_v40, %s9698_s18 }
 0x73a   : > { %v16383_v46 = vcombine.high %v16373_v54, %v16374_v59  ;;  %v16386_v42 = vcombine.low %v16384_v20, %v16385_v35  ;;  %v8523_v39 = vcombine.high %v16381_v43, %v14737_v9  ;;  %v9528_v11 = vpack.i.bf16 %v8522_v12, %v8386_v15  ;;  %v16394_v43 = vld [vmem:[#allocation81_spill] sm:$0xff] }
 0x73b   : > { %v16389_v50 = vcombine.low %v16387_v48, %v16388_v26  ;;  %v16390_v13 = vcombine.high %v16384_v20, %v16385_v35  ;;  %v8001_v59 = vcombine.high %v16382_v24, %v14734_v21  ;;  %v8388_v41 = vcombine.low %v14443_v63, %v14687_v51 }
 0x73c   : > { %v9518_v14 = vpack.i.bf16 %v7999_v53, %v16383_v46  ;;  %v9523_v4 = vpack.i.bf16 %v8136_v2, %v16386_v42  ;;  %v9543_v53 = vpack.i.bf16 %v8523_v39, %v8387_v30  ;;  %v8524_v9 = vcombine.low %v16391_v52, %v14773_v0  ;;  %9439 = vrot.lane.b32.xlu1 %v14798_v27, %s16178_s30 }
 0x73d   : > { %v9533_v58 = vpack.i.bf16 %v8000_v17, %v16389_v50  ;;  %v9538_v54 = vpack.i.bf16 %v8137_v16, %v16390_v13  ;;  %v8389_v28 = vcombine.high %v14443_v63, %v14687_v51  ;;  %v16392_v50 = vcombine.high %v16387_v48, %v16388_v26  ;;  %v16396_v51 = vld [vmem:[#allocation20_spill] sm:$0xff]  ;;  %v16403_v13 = vld [vmem:[#allocation103_spill] sm:$0xff] }
 0x73e   : > { %v8525_v21 = vcombine.high %v16391_v52, %v14773_v0  ;;  %v8390_v15 = vcombine.low %v16393_v33, %v14693_v1  ;;  %v8526_v12 = vcombine.low %v16394_v43, %v14779_v29  ;;  %v7369_v24 = vcombine.high %v16339_v37, %v14664_v49  ;;  %v16397_v0 = vld [vmem:[#allocation50_spill] sm:$0xff]  ;;  %v16399_v37 = vld [vmem:[#allocation96_spill] sm:$0xff] }
 0x73f   : > { %v9548_v2 = vpack.i.bf16 %v8001_v59, %v16392_v50  ;;  %v9553_v17 = vpack.i.bf16 %v8524_v9, %v8388_v41  ;;  %v8391_v63 = vcombine.high %v16393_v33, %v14693_v1  ;;  %v8527_v48 = vcombine.high %v16394_v43, %v14779_v29  ;;  %v16400_v29 = vld [vmem:[#allocation113_spill] sm:$0xff]  ;;  %v16408_v33 = vld [vmem:[#allocation42_spill] sm:$0xff] }
 0x740   : > { %v16395_v26 = vcombine.low %v16349_v8, %v14529_v31  ;;  %v16398_v40 = vcombine.low %v16396_v51, %v16397_v0  ;;  %v6215_v46 = vcombine.high %v16349_v8, %v14529_v31  ;;  %v9558_v20 = vpack.i.bf16 %v8525_v21, %v8389_v28 }
 0x741   : > { %v9563_v35 = vpack.i.bf16 %v8526_v12, %v8390_v15  ;;  %v6979_v49 = vcombine.high %v16342_v25, %v14631_v5  ;;  %v9568_v1 = vpack.i.bf16 %v8527_v48, %v8391_v63  ;;  %v16401_v42 = vcombine.low %v16399_v37, %v16400_v29  ;;  %v16404_v5 = vld [vmem:[#allocation85_spill] sm:$0xff]  ;;  %v16405_v25 = vld [vmem:[#allocation46_spill] sm:$0xff] }
 0x742   : > { %v9403_v16 = vpack.i.bf16 %v16398_v40, %v16395_v26  ;;  %v16402_v31 = vcombine.high %v16396_v51, %v16397_v0  ;;  %v16406_v27 = vcombine.low %v16404_v5, %v16405_v25  ;;  %v16409_v15 = vld [vmem:[#allocation21_spill] sm:$0xff] }
 0x743   : > { %v6172_v30 = vrot.slane %v16401_v42, %v10542_v47  ;;  %v9443_v39 = vpack.i.bf16 %v7369_v24, %v6979_v49  ;;  %v16407_v47 = vcombine.high %v16404_v5, %v16405_v25  ;;  %v16410_v43 = vcombine.low %v16408_v33, %v16409_v15  ;;  %v16411_v24 = vld [vmem:[#allocation73_spill] sm:$0xff] }
 0x744   : > { %9404 = vrot.lane.b32.xlu0 %v9403_v16, %s16177_s20  ;;  %v9408_v8 = vpack.i.bf16 %v16402_v31, %v6215_v46 }
 0x745   : > { %v6216_v59 = vcombine.low %v6172_v30, %v16403_v13  ;;  %9444 = vrot.lane.b32.xlu1 %v9443_v39, %s16174_s27  ;;  %v6217_v52 = vcombine.high %v6172_v30, %v16403_v13 }
 0x747   : > { %v9413_v41 = vpack.i.bf16 %v16406_v27, %v6216_v59  ;;  %v9418_v9 = vpack.i.bf16 %v16407_v47, %v6217_v52 }
 0x748   : > { %9409 = vrot.lane.b32.xlu0 %v9408_v8, %s16174_s27 }
 0x749   : > { %9459 = vrot.lane.b32.xlu1 %v14808_v7, %s9698_s18  ;;  %v15009_v7 = vpop.permute.xlu0 %9259 }
 0x74c   : > { %9414 = vrot.lane.b32.xlu0 %v9413_v41, %s16179_s21 }
 0x74d   : > { %9464 = vrot.lane.b32.xlu1 %v14816_v62, %s16181_s11 }
 0x750   : > { %9419 = vrot.lane.b32.xlu0 %v9418_v9, %s16175_s12 }
 0x751   : > { %9474 = vrot.lane.b32.xlu1 %v14829_v10, %s16177_s20  ;;  %v15004_v10 = vpop.permute.xlu1 %9264 }
 0x754   : > { %9449 = vrot.lane.b32.xlu0 %v14824_v38, %s16179_s21 }
 0x755   : > { %9479 = vrot.lane.b32.xlu1 %v14845_v60, %s16178_s30  ;;  %v15012_v62 = vpop.permute.xlu1 %9274 }
 0x758   : > { %9454 = vrot.lane.b32.xlu0 %v14836_v56, %s16175_s12  ;;  %v8659_v56 = vld [vmem:[%s15342_s8] sm:$0xff] }
 0x759   : > { %9489 = vrot.lane.b32.xlu1 %v14850_v44, %s16174_s27 }
 0x75c   : > { %9469 = vrot.lane.b32.xlu0 %v14859_v22, %s9698_s18 }
 0x75d   : > { %9494 = vrot.lane.b32.xlu1 %v14864_v34, %s16174_s27 }
 0x760   : > { %9484 = vrot.lane.b32.xlu0 %v14869_v23, %s16177_s20 }
 0x761   : > { %9504 = vrot.lane.b32.xlu1 %v14876_v18, %s16179_s21  ;;  %v15016_v18 = vpop.permute.xlu0 %9269 }
 0x764   : > { %9499 = vrot.lane.b32.xlu0 %v14881_v36, %s16179_s21  ;;  %v15019_v36 = vpop.permute.xlu1 %9284 }
 0x765   : > { %9514 = vrot.lane.b32.xlu1 %v9513_v3, %s9698_s18 }
 0x768   : > { %9509 = vrot.lane.b32.xlu0 %v14891_v6, %s16175_s12 }
 0x769   : > { %9524 = vrot.lane.b32.xlu1 %v9523_v4, %s16181_s11  ;;  %v15023_v4 = vpop.permute.xlu0 %9279 }
 0x76c   : > { %9519 = vrot.lane.b32.xlu0 %v9518_v14, %s16175_s12 }
 0x76d   : > { %9534 = vrot.lane.b32.xlu1 %v9533_v58, %s16181_s11  ;;  %v15031_v60 = vpop.permute.xlu0 %9289  ;;  %v8667_v58 = vld [vmem:[%s15343_s9] sm:$0xff] }
 0x770   : > { %9529 = vrot.lane.b32.xlu0 %v9528_v11, %s16177_s20 }
 0x771   : > { %9544 = vrot.lane.b32.xlu1 %v9543_v53, %s16174_s27  ;;  %v9315_v22 = vpop.permute.xlu0 %9314 }
 0x772   : > { %v9317_v49 = vunpack.i.h.bf16 %v9315_v22 }
 0x773   : > { %v9295_v38 = vpop.permute.xlu1 %9294 }
 0x774   : > { %9539 = vrot.lane.b32.xlu0 %v9538_v54, %s16178_s30  ;;  %v9297_v6 = vunpack.i.h.bf16 %v9295_v38  ;;  %v9296_v3 = vunpack.i.l.bf16 %v9295_v38 }
 0x775   : > { %9554 = vrot.lane.b32.xlu1 %v9553_v17, %s16179_s21  ;;  %v16412_v17 = vld [vmem:[#allocation61_spill] sm:$0xff] }
 0x776   : > { %v6634_v12 = vsel %vm1254_vm9, %v16410_v43, %v9297_v6  ;;  %v16413_v63 = vcombine.low %v16411_v24, %v16412_v17 }
 0x777   : > { %v9300_v44 = vpop.permute.xlu1 %9299 }
 0x778   : > { %9549 = vrot.lane.b32.xlu0 %v9548_v2, %s16178_s30  ;;  %v9302_v54 = vunpack.i.h.bf16 %v9300_v44  ;;  %v9301_v53 = vunpack.i.l.bf16 %v9300_v44  ;;  %v6276_v48 = vsel %vm1254_vm9, %v16413_v63, %v9296_v3 }
 0x779   : > { %9564 = vrot.lane.b32.xlu1 %v9563_v35, %s16181_s11 }
 0x77a   : > { %v6277_v26 = vsel %vm1256_vm10, %v6276_v48, %v9301_v53  ;;  %v6635_v51 = vsel %vm1256_vm10, %v6634_v12, %v9302_v54  ;;  %v9261_v48 = vunpack.i.l.bf16 %v15009_v7 }
 0x77c   : > { %9559 = vrot.lane.b32.xlu0 %v9558_v20, %s16175_s12  ;;  %s365_s12 = sand.u32 1, %s9679_s14  }
 0x77d   : > { %8662 = vperm.xlu1 %8921, %v8659_v56   ;;  %v9305_v34 = vpop.permute.xlu1 %9304  ;;  %s8769_s20 = sshll.u32 %s365_s12, 4  ;;  %s8680_s25 = scalar_lea.sflag [#allocation5], %s365_s12 }
 0x77e   : > { %v9320_v23 = vpop.permute.xlu0 %9319  ;;  %v9307_v28 = vunpack.i.h.bf16 %v9305_v34  ;;  %v9306_v50 = vunpack.i.l.bf16 %v9305_v34  ;;  %v16415_v34 = vld [vmem:[#allocation65_spill] sm:$0xff]  ;;  %s367_s21 = scalar_lea.vmem [#allocation4], %s8769_s20 }
 0x77f   : > { %v9322_v41 = vunpack.i.h.bf16 %v9320_v23  ;;  %v9321_v52 = vunpack.i.l.bf16 %v9320_v23  ;;  %s8694_s11 = sshll.u32 %s367_s21, 4  ;;  %s15294_s11 = int_to_ptr.vmem [resolvable:$true] %s8694_s11 }
 0x780   : > { %9569 = vrot.lane.b32.xlu0 %v9568_v1, %s16178_s30  ;;  %v6278_v0 = vsel %vm1258_vm11, %v6277_v26, %v9306_v50  ;;  %v6636_v40 = vsel %vm1258_vm11, %v6635_v51, %v9307_v28  ;;  %v9316_v1 = vunpack.i.l.bf16 %v9315_v22  ;;  %v16414_v22 = vld [vmem:[#allocation105_spill] sm:$0xff]  ;;  %v9267_v26 = vunpack.i.h.bf16 %v15004_v10  ;;  %s8797_s30 = sshll.u32 %s9789_s17, 8  ;;  %s9625_s29 = scalar_lea.vmem %s15294_s11, 256 }
 0x781   : > { %v16416_v6 = vcombine.low %v16414_v22, %v16415_v34  ;;  %v9277_v22 = vunpack.i.h.bf16 %v15012_v62  ;;  %v9276_v34 = vunpack.i.l.bf16 %v15012_v62  ;;  %s15292_s28 = scalar_lea.hbm %s15344_s10, %s8797_s30  ;;  %p9626_p11 = scmp.ne.s32.totalorder %s15294_s11, %s9625_s29 }
 0x782   : > { %s9712_s17 = smov [#allocation4]  }
 0x783   : > { %v9310_v11 = vpop.permute.xlu1 %9309  ;;  %v7040_v3 = vsel %vm1254_vm9, %v16416_v6, %v9321_v52  ;;  %p9627_p12 = pnand %p9626_p11, %p9806_p5  ;;  %s9629_s27 = sshll.u32 %s9712_s17, 4  ;;  %s9630_s27 = int_to_ptr.vmem [resolvable:$false] %s9629_s27 }
 0x784   : > { %8670 = vperm.xlu0 %8932, %v8667_v58   ;;  %v9325_v14 = vpop.permute.xlu0 %9324  ;;  %v9312_v2 = vunpack.i.h.bf16 %v9310_v11  ;;  %v9311_v21 = vunpack.i.l.bf16 %v9310_v11  ;;  %v9262_v58 = vunpack.i.h.bf16 %v15009_v7  ;;  %v16418_v11 = vld [vmem:[#allocation116_spill] sm:$0xff]  ;;  %s9631_s20 = scalar_lea.vmem %s9630_s27, 512  ;;  %p9632_p0 = scmp.lt.s32.totalorder %s15294_s11, %s9630_s27 }
 0x785   : > { %v9327_v42 = vunpack.i.h.bf16 %v9325_v14  ;;  %v9326_v30 = vunpack.i.l.bf16 %v9325_v14  ;;  %v16417_v14 = vld [vmem:[#allocation112_spill] sm:$0xff]  ;;  %p9628_p13 = pneg %p9627_p12  ;;  %p9633_p1 = scmp.lt.s32.totalorder %s9631_s20, %s9625_s29 }
 0x786   : > { %v6279_v20 = vsel %vm1260_vm12, %v6278_v0, %v9311_v21  ;;  %v6637_v35 = vsel %vm1260_vm12, %v6636_v40, %v9312_v2  ;;  %v16419_v54 = vcombine.low %v16417_v14, %v16418_v11  ;;  %v9272_v14 = vunpack.i.h.bf16 %v15016_v18 }
 0x787   : > { %v9340_v46 = vpop.permute.xlu1 %9339  ;;  %v6280_v37 = vsel %vm1262_vm13, %v6279_v20, %v9316_v1  ;;  %v6638_v29 = vsel %vm1262_vm13, %v6637_v35, %v9317_v49  ;;  %v9266_v49 = vunpack.i.l.bf16 %v15004_v10  ;;  %v9271_v11 = vunpack.i.l.bf16 %v15016_v18  ;;  %p9634_p2 = por %p9633_p1, %p9632_p0 }
 0x788   : > { %v9330_v16 = vpop.permute.xlu0 %9329  ;;  %v6281_v59 = vsel %vm1264_vm14, %v6280_v37, %v9326_v30  ;;  %v6639_v5 = vsel %vm1264_vm14, %v6638_v29, %v9327_v42  ;;  %v7430_v53 = vsel %vm1254_vm9, %v16419_v54, %v9322_v41  ;;  %v9342_v23 = vunpack.i.h.bf16 %v9340_v46  ;;  %v16424_v41 = vld [vmem:[#allocation27_spill] sm:$0xff] }
 0x789   : > { %v9332_v38 = vunpack.i.h.bf16 %v9330_v16  ;;  %v9331_v56 = vunpack.i.l.bf16 %v9330_v16  ;;  %v9341_v28 = vunpack.i.l.bf16 %v9340_v46  ;;  %v16420_v16 = vld [vmem:[#allocation40_spill] sm:$0xff]  ;;  %p9635_p3 = pnand %p9634_p2, %p9628_p13 }
 0x78a   : > { %v16421_v46 = vld [vmem:[#allocation48_spill] sm:$0xff] }
 0x78b   : > { %v7041_v2 = vsel %vm1256_vm10, %v7040_v3, %v9331_v56  ;;  %v7431_v21 = vsel %vm1256_vm10, %v7430_v53, %v9332_v38  ;;  %v16422_v20 = vcombine.low %v16420_v16, %v16421_v46  ;;  %v9286_v16 = vunpack.i.l.bf16 %v15019_v36 }
 0x78c   : > { %v9335_v39 = vpop.permute.xlu0 %9334  ;;  %v7432_v51 = vsel %vm1258_vm11, %v7431_v21, %v9342_v23  ;;  %v7042_v0 = vsel %vm1258_vm11, %v7041_v2, %v9341_v28  ;;  %v16426_v23 = vld [vmem:[#allocation47_spill] sm:$0xff] }
 0x78d   : > { %v9345_v31 = vpop.permute.xlu1 %9344  ;;  %v9337_v8 = vunpack.i.h.bf16 %v9335_v39  ;;  %v9336_v13 = vunpack.i.l.bf16 %v9335_v39  ;;  %v5487_v35 = vsel %vm1254_vm9, %v16422_v20, %v9262_v58  ;;  %v16427_v28 = vcombine.low %v14135_v55, %v16426_v23  ;;  %v16428_v21 = vld [vmem:[#allocation91_spill] sm:$0xff] }
 0x78e   : > { %v9347_v33 = vunpack.i.h.bf16 %v9345_v31  ;;  %v9346_v15 = vunpack.i.l.bf16 %v9345_v31  ;;  %v5488_v38 = vsel %vm1256_vm10, %v5487_v35, %v9267_v26  ;;  %v9282_v35 = vunpack.i.h.bf16 %v15023_v4 }
 0x78f   : > { %v15056_v25 = vsel %vm1266_vm15, %v6281_v59, %v9336_v13  ;;  %v15059_v27 = vsel %vm1266_vm15, %v6639_v5, %v9337_v8  ;;  %v16423_v5 = vld [vmem:[#allocation23_spill] sm:$0xff] }
 0x790   : > { %v8600_v47 = vpack.c.bf16 %v15059_v27, %v15056_v25  ;;  %v7043_v1 = vsel %vm1260_vm12, %v7042_v0, %v9346_v15  ;;  %v7433_v37 = vsel %vm1260_vm12, %v7432_v51, %v9347_v33  ;;  %v16425_v10 = vcombine.low %v16423_v5, %v16424_v41  ;;  %v16429_v33 = vld [vmem:[#allocation101_spill] sm:$0xff] }
 0x791   : > { %v9350_v44 = vpop.permute.xlu0 %9349  ;;  %v16430_v15 = vcombine.low %v16428_v21, %v16429_v33  ;;  %v9287_v0 = vunpack.i.h.bf16 %v15019_v36 }
 0x792   : > { %v9365_v9 = vpop.permute.xlu1 %9364  ;;  %v9352_v12 = vunpack.i.h.bf16 %v9350_v44  ;;  %v9351_v24 = vunpack.i.l.bf16 %v9350_v44  ;;  %v5480_v52 = vsel %vm1254_vm9, %v16425_v10, %v9261_v48 }
 0x793   : > { %v9367_v31 = vunpack.i.h.bf16 %v9365_v9  ;;  %v9366_v8 = vunpack.i.l.bf16 %v9365_v9  ;;  %v5481_v9 = vsel %vm1256_vm10, %v5480_v52, %v9266_v49  ;;  %v9281_v49 = vunpack.i.l.bf16 %v15023_v4 }
 0x794   : > { %v7044_v29 = vsel %vm1262_vm13, %v7043_v1, %v9351_v24  ;;  %v7434_v42 = vsel %vm1262_vm13, %v7433_v37, %v9352_v12  ;;  %v5489_v12 = vsel %vm1258_vm11, %v5488_v38, %v9272_v14 }
 0x795   : > { %v5893_v2 = vsel %vm1254_vm9, %v16427_v28, %v9367_v31  ;;  %v5886_v62 = vsel %vm1254_vm9, %v16430_v15, %v9366_v8  ;;  %v5490_v55 = vsel %vm1260_vm12, %v5489_v12, %v9277_v22 }
 0x796   : > { %v15072_v50 = vpop.permute.xlu1 %9374  ;;  %v9355_v43 = vpop.permute.xlu0 %9354 }
 0x797   : > { %v9357_v17 = vunpack.i.h.bf16 %v9355_v43  ;;  %v9356_v63 = vunpack.i.l.bf16 %v9355_v43  ;;  %v5482_v43 = vsel %vm1258_vm11, %v5481_v9, %v9271_v11  ;;  %v9377_v48 = vunpack.i.h.bf16 %v15072_v50 }
 0x798   : > { %v9376_v26 = vunpack.i.l.bf16 %v15072_v50 }
 0x799   : > { %v7045_v13 = vsel %vm1264_vm14, %v7044_v29, %v9356_v63  ;;  %v7435_v59 = vsel %vm1264_vm14, %v7434_v42, %v9357_v17  ;;  %v5483_v63 = vsel %vm1260_vm12, %v5482_v43, %v9276_v34  ;;  %v9291_v29 = vunpack.i.l.bf16 %v15031_v60 }
 0x79a   : > { %v15080_v40 = vpop.permute.xlu1 %9384  ;;  %v5484_v36 = vsel %vm1262_vm13, %v5483_v63, %v9281_v49 }
 0x79b   : > { %v9360_v7 = vpop.permute.xlu0 %9359  ;;  %v9387_v4 = vunpack.i.h.bf16 %v15080_v40  ;;  %v9386_v31 = vunpack.i.l.bf16 %v15080_v40 }
 0x79c   : > { %v9362_v30 = vunpack.i.h.bf16 %v9360_v7  ;;  %v9361_v39 = vunpack.i.l.bf16 %v9360_v7  ;;  %v9292_v7 = vunpack.i.h.bf16 %v15031_v60 }
 0x79e   : > { %v15099_v56 = vsel %vm1266_vm15, %v7045_v13, %v9361_v39  ;;  %v15102_v44 = vsel %vm1266_vm15, %v7435_v59, %v9362_v30  ;;  %v9395_v58 = vpop.permute.xlu1 %9394  ;;  %v5491_v39 = vsel %vm1262_vm13, %v5490_v55, %v9282_v35  ;;  %v5485_v13 = vsel %vm1264_vm14, %v5484_v36, %v9286_v16  ;;  %v16433_v16 = vld [vmem:[#allocation41_spill] sm:$0xff] }
 0x79f   : > { %v8602_v6 = vpack.c.bf16 %v15102_v44, %v15099_v56  ;;  %v9370_v3 = vpop.permute.xlu0 %9369  ;;  %v5492_v59 = vsel %vm1264_vm14, %v5491_v39, %v9287_v0  ;;  %v9397_v41 = vunpack.i.h.bf16 %v9395_v58  ;;  %v9396_v10 = vunpack.i.l.bf16 %v9395_v58  ;;  %v16432_v0 = vld [vmem:[#allocation56_spill] sm:$0xff] }
 0x7a0   : > { %v9372_v54 = vunpack.i.h.bf16 %v9370_v3  ;;  %v9371_v53 = vunpack.i.l.bf16 %v9370_v3  ;;  %v5493_v3 = vsel %vm1266_vm15, %v5492_v59, %v9292_v7  ;;  %v5486_v11 = vsel %vm1266_vm15, %v5485_v13, %v9291_v29 }
 0x7a1   : > { %v16441_v56 = vcombine.low %v16353_v45, %v16354_v61 }
 0x7a2   : > { %v5887_v24 = vsel %vm1256_vm10, %v5886_v62, %v9371_v53  ;;  %v5894_v18 = vsel %vm1256_vm10, %v5893_v2, %v9372_v54  ;;  %v15123_v17 = vpop.permute.xlu1 %9424 }
 0x7a3   : > { %v9380_v51 = vpop.permute.xlu0 %9379  ;;  %v5888_v1 = vsel %vm1258_vm11, %v5887_v24, %v9376_v26  ;;  %v5895_v37 = vsel %vm1258_vm11, %v5894_v18, %v9377_v48  ;;  %v16431_v26 = vcombine.low %v16346_v32, %v16347_v57  ;;  %v9427_v49 = vunpack.i.h.bf16 %v15123_v17 }
 0x7a4   : > { %v9382_v46 = vunpack.i.h.bf16 %v9380_v51  ;;  %v9381_v20 = vunpack.i.l.bf16 %v9380_v51 }
 0x7a6   : > { %v5889_v50 = vsel %vm1260_vm12, %v5888_v1, %v9381_v20  ;;  %v5896_v42 = vsel %vm1260_vm12, %v5895_v37, %v9382_v46  ;;  %v15139_v30 = vpop.permute.xlu1 %9429  ;;  %v16434_v46 = vcombine.low %v16432_v0, %v16433_v16  ;;  %v9426_v1 = vunpack.i.l.bf16 %v15123_v17 }
 0x7a7   : > { %v9390_v8 = vpop.permute.xlu0 %9389  ;;  %v5890_v52 = vsel %vm1262_vm13, %v5889_v50, %v9386_v31  ;;  %v5897_v38 = vsel %vm1262_vm13, %v5896_v42, %v9387_v4  ;;  %v9432_v36 = vunpack.i.h.bf16 %v15139_v30  ;;  %v9431_v39 = vunpack.i.l.bf16 %v15139_v30 }
 0x7a8   : > { %v9392_v60 = vunpack.i.h.bf16 %v9390_v8  ;;  %v9391_v5 = vunpack.i.l.bf16 %v9390_v8 }
 0x7aa   : > { %v5891_v9 = vsel %vm1264_vm14, %v5890_v52, %v9391_v5  ;;  %v5898_v22 = vsel %vm1264_vm14, %v5897_v38, %v9392_v60  ;;  %v15151_v34 = vpop.permute.xlu1 %9434 }
 0x7ab   : > { %v9400_v40 = vpop.permute.xlu0 %9399  ;;  %v5899_v14 = vsel %vm1266_vm15, %v5898_v22, %v9397_v41  ;;  %v5892_v54 = vsel %vm1266_vm15, %v5891_v9, %v9396_v10  ;;  %v9437_v5 = vunpack.i.h.bf16 %v15151_v34  ;;  %v9436_v41 = vunpack.i.l.bf16 %v15151_v34  ;;  %v16438_v34 = vld [vmem:[#allocation53_spill] sm:$0xff] }
 0x7ac   : > { %v8599_v58 = vpack.c.bf16 %v5899_v14, %v5493_v3  ;;  %v8598_v53 = vpack.c.bf16 %v5892_v54, %v5486_v11  ;;  %v9402_v33 = vunpack.i.h.bf16 %v9400_v40  ;;  %v9401_v15 = vunpack.i.l.bf16 %v9400_v40  ;;  %v16435_v54 = vld [vmem:[#allocation74_spill] sm:$0xff] }
 0x7ae   : > { %8618 = vmatprep.subr.bf16.mxu0 %v8599_v58  ;;  %v9440_v23 = vpop.permute.xlu1 %9439  ;;  %v6641_v51 = vsel %vm1254_vm9, %v16431_v26, %v9402_v33  ;;  %v6283_v20 = vsel %vm1254_vm9, %v16434_v46, %v9401_v15  ;;  %v16436_v58 = vld [vmem:[#allocation26_spill] sm:$0xff] }
 0x7af   : > { %8619 = vmatpush1.bf16.msra.mxu0 %v8598_v53  ;;  %v9442_v17 = vunpack.i.h.bf16 %v9440_v23  ;;  %v9441_v8 = vunpack.i.l.bf16 %v9440_v23  ;;  %v16437_v53 = vcombine.low %v16435_v54, %v16436_v58 }
 0x7b1   : > { %v7437_v23 = vsel %vm1254_vm9, %v16437_v53, %v9427_v49  ;;  %v16447_v53 = vld [vmem:[#allocation54_spill] sm:$0xff] }
 0x7b6   : > { %v9405_v28 = vpop.permute.xlu0 %9404 }
 0x7b7   : > { %v9445_v2 = vpop.permute.xlu1 %9444  ;;  %v9407_v43 = vunpack.i.h.bf16 %v9405_v28  ;;  %v9406_v12 = vunpack.i.l.bf16 %v9405_v28  ;;  %v16439_v28 = vld [vmem:[#allocation13_spill] sm:$0xff] }
 0x7b8   : > { %v9447_v38 = vunpack.i.h.bf16 %v9445_v2  ;;  %v9446_v9 = vunpack.i.l.bf16 %v9445_v2 }
 0x7b9   : > { %v6284_v37 = vsel %vm1256_vm10, %v6283_v20, %v9406_v12  ;;  %v6642_v7 = vsel %vm1256_vm10, %v6641_v51, %v9407_v43  ;;  %v7438_v43 = vsel %vm1256_vm10, %v7437_v23, %v9437_v5  ;;  %v16448_v23 = vld [vmem:[#allocation63_spill] sm:$0xff] }
 0x7ba   : > { %v9410_v21 = vpop.permute.xlu0 %9409 }
 0x7bb   : > { %v15157_v62 = vpop.permute.xlu1 %9459  ;;  %v9412_v18 = vunpack.i.h.bf16 %v9410_v21  ;;  %v9411_v63 = vunpack.i.l.bf16 %v9410_v21  ;;  %v16440_v21 = vcombine.low %v16438_v34, %v16439_v28  ;;  %v16449_v34 = vcombine.low %v16447_v53, %v16448_v23 }
 0x7bd   : > { %v6285_v50 = vsel %vm1258_vm11, %v6284_v37, %v9411_v63  ;;  %v6643_v32 = vsel %vm1258_vm11, %v6642_v7, %v9412_v18  ;;  %v7047_v33 = vsel %vm1254_vm9, %v16440_v21, %v9426_v1  ;;  %v7439_v18 = vsel %vm1258_vm11, %v7438_v43, %v9447_v38 }
 0x7be   : > { %v9415_v24 = vpop.permute.xlu0 %9414  ;;  %v7048_v2 = vsel %vm1256_vm10, %v7047_v33, %v9436_v41 }
 0x7bf   : > { %v9417_v55 = vunpack.i.h.bf16 %v9415_v24  ;;  %v9416_v48 = vunpack.i.l.bf16 %v9415_v24  ;;  %v9465_v35 = vpop.permute.xlu1 %9464  ;;  %v7049_v24 = vsel %vm1258_vm11, %v7048_v2, %v9446_v9 }
 0x7c0   : > { %v9466_v26 = vunpack.i.l.bf16 %v9465_v35 }
 0x7c1   : > { %v6286_v4 = vsel %vm1260_vm12, %v6285_v50, %v9416_v48  ;;  %v6644_v31 = vsel %vm1260_vm12, %v6643_v32, %v9417_v55  ;;  %v9467_v48 = vunpack.i.h.bf16 %v9465_v35 }
 0x7c2   : > { %v9420_v29 = vpop.permute.xlu0 %9419 }
 0x7c3   : > { %v9422_v57 = vunpack.i.h.bf16 %v9420_v29  ;;  %v9421_v42 = vunpack.i.l.bf16 %v9420_v29  ;;  %v15179_v60 = vpop.permute.xlu1 %9474 }
 0x7c4   : > { %v9476_v5 = vunpack.i.l.bf16 %v15179_v60 }
 0x7c5   : > { %v6287_v13 = vsel %vm1262_vm13, %v6286_v4, %v9421_v42  ;;  %v6645_v59 = vsel %vm1262_vm13, %v6644_v31, %v9422_v57 }
 0x7c6   : > { %v9450_v10 = vpop.permute.xlu0 %9449  ;;  %v6288_v52 = vsel %vm1264_vm14, %v6287_v13, %v9431_v39  ;;  %v6646_v30 = vsel %vm1264_vm14, %v6645_v59, %v9432_v36  ;;  %v9461_v39 = vunpack.i.l.bf16 %v15157_v62  ;;  %v9462_v59 = vunpack.i.h.bf16 %v15157_v62 }
 0x7c7   : > { %v6289_v22 = vsel %vm1266_vm15, %v6288_v52, %v9441_v8  ;;  %v6647_v40 = vsel %vm1266_vm15, %v6646_v30, %v9442_v17  ;;  %v9452_v3 = vunpack.i.h.bf16 %v9450_v10  ;;  %v9451_v14 = vunpack.i.l.bf16 %v9450_v10  ;;  %v9480_v15 = vpop.permute.xlu1 %9479  ;;  %v16442_v30 = vld [vmem:[#allocation29_spill] sm:$0xff] }
 0x7c8   : > { %v8601_v11 = vpack.c.bf16 %v6647_v40, %v6289_v22  ;;  %v9482_v20 = vunpack.i.h.bf16 %v9480_v15  ;;  %v9481_v49 = vunpack.i.l.bf16 %v9480_v15  ;;  %v7795_v44 = vsel %vm1254_vm9, %v16441_v56, %v9461_v39  ;;  %v16444_v22 = vld [vmem:[#allocation59_spill] sm:$0xff]  ;;  %v16445_v40 = vld [vmem:[#allocation16_spill] sm:$0xff] }
 0x7c9   : > { %v7050_v51 = vsel %vm1260_vm12, %v7049_v24, %v9451_v14  ;;  %v7440_v0 = vsel %vm1260_vm12, %v7439_v18, %v9452_v3  ;;  %v16443_v38 = vcombine.low %v16366_v19, %v16442_v30  ;;  %v16446_v62 = vcombine.low %v16444_v22, %v16445_v40  ;;  %v16451_v22 = vld [vmem:[#allocation104_spill] sm:$0xff] }
 0x7ca   : > { %v9455_v12 = vpop.permute.xlu0 %9454  ;;  %8620 = vmatprep.subr.bf16.mxu0 %v8601_v11  ;;  %v8201_v19 = vsel %vm1254_vm9, %v16449_v34, %v9462_v59  ;;  %v7796_v28 = vsel %vm1256_vm10, %v7795_v44, %v9476_v5 }
 0x7cb   : > { %v9457_v63 = vunpack.i.h.bf16 %v9455_v12  ;;  %v9456_v55 = vunpack.i.l.bf16 %v9455_v12  ;;  %8621 = vmatpush1.bf16.msra.mxu0 %v8600_v47  ;;  %v9490_v1 = vpop.permute.xlu1 %9489 }
 0x7cc   : > { %v9492_v10 = vunpack.i.h.bf16 %v9490_v1  ;;  %v9491_v52 = vunpack.i.l.bf16 %v9490_v1 }
 0x7cd   : > { %v7051_v16 = vsel %vm1262_vm13, %v7050_v51, %v9456_v55  ;;  %v7441_v46 = vsel %vm1262_vm13, %v7440_v0, %v9457_v63 }
 0x7ce   : > { %v9470_v37 = vpop.permute.xlu0 %9469  ;;  %v7052_v7 = vsel %vm1264_vm14, %v7051_v16, %v9466_v26  ;;  %v7442_v29 = vsel %vm1264_vm14, %v7441_v46, %v9467_v48  ;;  %v7797_v43 = vsel %vm1258_vm11, %v7796_v28, %v9491_v52 }
 0x7cf   : > { %v7053_v25 = vsel %vm1266_vm15, %v7052_v7, %v9481_v49  ;;  %v7443_v27 = vsel %vm1266_vm15, %v7442_v29, %v9482_v20  ;;  %v9495_v35 = vpop.permute.xlu1 %9494  ;;  %v9472_v4 = vunpack.i.h.bf16 %v9470_v37  ;;  %v9471_v31 = vunpack.i.l.bf16 %v9470_v37 }
 0x7d0   : > { %v8603_v47 = vpack.c.bf16 %v7443_v27, %v7053_v25  ;;  %v9497_v14 = vunpack.i.h.bf16 %v9495_v35  ;;  %v9496_v11 = vunpack.i.l.bf16 %v9495_v35 }
 0x7d1   : > { %v7788_v9 = vsel %vm1254_vm9, %v16443_v38, %v9471_v31  ;;  %v8194_v3 = vsel %vm1254_vm9, %v16446_v62, %v9472_v4 }
 0x7d2   : > { %v9485_v50 = vpop.permute.xlu0 %9484  ;;  %8622 = vmatprep.subr.bf16.mxu0 %v8603_v47 }
 0x7d3   : > { %8623 = vmatpush1.bf16.msra.mxu0 %v8602_v6  ;;  %v9505_v32 = vpop.permute.xlu1 %9504  ;;  %v9487_v17 = vunpack.i.h.bf16 %v9485_v50  ;;  %v9486_v8 = vunpack.i.l.bf16 %v9485_v50  ;;  %v9477_v6 = vunpack.i.h.bf16 %v15179_v60 }
 0x7d4   : > { %v9507_v54 = vunpack.i.h.bf16 %v9505_v32  ;;  %v9506_v60 = vunpack.i.l.bf16 %v9505_v32 }
 0x7d5   : > { %v7789_v45 = vsel %vm1256_vm10, %v7788_v9, %v9486_v8  ;;  %v8195_v61 = vsel %vm1256_vm10, %v8194_v3, %v9487_v17  ;;  %v8202_v2 = vsel %vm1256_vm10, %v8201_v19, %v9477_v6  ;;  %v16450_v9 = vld [vmem:[#allocation9_spill] sm:$0xff] }
 0x7d6   : > { %v9500_v57 = vpop.permute.xlu0 %9499  ;;  %v8196_v18 = vsel %vm1258_vm11, %v8195_v61, %v9497_v14  ;;  %v7790_v63 = vsel %vm1258_vm11, %v7789_v45, %v9496_v11  ;;  %v8203_v26 = vsel %vm1258_vm11, %v8202_v2, %v9492_v10  ;;  %v16452_v40 = vcombine.low %v16450_v9, %v16451_v22  ;;  %v16453_v3 = vld [vmem:[#allocation69_spill] sm:$0xff] }
 0x7d7   : > { %v15213_v42 = vpop.permute.xlu1 %9514  ;;  %v9502_v21 = vunpack.i.h.bf16 %v9500_v57  ;;  %v9501_v33 = vunpack.i.l.bf16 %v9500_v57  ;;  %v7791_v51 = vsel %vm1260_vm12, %v7790_v63, %v9506_v60  ;;  %v8197_v0 = vsel %vm1260_vm12, %v8196_v18, %v9507_v54  ;;  %v16454_v14 = vld [vmem:[#allocation97_spill] sm:$0xff] }
 0x7d8   : > { %v9517_v1 = vunpack.i.h.bf16 %v15213_v42  ;;  %v16455_v11 = vcombine.low %v16453_v3, %v16454_v14 }
 0x7d9   : > { %v7798_v20 = vsel %vm1260_vm12, %v7797_v43, %v9501_v33  ;;  %v8204_v49 = vsel %vm1260_vm12, %v8203_v26, %v9502_v21 }
 0x7da   : > { %v9510_v36 = vpop.permute.xlu0 %9509  ;;  %v8591_v62 = vsel %vm1254_vm9, %v16452_v40, %v9517_v1  ;;  %v8608_v1 = vld [vmem:[%s15339_s5] sm:$0xf] }
 0x7db   : > { %v9525_v13 = vpop.permute.xlu1 %9524  ;;  %v9512_v12 = vunpack.i.h.bf16 %v9510_v36  ;;  %v9511_v24 = vunpack.i.l.bf16 %v9510_v36  ;;  %v9516_v36 = vunpack.i.l.bf16 %v15213_v42 }
 0x7dc   : > { %v9527_v55 = vunpack.i.h.bf16 %v9525_v13  ;;  %v9526_v48 = vunpack.i.l.bf16 %v9525_v13 }
 0x7dd   : > { %v7799_v29 = vsel %vm1262_vm13, %v7798_v20, %v9511_v24  ;;  %v8205_v25 = vsel %vm1262_vm13, %v8204_v49, %v9512_v12  ;;  %v8584_v45 = vsel %vm1254_vm9, %v16455_v11, %v9516_v36 }
 0x7de   : > { %v9520_v41 = vpop.permute.xlu0 %9519  ;;  %v7800_v35 = vsel %vm1264_vm14, %v7799_v29, %v9526_v48  ;;  %v8206_v50 = vsel %vm1264_vm14, %v8205_v25, %v9527_v55 }
 0x7df   : > { %v9535_v58 = vpop.permute.xlu1 %9534  ;;  %v9521_v16 = vunpack.i.l.bf16 %v9520_v41  ;;  %v9522_v37 = vunpack.i.h.bf16 %v9520_v41 }
 0x7e0   : > { %v9537_v32 = vunpack.i.h.bf16 %v9535_v58  ;;  %v9536_v57 = vunpack.i.l.bf16 %v9535_v58 }
 0x7e1   : > { %v7792_v39 = vsel %vm1262_vm13, %v7791_v51, %v9521_v16  ;;  %v8198_v8 = vsel %vm1262_vm13, %v8197_v0, %v9522_v37 }
 0x7e2   : > { %v9530_v15 = vpop.permute.xlu0 %9529  ;;  %v7793_v52 = vsel %vm1264_vm14, %v7792_v39, %v9536_v57  ;;  %v8199_v42 = vsel %vm1264_vm14, %v8198_v8, %v9537_v32 }
 0x7e3   : > { %v9545_v46 = vpop.permute.xlu1 %9544  ;;  %v9532_v13 = vunpack.i.h.bf16 %v9530_v15  ;;  %v9531_v59 = vunpack.i.l.bf16 %v9530_v15 }
 0x7e4   : > { %v9547_v56 = vunpack.i.h.bf16 %v9545_v46  ;;  %v9546_v44 = vunpack.i.l.bf16 %v9545_v46 }
 0x7e5   : > { %v8585_v58 = vsel %vm1256_vm10, %v8584_v45, %v9531_v59  ;;  %v8592_v53 = vsel %vm1256_vm10, %v8591_v62, %v9532_v13 }
 0x7e6   : > { %v9540_v7 = vpop.permute.xlu0 %9539  ;;  %v8586_v19 = vsel %vm1258_vm11, %v8585_v58, %v9546_v44  ;;  %v8593_v28 = vsel %vm1258_vm11, %v8592_v53, %v9547_v56 }
 0x7e7   : > { %v9542_v27 = vunpack.i.h.bf16 %v9540_v7  ;;  %v9541_v47 = vunpack.i.l.bf16 %v9540_v7  ;;  %v9555_v4 = vpop.permute.xlu1 %9554 }
 0x7e8   : > { %v9557_v30 = vunpack.i.h.bf16 %v9555_v4  ;;  %v9556_v38 = vunpack.i.l.bf16 %v9555_v4 }
 0x7e9   : > { %v7801_v31 = vsel %vm1266_vm15, %v7800_v35, %v9541_v47  ;;  %v8207_v17 = vsel %vm1266_vm15, %v8206_v50, %v9542_v27 }
 0x7ea   : > { %v9550_v5 = vpop.permute.xlu0 %9549  ;;  %v8605_v41 = vpack.c.bf16 %v8207_v17, %v7801_v31  ;;  %v8587_v15 = vsel %vm1260_vm12, %v8586_v19, %v9556_v38  ;;  %v8594_v2 = vsel %vm1260_vm12, %v8593_v28, %v9557_v30 }
 0x7eb   : > { %v9552_v6 = vunpack.i.h.bf16 %v9550_v5  ;;  %v9551_v10 = vunpack.i.l.bf16 %v9550_v5  ;;  %v9565_v60 = vpop.permute.xlu1 %9564 }
 0x7ec   : > { %8624 = vmatprep.subr.bf16.mxu0 %v8605_v41  ;;  %v9567_v43 = vunpack.i.h.bf16 %v9565_v60  ;;  %v9566_v12 = vunpack.i.l.bf16 %v9565_v60 }
 0x7ed   : > { %v7794_v61 = vsel %vm1266_vm15, %v7793_v52, %v9551_v10  ;;  %v8200_v54 = vsel %vm1266_vm15, %v8199_v42, %v9552_v6 }
 0x7ee   : > { %v8604_v23 = vpack.c.bf16 %v8200_v54, %v7794_v61  ;;  %v9560_v34 = vpop.permute.xlu0 %9559 }
 0x7ef   : > { %v9562_v21 = vunpack.i.h.bf16 %v9560_v34  ;;  %v9561_v33 = vunpack.i.l.bf16 %v9560_v34 }
 0x7f0   : > { %8625 = vmatpush1.bf16.msra.mxu0 %v8604_v23 }
 0x7f1   : > { %v8588_v24 = vsel %vm1262_vm13, %v8587_v15, %v9561_v33  ;;  %v8595_v18 = vsel %vm1262_vm13, %v8594_v2, %v9562_v21 }
 0x7f2   : > { %v9570_v63 = vpop.permute.xlu0 %9569  ;;  %v8589_v26 = vsel %vm1264_vm14, %v8588_v24, %v9566_v12  ;;  %v8596_v51 = vsel %vm1264_vm14, %v8595_v18, %v9567_v43 }
 0x7f3   : > { %v9572_v55 = vunpack.i.h.bf16 %v9570_v63  ;;  %v9571_v48 = vunpack.i.l.bf16 %v9570_v63 }
 0x7f5   : > { %v8597_v0 = vsel %vm1266_vm15, %v8596_v51, %v9572_v55  ;;  %v8590_v16 = vsel %vm1266_vm15, %v8589_v26, %v9571_v48 }
 0x7f6   : > { %v8607_v46 = vpack.c.bf16 %v8597_v0, %v8597_v0  ;;  %v8606_v20 = vpack.c.bf16 %v8590_v16, %v8590_v16 }
 0x7f8   : > { %8788 = vmatprep.subr.msk.bf16.mxu0 %vm591_vm0, %v8607_v46  ;;  %v8613_v49 = vsel %vm591_vm0, %v8606_v20, 0 }
 0x7f9   : > { %8627 = vmatpush1.bf16.msra.mxu0 %v8613_v49 }
 0x7fc   : > { %8789 = vmatmul.mubr.msk.bf16.vlgmr.msra.gmra.mrb[12].mxu0 %vm4390_vm1, %v8608_v1  ;;  %v8663_v37 = vpop.permute.xlu1 %8662 }
 0x803   : > { %v8671_v27 = vpop.permute.xlu0 %8670 }
 0x8cf   : > { %v8652_v7 = vpop.f32.mrb[12].mxu0 }
 0x8d0   : > { %v8665_v29 = vmul.f32 %v8663_v37, %v8652_v7  ;;  %v8654_v25 = vpop.f32.mrb[13].mxu0 }
 0x8d1   : > { %v8666_v47 = vmul.f32 %v8663_v37, %v8654_v25  ;;  %v8656_v35 = vpop.f32.mrb[14].mxu0 }
 0x8d2   : > { %v8673_v50 = vadd.f32 %v8671_v27, %v8665_v29  ;;  %v8657_v32 = vpop.f32.mrb[15].mxu0 }
 0x8d3   : > { %v8674_v57 = vadd.f32 %v8671_v27, %v8666_v47 }
 0x8d4   : > { %v8675_v36 = vmax.f32 %v8673_v50, 0.0 }
 0x8d5   : > { %v8676_v39 = vmax.f32 %v8674_v57, 0.0 }
 0x8d6   : > { %8677 = vst [vmem:[%s367_s21] sm:$0xff] %v8675_v36 }
 0x8d7   : > { %8678 = vst [vmem:[%s367_s21 + $0x8] sm:$0xff] %v8676_v39 }
 0x8d8   : > { %9638 = shalt.err (!%p9635_p3)
}
 0x8d9   : > { %s9639_s12 = scalar_lea.hbm %s15292_s28, 256  ;;  %s9643_s18 = scalar_lea.hbm %s15344_s10, 512 }
 0x8da   : > { %p9640_p4 = scmp.ne.s32.totalorder %s15292_s28, %s9639_s12  ;;  %p9644_p9 = scmp.lt.u32.totalorder %s15292_s28, %s15344_s10 }
 0x8db   : > { %p9645_p10 = scmp.lt.u32.totalorder %s9643_s18, %s9639_s12  ;;  %p9647_p12 = scmp.lt.u32.totalorder %s9639_s12, %s15292_s28 }
 0x8dc   : > { %p9641_p7 = pnand %p9640_p4, %p9806_p5 }
 0x8dd   : > { %p9646_p11 = por %p9645_p10, %p9644_p9 }
 0x8de   : > { %p9642_p8 = pneg %p9641_p7 }
 0x8df   : > { %p9648_p13 = por %p9647_p12, %p9646_p11 }
 0x8e1   : > { %p9649_p0 = pnand %p9648_p13, %p9642_p8 }
 0x8e3   : > { %9652 = shalt.err (!%p9649_p0)
}
 0x8e4   : > { %8859 = dma.vmem_to_hbm [thread:$0]  (%p9806_p5), %s15294_s11, 256, %s15292_s28, %s8680_s25  }
 0x8e5 PF: > { %p8865_p1 = scmp.ge.s32.totalorder %s9687_s16, 2  ;;  %s8706_s29 = sand.u32 1, %s9675_s13  }
 0x8e6   : > { %s8707_s27 = scalar_lea.sflag [#allocation5], %s8706_s29 }
 0x8e7   : > { %p8862_p2 = pnand %p8865_p1, %p9810_p6 }
 0x8e9   : > { %9670 = dma.done.wait (!%p8862_p2), %s8707_s27, 256  }
 0x8ea   : > { %9672 = vsyncadd (!%p8862_p2), %s8707_s27, 4294967040  ;;  %p20_p3 = scmp.ge.s32.totalorder %s9793_s19, 4   ;;  %s16456_s13 = smov %s9679_s14 }
 0x8eb   : > { %s16457_s14 = smov %s9683_s15  ;;  %s16458_s15 = smov %s9804_s22 }
 0x8ec   : > { %s16459_s16 = smov %s9793_s19  ;;  %22 = sbr.rel (!%p20_p3) target bundleno = 3 (0x3), region = 102 }
 0x8f3   :  { %8712 = vsyncpa [#allocation5], 1 }
 0x8f4   :  { %8714 = vsyncpa [#allocation5 + $0x1], 1 }

</bundles_post_ra>
